<compile_context>
chip_gen: v7x
topology: tpu7x:2x2x1
jax: 0.10.0
libtpu: 0.0.40
codegen_flags: <defaults>
</compile_context>

<pallas_src>
import functools

import jax
import jax.numpy as jnp
from jax import lax
from jax.experimental import pallas as pl
from jax.experimental.pallas import tpu as pltpu


def _downconv_kernel(w1_ref, b1_ref, w2_ref, b2_ref, x_ref, o_ref,
                     xp_ref, y_ref, *, bt, cin, cout, hp, wp):
    """Fused MaxPool2x2 -> (conv3x3 + folded BN + ReLU) x 2 for Bt images.

    w1_ref: (cout*cin*9,)       SMEM  folded conv1 weights
    b1_ref: (cout,)             SMEM  folded conv1 bias
    w2_ref: (cout*cout*9,)      SMEM  folded conv2 weights
    b2_ref: (cout,)             SMEM  folded conv2 bias
    x_ref : (bt, cin, hp, 2*w)  raw input block; last dim holds the two rows
                                of each pooling pair back-to-back
                                ([..., :w] = rows 0,2,4,..., [..., w:] =
                                rows 1,3,5,...) via a free wrapper bitcast.
    o_ref : (bt, cout, hp, wp)  output block
    xp_ref: (cin,  hp+2, wp+2)  VMEM scratch: pooled input + zero halo
    y_ref : (cout, hp+2, wp+2)  VMEM scratch: stage-1 activation + zero halo
    """
    f32 = jnp.float32
    w = 2 * wp                       # original (un-pooled) image width

    # Exact 0/1 selection matrices:  (hm @ s_even)[i, j] == hm[i, 2j]   and
    #                                (hm @ s_odd )[i, j] == hm[i, 2j+1].
    # Runs the W-direction decimation of the pool on the idle MXU, avoiding
    # lane-strided loads entirely.
    rows = lax.broadcasted_iota(jnp.int32, (w, wp), 0)
    cols = lax.broadcasted_iota(jnp.int32, (w, wp), 1)
    s_even = (rows == 2 * cols).astype(f32)
    s_odd = (rows == 2 * cols + 1).astype(f32)

    # Zero ONLY the 1-px halo ring of the scratches; the interiors are fully
    # rewritten below.  Done every step so it stays correct when the
    # "parallel" grid axis is split across v7x TensorCores.
    zrow = jnp.zeros((1, wp + 2), f32)
    zcol = jnp.zeros((hp + 2, 1), f32)
    for ci in range(cin):
        xp_ref[ci, 0:1, :] = zrow
        xp_ref[ci, hp + 1:hp + 2, :] = zrow
        xp_ref[ci, :, 0:1] = zcol
        xp_ref[ci, :, wp + 1:wp + 2] = zcol
    for co in range(cout):
        y_ref[co, 0:1, :] = zrow
        y_ref[co, hp + 1:hp + 2, :] = zrow
        y_ref[co, :, 0:1] = zcol
        y_ref[co, :, wp + 1:wp + 2] = zcol

    for b in range(bt):
        # ---- fused 2x2 / stride-2 max-pool (VPU max + MXU decimation) ------
        for ci in range(cin):
            r_even = x_ref[b, ci, :, 0:w].astype(f32)        # rows 0,2,4,...
            r_odd = x_ref[b, ci, :, w:2 * w].astype(f32)     # rows 1,3,5,...
            hm = jnp.maximum(r_even, r_odd)                  # (hp, w)
            p_even = jnp.dot(hm, s_even, preferred_element_type=f32,
                             precision=lax.Precision.HIGHEST)
            p_odd = jnp.dot(hm, s_odd, preferred_element_type=f32,
                            precision=lax.Precision.HIGHEST)
            xp_ref[ci, 1:hp + 1, 1:wp + 1] = jnp.maximum(p_even, p_odd)

        # ---- conv1 (3x3, pad=1) + folded BN + ReLU :: VPU FMAs -------------
        # co outermost: one (hp, wp) accumulator live at a time; taps are read
        # straight from the haloed scratch (bounds vreg pressure).
        # TODO(synk): move the kx = 1,2 lane shifts to pltpu.roll (XLU) if the
        #             VALU becomes the binding unit at real sizes.
        for co in range(cout):
            acc = jnp.zeros((hp, wp), f32) + b1_ref[co]
            for ci in range(cin):
                for ky in range(3):
                    for kx in range(3):
                        wgt = w1_ref[(co * cin + ci) * 9 + ky * 3 + kx]
                        acc = acc + wgt * xp_ref[ci, ky:ky + hp, kx:kx + wp]
            y_ref[co, 1:hp + 1, 1:wp + 1] = jnp.maximum(acc, 0.0)

        # ---- conv2 (3x3, pad=1) + folded BN + ReLU -------------------------
        for co in range(cout):
            acc = jnp.zeros((hp, wp), f32) + b2_ref[co]
            for ci in range(cout):
                for ky in range(3):
                    for kx in range(3):
                        wgt = w2_ref[(co * cout + ci) * 9 + ky * 3 + kx]
                        acc = acc + wgt * y_ref[ci, ky:ky + hp, kx:kx + wp]
            o_ref[b, co, :, :] = jnp.maximum(acc, 0.0).astype(o_ref.dtype)


def _pick_batch_tile(n, cin, cout, h, w, itemsize,
                     vmem_budget=20 * 1024 * 1024):
    """Images per grid step: fatten the DMA tile (amortize ~0.35us/step)
    without blowing the per-generation VMEM budget, keeping >=2 grid steps
    when possible so both v7x TensorCores get work."""
    hp, wp = h // 2, w // 2
    per_img = 2 * (cin * h * w + cout * hp * wp) * itemsize   # 2x = dbl-buffer
    bt_cap = max(1, vmem_budget // max(per_img, 1))
    if n >= 2:
        bt_cap = min(bt_cap, n // 2)
    bt = 1
    for d in range(1, n + 1):
        if n % d == 0 and d <= bt_cap:
            bt = d
    return bt, per_img


@jax.jit
def down_conv(x, w1, b1, g1, beta1, m1, v1, w2, b2, g2, beta2, m2, v2,
              eps=1e-5):
    """DownConv forward: MaxPool2d(2,2) -> (Conv3x3+BN+ReLU) x 2 on NCHW."""
    N, Cin, H, W = x.shape
    Cout = w1.shape[0]
    assert H % 2 == 0 and W % 2 == 0, "MaxPool2d(2,2) path assumes even H, W"
    Hp, Wp = H // 2, W // 2

    # FREE bitcast reshape: each pooling row pair (rows 2i, 2i+1) is laid out
    # back-to-back along the last (lane) dim, so the kernel can max-pool the
    # H direction with plain contiguous slices and the input DMA is a single
    # contiguous 2*W-wide stream (no xp / xp_pad HBM round trips).
    xr = x.reshape(N, Cin, Hp, 2 * W)

    # Fold inference-mode BatchNorm into conv weights / bias.
    s1 = g1 * lax.rsqrt(v1 + eps)
    wf1 = (w1 * s1[:, None, None, None]).astype(jnp.float32).reshape(-1)
    bf1 = ((b1 - m1) * s1 + beta1).astype(jnp.float32)
    s2 = g2 * lax.rsqrt(v2 + eps)
    wf2 = (w2 * s2[:, None, None, None]).astype(jnp.float32).reshape(-1)
    bf2 = ((b2 - m2) * s2 + beta2).astype(jnp.float32)

    itemsize = jnp.dtype(x.dtype).itemsize
    Bt, per_img_bytes = _pick_batch_tile(N, Cin, Cout, H, W, itemsize)
    grid_n = N // Bt

    scratch_bytes = (Cin + Cout) * (Hp + 2) * (Wp + 2) * 4
    vmem_needed = Bt * per_img_bytes + scratch_bytes
    # Explicit scoped-VMEM limit: v5e defaults to 16 MiB; stay well under
    # v7x's 64 MiB physical VMEM.
    vmem_limit = int(min(max(2 * vmem_needed + (4 << 20), 16 << 20), 48 << 20))

    kernel = functools.partial(_downconv_kernel, bt=Bt, cin=Cin, cout=Cout,
                               hp=Hp, wp=Wp)

    flops = (2 * N * Hp * Wp * 9 * (Cin * Cout + Cout * Cout)   # convs
             + 2 * N * Cin * Hp * W * Wp * 2)                   # pool decimation
    bytes_accessed = ((N * Cin * H * W + N * Cout * Hp * Wp) * itemsize
                      + (wf1.size + wf2.size + 2 * Cout) * 4)

    out = pl.pallas_call(
        kernel,
        out_shape=jax.ShapeDtypeStruct((N, Cout, Hp, Wp), x.dtype),
        grid_spec=pltpu.PrefetchScalarGridSpec(
            num_scalar_prefetch=4,               # w1, b1, w2, b2 -> SMEM
            grid=(grid_n,),
            in_specs=[
                pl.BlockSpec((Bt, Cin, Hp, 2 * W),
                             lambda n, *_: (n, 0, 0, 0)),
            ],
            out_specs=pl.BlockSpec((Bt, Cout, Hp, Wp),
                                   lambda n, *_: (n, 0, 0, 0)),
            scratch_shapes=[
                pltpu.VMEM((Cin, Hp + 2, Wp + 2), jnp.float32),
                pltpu.VMEM((Cout, Hp + 2, Wp + 2), jnp.float32),
            ],
        ),
        compiler_params=pltpu.CompilerParams(
            dimension_semantics=("parallel",),
            vmem_limit_bytes=vmem_limit),
        cost_estimate=pl.CostEstimate(flops=int(flops), transcendentals=0,
                                      bytes_accessed=int(bytes_accessed)),
    )(wf1, bf1, wf2, bf2, xr)
    return out


def _reference(x, w1, b1, g1, beta1, m1, v1, w2, b2, g2, beta2, m2, v2,
               eps=1e-5):
    """Plain-JAX reference for DownConv (eval-mode BN)."""
    def conv3x3(t, w, b):
        y = lax.conv_general_dilated(
            t, w, window_strides=(1, 1), padding=((1, 1), (1, 1)),
            dimension_numbers=("NCHW", "OIHW", "NCHW"))
        return y + b[None, :, None, None]

    def bn(t, g, beta, m, v):
        return (g[None, :, None, None] * (t - m[None, :, None, None]) *
                lax.rsqrt(v[None, :, None, None] + eps)
                + beta[None, :, None, None])

    xp = lax.reduce_window(x, -jnp.inf, lax.max, (1, 1, 2, 2), (1, 1, 2, 2),
                           "VALID")
    y = jnp.maximum(bn(conv3x3(xp, w1, b1), g1, beta1, m1, v1), 0.0)
    y = jnp.maximum(bn(conv3x3(y, w2, b2), g2, beta2, m2, v2), 0.0)
    return y


if __name__ == "__main__":
    input_channels = 3
    output_channels = 4
    N, H, W = 2, 16, 16

    keys = jax.random.split(jax.random.PRNGKey(0), 13)
    x = jax.random.normal(keys[0], (N, input_channels, H, W), jnp.float32)

    w1 = 0.2 * jax.random.normal(
        keys[1], (output_channels, input_channels, 3, 3), jnp.float32)
    b1 = 0.1 * jax.random.normal(keys[2], (output_channels,), jnp.float32)
    g1 = 1.0 + 0.1 * jax.random.normal(keys[3], (output_channels,), jnp.float32)
    be1 = 0.1 * jax.random.normal(keys[4], (output_channels,), jnp.float32)
    m1 = 0.1 * jax.random.normal(keys[5], (output_channels,), jnp.float32)
    v1 = 1.0 + 0.1 * jax.random.uniform(keys[6], (output_channels,), jnp.float32)

    w2 = 0.2 * jax.random.normal(
        keys[7], (output_channels, output_channels, 3, 3), jnp.float32)
    b2 = 0.1 * jax.random.normal(keys[8], (output_channels,), jnp.float32)
    g2 = 1.0 + 0.1 * jax.random.normal(keys[9], (output_channels,), jnp.float32)
    be2 = 0.1 * jax.random.normal(keys[10], (output_channels,), jnp.float32)
    m2 = 0.1 * jax.random.normal(keys[11], (output_channels,), jnp.float32)
    v2 = 1.0 + 0.1 * jax.random.uniform(keys[12], (output_channels,),
                                        jnp.float32)

    out = down_conv(x, w1, b1, g1, be1, m1, v1, w2, b2, g2, be2, m2, v2)
    out = jax.block_until_ready(out)

    ref = _reference(x, w1, b1, g1, be1, m1, v1, w2, b2, g2, be2, m2, v2)
    assert out.shape == (N, output_channels, H // 2, W // 2)
    assert jnp.allclose(out, ref, atol=1e-4, rtol=1e-4), float(
        jnp.max(jnp.abs(out - ref)))

    print("KERNEL_OK")
</pallas_src>

<mosaic_0001>
module attributes {stable_mosaic.version = 11 : i64} {
  func.func @_downconv_kernel(%arg0: i32, %arg1: memref<108xf32, #tpu.memory_space<smem>>, %arg2: memref<4xf32, #tpu.memory_space<smem>>, %arg3: memref<144xf32, #tpu.memory_space<smem>>, %arg4: memref<4xf32, #tpu.memory_space<smem>>, %arg5: memref<1x3x8x32xf32, #tpu.memory_space<vmem>>, %arg6: memref<1x4x8x8xf32, #tpu.memory_space<vmem>>, %arg7: memref<3x10x10xf32, #tpu.memory_space<vmem>>, %arg8: memref<4x10x10xf32, #tpu.memory_space<vmem>>) attributes {dimension_semantics = [#tpu.dimension_semantics<parallel>], iteration_bounds = array<i64: 2>, scalar_prefetch = 4 : i64, scratch_operands = 2 : i64, tpu.core_type = #tpu.core_type<tc>, window_params = [{transform_indices = @transform_0, window_bounds = array<i64: 1, 3, 8, 32>}, {transform_indices = @transform_1, window_bounds = array<i64: 1, 4, 8, 8>}]} {
    %0 = tpu.iota {dimensions = array<i32: 0>} : vector<16x8xi32>
    %1 = tpu.iota {dimensions = array<i32: 1>} : vector<16x8xi32>
    %c2_i32 = arith.constant 2 : i32
    %2 = vector.broadcast %c2_i32 : i32 to vector<16x8xi32>
    %3 = arith.muli %2, %1 : vector<16x8xi32>
    %4 = arith.cmpi eq, %0, %3 : vector<16x8xi32>
    %5 = arith.extui %4 : vector<16x8xi1> to vector<16x8xi32>
    %6 = arith.sitofp %5 : vector<16x8xi32> to vector<16x8xf32>
    %c2_i32_0 = arith.constant 2 : i32
    %7 = vector.broadcast %c2_i32_0 : i32 to vector<16x8xi32>
    %8 = arith.muli %7, %1 : vector<16x8xi32>
    %c1_i32 = arith.constant 1 : i32
    %9 = vector.broadcast %c1_i32 : i32 to vector<16x8xi32>
    %10 = arith.addi %8, %9 : vector<16x8xi32>
    %11 = arith.cmpi eq, %0, %10 : vector<16x8xi32>
    %12 = arith.extui %11 : vector<16x8xi1> to vector<16x8xi32>
    %13 = arith.sitofp %12 : vector<16x8xi32> to vector<16x8xf32>
    %cst = arith.constant 0.000000e+00 : f32
    %14 = vector.broadcast %cst : f32 to vector<1x10xf32>
    %cst_1 = arith.constant 0.000000e+00 : f32
    %15 = vector.broadcast %cst_1 : f32 to vector<10x1xf32>
    %c0 = arith.constant 0 : index
    %c0_2 = arith.constant 0 : index
    %c0_3 = arith.constant 0 : index
    %16 = vector.load %arg7[%c0, %c0_2, %c0_3] : memref<3x10x10xf32, #tpu.memory_space<vmem>>, vector<1x1x10xf32>
    %17 = vector.shape_cast %16 : vector<1x1x10xf32> to vector<1x10xf32>
    %18 = vector.shape_cast %14 : vector<1x10xf32> to vector<1x1x10xf32>
    tpu.vector_store %arg7[%c0, %c0_2, %c0_3], %18 {strides = array<i32>} : memref<3x10x10xf32, #tpu.memory_space<vmem>>, vector<1x1x10xf32>,
    %c0_4 = arith.constant 0 : index
    %c9 = arith.constant 9 : index
    %c0_5 = arith.constant 0 : index
    %19 = vector.load %arg7[%c0_4, %c9, %c0_5] : memref<3x10x10xf32, #tpu.memory_space<vmem>>, vector<1x1x10xf32>
    %20 = vector.shape_cast %19 : vector<1x1x10xf32> to vector<1x10xf32>
    %21 = vector.shape_cast %14 : vector<1x10xf32> to vector<1x1x10xf32>
    tpu.vector_store %arg7[%c0_4, %c9, %c0_5], %21 {strides = array<i32>} : memref<3x10x10xf32, #tpu.memory_space<vmem>>, vector<1x1x10xf32>,
    %c0_6 = arith.constant 0 : index
    %c0_7 = arith.constant 0 : index
    %c0_8 = arith.constant 0 : index
    %22 = vector.load %arg7[%c0_6, %c0_7, %c0_8] : memref<3x10x10xf32, #tpu.memory_space<vmem>>, vector<1x10x1xf32>
    %23 = vector.shape_cast %22 : vector<1x10x1xf32> to vector<10x1xf32>
    %24 = vector.shape_cast %15 : vector<10x1xf32> to vector<1x10x1xf32>
    tpu.vector_store %arg7[%c0_6, %c0_7, %c0_8], %24 {strides = array<i32>} : memref<3x10x10xf32, #tpu.memory_space<vmem>>, vector<1x10x1xf32>,
    %c0_9 = arith.constant 0 : index
    %c0_10 = arith.constant 0 : index
    %c9_11 = arith.constant 9 : index
    %25 = vector.load %arg7[%c0_9, %c0_10, %c9_11] : memref<3x10x10xf32, #tpu.memory_space<vmem>>, vector<1x10x1xf32>
    %26 = vector.shape_cast %25 : vector<1x10x1xf32> to vector<10x1xf32>
    %27 = vector.shape_cast %15 : vector<10x1xf32> to vector<1x10x1xf32>
    tpu.vector_store %arg7[%c0_9, %c0_10, %c9_11], %27 {strides = array<i32>} : memref<3x10x10xf32, #tpu.memory_space<vmem>>, vector<1x10x1xf32>,
    %c1 = arith.constant 1 : index
    %c0_12 = arith.constant 0 : index
    %c0_13 = arith.constant 0 : index
    %28 = vector.load %arg7[%c1, %c0_12, %c0_13] : memref<3x10x10xf32, #tpu.memory_space<vmem>>, vector<1x1x10xf32>
    %29 = vector.shape_cast %28 : vector<1x1x10xf32> to vector<1x10xf32>
    %30 = vector.shape_cast %14 : vector<1x10xf32> to vector<1x1x10xf32>
    tpu.vector_store %arg7[%c1, %c0_12, %c0_13], %30 {strides = array<i32>} : memref<3x10x10xf32, #tpu.memory_space<vmem>>, vector<1x1x10xf32>,
    %c1_14 = arith.constant 1 : index
    %c9_15 = arith.constant 9 : index
    %c0_16 = arith.constant 0 : index
    %31 = vector.load %arg7[%c1_14, %c9_15, %c0_16] : memref<3x10x10xf32, #tpu.memory_space<vmem>>, vector<1x1x10xf32>
    %32 = vector.shape_cast %31 : vector<1x1x10xf32> to vector<1x10xf32>
    %33 = vector.shape_cast %14 : vector<1x10xf32> to vector<1x1x10xf32>
    tpu.vector_store %arg7[%c1_14, %c9_15, %c0_16], %33 {strides = array<i32>} : memref<3x10x10xf32, #tpu.memory_space<vmem>>, vector<1x1x10xf32>,
    %c1_17 = arith.constant 1 : index
    %c0_18 = arith.constant 0 : index
    %c0_19 = arith.constant 0 : index
    %34 = vector.load %arg7[%c1_17, %c0_18, %c0_19] : memref<3x10x10xf32, #tpu.memory_space<vmem>>, vector<1x10x1xf32>
    %35 = vector.shape_cast %34 : vector<1x10x1xf32> to vector<10x1xf32>
    %36 = vector.shape_cast %15 : vector<10x1xf32> to vector<1x10x1xf32>
    tpu.vector_store %arg7[%c1_17, %c0_18, %c0_19], %36 {strides = array<i32>} : memref<3x10x10xf32, #tpu.memory_space<vmem>>, vector<1x10x1xf32>,
    %c1_20 = arith.constant 1 : index
    %c0_21 = arith.constant 0 : index
    %c9_22 = arith.constant 9 : index
    %37 = vector.load %arg7[%c1_20, %c0_21, %c9_22] : memref<3x10x10xf32, #tpu.memory_space<vmem>>, vector<1x10x1xf32>
    %38 = vector.shape_cast %37 : vector<1x10x1xf32> to vector<10x1xf32>
    %39 = vector.shape_cast %15 : vector<10x1xf32> to vector<1x10x1xf32>
    tpu.vector_store %arg7[%c1_20, %c0_21, %c9_22], %39 {strides = array<i32>} : memref<3x10x10xf32, #tpu.memory_space<vmem>>, vector<1x10x1xf32>,
    %c2 = arith.constant 2 : index
    %c0_23 = arith.constant 0 : index
    %c0_24 = arith.constant 0 : index
    %40 = vector.load %arg7[%c2, %c0_23, %c0_24] : memref<3x10x10xf32, #tpu.memory_space<vmem>>, vector<1x1x10xf32>
    %41 = vector.shape_cast %40 : vector<1x1x10xf32> to vector<1x10xf32>
    %42 = vector.shape_cast %14 : vector<1x10xf32> to vector<1x1x10xf32>
    tpu.vector_store %arg7[%c2, %c0_23, %c0_24], %42 {strides = array<i32>} : memref<3x10x10xf32, #tpu.memory_space<vmem>>, vector<1x1x10xf32>,
    %c2_25 = arith.constant 2 : index
    %c9_26 = arith.constant 9 : index
    %c0_27 = arith.constant 0 : index
    %43 = vector.load %arg7[%c2_25, %c9_26, %c0_27] : memref<3x10x10xf32, #tpu.memory_space<vmem>>, vector<1x1x10xf32>
    %44 = vector.shape_cast %43 : vector<1x1x10xf32> to vector<1x10xf32>
    %45 = vector.shape_cast %14 : vector<1x10xf32> to vector<1x1x10xf32>
    tpu.vector_store %arg7[%c2_25, %c9_26, %c0_27], %45 {strides = array<i32>} : memref<3x10x10xf32, #tpu.memory_space<vmem>>, vector<1x1x10xf32>,
    %c2_28 = arith.constant 2 : index
    %c0_29 = arith.constant 0 : index
    %c0_30 = arith.constant 0 : index
    %46 = vector.load %arg7[%c2_28, %c0_29, %c0_30] : memref<3x10x10xf32, #tpu.memory_space<vmem>>, vector<1x10x1xf32>
    %47 = vector.shape_cast %46 : vector<1x10x1xf32> to vector<10x1xf32>
    %48 = vector.shape_cast %15 : vector<10x1xf32> to vector<1x10x1xf32>
    tpu.vector_store %arg7[%c2_28, %c0_29, %c0_30], %48 {strides = array<i32>} : memref<3x10x10xf32, #tpu.memory_space<vmem>>, vector<1x10x1xf32>,
    %c2_31 = arith.constant 2 : index
    %c0_32 = arith.constant 0 : index
    %c9_33 = arith.constant 9 : index
    %49 = vector.load %arg7[%c2_31, %c0_32, %c9_33] : memref<3x10x10xf32, #tpu.memory_space<vmem>>, vector<1x10x1xf32>
    %50 = vector.shape_cast %49 : vector<1x10x1xf32> to vector<10x1xf32>
    %51 = vector.shape_cast %15 : vector<10x1xf32> to vector<1x10x1xf32>
    tpu.vector_store %arg7[%c2_31, %c0_32, %c9_33], %51 {strides = array<i32>} : memref<3x10x10xf32, #tpu.memory_space<vmem>>, vector<1x10x1xf32>,
    %c0_34 = arith.constant 0 : index
    %c0_35 = arith.constant 0 : index
    %c0_36 = arith.constant 0 : index
    %52 = vector.load %arg8[%c0_34, %c0_35, %c0_36] : memref<4x10x10xf32, #tpu.memory_space<vmem>>, vector<1x1x10xf32>
    %53 = vector.shape_cast %52 : vector<1x1x10xf32> to vector<1x10xf32>
    %54 = vector.shape_cast %14 : vector<1x10xf32> to vector<1x1x10xf32>
    tpu.vector_store %arg8[%c0_34, %c0_35, %c0_36], %54 {strides = array<i32>} : memref<4x10x10xf32, #tpu.memory_space<vmem>>, vector<1x1x10xf32>,
    %c0_37 = arith.constant 0 : index
    %c9_38 = arith.constant 9 : index
    %c0_39 = arith.constant 0 : index
    %55 = vector.load %arg8[%c0_37, %c9_38, %c0_39] : memref<4x10x10xf32, #tpu.memory_space<vmem>>, vector<1x1x10xf32>
    %56 = vector.shape_cast %55 : vector<1x1x10xf32> to vector<1x10xf32>
    %57 = vector.shape_cast %14 : vector<1x10xf32> to vector<1x1x10xf32>
    tpu.vector_store %arg8[%c0_37, %c9_38, %c0_39], %57 {strides = array<i32>} : memref<4x10x10xf32, #tpu.memory_space<vmem>>, vector<1x1x10xf32>,
    %c0_40 = arith.constant 0 : index
    %c0_41 = arith.constant 0 : index
    %c0_42 = arith.constant 0 : index
    %58 = vector.load %arg8[%c0_40, %c0_41, %c0_42] : memref<4x10x10xf32, #tpu.memory_space<vmem>>, vector<1x10x1xf32>
    %59 = vector.shape_cast %58 : vector<1x10x1xf32> to vector<10x1xf32>
    %60 = vector.shape_cast %15 : vector<10x1xf32> to vector<1x10x1xf32>
    tpu.vector_store %arg8[%c0_40, %c0_41, %c0_42], %60 {strides = array<i32>} : memref<4x10x10xf32, #tpu.memory_space<vmem>>, vector<1x10x1xf32>,
    %c0_43 = arith.constant 0 : index
    %c0_44 = arith.constant 0 : index
    %c9_45 = arith.constant 9 : index
    %61 = vector.load %arg8[%c0_43, %c0_44, %c9_45] : memref<4x10x10xf32, #tpu.memory_space<vmem>>, vector<1x10x1xf32>
    %62 = vector.shape_cast %61 : vector<1x10x1xf32> to vector<10x1xf32>
    %63 = vector.shape_cast %15 : vector<10x1xf32> to vector<1x10x1xf32>
    tpu.vector_store %arg8[%c0_43, %c0_44, %c9_45], %63 {strides = array<i32>} : memref<4x10x10xf32, #tpu.memory_space<vmem>>, vector<1x10x1xf32>,
    %c1_46 = arith.constant 1 : index
    %c0_47 = arith.constant 0 : index
    %c0_48 = arith.constant 0 : index
    %64 = vector.load %arg8[%c1_46, %c0_47, %c0_48] : memref<4x10x10xf32, #tpu.memory_space<vmem>>, vector<1x1x10xf32>
    %65 = vector.shape_cast %64 : vector<1x1x10xf32> to vector<1x10xf32>
    %66 = vector.shape_cast %14 : vector<1x10xf32> to vector<1x1x10xf32>
    tpu.vector_store %arg8[%c1_46, %c0_47, %c0_48], %66 {strides = array<i32>} : memref<4x10x10xf32, #tpu.memory_space<vmem>>, vector<1x1x10xf32>,
    %c1_49 = arith.constant 1 : index
    %c9_50 = arith.constant 9 : index
    %c0_51 = arith.constant 0 : index
    %67 = vector.load %arg8[%c1_49, %c9_50, %c0_51] : memref<4x10x10xf32, #tpu.memory_space<vmem>>, vector<1x1x10xf32>
    %68 = vector.shape_cast %67 : vector<1x1x10xf32> to vector<1x10xf32>
    %69 = vector.shape_cast %14 : vector<1x10xf32> to vector<1x1x10xf32>
    tpu.vector_store %arg8[%c1_49, %c9_50, %c0_51], %69 {strides = array<i32>} : memref<4x10x10xf32, #tpu.memory_space<vmem>>, vector<1x1x10xf32>,
    %c1_52 = arith.constant 1 : index
    %c0_53 = arith.constant 0 : index
    %c0_54 = arith.constant 0 : index
    %70 = vector.load %arg8[%c1_52, %c0_53, %c0_54] : memref<4x10x10xf32, #tpu.memory_space<vmem>>, vector<1x10x1xf32>
    %71 = vector.shape_cast %70 : vector<1x10x1xf32> to vector<10x1xf32>
    %72 = vector.shape_cast %15 : vector<10x1xf32> to vector<1x10x1xf32>
    tpu.vector_store %arg8[%c1_52, %c0_53, %c0_54], %72 {strides = array<i32>} : memref<4x10x10xf32, #tpu.memory_space<vmem>>, vector<1x10x1xf32>,
    %c1_55 = arith.constant 1 : index
    %c0_56 = arith.constant 0 : index
    %c9_57 = arith.constant 9 : index
    %73 = vector.load %arg8[%c1_55, %c0_56, %c9_57] : memref<4x10x10xf32, #tpu.memory_space<vmem>>, vector<1x10x1xf32>
    %74 = vector.shape_cast %73 : vector<1x10x1xf32> to vector<10x1xf32>
    %75 = vector.shape_cast %15 : vector<10x1xf32> to vector<1x10x1xf32>
    tpu.vector_store %arg8[%c1_55, %c0_56, %c9_57], %75 {strides = array<i32>} : memref<4x10x10xf32, #tpu.memory_space<vmem>>, vector<1x10x1xf32>,
    %c2_58 = arith.constant 2 : index
    %c0_59 = arith.constant 0 : index
    %c0_60 = arith.constant 0 : index
    %76 = vector.load %arg8[%c2_58, %c0_59, %c0_60] : memref<4x10x10xf32, #tpu.memory_space<vmem>>, vector<1x1x10xf32>
    %77 = vector.shape_cast %76 : vector<1x1x10xf32> to vector<1x10xf32>
    %78 = vector.shape_cast %14 : vector<1x10xf32> to vector<1x1x10xf32>
    tpu.vector_store %arg8[%c2_58, %c0_59, %c0_60], %78 {strides = array<i32>} : memref<4x10x10xf32, #tpu.memory_space<vmem>>, vector<1x1x10xf32>,
    %c2_61 = arith.constant 2 : index
    %c9_62 = arith.constant 9 : index
    %c0_63 = arith.constant 0 : index
    %79 = vector.load %arg8[%c2_61, %c9_62, %c0_63] : memref<4x10x10xf32, #tpu.memory_space<vmem>>, vector<1x1x10xf32>
    %80 = vector.shape_cast %79 : vector<1x1x10xf32> to vector<1x10xf32>
    %81 = vector.shape_cast %14 : vector<1x10xf32> to vector<1x1x10xf32>
    tpu.vector_store %arg8[%c2_61, %c9_62, %c0_63], %81 {strides = array<i32>} : memref<4x10x10xf32, #tpu.memory_space<vmem>>, vector<1x1x10xf32>,
    %c2_64 = arith.constant 2 : index
    %c0_65 = arith.constant 0 : index
    %c0_66 = arith.constant 0 : index
    %82 = vector.load %arg8[%c2_64, %c0_65, %c0_66] : memref<4x10x10xf32, #tpu.memory_space<vmem>>, vector<1x10x1xf32>
    %83 = vector.shape_cast %82 : vector<1x10x1xf32> to vector<10x1xf32>
    %84 = vector.shape_cast %15 : vector<10x1xf32> to vector<1x10x1xf32>
    tpu.vector_store %arg8[%c2_64, %c0_65, %c0_66], %84 {strides = array<i32>} : memref<4x10x10xf32, #tpu.memory_space<vmem>>, vector<1x10x1xf32>,
    %c2_67 = arith.constant 2 : index
    %c0_68 = arith.constant 0 : index
    %c9_69 = arith.constant 9 : index
    %85 = vector.load %arg8[%c2_67, %c0_68, %c9_69] : memref<4x10x10xf32, #tpu.memory_space<vmem>>, vector<1x10x1xf32>
    %86 = vector.shape_cast %85 : vector<1x10x1xf32> to vector<10x1xf32>
    %87 = vector.shape_cast %15 : vector<10x1xf32> to vector<1x10x1xf32>
    tpu.vector_store %arg8[%c2_67, %c0_68, %c9_69], %87 {strides = array<i32>} : memref<4x10x10xf32, #tpu.memory_space<vmem>>, vector<1x10x1xf32>,
    %c3 = arith.constant 3 : index
    %c0_70 = arith.constant 0 : index
    %c0_71 = arith.constant 0 : index
    %88 = vector.load %arg8[%c3, %c0_70, %c0_71] : memref<4x10x10xf32, #tpu.memory_space<vmem>>, vector<1x1x10xf32>
    %89 = vector.shape_cast %88 : vector<1x1x10xf32> to vector<1x10xf32>
    %90 = vector.shape_cast %14 : vector<1x10xf32> to vector<1x1x10xf32>
    tpu.vector_store %arg8[%c3, %c0_70, %c0_71], %90 {strides = array<i32>} : memref<4x10x10xf32, #tpu.memory_space<vmem>>, vector<1x1x10xf32>,
    %c3_72 = arith.constant 3 : index
    %c9_73 = arith.constant 9 : index
    %c0_74 = arith.constant 0 : index
    %91 = vector.load %arg8[%c3_72, %c9_73, %c0_74] : memref<4x10x10xf32, #tpu.memory_space<vmem>>, vector<1x1x10xf32>
    %92 = vector.shape_cast %91 : vector<1x1x10xf32> to vector<1x10xf32>
    %93 = vector.shape_cast %14 : vector<1x10xf32> to vector<1x1x10xf32>
    tpu.vector_store %arg8[%c3_72, %c9_73, %c0_74], %93 {strides = array<i32>} : memref<4x10x10xf32, #tpu.memory_space<vmem>>, vector<1x1x10xf32>,
    %c3_75 = arith.constant 3 : index
    %c0_76 = arith.constant 0 : index
    %c0_77 = arith.constant 0 : index
    %94 = vector.load %arg8[%c3_75, %c0_76, %c0_77] : memref<4x10x10xf32, #tpu.memory_space<vmem>>, vector<1x10x1xf32>
    %95 = vector.shape_cast %94 : vector<1x10x1xf32> to vector<10x1xf32>
    %96 = vector.shape_cast %15 : vector<10x1xf32> to vector<1x10x1xf32>
    tpu.vector_store %arg8[%c3_75, %c0_76, %c0_77], %96 {strides = array<i32>} : memref<4x10x10xf32, #tpu.memory_space<vmem>>, vector<1x10x1xf32>,
    %c3_78 = arith.constant 3 : index
    %c0_79 = arith.constant 0 : index
    %c9_80 = arith.constant 9 : index
    %97 = vector.load %arg8[%c3_78, %c0_79, %c9_80] : memref<4x10x10xf32, #tpu.memory_space<vmem>>, vector<1x10x1xf32>
    %98 = vector.shape_cast %97 : vector<1x10x1xf32> to vector<10x1xf32>
    %99 = vector.shape_cast %15 : vector<10x1xf32> to vector<1x10x1xf32>
    tpu.vector_store %arg8[%c3_78, %c0_79, %c9_80], %99 {strides = array<i32>} : memref<4x10x10xf32, #tpu.memory_space<vmem>>, vector<1x10x1xf32>,
    %c0_81 = arith.constant 0 : index
    %c0_82 = arith.constant 0 : index
    %c0_83 = arith.constant 0 : index
    %c0_84 = arith.constant 0 : index
    %100 = vector.load %arg5[%c0_81, %c0_82, %c0_83, %c0_84] : memref<1x3x8x32xf32, #tpu.memory_space<vmem>>, vector<1x1x8x16xf32>
    %101 = vector.shape_cast %100 : vector<1x1x8x16xf32> to vector<8x16xf32>
    %c0_85 = arith.constant 0 : index
    %c0_86 = arith.constant 0 : index
    %c0_87 = arith.constant 0 : index
    %c16 = arith.constant 16 : index
    %102 = vector.load %arg5[%c0_85, %c0_86, %c0_87, %c16] : memref<1x3x8x32xf32, #tpu.memory_space<vmem>>, vector<1x1x8x16xf32>
    %103 = vector.shape_cast %102 : vector<1x1x8x16xf32> to vector<8x16xf32>
    %104 = arith.maximumf %101, %103 : vector<8x16xf32>
    %cst_88 = arith.constant dense<0.000000e+00> : vector<8x8xf32>
    %105 = tpu.matmul %104, %6, %cst_88 {dimension_numbers = #tpu.dot_dimension_numbers<[1], [0], [0], [1], [0, 0, 1, 1], [], []>, precision = #tpu.contract_precision<fp32>} : vector<8x16xf32>, vector<16x8xf32>, vector<8x8xf32> -> vector<8x8xf32>
    %cst_89 = arith.constant dense<0.000000e+00> : vector<8x8xf32>
    %106 = tpu.matmul %104, %13, %cst_89 {dimension_numbers = #tpu.dot_dimension_numbers<[1], [0], [0], [1], [0, 0, 1, 1], [], []>, precision = #tpu.contract_precision<fp32>} : vector<8x16xf32>, vector<16x8xf32>, vector<8x8xf32> -> vector<8x8xf32>
    %107 = arith.maximumf %105, %106 : vector<8x8xf32>
    %c0_90 = arith.constant 0 : index
    %c1_91 = arith.constant 1 : index
    %c1_92 = arith.constant 1 : index
    %108 = vector.load %arg7[%c0_90, %c1_91, %c1_92] : memref<3x10x10xf32, #tpu.memory_space<vmem>>, vector<1x8x8xf32>
    %109 = vector.shape_cast %108 : vector<1x8x8xf32> to vector<8x8xf32>
    %110 = vector.shape_cast %107 : vector<8x8xf32> to vector<1x8x8xf32>
    tpu.vector_store %arg7[%c0_90, %c1_91, %c1_92], %110 {strides = array<i32>} : memref<3x10x10xf32, #tpu.memory_space<vmem>>, vector<1x8x8xf32>,
    %c0_93 = arith.constant 0 : index
    %c1_94 = arith.constant 1 : index
    %c0_95 = arith.constant 0 : index
    %c0_96 = arith.constant 0 : index
    %111 = vector.load %arg5[%c0_93, %c1_94, %c0_95, %c0_96] : memref<1x3x8x32xf32, #tpu.memory_space<vmem>>, vector<1x1x8x16xf32>
    %112 = vector.shape_cast %111 : vector<1x1x8x16xf32> to vector<8x16xf32>
    %c0_97 = arith.constant 0 : index
    %c1_98 = arith.constant 1 : index
    %c0_99 = arith.constant 0 : index
    %c16_100 = arith.constant 16 : index
    %113 = vector.load %arg5[%c0_97, %c1_98, %c0_99, %c16_100] : memref<1x3x8x32xf32, #tpu.memory_space<vmem>>, vector<1x1x8x16xf32>
    %114 = vector.shape_cast %113 : vector<1x1x8x16xf32> to vector<8x16xf32>
    %115 = arith.maximumf %112, %114 : vector<8x16xf32>
    %cst_101 = arith.constant dense<0.000000e+00> : vector<8x8xf32>
    %116 = tpu.matmul %115, %6, %cst_101 {dimension_numbers = #tpu.dot_dimension_numbers<[1], [0], [0], [1], [0, 0, 1, 1], [], []>, precision = #tpu.contract_precision<fp32>} : vector<8x16xf32>, vector<16x8xf32>, vector<8x8xf32> -> vector<8x8xf32>
    %cst_102 = arith.constant dense<0.000000e+00> : vector<8x8xf32>
    %117 = tpu.matmul %115, %13, %cst_102 {dimension_numbers = #tpu.dot_dimension_numbers<[1], [0], [0], [1], [0, 0, 1, 1], [], []>, precision = #tpu.contract_precision<fp32>} : vector<8x16xf32>, vector<16x8xf32>, vector<8x8xf32> -> vector<8x8xf32>
    %118 = arith.maximumf %116, %117 : vector<8x8xf32>
    %c1_103 = arith.constant 1 : index
    %c1_104 = arith.constant 1 : index
    %c1_105 = arith.constant 1 : index
    %119 = vector.load %arg7[%c1_103, %c1_104, %c1_105] : memref<3x10x10xf32, #tpu.memory_space<vmem>>, vector<1x8x8xf32>
    %120 = vector.shape_cast %119 : vector<1x8x8xf32> to vector<8x8xf32>
    %121 = vector.shape_cast %118 : vector<8x8xf32> to vector<1x8x8xf32>
    tpu.vector_store %arg7[%c1_103, %c1_104, %c1_105], %121 {strides = array<i32>} : memref<3x10x10xf32, #tpu.memory_space<vmem>>, vector<1x8x8xf32>,
    %c0_106 = arith.constant 0 : index
    %c2_107 = arith.constant 2 : index
    %c0_108 = arith.constant 0 : index
    %c0_109 = arith.constant 0 : index
    %122 = vector.load %arg5[%c0_106, %c2_107, %c0_108, %c0_109] : memref<1x3x8x32xf32, #tpu.memory_space<vmem>>, vector<1x1x8x16xf32>
    %123 = vector.shape_cast %122 : vector<1x1x8x16xf32> to vector<8x16xf32>
    %c0_110 = arith.constant 0 : index
    %c2_111 = arith.constant 2 : index
    %c0_112 = arith.constant 0 : index
    %c16_113 = arith.constant 16 : index
    %124 = vector.load %arg5[%c0_110, %c2_111, %c0_112, %c16_113] : memref<1x3x8x32xf32, #tpu.memory_space<vmem>>, vector<1x1x8x16xf32>
    %125 = vector.shape_cast %124 : vector<1x1x8x16xf32> to vector<8x16xf32>
    %126 = arith.maximumf %123, %125 : vector<8x16xf32>
    %cst_114 = arith.constant dense<0.000000e+00> : vector<8x8xf32>
    %127 = tpu.matmul %126, %6, %cst_114 {dimension_numbers = #tpu.dot_dimension_numbers<[1], [0], [0], [1], [0, 0, 1, 1], [], []>, precision = #tpu.contract_precision<fp32>} : vector<8x16xf32>, vector<16x8xf32>, vector<8x8xf32> -> vector<8x8xf32>
    %cst_115 = arith.constant dense<0.000000e+00> : vector<8x8xf32>
    %128 = tpu.matmul %126, %13, %cst_115 {dimension_numbers = #tpu.dot_dimension_numbers<[1], [0], [0], [1], [0, 0, 1, 1], [], []>, precision = #tpu.contract_precision<fp32>} : vector<8x16xf32>, vector<16x8xf32>, vector<8x8xf32> -> vector<8x8xf32>
    %129 = arith.maximumf %127, %128 : vector<8x8xf32>
    %c2_116 = arith.constant 2 : index
    %c1_117 = arith.constant 1 : index
    %c1_118 = arith.constant 1 : index
    %130 = vector.load %arg7[%c2_116, %c1_117, %c1_118] : memref<3x10x10xf32, #tpu.memory_space<vmem>>, vector<1x8x8xf32>
    %131 = vector.shape_cast %130 : vector<1x8x8xf32> to vector<8x8xf32>
    %132 = vector.shape_cast %129 : vector<8x8xf32> to vector<1x8x8xf32>
    tpu.vector_store %arg7[%c2_116, %c1_117, %c1_118], %132 {strides = array<i32>} : memref<3x10x10xf32, #tpu.memory_space<vmem>>, vector<1x8x8xf32>,
    %cst_119 = arith.constant 0.000000e+00 : f32
    %133 = vector.broadcast %cst_119 : f32 to vector<8x8xf32>
    %c0_120 = arith.constant 0 : index
    %134 = memref.load %arg2[%c0_120] : memref<4xf32, #tpu.memory_space<smem>>
    %135 = vector.broadcast %134 : f32 to vector<8x8xf32>
    %136 = arith.addf %133, %135 : vector<8x8xf32>
    %c0_121 = arith.constant 0 : index
    %137 = memref.load %arg1[%c0_121] : memref<108xf32, #tpu.memory_space<smem>>
    %c0_122 = arith.constant 0 : index
    %c0_123 = arith.constant 0 : index
    %c0_124 = arith.constant 0 : index
    %138 = vector.load %arg7[%c0_122, %c0_123, %c0_124] : memref<3x10x10xf32, #tpu.memory_space<vmem>>, vector<1x8x8xf32>
    %139 = vector.shape_cast %138 : vector<1x8x8xf32> to vector<8x8xf32>
    %140 = vector.broadcast %137 : f32 to vector<8x8xf32>
    %141 = arith.mulf %140, %139 : vector<8x8xf32>
    %142 = arith.addf %136, %141 : vector<8x8xf32>
    %c1_125 = arith.constant 1 : index
    %143 = memref.load %arg1[%c1_125] : memref<108xf32, #tpu.memory_space<smem>>
    %c0_126 = arith.constant 0 : index
    %c0_127 = arith.constant 0 : index
    %c1_128 = arith.constant 1 : index
    %144 = vector.load %arg7[%c0_126, %c0_127, %c1_128] : memref<3x10x10xf32, #tpu.memory_space<vmem>>, vector<1x8x8xf32>
    %145 = vector.shape_cast %144 : vector<1x8x8xf32> to vector<8x8xf32>
    %146 = vector.broadcast %143 : f32 to vector<8x8xf32>
    %147 = arith.mulf %146, %145 : vector<8x8xf32>
    %148 = arith.addf %142, %147 : vector<8x8xf32>
    %c2_129 = arith.constant 2 : index
    %149 = memref.load %arg1[%c2_129] : memref<108xf32, #tpu.memory_space<smem>>
    %c0_130 = arith.constant 0 : index
    %c0_131 = arith.constant 0 : index
    %c2_132 = arith.constant 2 : index
    %150 = vector.load %arg7[%c0_130, %c0_131, %c2_132] : memref<3x10x10xf32, #tpu.memory_space<vmem>>, vector<1x8x8xf32>
    %151 = vector.shape_cast %150 : vector<1x8x8xf32> to vector<8x8xf32>
    %152 = vector.broadcast %149 : f32 to vector<8x8xf32>
    %153 = arith.mulf %152, %151 : vector<8x8xf32>
    %154 = arith.addf %148, %153 : vector<8x8xf32>
    %c3_133 = arith.constant 3 : index
    %155 = memref.load %arg1[%c3_133] : memref<108xf32, #tpu.memory_space<smem>>
    %c0_134 = arith.constant 0 : index
    %c1_135 = arith.constant 1 : index
    %c0_136 = arith.constant 0 : index
    %156 = vector.load %arg7[%c0_134, %c1_135, %c0_136] : memref<3x10x10xf32, #tpu.memory_space<vmem>>, vector<1x8x8xf32>
    %157 = vector.shape_cast %156 : vector<1x8x8xf32> to vector<8x8xf32>
    %158 = vector.broadcast %155 : f32 to vector<8x8xf32>
    %159 = arith.mulf %158, %157 : vector<8x8xf32>
    %160 = arith.addf %154, %159 : vector<8x8xf32>
    %c4 = arith.constant 4 : index
    %161 = memref.load %arg1[%c4] : memref<108xf32, #tpu.memory_space<smem>>
    %c0_137 = arith.constant 0 : index
    %c1_138 = arith.constant 1 : index
    %c1_139 = arith.constant 1 : index
    %162 = vector.load %arg7[%c0_137, %c1_138, %c1_139] : memref<3x10x10xf32, #tpu.memory_space<vmem>>, vector<1x8x8xf32>
    %163 = vector.shape_cast %162 : vector<1x8x8xf32> to vector<8x8xf32>
    %164 = vector.broadcast %161 : f32 to vector<8x8xf32>
    %165 = arith.mulf %164, %163 : vector<8x8xf32>
    %166 = arith.addf %160, %165 : vector<8x8xf32>
    %c5 = arith.constant 5 : index
    %167 = memref.load %arg1[%c5] : memref<108xf32, #tpu.memory_space<smem>>
    %c0_140 = arith.constant 0 : index
    %c1_141 = arith.constant 1 : index
    %c2_142 = arith.constant 2 : index
    %168 = vector.load %arg7[%c0_140, %c1_141, %c2_142] : memref<3x10x10xf32, #tpu.memory_space<vmem>>, vector<1x8x8xf32>
    %169 = vector.shape_cast %168 : vector<1x8x8xf32> to vector<8x8xf32>
    %170 = vector.broadcast %167 : f32 to vector<8x8xf32>
    %171 = arith.mulf %170, %169 : vector<8x8xf32>
    %172 = arith.addf %166, %171 : vector<8x8xf32>
    %c6 = arith.constant 6 : index
    %173 = memref.load %arg1[%c6] : memref<108xf32, #tpu.memory_space<smem>>
    %c0_143 = arith.constant 0 : index
    %c2_144 = arith.constant 2 : index
    %c0_145 = arith.constant 0 : index
    %174 = vector.load %arg7[%c0_143, %c2_144, %c0_145] : memref<3x10x10xf32, #tpu.memory_space<vmem>>, vector<1x8x8xf32>
    %175 = vector.shape_cast %174 : vector<1x8x8xf32> to vector<8x8xf32>
    %176 = vector.broadcast %173 : f32 to vector<8x8xf32>
    %177 = arith.mulf %176, %175 : vector<8x8xf32>
    %178 = arith.addf %172, %177 : vector<8x8xf32>
    %c7 = arith.constant 7 : index
    %179 = memref.load %arg1[%c7] : memref<108xf32, #tpu.memory_space<smem>>
    %c0_146 = arith.constant 0 : index
    %c2_147 = arith.constant 2 : index
    %c1_148 = arith.constant 1 : index
    %180 = vector.load %arg7[%c0_146, %c2_147, %c1_148] : memref<3x10x10xf32, #tpu.memory_space<vmem>>, vector<1x8x8xf32>
    %181 = vector.shape_cast %180 : vector<1x8x8xf32> to vector<8x8xf32>
    %182 = vector.broadcast %179 : f32 to vector<8x8xf32>
    %183 = arith.mulf %182, %181 : vector<8x8xf32>
    %184 = arith.addf %178, %183 : vector<8x8xf32>
    %c8 = arith.constant 8 : index
    %185 = memref.load %arg1[%c8] : memref<108xf32, #tpu.memory_space<smem>>
    %c0_149 = arith.constant 0 : index
    %c2_150 = arith.constant 2 : index
    %c2_151 = arith.constant 2 : index
    %186 = vector.load %arg7[%c0_149, %c2_150, %c2_151] : memref<3x10x10xf32, #tpu.memory_space<vmem>>, vector<1x8x8xf32>
    %187 = vector.shape_cast %186 : vector<1x8x8xf32> to vector<8x8xf32>
    %188 = vector.broadcast %185 : f32 to vector<8x8xf32>
    %189 = arith.mulf %188, %187 : vector<8x8xf32>
    %190 = arith.addf %184, %189 : vector<8x8xf32>
    %c9_152 = arith.constant 9 : index
    %191 = memref.load %arg1[%c9_152] : memref<108xf32, #tpu.memory_space<smem>>
    %c1_153 = arith.constant 1 : index
    %c0_154 = arith.constant 0 : index
    %c0_155 = arith.constant 0 : index
    %192 = vector.load %arg7[%c1_153, %c0_154, %c0_155] : memref<3x10x10xf32, #tpu.memory_space<vmem>>, vector<1x8x8xf32>
    %193 = vector.shape_cast %192 : vector<1x8x8xf32> to vector<8x8xf32>
    %194 = vector.broadcast %191 : f32 to vector<8x8xf32>
    %195 = arith.mulf %194, %193 : vector<8x8xf32>
    %196 = arith.addf %190, %195 : vector<8x8xf32>
    %c10 = arith.constant 10 : index
    %197 = memref.load %arg1[%c10] : memref<108xf32, #tpu.memory_space<smem>>
    %c1_156 = arith.constant 1 : index
    %c0_157 = arith.constant 0 : index
    %c1_158 = arith.constant 1 : index
    %198 = vector.load %arg7[%c1_156, %c0_157, %c1_158] : memref<3x10x10xf32, #tpu.memory_space<vmem>>, vector<1x8x8xf32>
    %199 = vector.shape_cast %198 : vector<1x8x8xf32> to vector<8x8xf32>
    %200 = vector.broadcast %197 : f32 to vector<8x8xf32>
    %201 = arith.mulf %200, %199 : vector<8x8xf32>
    %202 = arith.addf %196, %201 : vector<8x8xf32>
    %c11 = arith.constant 11 : index
    %203 = memref.load %arg1[%c11] : memref<108xf32, #tpu.memory_space<smem>>
    %c1_159 = arith.constant 1 : index
    %c0_160 = arith.constant 0 : index
    %c2_161 = arith.constant 2 : index
    %204 = vector.load %arg7[%c1_159, %c0_160, %c2_161] : memref<3x10x10xf32, #tpu.memory_space<vmem>>, vector<1x8x8xf32>
    %205 = vector.shape_cast %204 : vector<1x8x8xf32> to vector<8x8xf32>
    %206 = vector.broadcast %203 : f32 to vector<8x8xf32>
    %207 = arith.mulf %206, %205 : vector<8x8xf32>
    %208 = arith.addf %202, %207 : vector<8x8xf32>
    %c12 = arith.constant 12 : index
    %209 = memref.load %arg1[%c12] : memref<108xf32, #tpu.memory_space<smem>>
    %c1_162 = arith.constant 1 : index
    %c1_163 = arith.constant 1 : index
    %c0_164 = arith.constant 0 : index
    %210 = vector.load %arg7[%c1_162, %c1_163, %c0_164] : memref<3x10x10xf32, #tpu.memory_space<vmem>>, vector<1x8x8xf32>
    %211 = vector.shape_cast %210 : vector<1x8x8xf32> to vector<8x8xf32>
    %212 = vector.broadcast %209 : f32 to vector<8x8xf32>
    %213 = arith.mulf %212, %211 : vector<8x8xf32>
    %214 = arith.addf %208, %213 : vector<8x8xf32>
    %c13 = arith.constant 13 : index
    %215 = memref.load %arg1[%c13] : memref<108xf32, #tpu.memory_space<smem>>
    %c1_165 = arith.constant 1 : index
    %c1_166 = arith.constant 1 : index
    %c1_167 = arith.constant 1 : index
    %216 = vector.load %arg7[%c1_165, %c1_166, %c1_167] : memref<3x10x10xf32, #tpu.memory_space<vmem>>, vector<1x8x8xf32>
    %217 = vector.shape_cast %216 : vector<1x8x8xf32> to vector<8x8xf32>
    %218 = vector.broadcast %215 : f32 to vector<8x8xf32>
    %219 = arith.mulf %218, %217 : vector<8x8xf32>
    %220 = arith.addf %214, %219 : vector<8x8xf32>
    %c14 = arith.constant 14 : index
    %221 = memref.load %arg1[%c14] : memref<108xf32, #tpu.memory_space<smem>>
    %c1_168 = arith.constant 1 : index
    %c1_169 = arith.constant 1 : index
    %c2_170 = arith.constant 2 : index
    %222 = vector.load %arg7[%c1_168, %c1_169, %c2_170] : memref<3x10x10xf32, #tpu.memory_space<vmem>>, vector<1x8x8xf32>
    %223 = vector.shape_cast %222 : vector<1x8x8xf32> to vector<8x8xf32>
    %224 = vector.broadcast %221 : f32 to vector<8x8xf32>
    %225 = arith.mulf %224, %223 : vector<8x8xf32>
    %226 = arith.addf %220, %225 : vector<8x8xf32>
    %c15 = arith.constant 15 : index
    %227 = memref.load %arg1[%c15] : memref<108xf32, #tpu.memory_space<smem>>
    %c1_171 = arith.constant 1 : index
    %c2_172 = arith.constant 2 : index
    %c0_173 = arith.constant 0 : index
    %228 = vector.load %arg7[%c1_171, %c2_172, %c0_173] : memref<3x10x10xf32, #tpu.memory_space<vmem>>, vector<1x8x8xf32>
    %229 = vector.shape_cast %228 : vector<1x8x8xf32> to vector<8x8xf32>
    %230 = vector.broadcast %227 : f32 to vector<8x8xf32>
    %231 = arith.mulf %230, %229 : vector<8x8xf32>
    %232 = arith.addf %226, %231 : vector<8x8xf32>
    %c16_174 = arith.constant 16 : index
    %233 = memref.load %arg1[%c16_174] : memref<108xf32, #tpu.memory_space<smem>>
    %c1_175 = arith.constant 1 : index
    %c2_176 = arith.constant 2 : index
    %c1_177 = arith.constant 1 : index
    %234 = vector.load %arg7[%c1_175, %c2_176, %c1_177] : memref<3x10x10xf32, #tpu.memory_space<vmem>>, vector<1x8x8xf32>
    %235 = vector.shape_cast %234 : vector<1x8x8xf32> to vector<8x8xf32>
    %236 = vector.broadcast %233 : f32 to vector<8x8xf32>
    %237 = arith.mulf %236, %235 : vector<8x8xf32>
    %238 = arith.addf %232, %237 : vector<8x8xf32>
    %c17 = arith.constant 17 : index
    %239 = memref.load %arg1[%c17] : memref<108xf32, #tpu.memory_space<smem>>
    %c1_178 = arith.constant 1 : index
    %c2_179 = arith.constant 2 : index
    %c2_180 = arith.constant 2 : index
    %240 = vector.load %arg7[%c1_178, %c2_179, %c2_180] : memref<3x10x10xf32, #tpu.memory_space<vmem>>, vector<1x8x8xf32>
    %241 = vector.shape_cast %240 : vector<1x8x8xf32> to vector<8x8xf32>
    %242 = vector.broadcast %239 : f32 to vector<8x8xf32>
    %243 = arith.mulf %242, %241 : vector<8x8xf32>
    %244 = arith.addf %238, %243 : vector<8x8xf32>
    %c18 = arith.constant 18 : index
    %245 = memref.load %arg1[%c18] : memref<108xf32, #tpu.memory_space<smem>>
    %c2_181 = arith.constant 2 : index
    %c0_182 = arith.constant 0 : index
    %c0_183 = arith.constant 0 : index
    %246 = vector.load %arg7[%c2_181, %c0_182, %c0_183] : memref<3x10x10xf32, #tpu.memory_space<vmem>>, vector<1x8x8xf32>
    %247 = vector.shape_cast %246 : vector<1x8x8xf32> to vector<8x8xf32>
    %248 = vector.broadcast %245 : f32 to vector<8x8xf32>
    %249 = arith.mulf %248, %247 : vector<8x8xf32>
    %250 = arith.addf %244, %249 : vector<8x8xf32>
    %c19 = arith.constant 19 : index
    %251 = memref.load %arg1[%c19] : memref<108xf32, #tpu.memory_space<smem>>
    %c2_184 = arith.constant 2 : index
    %c0_185 = arith.constant 0 : index
    %c1_186 = arith.constant 1 : index
    %252 = vector.load %arg7[%c2_184, %c0_185, %c1_186] : memref<3x10x10xf32, #tpu.memory_space<vmem>>, vector<1x8x8xf32>
    %253 = vector.shape_cast %252 : vector<1x8x8xf32> to vector<8x8xf32>
    %254 = vector.broadcast %251 : f32 to vector<8x8xf32>
    %255 = arith.mulf %254, %253 : vector<8x8xf32>
    %256 = arith.addf %250, %255 : vector<8x8xf32>
    %c20 = arith.constant 20 : index
    %257 = memref.load %arg1[%c20] : memref<108xf32, #tpu.memory_space<smem>>
    %c2_187 = arith.constant 2 : index
    %c0_188 = arith.constant 0 : index
    %c2_189 = arith.constant 2 : index
    %258 = vector.load %arg7[%c2_187, %c0_188, %c2_189] : memref<3x10x10xf32, #tpu.memory_space<vmem>>, vector<1x8x8xf32>
    %259 = vector.shape_cast %258 : vector<1x8x8xf32> to vector<8x8xf32>
    %260 = vector.broadcast %257 : f32 to vector<8x8xf32>
    %261 = arith.mulf %260, %259 : vector<8x8xf32>
    %262 = arith.addf %256, %261 : vector<8x8xf32>
    %c21 = arith.constant 21 : index
    %263 = memref.load %arg1[%c21] : memref<108xf32, #tpu.memory_space<smem>>
    %c2_190 = arith.constant 2 : index
    %c1_191 = arith.constant 1 : index
    %c0_192 = arith.constant 0 : index
    %264 = vector.load %arg7[%c2_190, %c1_191, %c0_192] : memref<3x10x10xf32, #tpu.memory_space<vmem>>, vector<1x8x8xf32>
    %265 = vector.shape_cast %264 : vector<1x8x8xf32> to vector<8x8xf32>
    %266 = vector.broadcast %263 : f32 to vector<8x8xf32>
    %267 = arith.mulf %266, %265 : vector<8x8xf32>
    %268 = arith.addf %262, %267 : vector<8x8xf32>
    %c22 = arith.constant 22 : index
    %269 = memref.load %arg1[%c22] : memref<108xf32, #tpu.memory_space<smem>>
    %c2_193 = arith.constant 2 : index
    %c1_194 = arith.constant 1 : index
    %c1_195 = arith.constant 1 : index
    %270 = vector.load %arg7[%c2_193, %c1_194, %c1_195] : memref<3x10x10xf32, #tpu.memory_space<vmem>>, vector<1x8x8xf32>
    %271 = vector.shape_cast %270 : vector<1x8x8xf32> to vector<8x8xf32>
    %272 = vector.broadcast %269 : f32 to vector<8x8xf32>
    %273 = arith.mulf %272, %271 : vector<8x8xf32>
    %274 = arith.addf %268, %273 : vector<8x8xf32>
    %c23 = arith.constant 23 : index
    %275 = memref.load %arg1[%c23] : memref<108xf32, #tpu.memory_space<smem>>
    %c2_196 = arith.constant 2 : index
    %c1_197 = arith.constant 1 : index
    %c2_198 = arith.constant 2 : index
    %276 = vector.load %arg7[%c2_196, %c1_197, %c2_198] : memref<3x10x10xf32, #tpu.memory_space<vmem>>, vector<1x8x8xf32>
    %277 = vector.shape_cast %276 : vector<1x8x8xf32> to vector<8x8xf32>
    %278 = vector.broadcast %275 : f32 to vector<8x8xf32>
    %279 = arith.mulf %278, %277 : vector<8x8xf32>
    %280 = arith.addf %274, %279 : vector<8x8xf32>
    %c24 = arith.constant 24 : index
    %281 = memref.load %arg1[%c24] : memref<108xf32, #tpu.memory_space<smem>>
    %c2_199 = arith.constant 2 : index
    %c2_200 = arith.constant 2 : index
    %c0_201 = arith.constant 0 : index
    %282 = vector.load %arg7[%c2_199, %c2_200, %c0_201] : memref<3x10x10xf32, #tpu.memory_space<vmem>>, vector<1x8x8xf32>
    %283 = vector.shape_cast %282 : vector<1x8x8xf32> to vector<8x8xf32>
    %284 = vector.broadcast %281 : f32 to vector<8x8xf32>
    %285 = arith.mulf %284, %283 : vector<8x8xf32>
    %286 = arith.addf %280, %285 : vector<8x8xf32>
    %c25 = arith.constant 25 : index
    %287 = memref.load %arg1[%c25] : memref<108xf32, #tpu.memory_space<smem>>
    %c2_202 = arith.constant 2 : index
    %c2_203 = arith.constant 2 : index
    %c1_204 = arith.constant 1 : index
    %288 = vector.load %arg7[%c2_202, %c2_203, %c1_204] : memref<3x10x10xf32, #tpu.memory_space<vmem>>, vector<1x8x8xf32>
    %289 = vector.shape_cast %288 : vector<1x8x8xf32> to vector<8x8xf32>
    %290 = vector.broadcast %287 : f32 to vector<8x8xf32>
    %291 = arith.mulf %290, %289 : vector<8x8xf32>
    %292 = arith.addf %286, %291 : vector<8x8xf32>
    %c26 = arith.constant 26 : index
    %293 = memref.load %arg1[%c26] : memref<108xf32, #tpu.memory_space<smem>>
    %c2_205 = arith.constant 2 : index
    %c2_206 = arith.constant 2 : index
    %c2_207 = arith.constant 2 : index
    %294 = vector.load %arg7[%c2_205, %c2_206, %c2_207] : memref<3x10x10xf32, #tpu.memory_space<vmem>>, vector<1x8x8xf32>
    %295 = vector.shape_cast %294 : vector<1x8x8xf32> to vector<8x8xf32>
    %296 = vector.broadcast %293 : f32 to vector<8x8xf32>
    %297 = arith.mulf %296, %295 : vector<8x8xf32>
    %298 = arith.addf %292, %297 : vector<8x8xf32>
    %cst_208 = arith.constant 0.000000e+00 : f32
    %299 = vector.broadcast %cst_208 : f32 to vector<8x8xf32>
    %300 = arith.maximumf %298, %299 : vector<8x8xf32>
    %c0_209 = arith.constant 0 : index
    %c1_210 = arith.constant 1 : index
    %c1_211 = arith.constant 1 : index
    %301 = vector.load %arg8[%c0_209, %c1_210, %c1_211] : memref<4x10x10xf32, #tpu.memory_space<vmem>>, vector<1x8x8xf32>
    %302 = vector.shape_cast %301 : vector<1x8x8xf32> to vector<8x8xf32>
    %303 = vector.shape_cast %300 : vector<8x8xf32> to vector<1x8x8xf32>
    tpu.vector_store %arg8[%c0_209, %c1_210, %c1_211], %303 {strides = array<i32>} : memref<4x10x10xf32, #tpu.memory_space<vmem>>, vector<1x8x8xf32>,
    %cst_212 = arith.constant 0.000000e+00 : f32
    %304 = vector.broadcast %cst_212 : f32 to vector<8x8xf32>
    %c1_213 = arith.constant 1 : index
    %305 = memref.load %arg2[%c1_213] : memref<4xf32, #tpu.memory_space<smem>>
    %306 = vector.broadcast %305 : f32 to vector<8x8xf32>
    %307 = arith.addf %304, %306 : vector<8x8xf32>
    %c27 = arith.constant 27 : index
    %308 = memref.load %arg1[%c27] : memref<108xf32, #tpu.memory_space<smem>>
    %c0_214 = arith.constant 0 : index
    %c0_215 = arith.constant 0 : index
    %c0_216 = arith.constant 0 : index
    %309 = vector.load %arg7[%c0_214, %c0_215, %c0_216] : memref<3x10x10xf32, #tpu.memory_space<vmem>>, vector<1x8x8xf32>
    %310 = vector.shape_cast %309 : vector<1x8x8xf32> to vector<8x8xf32>
    %311 = vector.broadcast %308 : f32 to vector<8x8xf32>
    %312 = arith.mulf %311, %310 : vector<8x8xf32>
    %313 = arith.addf %307, %312 : vector<8x8xf32>
    %c28 = arith.constant 28 : index
    %314 = memref.load %arg1[%c28] : memref<108xf32, #tpu.memory_space<smem>>
    %c0_217 = arith.constant 0 : index
    %c0_218 = arith.constant 0 : index
    %c1_219 = arith.constant 1 : index
    %315 = vector.load %arg7[%c0_217, %c0_218, %c1_219] : memref<3x10x10xf32, #tpu.memory_space<vmem>>, vector<1x8x8xf32>
    %316 = vector.shape_cast %315 : vector<1x8x8xf32> to vector<8x8xf32>
    %317 = vector.broadcast %314 : f32 to vector<8x8xf32>
    %318 = arith.mulf %317, %316 : vector<8x8xf32>
    %319 = arith.addf %313, %318 : vector<8x8xf32>
    %c29 = arith.constant 29 : index
    %320 = memref.load %arg1[%c29] : memref<108xf32, #tpu.memory_space<smem>>
    %c0_220 = arith.constant 0 : index
    %c0_221 = arith.constant 0 : index
    %c2_222 = arith.constant 2 : index
    %321 = vector.load %arg7[%c0_220, %c0_221, %c2_222] : memref<3x10x10xf32, #tpu.memory_space<vmem>>, vector<1x8x8xf32>
    %322 = vector.shape_cast %321 : vector<1x8x8xf32> to vector<8x8xf32>
    %323 = vector.broadcast %320 : f32 to vector<8x8xf32>
    %324 = arith.mulf %323, %322 : vector<8x8xf32>
    %325 = arith.addf %319, %324 : vector<8x8xf32>
    %c30 = arith.constant 30 : index
    %326 = memref.load %arg1[%c30] : memref<108xf32, #tpu.memory_space<smem>>
    %c0_223 = arith.constant 0 : index
    %c1_224 = arith.constant 1 : index
    %c0_225 = arith.constant 0 : index
    %327 = vector.load %arg7[%c0_223, %c1_224, %c0_225] : memref<3x10x10xf32, #tpu.memory_space<vmem>>, vector<1x8x8xf32>
    %328 = vector.shape_cast %327 : vector<1x8x8xf32> to vector<8x8xf32>
    %329 = vector.broadcast %326 : f32 to vector<8x8xf32>
    %330 = arith.mulf %329, %328 : vector<8x8xf32>
    %331 = arith.addf %325, %330 : vector<8x8xf32>
    %c31 = arith.constant 31 : index
    %332 = memref.load %arg1[%c31] : memref<108xf32, #tpu.memory_space<smem>>
    %c0_226 = arith.constant 0 : index
    %c1_227 = arith.constant 1 : index
    %c1_228 = arith.constant 1 : index
    %333 = vector.load %arg7[%c0_226, %c1_227, %c1_228] : memref<3x10x10xf32, #tpu.memory_space<vmem>>, vector<1x8x8xf32>
    %334 = vector.shape_cast %333 : vector<1x8x8xf32> to vector<8x8xf32>
    %335 = vector.broadcast %332 : f32 to vector<8x8xf32>
    %336 = arith.mulf %335, %334 : vector<8x8xf32>
    %337 = arith.addf %331, %336 : vector<8x8xf32>
    %c32 = arith.constant 32 : index
    %338 = memref.load %arg1[%c32] : memref<108xf32, #tpu.memory_space<smem>>
    %c0_229 = arith.constant 0 : index
    %c1_230 = arith.constant 1 : index
    %c2_231 = arith.constant 2 : index
    %339 = vector.load %arg7[%c0_229, %c1_230, %c2_231] : memref<3x10x10xf32, #tpu.memory_space<vmem>>, vector<1x8x8xf32>
    %340 = vector.shape_cast %339 : vector<1x8x8xf32> to vector<8x8xf32>
    %341 = vector.broadcast %338 : f32 to vector<8x8xf32>
    %342 = arith.mulf %341, %340 : vector<8x8xf32>
    %343 = arith.addf %337, %342 : vector<8x8xf32>
    %c33 = arith.constant 33 : index
    %344 = memref.load %arg1[%c33] : memref<108xf32, #tpu.memory_space<smem>>
    %c0_232 = arith.constant 0 : index
    %c2_233 = arith.constant 2 : index
    %c0_234 = arith.constant 0 : index
    %345 = vector.load %arg7[%c0_232, %c2_233, %c0_234] : memref<3x10x10xf32, #tpu.memory_space<vmem>>, vector<1x8x8xf32>
    %346 = vector.shape_cast %345 : vector<1x8x8xf32> to vector<8x8xf32>
    %347 = vector.broadcast %344 : f32 to vector<8x8xf32>
    %348 = arith.mulf %347, %346 : vector<8x8xf32>
    %349 = arith.addf %343, %348 : vector<8x8xf32>
    %c34 = arith.constant 34 : index
    %350 = memref.load %arg1[%c34] : memref<108xf32, #tpu.memory_space<smem>>
    %c0_235 = arith.constant 0 : index
    %c2_236 = arith.constant 2 : index
    %c1_237 = arith.constant 1 : index
    %351 = vector.load %arg7[%c0_235, %c2_236, %c1_237] : memref<3x10x10xf32, #tpu.memory_space<vmem>>, vector<1x8x8xf32>
    %352 = vector.shape_cast %351 : vector<1x8x8xf32> to vector<8x8xf32>
    %353 = vector.broadcast %350 : f32 to vector<8x8xf32>
    %354 = arith.mulf %353, %352 : vector<8x8xf32>
    %355 = arith.addf %349, %354 : vector<8x8xf32>
    %c35 = arith.constant 35 : index
    %356 = memref.load %arg1[%c35] : memref<108xf32, #tpu.memory_space<smem>>
    %c0_238 = arith.constant 0 : index
    %c2_239 = arith.constant 2 : index
    %c2_240 = arith.constant 2 : index
    %357 = vector.load %arg7[%c0_238, %c2_239, %c2_240] : memref<3x10x10xf32, #tpu.memory_space<vmem>>, vector<1x8x8xf32>
    %358 = vector.shape_cast %357 : vector<1x8x8xf32> to vector<8x8xf32>
    %359 = vector.broadcast %356 : f32 to vector<8x8xf32>
    %360 = arith.mulf %359, %358 : vector<8x8xf32>
    %361 = arith.addf %355, %360 : vector<8x8xf32>
    %c36 = arith.constant 36 : index
    %362 = memref.load %arg1[%c36] : memref<108xf32, #tpu.memory_space<smem>>
    %c1_241 = arith.constant 1 : index
    %c0_242 = arith.constant 0 : index
    %c0_243 = arith.constant 0 : index
    %363 = vector.load %arg7[%c1_241, %c0_242, %c0_243] : memref<3x10x10xf32, #tpu.memory_space<vmem>>, vector<1x8x8xf32>
    %364 = vector.shape_cast %363 : vector<1x8x8xf32> to vector<8x8xf32>
    %365 = vector.broadcast %362 : f32 to vector<8x8xf32>
    %366 = arith.mulf %365, %364 : vector<8x8xf32>
    %367 = arith.addf %361, %366 : vector<8x8xf32>
    %c37 = arith.constant 37 : index
    %368 = memref.load %arg1[%c37] : memref<108xf32, #tpu.memory_space<smem>>
    %c1_244 = arith.constant 1 : index
    %c0_245 = arith.constant 0 : index
    %c1_246 = arith.constant 1 : index
    %369 = vector.load %arg7[%c1_244, %c0_245, %c1_246] : memref<3x10x10xf32, #tpu.memory_space<vmem>>, vector<1x8x8xf32>
    %370 = vector.shape_cast %369 : vector<1x8x8xf32> to vector<8x8xf32>
    %371 = vector.broadcast %368 : f32 to vector<8x8xf32>
    %372 = arith.mulf %371, %370 : vector<8x8xf32>
    %373 = arith.addf %367, %372 : vector<8x8xf32>
    %c38 = arith.constant 38 : index
    %374 = memref.load %arg1[%c38] : memref<108xf32, #tpu.memory_space<smem>>
    %c1_247 = arith.constant 1 : index
    %c0_248 = arith.constant 0 : index
    %c2_249 = arith.constant 2 : index
    %375 = vector.load %arg7[%c1_247, %c0_248, %c2_249] : memref<3x10x10xf32, #tpu.memory_space<vmem>>, vector<1x8x8xf32>
    %376 = vector.shape_cast %375 : vector<1x8x8xf32> to vector<8x8xf32>
    %377 = vector.broadcast %374 : f32 to vector<8x8xf32>
    %378 = arith.mulf %377, %376 : vector<8x8xf32>
    %379 = arith.addf %373, %378 : vector<8x8xf32>
    %c39 = arith.constant 39 : index
    %380 = memref.load %arg1[%c39] : memref<108xf32, #tpu.memory_space<smem>>
    %c1_250 = arith.constant 1 : index
    %c1_251 = arith.constant 1 : index
    %c0_252 = arith.constant 0 : index
    %381 = vector.load %arg7[%c1_250, %c1_251, %c0_252] : memref<3x10x10xf32, #tpu.memory_space<vmem>>, vector<1x8x8xf32>
    %382 = vector.shape_cast %381 : vector<1x8x8xf32> to vector<8x8xf32>
    %383 = vector.broadcast %380 : f32 to vector<8x8xf32>
    %384 = arith.mulf %383, %382 : vector<8x8xf32>
    %385 = arith.addf %379, %384 : vector<8x8xf32>
    %c40 = arith.constant 40 : index
    %386 = memref.load %arg1[%c40] : memref<108xf32, #tpu.memory_space<smem>>
    %c1_253 = arith.constant 1 : index
    %c1_254 = arith.constant 1 : index
    %c1_255 = arith.constant 1 : index
    %387 = vector.load %arg7[%c1_253, %c1_254, %c1_255] : memref<3x10x10xf32, #tpu.memory_space<vmem>>, vector<1x8x8xf32>
    %388 = vector.shape_cast %387 : vector<1x8x8xf32> to vector<8x8xf32>
    %389 = vector.broadcast %386 : f32 to vector<8x8xf32>
    %390 = arith.mulf %389, %388 : vector<8x8xf32>
    %391 = arith.addf %385, %390 : vector<8x8xf32>
    %c41 = arith.constant 41 : index
    %392 = memref.load %arg1[%c41] : memref<108xf32, #tpu.memory_space<smem>>
    %c1_256 = arith.constant 1 : index
    %c1_257 = arith.constant 1 : index
    %c2_258 = arith.constant 2 : index
    %393 = vector.load %arg7[%c1_256, %c1_257, %c2_258] : memref<3x10x10xf32, #tpu.memory_space<vmem>>, vector<1x8x8xf32>
    %394 = vector.shape_cast %393 : vector<1x8x8xf32> to vector<8x8xf32>
    %395 = vector.broadcast %392 : f32 to vector<8x8xf32>
    %396 = arith.mulf %395, %394 : vector<8x8xf32>
    %397 = arith.addf %391, %396 : vector<8x8xf32>
    %c42 = arith.constant 42 : index
    %398 = memref.load %arg1[%c42] : memref<108xf32, #tpu.memory_space<smem>>
    %c1_259 = arith.constant 1 : index
    %c2_260 = arith.constant 2 : index
    %c0_261 = arith.constant 0 : index
    %399 = vector.load %arg7[%c1_259, %c2_260, %c0_261] : memref<3x10x10xf32, #tpu.memory_space<vmem>>, vector<1x8x8xf32>
    %400 = vector.shape_cast %399 : vector<1x8x8xf32> to vector<8x8xf32>
    %401 = vector.broadcast %398 : f32 to vector<8x8xf32>
    %402 = arith.mulf %401, %400 : vector<8x8xf32>
    %403 = arith.addf %397, %402 : vector<8x8xf32>
    %c43 = arith.constant 43 : index
    %404 = memref.load %arg1[%c43] : memref<108xf32, #tpu.memory_space<smem>>
    %c1_262 = arith.constant 1 : index
    %c2_263 = arith.constant 2 : index
    %c1_264 = arith.constant 1 : index
    %405 = vector.load %arg7[%c1_262, %c2_263, %c1_264] : memref<3x10x10xf32, #tpu.memory_space<vmem>>, vector<1x8x8xf32>
    %406 = vector.shape_cast %405 : vector<1x8x8xf32> to vector<8x8xf32>
    %407 = vector.broadcast %404 : f32 to vector<8x8xf32>
    %408 = arith.mulf %407, %406 : vector<8x8xf32>
    %409 = arith.addf %403, %408 : vector<8x8xf32>
    %c44 = arith.constant 44 : index
    %410 = memref.load %arg1[%c44] : memref<108xf32, #tpu.memory_space<smem>>
    %c1_265 = arith.constant 1 : index
    %c2_266 = arith.constant 2 : index
    %c2_267 = arith.constant 2 : index
    %411 = vector.load %arg7[%c1_265, %c2_266, %c2_267] : memref<3x10x10xf32, #tpu.memory_space<vmem>>, vector<1x8x8xf32>
    %412 = vector.shape_cast %411 : vector<1x8x8xf32> to vector<8x8xf32>
    %413 = vector.broadcast %410 : f32 to vector<8x8xf32>
    %414 = arith.mulf %413, %412 : vector<8x8xf32>
    %415 = arith.addf %409, %414 : vector<8x8xf32>
    %c45 = arith.constant 45 : index
    %416 = memref.load %arg1[%c45] : memref<108xf32, #tpu.memory_space<smem>>
    %c2_268 = arith.constant 2 : index
    %c0_269 = arith.constant 0 : index
    %c0_270 = arith.constant 0 : index
    %417 = vector.load %arg7[%c2_268, %c0_269, %c0_270] : memref<3x10x10xf32, #tpu.memory_space<vmem>>, vector<1x8x8xf32>
    %418 = vector.shape_cast %417 : vector<1x8x8xf32> to vector<8x8xf32>
    %419 = vector.broadcast %416 : f32 to vector<8x8xf32>
    %420 = arith.mulf %419, %418 : vector<8x8xf32>
    %421 = arith.addf %415, %420 : vector<8x8xf32>
    %c46 = arith.constant 46 : index
    %422 = memref.load %arg1[%c46] : memref<108xf32, #tpu.memory_space<smem>>
    %c2_271 = arith.constant 2 : index
    %c0_272 = arith.constant 0 : index
    %c1_273 = arith.constant 1 : index
    %423 = vector.load %arg7[%c2_271, %c0_272, %c1_273] : memref<3x10x10xf32, #tpu.memory_space<vmem>>, vector<1x8x8xf32>
    %424 = vector.shape_cast %423 : vector<1x8x8xf32> to vector<8x8xf32>
    %425 = vector.broadcast %422 : f32 to vector<8x8xf32>
    %426 = arith.mulf %425, %424 : vector<8x8xf32>
    %427 = arith.addf %421, %426 : vector<8x8xf32>
    %c47 = arith.constant 47 : index
    %428 = memref.load %arg1[%c47] : memref<108xf32, #tpu.memory_space<smem>>
    %c2_274 = arith.constant 2 : index
    %c0_275 = arith.constant 0 : index
    %c2_276 = arith.constant 2 : index
    %429 = vector.load %arg7[%c2_274, %c0_275, %c2_276] : memref<3x10x10xf32, #tpu.memory_space<vmem>>, vector<1x8x8xf32>
    %430 = vector.shape_cast %429 : vector<1x8x8xf32> to vector<8x8xf32>
    %431 = vector.broadcast %428 : f32 to vector<8x8xf32>
    %432 = arith.mulf %431, %430 : vector<8x8xf32>
    %433 = arith.addf %427, %432 : vector<8x8xf32>
    %c48 = arith.constant 48 : index
    %434 = memref.load %arg1[%c48] : memref<108xf32, #tpu.memory_space<smem>>
    %c2_277 = arith.constant 2 : index
    %c1_278 = arith.constant 1 : index
    %c0_279 = arith.constant 0 : index
    %435 = vector.load %arg7[%c2_277, %c1_278, %c0_279] : memref<3x10x10xf32, #tpu.memory_space<vmem>>, vector<1x8x8xf32>
    %436 = vector.shape_cast %435 : vector<1x8x8xf32> to vector<8x8xf32>
    %437 = vector.broadcast %434 : f32 to vector<8x8xf32>
    %438 = arith.mulf %437, %436 : vector<8x8xf32>
    %439 = arith.addf %433, %438 : vector<8x8xf32>
    %c49 = arith.constant 49 : index
    %440 = memref.load %arg1[%c49] : memref<108xf32, #tpu.memory_space<smem>>
    %c2_280 = arith.constant 2 : index
    %c1_281 = arith.constant 1 : index
    %c1_282 = arith.constant 1 : index
    %441 = vector.load %arg7[%c2_280, %c1_281, %c1_282] : memref<3x10x10xf32, #tpu.memory_space<vmem>>, vector<1x8x8xf32>
    %442 = vector.shape_cast %441 : vector<1x8x8xf32> to vector<8x8xf32>
    %443 = vector.broadcast %440 : f32 to vector<8x8xf32>
    %444 = arith.mulf %443, %442 : vector<8x8xf32>
    %445 = arith.addf %439, %444 : vector<8x8xf32>
    %c50 = arith.constant 50 : index
    %446 = memref.load %arg1[%c50] : memref<108xf32, #tpu.memory_space<smem>>
    %c2_283 = arith.constant 2 : index
    %c1_284 = arith.constant 1 : index
    %c2_285 = arith.constant 2 : index
    %447 = vector.load %arg7[%c2_283, %c1_284, %c2_285] : memref<3x10x10xf32, #tpu.memory_space<vmem>>, vector<1x8x8xf32>
    %448 = vector.shape_cast %447 : vector<1x8x8xf32> to vector<8x8xf32>
    %449 = vector.broadcast %446 : f32 to vector<8x8xf32>
    %450 = arith.mulf %449, %448 : vector<8x8xf32>
    %451 = arith.addf %445, %450 : vector<8x8xf32>
    %c51 = arith.constant 51 : index
    %452 = memref.load %arg1[%c51] : memref<108xf32, #tpu.memory_space<smem>>
    %c2_286 = arith.constant 2 : index
    %c2_287 = arith.constant 2 : index
    %c0_288 = arith.constant 0 : index
    %453 = vector.load %arg7[%c2_286, %c2_287, %c0_288] : memref<3x10x10xf32, #tpu.memory_space<vmem>>, vector<1x8x8xf32>
    %454 = vector.shape_cast %453 : vector<1x8x8xf32> to vector<8x8xf32>
    %455 = vector.broadcast %452 : f32 to vector<8x8xf32>
    %456 = arith.mulf %455, %454 : vector<8x8xf32>
    %457 = arith.addf %451, %456 : vector<8x8xf32>
    %c52 = arith.constant 52 : index
    %458 = memref.load %arg1[%c52] : memref<108xf32, #tpu.memory_space<smem>>
    %c2_289 = arith.constant 2 : index
    %c2_290 = arith.constant 2 : index
    %c1_291 = arith.constant 1 : index
    %459 = vector.load %arg7[%c2_289, %c2_290, %c1_291] : memref<3x10x10xf32, #tpu.memory_space<vmem>>, vector<1x8x8xf32>
    %460 = vector.shape_cast %459 : vector<1x8x8xf32> to vector<8x8xf32>
    %461 = vector.broadcast %458 : f32 to vector<8x8xf32>
    %462 = arith.mulf %461, %460 : vector<8x8xf32>
    %463 = arith.addf %457, %462 : vector<8x8xf32>
    %c53 = arith.constant 53 : index
    %464 = memref.load %arg1[%c53] : memref<108xf32, #tpu.memory_space<smem>>
    %c2_292 = arith.constant 2 : index
    %c2_293 = arith.constant 2 : index
    %c2_294 = arith.constant 2 : index
    %465 = vector.load %arg7[%c2_292, %c2_293, %c2_294] : memref<3x10x10xf32, #tpu.memory_space<vmem>>, vector<1x8x8xf32>
    %466 = vector.shape_cast %465 : vector<1x8x8xf32> to vector<8x8xf32>
    %467 = vector.broadcast %464 : f32 to vector<8x8xf32>
    %468 = arith.mulf %467, %466 : vector<8x8xf32>
    %469 = arith.addf %463, %468 : vector<8x8xf32>
    %cst_295 = arith.constant 0.000000e+00 : f32
    %470 = vector.broadcast %cst_295 : f32 to vector<8x8xf32>
    %471 = arith.maximumf %469, %470 : vector<8x8xf32>
    %c1_296 = arith.constant 1 : index
    %c1_297 = arith.constant 1 : index
    %c1_298 = arith.constant 1 : index
    %472 = vector.load %arg8[%c1_296, %c1_297, %c1_298] : memref<4x10x10xf32, #tpu.memory_space<vmem>>, vector<1x8x8xf32>
    %473 = vector.shape_cast %472 : vector<1x8x8xf32> to vector<8x8xf32>
    %474 = vector.shape_cast %471 : vector<8x8xf32> to vector<1x8x8xf32>
    tpu.vector_store %arg8[%c1_296, %c1_297, %c1_298], %474 {strides = array<i32>} : memref<4x10x10xf32, #tpu.memory_space<vmem>>, vector<1x8x8xf32>,
    %cst_299 = arith.constant 0.000000e+00 : f32
    %475 = vector.broadcast %cst_299 : f32 to vector<8x8xf32>
    %c2_300 = arith.constant 2 : index
    %476 = memref.load %arg2[%c2_300] : memref<4xf32, #tpu.memory_space<smem>>
    %477 = vector.broadcast %476 : f32 to vector<8x8xf32>
    %478 = arith.addf %475, %477 : vector<8x8xf32>
    %c54 = arith.constant 54 : index
    %479 = memref.load %arg1[%c54] : memref<108xf32, #tpu.memory_space<smem>>
    %c0_301 = arith.constant 0 : index
    %c0_302 = arith.constant 0 : index
    %c0_303 = arith.constant 0 : index
    %480 = vector.load %arg7[%c0_301, %c0_302, %c0_303] : memref<3x10x10xf32, #tpu.memory_space<vmem>>, vector<1x8x8xf32>
    %481 = vector.shape_cast %480 : vector<1x8x8xf32> to vector<8x8xf32>
    %482 = vector.broadcast %479 : f32 to vector<8x8xf32>
    %483 = arith.mulf %482, %481 : vector<8x8xf32>
    %484 = arith.addf %478, %483 : vector<8x8xf32>
    %c55 = arith.constant 55 : index
    %485 = memref.load %arg1[%c55] : memref<108xf32, #tpu.memory_space<smem>>
    %c0_304 = arith.constant 0 : index
    %c0_305 = arith.constant 0 : index
    %c1_306 = arith.constant 1 : index
    %486 = vector.load %arg7[%c0_304, %c0_305, %c1_306] : memref<3x10x10xf32, #tpu.memory_space<vmem>>, vector<1x8x8xf32>
    %487 = vector.shape_cast %486 : vector<1x8x8xf32> to vector<8x8xf32>
    %488 = vector.broadcast %485 : f32 to vector<8x8xf32>
    %489 = arith.mulf %488, %487 : vector<8x8xf32>
    %490 = arith.addf %484, %489 : vector<8x8xf32>
    %c56 = arith.constant 56 : index
    %491 = memref.load %arg1[%c56] : memref<108xf32, #tpu.memory_space<smem>>
    %c0_307 = arith.constant 0 : index
    %c0_308 = arith.constant 0 : index
    %c2_309 = arith.constant 2 : index
    %492 = vector.load %arg7[%c0_307, %c0_308, %c2_309] : memref<3x10x10xf32, #tpu.memory_space<vmem>>, vector<1x8x8xf32>
    %493 = vector.shape_cast %492 : vector<1x8x8xf32> to vector<8x8xf32>
    %494 = vector.broadcast %491 : f32 to vector<8x8xf32>
    %495 = arith.mulf %494, %493 : vector<8x8xf32>
    %496 = arith.addf %490, %495 : vector<8x8xf32>
    %c57 = arith.constant 57 : index
    %497 = memref.load %arg1[%c57] : memref<108xf32, #tpu.memory_space<smem>>
    %c0_310 = arith.constant 0 : index
    %c1_311 = arith.constant 1 : index
    %c0_312 = arith.constant 0 : index
    %498 = vector.load %arg7[%c0_310, %c1_311, %c0_312] : memref<3x10x10xf32, #tpu.memory_space<vmem>>, vector<1x8x8xf32>
    %499 = vector.shape_cast %498 : vector<1x8x8xf32> to vector<8x8xf32>
    %500 = vector.broadcast %497 : f32 to vector<8x8xf32>
    %501 = arith.mulf %500, %499 : vector<8x8xf32>
    %502 = arith.addf %496, %501 : vector<8x8xf32>
    %c58 = arith.constant 58 : index
    %503 = memref.load %arg1[%c58] : memref<108xf32, #tpu.memory_space<smem>>
    %c0_313 = arith.constant 0 : index
    %c1_314 = arith.constant 1 : index
    %c1_315 = arith.constant 1 : index
    %504 = vector.load %arg7[%c0_313, %c1_314, %c1_315] : memref<3x10x10xf32, #tpu.memory_space<vmem>>, vector<1x8x8xf32>
    %505 = vector.shape_cast %504 : vector<1x8x8xf32> to vector<8x8xf32>
    %506 = vector.broadcast %503 : f32 to vector<8x8xf32>
    %507 = arith.mulf %506, %505 : vector<8x8xf32>
    %508 = arith.addf %502, %507 : vector<8x8xf32>
    %c59 = arith.constant 59 : index
    %509 = memref.load %arg1[%c59] : memref<108xf32, #tpu.memory_space<smem>>
    %c0_316 = arith.constant 0 : index
    %c1_317 = arith.constant 1 : index
    %c2_318 = arith.constant 2 : index
    %510 = vector.load %arg7[%c0_316, %c1_317, %c2_318] : memref<3x10x10xf32, #tpu.memory_space<vmem>>, vector<1x8x8xf32>
    %511 = vector.shape_cast %510 : vector<1x8x8xf32> to vector<8x8xf32>
    %512 = vector.broadcast %509 : f32 to vector<8x8xf32>
    %513 = arith.mulf %512, %511 : vector<8x8xf32>
    %514 = arith.addf %508, %513 : vector<8x8xf32>
    %c60 = arith.constant 60 : index
    %515 = memref.load %arg1[%c60] : memref<108xf32, #tpu.memory_space<smem>>
    %c0_319 = arith.constant 0 : index
    %c2_320 = arith.constant 2 : index
    %c0_321 = arith.constant 0 : index
    %516 = vector.load %arg7[%c0_319, %c2_320, %c0_321] : memref<3x10x10xf32, #tpu.memory_space<vmem>>, vector<1x8x8xf32>
    %517 = vector.shape_cast %516 : vector<1x8x8xf32> to vector<8x8xf32>
    %518 = vector.broadcast %515 : f32 to vector<8x8xf32>
    %519 = arith.mulf %518, %517 : vector<8x8xf32>
    %520 = arith.addf %514, %519 : vector<8x8xf32>
    %c61 = arith.constant 61 : index
    %521 = memref.load %arg1[%c61] : memref<108xf32, #tpu.memory_space<smem>>
    %c0_322 = arith.constant 0 : index
    %c2_323 = arith.constant 2 : index
    %c1_324 = arith.constant 1 : index
    %522 = vector.load %arg7[%c0_322, %c2_323, %c1_324] : memref<3x10x10xf32, #tpu.memory_space<vmem>>, vector<1x8x8xf32>
    %523 = vector.shape_cast %522 : vector<1x8x8xf32> to vector<8x8xf32>
    %524 = vector.broadcast %521 : f32 to vector<8x8xf32>
    %525 = arith.mulf %524, %523 : vector<8x8xf32>
    %526 = arith.addf %520, %525 : vector<8x8xf32>
    %c62 = arith.constant 62 : index
    %527 = memref.load %arg1[%c62] : memref<108xf32, #tpu.memory_space<smem>>
    %c0_325 = arith.constant 0 : index
    %c2_326 = arith.constant 2 : index
    %c2_327 = arith.constant 2 : index
    %528 = vector.load %arg7[%c0_325, %c2_326, %c2_327] : memref<3x10x10xf32, #tpu.memory_space<vmem>>, vector<1x8x8xf32>
    %529 = vector.shape_cast %528 : vector<1x8x8xf32> to vector<8x8xf32>
    %530 = vector.broadcast %527 : f32 to vector<8x8xf32>
    %531 = arith.mulf %530, %529 : vector<8x8xf32>
    %532 = arith.addf %526, %531 : vector<8x8xf32>
    %c63 = arith.constant 63 : index
    %533 = memref.load %arg1[%c63] : memref<108xf32, #tpu.memory_space<smem>>
    %c1_328 = arith.constant 1 : index
    %c0_329 = arith.constant 0 : index
    %c0_330 = arith.constant 0 : index
    %534 = vector.load %arg7[%c1_328, %c0_329, %c0_330] : memref<3x10x10xf32, #tpu.memory_space<vmem>>, vector<1x8x8xf32>
    %535 = vector.shape_cast %534 : vector<1x8x8xf32> to vector<8x8xf32>
    %536 = vector.broadcast %533 : f32 to vector<8x8xf32>
    %537 = arith.mulf %536, %535 : vector<8x8xf32>
    %538 = arith.addf %532, %537 : vector<8x8xf32>
    %c64 = arith.constant 64 : index
    %539 = memref.load %arg1[%c64] : memref<108xf32, #tpu.memory_space<smem>>
    %c1_331 = arith.constant 1 : index
    %c0_332 = arith.constant 0 : index
    %c1_333 = arith.constant 1 : index
    %540 = vector.load %arg7[%c1_331, %c0_332, %c1_333] : memref<3x10x10xf32, #tpu.memory_space<vmem>>, vector<1x8x8xf32>
    %541 = vector.shape_cast %540 : vector<1x8x8xf32> to vector<8x8xf32>
    %542 = vector.broadcast %539 : f32 to vector<8x8xf32>
    %543 = arith.mulf %542, %541 : vector<8x8xf32>
    %544 = arith.addf %538, %543 : vector<8x8xf32>
    %c65 = arith.constant 65 : index
    %545 = memref.load %arg1[%c65] : memref<108xf32, #tpu.memory_space<smem>>
    %c1_334 = arith.constant 1 : index
    %c0_335 = arith.constant 0 : index
    %c2_336 = arith.constant 2 : index
    %546 = vector.load %arg7[%c1_334, %c0_335, %c2_336] : memref<3x10x10xf32, #tpu.memory_space<vmem>>, vector<1x8x8xf32>
    %547 = vector.shape_cast %546 : vector<1x8x8xf32> to vector<8x8xf32>
    %548 = vector.broadcast %545 : f32 to vector<8x8xf32>
    %549 = arith.mulf %548, %547 : vector<8x8xf32>
    %550 = arith.addf %544, %549 : vector<8x8xf32>
    %c66 = arith.constant 66 : index
    %551 = memref.load %arg1[%c66] : memref<108xf32, #tpu.memory_space<smem>>
    %c1_337 = arith.constant 1 : index
    %c1_338 = arith.constant 1 : index
    %c0_339 = arith.constant 0 : index
    %552 = vector.load %arg7[%c1_337, %c1_338, %c0_339] : memref<3x10x10xf32, #tpu.memory_space<vmem>>, vector<1x8x8xf32>
    %553 = vector.shape_cast %552 : vector<1x8x8xf32> to vector<8x8xf32>
    %554 = vector.broadcast %551 : f32 to vector<8x8xf32>
    %555 = arith.mulf %554, %553 : vector<8x8xf32>
    %556 = arith.addf %550, %555 : vector<8x8xf32>
    %c67 = arith.constant 67 : index
    %557 = memref.load %arg1[%c67] : memref<108xf32, #tpu.memory_space<smem>>
    %c1_340 = arith.constant 1 : index
    %c1_341 = arith.constant 1 : index
    %c1_342 = arith.constant 1 : index
    %558 = vector.load %arg7[%c1_340, %c1_341, %c1_342] : memref<3x10x10xf32, #tpu.memory_space<vmem>>, vector<1x8x8xf32>
    %559 = vector.shape_cast %558 : vector<1x8x8xf32> to vector<8x8xf32>
    %560 = vector.broadcast %557 : f32 to vector<8x8xf32>
    %561 = arith.mulf %560, %559 : vector<8x8xf32>
    %562 = arith.addf %556, %561 : vector<8x8xf32>
    %c68 = arith.constant 68 : index
    %563 = memref.load %arg1[%c68] : memref<108xf32, #tpu.memory_space<smem>>
    %c1_343 = arith.constant 1 : index
    %c1_344 = arith.constant 1 : index
    %c2_345 = arith.constant 2 : index
    %564 = vector.load %arg7[%c1_343, %c1_344, %c2_345] : memref<3x10x10xf32, #tpu.memory_space<vmem>>, vector<1x8x8xf32>
    %565 = vector.shape_cast %564 : vector<1x8x8xf32> to vector<8x8xf32>
    %566 = vector.broadcast %563 : f32 to vector<8x8xf32>
    %567 = arith.mulf %566, %565 : vector<8x8xf32>
    %568 = arith.addf %562, %567 : vector<8x8xf32>
    %c69 = arith.constant 69 : index
    %569 = memref.load %arg1[%c69] : memref<108xf32, #tpu.memory_space<smem>>
    %c1_346 = arith.constant 1 : index
    %c2_347 = arith.constant 2 : index
    %c0_348 = arith.constant 0 : index
    %570 = vector.load %arg7[%c1_346, %c2_347, %c0_348] : memref<3x10x10xf32, #tpu.memory_space<vmem>>, vector<1x8x8xf32>
    %571 = vector.shape_cast %570 : vector<1x8x8xf32> to vector<8x8xf32>
    %572 = vector.broadcast %569 : f32 to vector<8x8xf32>
    %573 = arith.mulf %572, %571 : vector<8x8xf32>
    %574 = arith.addf %568, %573 : vector<8x8xf32>
    %c70 = arith.constant 70 : index
    %575 = memref.load %arg1[%c70] : memref<108xf32, #tpu.memory_space<smem>>
    %c1_349 = arith.constant 1 : index
    %c2_350 = arith.constant 2 : index
    %c1_351 = arith.constant 1 : index
    %576 = vector.load %arg7[%c1_349, %c2_350, %c1_351] : memref<3x10x10xf32, #tpu.memory_space<vmem>>, vector<1x8x8xf32>
    %577 = vector.shape_cast %576 : vector<1x8x8xf32> to vector<8x8xf32>
    %578 = vector.broadcast %575 : f32 to vector<8x8xf32>
    %579 = arith.mulf %578, %577 : vector<8x8xf32>
    %580 = arith.addf %574, %579 : vector<8x8xf32>
    %c71 = arith.constant 71 : index
    %581 = memref.load %arg1[%c71] : memref<108xf32, #tpu.memory_space<smem>>
    %c1_352 = arith.constant 1 : index
    %c2_353 = arith.constant 2 : index
    %c2_354 = arith.constant 2 : index
    %582 = vector.load %arg7[%c1_352, %c2_353, %c2_354] : memref<3x10x10xf32, #tpu.memory_space<vmem>>, vector<1x8x8xf32>
    %583 = vector.shape_cast %582 : vector<1x8x8xf32> to vector<8x8xf32>
    %584 = vector.broadcast %581 : f32 to vector<8x8xf32>
    %585 = arith.mulf %584, %583 : vector<8x8xf32>
    %586 = arith.addf %580, %585 : vector<8x8xf32>
    %c72 = arith.constant 72 : index
    %587 = memref.load %arg1[%c72] : memref<108xf32, #tpu.memory_space<smem>>
    %c2_355 = arith.constant 2 : index
    %c0_356 = arith.constant 0 : index
    %c0_357 = arith.constant 0 : index
    %588 = vector.load %arg7[%c2_355, %c0_356, %c0_357] : memref<3x10x10xf32, #tpu.memory_space<vmem>>, vector<1x8x8xf32>
    %589 = vector.shape_cast %588 : vector<1x8x8xf32> to vector<8x8xf32>
    %590 = vector.broadcast %587 : f32 to vector<8x8xf32>
    %591 = arith.mulf %590, %589 : vector<8x8xf32>
    %592 = arith.addf %586, %591 : vector<8x8xf32>
    %c73 = arith.constant 73 : index
    %593 = memref.load %arg1[%c73] : memref<108xf32, #tpu.memory_space<smem>>
    %c2_358 = arith.constant 2 : index
    %c0_359 = arith.constant 0 : index
    %c1_360 = arith.constant 1 : index
    %594 = vector.load %arg7[%c2_358, %c0_359, %c1_360] : memref<3x10x10xf32, #tpu.memory_space<vmem>>, vector<1x8x8xf32>
    %595 = vector.shape_cast %594 : vector<1x8x8xf32> to vector<8x8xf32>
    %596 = vector.broadcast %593 : f32 to vector<8x8xf32>
    %597 = arith.mulf %596, %595 : vector<8x8xf32>
    %598 = arith.addf %592, %597 : vector<8x8xf32>
    %c74 = arith.constant 74 : index
    %599 = memref.load %arg1[%c74] : memref<108xf32, #tpu.memory_space<smem>>
    %c2_361 = arith.constant 2 : index
    %c0_362 = arith.constant 0 : index
    %c2_363 = arith.constant 2 : index
    %600 = vector.load %arg7[%c2_361, %c0_362, %c2_363] : memref<3x10x10xf32, #tpu.memory_space<vmem>>, vector<1x8x8xf32>
    %601 = vector.shape_cast %600 : vector<1x8x8xf32> to vector<8x8xf32>
    %602 = vector.broadcast %599 : f32 to vector<8x8xf32>
    %603 = arith.mulf %602, %601 : vector<8x8xf32>
    %604 = arith.addf %598, %603 : vector<8x8xf32>
    %c75 = arith.constant 75 : index
    %605 = memref.load %arg1[%c75] : memref<108xf32, #tpu.memory_space<smem>>
    %c2_364 = arith.constant 2 : index
    %c1_365 = arith.constant 1 : index
    %c0_366 = arith.constant 0 : index
    %606 = vector.load %arg7[%c2_364, %c1_365, %c0_366] : memref<3x10x10xf32, #tpu.memory_space<vmem>>, vector<1x8x8xf32>
    %607 = vector.shape_cast %606 : vector<1x8x8xf32> to vector<8x8xf32>
    %608 = vector.broadcast %605 : f32 to vector<8x8xf32>
    %609 = arith.mulf %608, %607 : vector<8x8xf32>
    %610 = arith.addf %604, %609 : vector<8x8xf32>
    %c76 = arith.constant 76 : index
    %611 = memref.load %arg1[%c76] : memref<108xf32, #tpu.memory_space<smem>>
    %c2_367 = arith.constant 2 : index
    %c1_368 = arith.constant 1 : index
    %c1_369 = arith.constant 1 : index
    %612 = vector.load %arg7[%c2_367, %c1_368, %c1_369] : memref<3x10x10xf32, #tpu.memory_space<vmem>>, vector<1x8x8xf32>
    %613 = vector.shape_cast %612 : vector<1x8x8xf32> to vector<8x8xf32>
    %614 = vector.broadcast %611 : f32 to vector<8x8xf32>
    %615 = arith.mulf %614, %613 : vector<8x8xf32>
    %616 = arith.addf %610, %615 : vector<8x8xf32>
    %c77 = arith.constant 77 : index
    %617 = memref.load %arg1[%c77] : memref<108xf32, #tpu.memory_space<smem>>
    %c2_370 = arith.constant 2 : index
    %c1_371 = arith.constant 1 : index
    %c2_372 = arith.constant 2 : index
    %618 = vector.load %arg7[%c2_370, %c1_371, %c2_372] : memref<3x10x10xf32, #tpu.memory_space<vmem>>, vector<1x8x8xf32>
    %619 = vector.shape_cast %618 : vector<1x8x8xf32> to vector<8x8xf32>
    %620 = vector.broadcast %617 : f32 to vector<8x8xf32>
    %621 = arith.mulf %620, %619 : vector<8x8xf32>
    %622 = arith.addf %616, %621 : vector<8x8xf32>
    %c78 = arith.constant 78 : index
    %623 = memref.load %arg1[%c78] : memref<108xf32, #tpu.memory_space<smem>>
    %c2_373 = arith.constant 2 : index
    %c2_374 = arith.constant 2 : index
    %c0_375 = arith.constant 0 : index
    %624 = vector.load %arg7[%c2_373, %c2_374, %c0_375] : memref<3x10x10xf32, #tpu.memory_space<vmem>>, vector<1x8x8xf32>
    %625 = vector.shape_cast %624 : vector<1x8x8xf32> to vector<8x8xf32>
    %626 = vector.broadcast %623 : f32 to vector<8x8xf32>
    %627 = arith.mulf %626, %625 : vector<8x8xf32>
    %628 = arith.addf %622, %627 : vector<8x8xf32>
    %c79 = arith.constant 79 : index
    %629 = memref.load %arg1[%c79] : memref<108xf32, #tpu.memory_space<smem>>
    %c2_376 = arith.constant 2 : index
    %c2_377 = arith.constant 2 : index
    %c1_378 = arith.constant 1 : index
    %630 = vector.load %arg7[%c2_376, %c2_377, %c1_378] : memref<3x10x10xf32, #tpu.memory_space<vmem>>, vector<1x8x8xf32>
    %631 = vector.shape_cast %630 : vector<1x8x8xf32> to vector<8x8xf32>
    %632 = vector.broadcast %629 : f32 to vector<8x8xf32>
    %633 = arith.mulf %632, %631 : vector<8x8xf32>
    %634 = arith.addf %628, %633 : vector<8x8xf32>
    %c80 = arith.constant 80 : index
    %635 = memref.load %arg1[%c80] : memref<108xf32, #tpu.memory_space<smem>>
    %c2_379 = arith.constant 2 : index
    %c2_380 = arith.constant 2 : index
    %c2_381 = arith.constant 2 : index
    %636 = vector.load %arg7[%c2_379, %c2_380, %c2_381] : memref<3x10x10xf32, #tpu.memory_space<vmem>>, vector<1x8x8xf32>
    %637 = vector.shape_cast %636 : vector<1x8x8xf32> to vector<8x8xf32>
    %638 = vector.broadcast %635 : f32 to vector<8x8xf32>
    %639 = arith.mulf %638, %637 : vector<8x8xf32>
    %640 = arith.addf %634, %639 : vector<8x8xf32>
    %cst_382 = arith.constant 0.000000e+00 : f32
    %641 = vector.broadcast %cst_382 : f32 to vector<8x8xf32>
    %642 = arith.maximumf %640, %641 : vector<8x8xf32>
    %c2_383 = arith.constant 2 : index
    %c1_384 = arith.constant 1 : index
    %c1_385 = arith.constant 1 : index
    %643 = vector.load %arg8[%c2_383, %c1_384, %c1_385] : memref<4x10x10xf32, #tpu.memory_space<vmem>>, vector<1x8x8xf32>
    %644 = vector.shape_cast %643 : vector<1x8x8xf32> to vector<8x8xf32>
    %645 = vector.shape_cast %642 : vector<8x8xf32> to vector<1x8x8xf32>
    tpu.vector_store %arg8[%c2_383, %c1_384, %c1_385], %645 {strides = array<i32>} : memref<4x10x10xf32, #tpu.memory_space<vmem>>, vector<1x8x8xf32>,
    %cst_386 = arith.constant 0.000000e+00 : f32
    %646 = vector.broadcast %cst_386 : f32 to vector<8x8xf32>
    %c3_387 = arith.constant 3 : index
    %647 = memref.load %arg2[%c3_387] : memref<4xf32, #tpu.memory_space<smem>>
    %648 = vector.broadcast %647 : f32 to vector<8x8xf32>
    %649 = arith.addf %646, %648 : vector<8x8xf32>
    %c81 = arith.constant 81 : index
    %650 = memref.load %arg1[%c81] : memref<108xf32, #tpu.memory_space<smem>>
    %c0_388 = arith.constant 0 : index
    %c0_389 = arith.constant 0 : index
    %c0_390 = arith.constant 0 : index
    %651 = vector.load %arg7[%c0_388, %c0_389, %c0_390] : memref<3x10x10xf32, #tpu.memory_space<vmem>>, vector<1x8x8xf32>
    %652 = vector.shape_cast %651 : vector<1x8x8xf32> to vector<8x8xf32>
    %653 = vector.broadcast %650 : f32 to vector<8x8xf32>
    %654 = arith.mulf %653, %652 : vector<8x8xf32>
    %655 = arith.addf %649, %654 : vector<8x8xf32>
    %c82 = arith.constant 82 : index
    %656 = memref.load %arg1[%c82] : memref<108xf32, #tpu.memory_space<smem>>
    %c0_391 = arith.constant 0 : index
    %c0_392 = arith.constant 0 : index
    %c1_393 = arith.constant 1 : index
    %657 = vector.load %arg7[%c0_391, %c0_392, %c1_393] : memref<3x10x10xf32, #tpu.memory_space<vmem>>, vector<1x8x8xf32>
    %658 = vector.shape_cast %657 : vector<1x8x8xf32> to vector<8x8xf32>
    %659 = vector.broadcast %656 : f32 to vector<8x8xf32>
    %660 = arith.mulf %659, %658 : vector<8x8xf32>
    %661 = arith.addf %655, %660 : vector<8x8xf32>
    %c83 = arith.constant 83 : index
    %662 = memref.load %arg1[%c83] : memref<108xf32, #tpu.memory_space<smem>>
    %c0_394 = arith.constant 0 : index
    %c0_395 = arith.constant 0 : index
    %c2_396 = arith.constant 2 : index
    %663 = vector.load %arg7[%c0_394, %c0_395, %c2_396] : memref<3x10x10xf32, #tpu.memory_space<vmem>>, vector<1x8x8xf32>
    %664 = vector.shape_cast %663 : vector<1x8x8xf32> to vector<8x8xf32>
    %665 = vector.broadcast %662 : f32 to vector<8x8xf32>
    %666 = arith.mulf %665, %664 : vector<8x8xf32>
    %667 = arith.addf %661, %666 : vector<8x8xf32>
    %c84 = arith.constant 84 : index
    %668 = memref.load %arg1[%c84] : memref<108xf32, #tpu.memory_space<smem>>
    %c0_397 = arith.constant 0 : index
    %c1_398 = arith.constant 1 : index
    %c0_399 = arith.constant 0 : index
    %669 = vector.load %arg7[%c0_397, %c1_398, %c0_399] : memref<3x10x10xf32, #tpu.memory_space<vmem>>, vector<1x8x8xf32>
    %670 = vector.shape_cast %669 : vector<1x8x8xf32> to vector<8x8xf32>
    %671 = vector.broadcast %668 : f32 to vector<8x8xf32>
    %672 = arith.mulf %671, %670 : vector<8x8xf32>
    %673 = arith.addf %667, %672 : vector<8x8xf32>
    %c85 = arith.constant 85 : index
    %674 = memref.load %arg1[%c85] : memref<108xf32, #tpu.memory_space<smem>>
    %c0_400 = arith.constant 0 : index
    %c1_401 = arith.constant 1 : index
    %c1_402 = arith.constant 1 : index
    %675 = vector.load %arg7[%c0_400, %c1_401, %c1_402] : memref<3x10x10xf32, #tpu.memory_space<vmem>>, vector<1x8x8xf32>
    %676 = vector.shape_cast %675 : vector<1x8x8xf32> to vector<8x8xf32>
    %677 = vector.broadcast %674 : f32 to vector<8x8xf32>
    %678 = arith.mulf %677, %676 : vector<8x8xf32>
    %679 = arith.addf %673, %678 : vector<8x8xf32>
    %c86 = arith.constant 86 : index
    %680 = memref.load %arg1[%c86] : memref<108xf32, #tpu.memory_space<smem>>
    %c0_403 = arith.constant 0 : index
    %c1_404 = arith.constant 1 : index
    %c2_405 = arith.constant 2 : index
    %681 = vector.load %arg7[%c0_403, %c1_404, %c2_405] : memref<3x10x10xf32, #tpu.memory_space<vmem>>, vector<1x8x8xf32>
    %682 = vector.shape_cast %681 : vector<1x8x8xf32> to vector<8x8xf32>
    %683 = vector.broadcast %680 : f32 to vector<8x8xf32>
    %684 = arith.mulf %683, %682 : vector<8x8xf32>
    %685 = arith.addf %679, %684 : vector<8x8xf32>
    %c87 = arith.constant 87 : index
    %686 = memref.load %arg1[%c87] : memref<108xf32, #tpu.memory_space<smem>>
    %c0_406 = arith.constant 0 : index
    %c2_407 = arith.constant 2 : index
    %c0_408 = arith.constant 0 : index
    %687 = vector.load %arg7[%c0_406, %c2_407, %c0_408] : memref<3x10x10xf32, #tpu.memory_space<vmem>>, vector<1x8x8xf32>
    %688 = vector.shape_cast %687 : vector<1x8x8xf32> to vector<8x8xf32>
    %689 = vector.broadcast %686 : f32 to vector<8x8xf32>
    %690 = arith.mulf %689, %688 : vector<8x8xf32>
    %691 = arith.addf %685, %690 : vector<8x8xf32>
    %c88 = arith.constant 88 : index
    %692 = memref.load %arg1[%c88] : memref<108xf32, #tpu.memory_space<smem>>
    %c0_409 = arith.constant 0 : index
    %c2_410 = arith.constant 2 : index
    %c1_411 = arith.constant 1 : index
    %693 = vector.load %arg7[%c0_409, %c2_410, %c1_411] : memref<3x10x10xf32, #tpu.memory_space<vmem>>, vector<1x8x8xf32>
    %694 = vector.shape_cast %693 : vector<1x8x8xf32> to vector<8x8xf32>
    %695 = vector.broadcast %692 : f32 to vector<8x8xf32>
    %696 = arith.mulf %695, %694 : vector<8x8xf32>
    %697 = arith.addf %691, %696 : vector<8x8xf32>
    %c89 = arith.constant 89 : index
    %698 = memref.load %arg1[%c89] : memref<108xf32, #tpu.memory_space<smem>>
    %c0_412 = arith.constant 0 : index
    %c2_413 = arith.constant 2 : index
    %c2_414 = arith.constant 2 : index
    %699 = vector.load %arg7[%c0_412, %c2_413, %c2_414] : memref<3x10x10xf32, #tpu.memory_space<vmem>>, vector<1x8x8xf32>
    %700 = vector.shape_cast %699 : vector<1x8x8xf32> to vector<8x8xf32>
    %701 = vector.broadcast %698 : f32 to vector<8x8xf32>
    %702 = arith.mulf %701, %700 : vector<8x8xf32>
    %703 = arith.addf %697, %702 : vector<8x8xf32>
    %c90 = arith.constant 90 : index
    %704 = memref.load %arg1[%c90] : memref<108xf32, #tpu.memory_space<smem>>
    %c1_415 = arith.constant 1 : index
    %c0_416 = arith.constant 0 : index
    %c0_417 = arith.constant 0 : index
    %705 = vector.load %arg7[%c1_415, %c0_416, %c0_417] : memref<3x10x10xf32, #tpu.memory_space<vmem>>, vector<1x8x8xf32>
    %706 = vector.shape_cast %705 : vector<1x8x8xf32> to vector<8x8xf32>
    %707 = vector.broadcast %704 : f32 to vector<8x8xf32>
    %708 = arith.mulf %707, %706 : vector<8x8xf32>
    %709 = arith.addf %703, %708 : vector<8x8xf32>
    %c91 = arith.constant 91 : index
    %710 = memref.load %arg1[%c91] : memref<108xf32, #tpu.memory_space<smem>>
    %c1_418 = arith.constant 1 : index
    %c0_419 = arith.constant 0 : index
    %c1_420 = arith.constant 1 : index
    %711 = vector.load %arg7[%c1_418, %c0_419, %c1_420] : memref<3x10x10xf32, #tpu.memory_space<vmem>>, vector<1x8x8xf32>
    %712 = vector.shape_cast %711 : vector<1x8x8xf32> to vector<8x8xf32>
    %713 = vector.broadcast %710 : f32 to vector<8x8xf32>
    %714 = arith.mulf %713, %712 : vector<8x8xf32>
    %715 = arith.addf %709, %714 : vector<8x8xf32>
    %c92 = arith.constant 92 : index
    %716 = memref.load %arg1[%c92] : memref<108xf32, #tpu.memory_space<smem>>
    %c1_421 = arith.constant 1 : index
    %c0_422 = arith.constant 0 : index
    %c2_423 = arith.constant 2 : index
    %717 = vector.load %arg7[%c1_421, %c0_422, %c2_423] : memref<3x10x10xf32, #tpu.memory_space<vmem>>, vector<1x8x8xf32>
    %718 = vector.shape_cast %717 : vector<1x8x8xf32> to vector<8x8xf32>
    %719 = vector.broadcast %716 : f32 to vector<8x8xf32>
    %720 = arith.mulf %719, %718 : vector<8x8xf32>
    %721 = arith.addf %715, %720 : vector<8x8xf32>
    %c93 = arith.constant 93 : index
    %722 = memref.load %arg1[%c93] : memref<108xf32, #tpu.memory_space<smem>>
    %c1_424 = arith.constant 1 : index
    %c1_425 = arith.constant 1 : index
    %c0_426 = arith.constant 0 : index
    %723 = vector.load %arg7[%c1_424, %c1_425, %c0_426] : memref<3x10x10xf32, #tpu.memory_space<vmem>>, vector<1x8x8xf32>
    %724 = vector.shape_cast %723 : vector<1x8x8xf32> to vector<8x8xf32>
    %725 = vector.broadcast %722 : f32 to vector<8x8xf32>
    %726 = arith.mulf %725, %724 : vector<8x8xf32>
    %727 = arith.addf %721, %726 : vector<8x8xf32>
    %c94 = arith.constant 94 : index
    %728 = memref.load %arg1[%c94] : memref<108xf32, #tpu.memory_space<smem>>
    %c1_427 = arith.constant 1 : index
    %c1_428 = arith.constant 1 : index
    %c1_429 = arith.constant 1 : index
    %729 = vector.load %arg7[%c1_427, %c1_428, %c1_429] : memref<3x10x10xf32, #tpu.memory_space<vmem>>, vector<1x8x8xf32>
    %730 = vector.shape_cast %729 : vector<1x8x8xf32> to vector<8x8xf32>
    %731 = vector.broadcast %728 : f32 to vector<8x8xf32>
    %732 = arith.mulf %731, %730 : vector<8x8xf32>
    %733 = arith.addf %727, %732 : vector<8x8xf32>
    %c95 = arith.constant 95 : index
    %734 = memref.load %arg1[%c95] : memref<108xf32, #tpu.memory_space<smem>>
    %c1_430 = arith.constant 1 : index
    %c1_431 = arith.constant 1 : index
    %c2_432 = arith.constant 2 : index
    %735 = vector.load %arg7[%c1_430, %c1_431, %c2_432] : memref<3x10x10xf32, #tpu.memory_space<vmem>>, vector<1x8x8xf32>
    %736 = vector.shape_cast %735 : vector<1x8x8xf32> to vector<8x8xf32>
    %737 = vector.broadcast %734 : f32 to vector<8x8xf32>
    %738 = arith.mulf %737, %736 : vector<8x8xf32>
    %739 = arith.addf %733, %738 : vector<8x8xf32>
    %c96 = arith.constant 96 : index
    %740 = memref.load %arg1[%c96] : memref<108xf32, #tpu.memory_space<smem>>
    %c1_433 = arith.constant 1 : index
    %c2_434 = arith.constant 2 : index
    %c0_435 = arith.constant 0 : index
    %741 = vector.load %arg7[%c1_433, %c2_434, %c0_435] : memref<3x10x10xf32, #tpu.memory_space<vmem>>, vector<1x8x8xf32>
    %742 = vector.shape_cast %741 : vector<1x8x8xf32> to vector<8x8xf32>
    %743 = vector.broadcast %740 : f32 to vector<8x8xf32>
    %744 = arith.mulf %743, %742 : vector<8x8xf32>
    %745 = arith.addf %739, %744 : vector<8x8xf32>
    %c97 = arith.constant 97 : index
    %746 = memref.load %arg1[%c97] : memref<108xf32, #tpu.memory_space<smem>>
    %c1_436 = arith.constant 1 : index
    %c2_437 = arith.constant 2 : index
    %c1_438 = arith.constant 1 : index
    %747 = vector.load %arg7[%c1_436, %c2_437, %c1_438] : memref<3x10x10xf32, #tpu.memory_space<vmem>>, vector<1x8x8xf32>
    %748 = vector.shape_cast %747 : vector<1x8x8xf32> to vector<8x8xf32>
    %749 = vector.broadcast %746 : f32 to vector<8x8xf32>
    %750 = arith.mulf %749, %748 : vector<8x8xf32>
    %751 = arith.addf %745, %750 : vector<8x8xf32>
    %c98 = arith.constant 98 : index
    %752 = memref.load %arg1[%c98] : memref<108xf32, #tpu.memory_space<smem>>
    %c1_439 = arith.constant 1 : index
    %c2_440 = arith.constant 2 : index
    %c2_441 = arith.constant 2 : index
    %753 = vector.load %arg7[%c1_439, %c2_440, %c2_441] : memref<3x10x10xf32, #tpu.memory_space<vmem>>, vector<1x8x8xf32>
    %754 = vector.shape_cast %753 : vector<1x8x8xf32> to vector<8x8xf32>
    %755 = vector.broadcast %752 : f32 to vector<8x8xf32>
    %756 = arith.mulf %755, %754 : vector<8x8xf32>
    %757 = arith.addf %751, %756 : vector<8x8xf32>
    %c99 = arith.constant 99 : index
    %758 = memref.load %arg1[%c99] : memref<108xf32, #tpu.memory_space<smem>>
    %c2_442 = arith.constant 2 : index
    %c0_443 = arith.constant 0 : index
    %c0_444 = arith.constant 0 : index
    %759 = vector.load %arg7[%c2_442, %c0_443, %c0_444] : memref<3x10x10xf32, #tpu.memory_space<vmem>>, vector<1x8x8xf32>
    %760 = vector.shape_cast %759 : vector<1x8x8xf32> to vector<8x8xf32>
    %761 = vector.broadcast %758 : f32 to vector<8x8xf32>
    %762 = arith.mulf %761, %760 : vector<8x8xf32>
    %763 = arith.addf %757, %762 : vector<8x8xf32>
    %c100 = arith.constant 100 : index
    %764 = memref.load %arg1[%c100] : memref<108xf32, #tpu.memory_space<smem>>
    %c2_445 = arith.constant 2 : index
    %c0_446 = arith.constant 0 : index
    %c1_447 = arith.constant 1 : index
    %765 = vector.load %arg7[%c2_445, %c0_446, %c1_447] : memref<3x10x10xf32, #tpu.memory_space<vmem>>, vector<1x8x8xf32>
    %766 = vector.shape_cast %765 : vector<1x8x8xf32> to vector<8x8xf32>
    %767 = vector.broadcast %764 : f32 to vector<8x8xf32>
    %768 = arith.mulf %767, %766 : vector<8x8xf32>
    %769 = arith.addf %763, %768 : vector<8x8xf32>
    %c101 = arith.constant 101 : index
    %770 = memref.load %arg1[%c101] : memref<108xf32, #tpu.memory_space<smem>>
    %c2_448 = arith.constant 2 : index
    %c0_449 = arith.constant 0 : index
    %c2_450 = arith.constant 2 : index
    %771 = vector.load %arg7[%c2_448, %c0_449, %c2_450] : memref<3x10x10xf32, #tpu.memory_space<vmem>>, vector<1x8x8xf32>
    %772 = vector.shape_cast %771 : vector<1x8x8xf32> to vector<8x8xf32>
    %773 = vector.broadcast %770 : f32 to vector<8x8xf32>
    %774 = arith.mulf %773, %772 : vector<8x8xf32>
    %775 = arith.addf %769, %774 : vector<8x8xf32>
    %c102 = arith.constant 102 : index
    %776 = memref.load %arg1[%c102] : memref<108xf32, #tpu.memory_space<smem>>
    %c2_451 = arith.constant 2 : index
    %c1_452 = arith.constant 1 : index
    %c0_453 = arith.constant 0 : index
    %777 = vector.load %arg7[%c2_451, %c1_452, %c0_453] : memref<3x10x10xf32, #tpu.memory_space<vmem>>, vector<1x8x8xf32>
    %778 = vector.shape_cast %777 : vector<1x8x8xf32> to vector<8x8xf32>
    %779 = vector.broadcast %776 : f32 to vector<8x8xf32>
    %780 = arith.mulf %779, %778 : vector<8x8xf32>
    %781 = arith.addf %775, %780 : vector<8x8xf32>
    %c103 = arith.constant 103 : index
    %782 = memref.load %arg1[%c103] : memref<108xf32, #tpu.memory_space<smem>>
    %c2_454 = arith.constant 2 : index
    %c1_455 = arith.constant 1 : index
    %c1_456 = arith.constant 1 : index
    %783 = vector.load %arg7[%c2_454, %c1_455, %c1_456] : memref<3x10x10xf32, #tpu.memory_space<vmem>>, vector<1x8x8xf32>
    %784 = vector.shape_cast %783 : vector<1x8x8xf32> to vector<8x8xf32>
    %785 = vector.broadcast %782 : f32 to vector<8x8xf32>
    %786 = arith.mulf %785, %784 : vector<8x8xf32>
    %787 = arith.addf %781, %786 : vector<8x8xf32>
    %c104 = arith.constant 104 : index
    %788 = memref.load %arg1[%c104] : memref<108xf32, #tpu.memory_space<smem>>
    %c2_457 = arith.constant 2 : index
    %c1_458 = arith.constant 1 : index
    %c2_459 = arith.constant 2 : index
    %789 = vector.load %arg7[%c2_457, %c1_458, %c2_459] : memref<3x10x10xf32, #tpu.memory_space<vmem>>, vector<1x8x8xf32>
    %790 = vector.shape_cast %789 : vector<1x8x8xf32> to vector<8x8xf32>
    %791 = vector.broadcast %788 : f32 to vector<8x8xf32>
    %792 = arith.mulf %791, %790 : vector<8x8xf32>
    %793 = arith.addf %787, %792 : vector<8x8xf32>
    %c105 = arith.constant 105 : index
    %794 = memref.load %arg1[%c105] : memref<108xf32, #tpu.memory_space<smem>>
    %c2_460 = arith.constant 2 : index
    %c2_461 = arith.constant 2 : index
    %c0_462 = arith.constant 0 : index
    %795 = vector.load %arg7[%c2_460, %c2_461, %c0_462] : memref<3x10x10xf32, #tpu.memory_space<vmem>>, vector<1x8x8xf32>
    %796 = vector.shape_cast %795 : vector<1x8x8xf32> to vector<8x8xf32>
    %797 = vector.broadcast %794 : f32 to vector<8x8xf32>
    %798 = arith.mulf %797, %796 : vector<8x8xf32>
    %799 = arith.addf %793, %798 : vector<8x8xf32>
    %c106 = arith.constant 106 : index
    %800 = memref.load %arg1[%c106] : memref<108xf32, #tpu.memory_space<smem>>
    %c2_463 = arith.constant 2 : index
    %c2_464 = arith.constant 2 : index
    %c1_465 = arith.constant 1 : index
    %801 = vector.load %arg7[%c2_463, %c2_464, %c1_465] : memref<3x10x10xf32, #tpu.memory_space<vmem>>, vector<1x8x8xf32>
    %802 = vector.shape_cast %801 : vector<1x8x8xf32> to vector<8x8xf32>
    %803 = vector.broadcast %800 : f32 to vector<8x8xf32>
    %804 = arith.mulf %803, %802 : vector<8x8xf32>
    %805 = arith.addf %799, %804 : vector<8x8xf32>
    %c107 = arith.constant 107 : index
    %806 = memref.load %arg1[%c107] : memref<108xf32, #tpu.memory_space<smem>>
    %c2_466 = arith.constant 2 : index
    %c2_467 = arith.constant 2 : index
    %c2_468 = arith.constant 2 : index
    %807 = vector.load %arg7[%c2_466, %c2_467, %c2_468] : memref<3x10x10xf32, #tpu.memory_space<vmem>>, vector<1x8x8xf32>
    %808 = vector.shape_cast %807 : vector<1x8x8xf32> to vector<8x8xf32>
    %809 = vector.broadcast %806 : f32 to vector<8x8xf32>
    %810 = arith.mulf %809, %808 : vector<8x8xf32>
    %811 = arith.addf %805, %810 : vector<8x8xf32>
    %cst_469 = arith.constant 0.000000e+00 : f32
    %812 = vector.broadcast %cst_469 : f32 to vector<8x8xf32>
    %813 = arith.maximumf %811, %812 : vector<8x8xf32>
    %c3_470 = arith.constant 3 : index
    %c1_471 = arith.constant 1 : index
    %c1_472 = arith.constant 1 : index
    %814 = vector.load %arg8[%c3_470, %c1_471, %c1_472] : memref<4x10x10xf32, #tpu.memory_space<vmem>>, vector<1x8x8xf32>
    %815 = vector.shape_cast %814 : vector<1x8x8xf32> to vector<8x8xf32>
    %816 = vector.shape_cast %813 : vector<8x8xf32> to vector<1x8x8xf32>
    tpu.vector_store %arg8[%c3_470, %c1_471, %c1_472], %816 {strides = array<i32>} : memref<4x10x10xf32, #tpu.memory_space<vmem>>, vector<1x8x8xf32>,
    %cst_473 = arith.constant 0.000000e+00 : f32
    %817 = vector.broadcast %cst_473 : f32 to vector<8x8xf32>
    %c0_474 = arith.constant 0 : index
    %818 = memref.load %arg4[%c0_474] : memref<4xf32, #tpu.memory_space<smem>>
    %819 = vector.broadcast %818 : f32 to vector<8x8xf32>
    %820 = arith.addf %817, %819 : vector<8x8xf32>
    %c0_475 = arith.constant 0 : index
    %821 = memref.load %arg3[%c0_475] : memref<144xf32, #tpu.memory_space<smem>>
    %c0_476 = arith.constant 0 : index
    %c0_477 = arith.constant 0 : index
    %c0_478 = arith.constant 0 : index
    %822 = vector.load %arg8[%c0_476, %c0_477, %c0_478] : memref<4x10x10xf32, #tpu.memory_space<vmem>>, vector<1x8x8xf32>
    %823 = vector.shape_cast %822 : vector<1x8x8xf32> to vector<8x8xf32>
    %824 = vector.broadcast %821 : f32 to vector<8x8xf32>
    %825 = arith.mulf %824, %823 : vector<8x8xf32>
    %826 = arith.addf %820, %825 : vector<8x8xf32>
    %c1_479 = arith.constant 1 : index
    %827 = memref.load %arg3[%c1_479] : memref<144xf32, #tpu.memory_space<smem>>
    %c0_480 = arith.constant 0 : index
    %c0_481 = arith.constant 0 : index
    %c1_482 = arith.constant 1 : index
    %828 = vector.load %arg8[%c0_480, %c0_481, %c1_482] : memref<4x10x10xf32, #tpu.memory_space<vmem>>, vector<1x8x8xf32>
    %829 = vector.shape_cast %828 : vector<1x8x8xf32> to vector<8x8xf32>
    %830 = vector.broadcast %827 : f32 to vector<8x8xf32>
    %831 = arith.mulf %830, %829 : vector<8x8xf32>
    %832 = arith.addf %826, %831 : vector<8x8xf32>
    %c2_483 = arith.constant 2 : index
    %833 = memref.load %arg3[%c2_483] : memref<144xf32, #tpu.memory_space<smem>>
    %c0_484 = arith.constant 0 : index
    %c0_485 = arith.constant 0 : index
    %c2_486 = arith.constant 2 : index
    %834 = vector.load %arg8[%c0_484, %c0_485, %c2_486] : memref<4x10x10xf32, #tpu.memory_space<vmem>>, vector<1x8x8xf32>
    %835 = vector.shape_cast %834 : vector<1x8x8xf32> to vector<8x8xf32>
    %836 = vector.broadcast %833 : f32 to vector<8x8xf32>
    %837 = arith.mulf %836, %835 : vector<8x8xf32>
    %838 = arith.addf %832, %837 : vector<8x8xf32>
    %c3_487 = arith.constant 3 : index
    %839 = memref.load %arg3[%c3_487] : memref<144xf32, #tpu.memory_space<smem>>
    %c0_488 = arith.constant 0 : index
    %c1_489 = arith.constant 1 : index
    %c0_490 = arith.constant 0 : index
    %840 = vector.load %arg8[%c0_488, %c1_489, %c0_490] : memref<4x10x10xf32, #tpu.memory_space<vmem>>, vector<1x8x8xf32>
    %841 = vector.shape_cast %840 : vector<1x8x8xf32> to vector<8x8xf32>
    %842 = vector.broadcast %839 : f32 to vector<8x8xf32>
    %843 = arith.mulf %842, %841 : vector<8x8xf32>
    %844 = arith.addf %838, %843 : vector<8x8xf32>
    %c4_491 = arith.constant 4 : index
    %845 = memref.load %arg3[%c4_491] : memref<144xf32, #tpu.memory_space<smem>>
    %c0_492 = arith.constant 0 : index
    %c1_493 = arith.constant 1 : index
    %c1_494 = arith.constant 1 : index
    %846 = vector.load %arg8[%c0_492, %c1_493, %c1_494] : memref<4x10x10xf32, #tpu.memory_space<vmem>>, vector<1x8x8xf32>
    %847 = vector.shape_cast %846 : vector<1x8x8xf32> to vector<8x8xf32>
    %848 = vector.broadcast %845 : f32 to vector<8x8xf32>
    %849 = arith.mulf %848, %847 : vector<8x8xf32>
    %850 = arith.addf %844, %849 : vector<8x8xf32>
    %c5_495 = arith.constant 5 : index
    %851 = memref.load %arg3[%c5_495] : memref<144xf32, #tpu.memory_space<smem>>
    %c0_496 = arith.constant 0 : index
    %c1_497 = arith.constant 1 : index
    %c2_498 = arith.constant 2 : index
    %852 = vector.load %arg8[%c0_496, %c1_497, %c2_498] : memref<4x10x10xf32, #tpu.memory_space<vmem>>, vector<1x8x8xf32>
    %853 = vector.shape_cast %852 : vector<1x8x8xf32> to vector<8x8xf32>
    %854 = vector.broadcast %851 : f32 to vector<8x8xf32>
    %855 = arith.mulf %854, %853 : vector<8x8xf32>
    %856 = arith.addf %850, %855 : vector<8x8xf32>
    %c6_499 = arith.constant 6 : index
    %857 = memref.load %arg3[%c6_499] : memref<144xf32, #tpu.memory_space<smem>>
    %c0_500 = arith.constant 0 : index
    %c2_501 = arith.constant 2 : index
    %c0_502 = arith.constant 0 : index
    %858 = vector.load %arg8[%c0_500, %c2_501, %c0_502] : memref<4x10x10xf32, #tpu.memory_space<vmem>>, vector<1x8x8xf32>
    %859 = vector.shape_cast %858 : vector<1x8x8xf32> to vector<8x8xf32>
    %860 = vector.broadcast %857 : f32 to vector<8x8xf32>
    %861 = arith.mulf %860, %859 : vector<8x8xf32>
    %862 = arith.addf %856, %861 : vector<8x8xf32>
    %c7_503 = arith.constant 7 : index
    %863 = memref.load %arg3[%c7_503] : memref<144xf32, #tpu.memory_space<smem>>
    %c0_504 = arith.constant 0 : index
    %c2_505 = arith.constant 2 : index
    %c1_506 = arith.constant 1 : index
    %864 = vector.load %arg8[%c0_504, %c2_505, %c1_506] : memref<4x10x10xf32, #tpu.memory_space<vmem>>, vector<1x8x8xf32>
    %865 = vector.shape_cast %864 : vector<1x8x8xf32> to vector<8x8xf32>
    %866 = vector.broadcast %863 : f32 to vector<8x8xf32>
    %867 = arith.mulf %866, %865 : vector<8x8xf32>
    %868 = arith.addf %862, %867 : vector<8x8xf32>
    %c8_507 = arith.constant 8 : index
    %869 = memref.load %arg3[%c8_507] : memref<144xf32, #tpu.memory_space<smem>>
    %c0_508 = arith.constant 0 : index
    %c2_509 = arith.constant 2 : index
    %c2_510 = arith.constant 2 : index
    %870 = vector.load %arg8[%c0_508, %c2_509, %c2_510] : memref<4x10x10xf32, #tpu.memory_space<vmem>>, vector<1x8x8xf32>
    %871 = vector.shape_cast %870 : vector<1x8x8xf32> to vector<8x8xf32>
    %872 = vector.broadcast %869 : f32 to vector<8x8xf32>
    %873 = arith.mulf %872, %871 : vector<8x8xf32>
    %874 = arith.addf %868, %873 : vector<8x8xf32>
    %c9_511 = arith.constant 9 : index
    %875 = memref.load %arg3[%c9_511] : memref<144xf32, #tpu.memory_space<smem>>
    %c1_512 = arith.constant 1 : index
    %c0_513 = arith.constant 0 : index
    %c0_514 = arith.constant 0 : index
    %876 = vector.load %arg8[%c1_512, %c0_513, %c0_514] : memref<4x10x10xf32, #tpu.memory_space<vmem>>, vector<1x8x8xf32>
    %877 = vector.shape_cast %876 : vector<1x8x8xf32> to vector<8x8xf32>
    %878 = vector.broadcast %875 : f32 to vector<8x8xf32>
    %879 = arith.mulf %878, %877 : vector<8x8xf32>
    %880 = arith.addf %874, %879 : vector<8x8xf32>
    %c10_515 = arith.constant 10 : index
    %881 = memref.load %arg3[%c10_515] : memref<144xf32, #tpu.memory_space<smem>>
    %c1_516 = arith.constant 1 : index
    %c0_517 = arith.constant 0 : index
    %c1_518 = arith.constant 1 : index
    %882 = vector.load %arg8[%c1_516, %c0_517, %c1_518] : memref<4x10x10xf32, #tpu.memory_space<vmem>>, vector<1x8x8xf32>
    %883 = vector.shape_cast %882 : vector<1x8x8xf32> to vector<8x8xf32>
    %884 = vector.broadcast %881 : f32 to vector<8x8xf32>
    %885 = arith.mulf %884, %883 : vector<8x8xf32>
    %886 = arith.addf %880, %885 : vector<8x8xf32>
    %c11_519 = arith.constant 11 : index
    %887 = memref.load %arg3[%c11_519] : memref<144xf32, #tpu.memory_space<smem>>
    %c1_520 = arith.constant 1 : index
    %c0_521 = arith.constant 0 : index
    %c2_522 = arith.constant 2 : index
    %888 = vector.load %arg8[%c1_520, %c0_521, %c2_522] : memref<4x10x10xf32, #tpu.memory_space<vmem>>, vector<1x8x8xf32>
    %889 = vector.shape_cast %888 : vector<1x8x8xf32> to vector<8x8xf32>
    %890 = vector.broadcast %887 : f32 to vector<8x8xf32>
    %891 = arith.mulf %890, %889 : vector<8x8xf32>
    %892 = arith.addf %886, %891 : vector<8x8xf32>
    %c12_523 = arith.constant 12 : index
    %893 = memref.load %arg3[%c12_523] : memref<144xf32, #tpu.memory_space<smem>>
    %c1_524 = arith.constant 1 : index
    %c1_525 = arith.constant 1 : index
    %c0_526 = arith.constant 0 : index
    %894 = vector.load %arg8[%c1_524, %c1_525, %c0_526] : memref<4x10x10xf32, #tpu.memory_space<vmem>>, vector<1x8x8xf32>
    %895 = vector.shape_cast %894 : vector<1x8x8xf32> to vector<8x8xf32>
    %896 = vector.broadcast %893 : f32 to vector<8x8xf32>
    %897 = arith.mulf %896, %895 : vector<8x8xf32>
    %898 = arith.addf %892, %897 : vector<8x8xf32>
    %c13_527 = arith.constant 13 : index
    %899 = memref.load %arg3[%c13_527] : memref<144xf32, #tpu.memory_space<smem>>
    %c1_528 = arith.constant 1 : index
    %c1_529 = arith.constant 1 : index
    %c1_530 = arith.constant 1 : index
    %900 = vector.load %arg8[%c1_528, %c1_529, %c1_530] : memref<4x10x10xf32, #tpu.memory_space<vmem>>, vector<1x8x8xf32>
    %901 = vector.shape_cast %900 : vector<1x8x8xf32> to vector<8x8xf32>
    %902 = vector.broadcast %899 : f32 to vector<8x8xf32>
    %903 = arith.mulf %902, %901 : vector<8x8xf32>
    %904 = arith.addf %898, %903 : vector<8x8xf32>
    %c14_531 = arith.constant 14 : index
    %905 = memref.load %arg3[%c14_531] : memref<144xf32, #tpu.memory_space<smem>>
    %c1_532 = arith.constant 1 : index
    %c1_533 = arith.constant 1 : index
    %c2_534 = arith.constant 2 : index
    %906 = vector.load %arg8[%c1_532, %c1_533, %c2_534] : memref<4x10x10xf32, #tpu.memory_space<vmem>>, vector<1x8x8xf32>
    %907 = vector.shape_cast %906 : vector<1x8x8xf32> to vector<8x8xf32>
    %908 = vector.broadcast %905 : f32 to vector<8x8xf32>
    %909 = arith.mulf %908, %907 : vector<8x8xf32>
    %910 = arith.addf %904, %909 : vector<8x8xf32>
    %c15_535 = arith.constant 15 : index
    %911 = memref.load %arg3[%c15_535] : memref<144xf32, #tpu.memory_space<smem>>
    %c1_536 = arith.constant 1 : index
    %c2_537 = arith.constant 2 : index
    %c0_538 = arith.constant 0 : index
    %912 = vector.load %arg8[%c1_536, %c2_537, %c0_538] : memref<4x10x10xf32, #tpu.memory_space<vmem>>, vector<1x8x8xf32>
    %913 = vector.shape_cast %912 : vector<1x8x8xf32> to vector<8x8xf32>
    %914 = vector.broadcast %911 : f32 to vector<8x8xf32>
    %915 = arith.mulf %914, %913 : vector<8x8xf32>
    %916 = arith.addf %910, %915 : vector<8x8xf32>
    %c16_539 = arith.constant 16 : index
    %917 = memref.load %arg3[%c16_539] : memref<144xf32, #tpu.memory_space<smem>>
    %c1_540 = arith.constant 1 : index
    %c2_541 = arith.constant 2 : index
    %c1_542 = arith.constant 1 : index
    %918 = vector.load %arg8[%c1_540, %c2_541, %c1_542] : memref<4x10x10xf32, #tpu.memory_space<vmem>>, vector<1x8x8xf32>
    %919 = vector.shape_cast %918 : vector<1x8x8xf32> to vector<8x8xf32>
    %920 = vector.broadcast %917 : f32 to vector<8x8xf32>
    %921 = arith.mulf %920, %919 : vector<8x8xf32>
    %922 = arith.addf %916, %921 : vector<8x8xf32>
    %c17_543 = arith.constant 17 : index
    %923 = memref.load %arg3[%c17_543] : memref<144xf32, #tpu.memory_space<smem>>
    %c1_544 = arith.constant 1 : index
    %c2_545 = arith.constant 2 : index
    %c2_546 = arith.constant 2 : index
    %924 = vector.load %arg8[%c1_544, %c2_545, %c2_546] : memref<4x10x10xf32, #tpu.memory_space<vmem>>, vector<1x8x8xf32>
    %925 = vector.shape_cast %924 : vector<1x8x8xf32> to vector<8x8xf32>
    %926 = vector.broadcast %923 : f32 to vector<8x8xf32>
    %927 = arith.mulf %926, %925 : vector<8x8xf32>
    %928 = arith.addf %922, %927 : vector<8x8xf32>
    %c18_547 = arith.constant 18 : index
    %929 = memref.load %arg3[%c18_547] : memref<144xf32, #tpu.memory_space<smem>>
    %c2_548 = arith.constant 2 : index
    %c0_549 = arith.constant 0 : index
    %c0_550 = arith.constant 0 : index
    %930 = vector.load %arg8[%c2_548, %c0_549, %c0_550] : memref<4x10x10xf32, #tpu.memory_space<vmem>>, vector<1x8x8xf32>
    %931 = vector.shape_cast %930 : vector<1x8x8xf32> to vector<8x8xf32>
    %932 = vector.broadcast %929 : f32 to vector<8x8xf32>
    %933 = arith.mulf %932, %931 : vector<8x8xf32>
    %934 = arith.addf %928, %933 : vector<8x8xf32>
    %c19_551 = arith.constant 19 : index
    %935 = memref.load %arg3[%c19_551] : memref<144xf32, #tpu.memory_space<smem>>
    %c2_552 = arith.constant 2 : index
    %c0_553 = arith.constant 0 : index
    %c1_554 = arith.constant 1 : index
    %936 = vector.load %arg8[%c2_552, %c0_553, %c1_554] : memref<4x10x10xf32, #tpu.memory_space<vmem>>, vector<1x8x8xf32>
    %937 = vector.shape_cast %936 : vector<1x8x8xf32> to vector<8x8xf32>
    %938 = vector.broadcast %935 : f32 to vector<8x8xf32>
    %939 = arith.mulf %938, %937 : vector<8x8xf32>
    %940 = arith.addf %934, %939 : vector<8x8xf32>
    %c20_555 = arith.constant 20 : index
    %941 = memref.load %arg3[%c20_555] : memref<144xf32, #tpu.memory_space<smem>>
    %c2_556 = arith.constant 2 : index
    %c0_557 = arith.constant 0 : index
    %c2_558 = arith.constant 2 : index
    %942 = vector.load %arg8[%c2_556, %c0_557, %c2_558] : memref<4x10x10xf32, #tpu.memory_space<vmem>>, vector<1x8x8xf32>
    %943 = vector.shape_cast %942 : vector<1x8x8xf32> to vector<8x8xf32>
    %944 = vector.broadcast %941 : f32 to vector<8x8xf32>
    %945 = arith.mulf %944, %943 : vector<8x8xf32>
    %946 = arith.addf %940, %945 : vector<8x8xf32>
    %c21_559 = arith.constant 21 : index
    %947 = memref.load %arg3[%c21_559] : memref<144xf32, #tpu.memory_space<smem>>
    %c2_560 = arith.constant 2 : index
    %c1_561 = arith.constant 1 : index
    %c0_562 = arith.constant 0 : index
    %948 = vector.load %arg8[%c2_560, %c1_561, %c0_562] : memref<4x10x10xf32, #tpu.memory_space<vmem>>, vector<1x8x8xf32>
    %949 = vector.shape_cast %948 : vector<1x8x8xf32> to vector<8x8xf32>
    %950 = vector.broadcast %947 : f32 to vector<8x8xf32>
    %951 = arith.mulf %950, %949 : vector<8x8xf32>
    %952 = arith.addf %946, %951 : vector<8x8xf32>
    %c22_563 = arith.constant 22 : index
    %953 = memref.load %arg3[%c22_563] : memref<144xf32, #tpu.memory_space<smem>>
    %c2_564 = arith.constant 2 : index
    %c1_565 = arith.constant 1 : index
    %c1_566 = arith.constant 1 : index
    %954 = vector.load %arg8[%c2_564, %c1_565, %c1_566] : memref<4x10x10xf32, #tpu.memory_space<vmem>>, vector<1x8x8xf32>
    %955 = vector.shape_cast %954 : vector<1x8x8xf32> to vector<8x8xf32>
    %956 = vector.broadcast %953 : f32 to vector<8x8xf32>
    %957 = arith.mulf %956, %955 : vector<8x8xf32>
    %958 = arith.addf %952, %957 : vector<8x8xf32>
    %c23_567 = arith.constant 23 : index
    %959 = memref.load %arg3[%c23_567] : memref<144xf32, #tpu.memory_space<smem>>
    %c2_568 = arith.constant 2 : index
    %c1_569 = arith.constant 1 : index
    %c2_570 = arith.constant 2 : index
    %960 = vector.load %arg8[%c2_568, %c1_569, %c2_570] : memref<4x10x10xf32, #tpu.memory_space<vmem>>, vector<1x8x8xf32>
    %961 = vector.shape_cast %960 : vector<1x8x8xf32> to vector<8x8xf32>
    %962 = vector.broadcast %959 : f32 to vector<8x8xf32>
    %963 = arith.mulf %962, %961 : vector<8x8xf32>
    %964 = arith.addf %958, %963 : vector<8x8xf32>
    %c24_571 = arith.constant 24 : index
    %965 = memref.load %arg3[%c24_571] : memref<144xf32, #tpu.memory_space<smem>>
    %c2_572 = arith.constant 2 : index
    %c2_573 = arith.constant 2 : index
    %c0_574 = arith.constant 0 : index
    %966 = vector.load %arg8[%c2_572, %c2_573, %c0_574] : memref<4x10x10xf32, #tpu.memory_space<vmem>>, vector<1x8x8xf32>
    %967 = vector.shape_cast %966 : vector<1x8x8xf32> to vector<8x8xf32>
    %968 = vector.broadcast %965 : f32 to vector<8x8xf32>
    %969 = arith.mulf %968, %967 : vector<8x8xf32>
    %970 = arith.addf %964, %969 : vector<8x8xf32>
    %c25_575 = arith.constant 25 : index
    %971 = memref.load %arg3[%c25_575] : memref<144xf32, #tpu.memory_space<smem>>
    %c2_576 = arith.constant 2 : index
    %c2_577 = arith.constant 2 : index
    %c1_578 = arith.constant 1 : index
    %972 = vector.load %arg8[%c2_576, %c2_577, %c1_578] : memref<4x10x10xf32, #tpu.memory_space<vmem>>, vector<1x8x8xf32>
    %973 = vector.shape_cast %972 : vector<1x8x8xf32> to vector<8x8xf32>
    %974 = vector.broadcast %971 : f32 to vector<8x8xf32>
    %975 = arith.mulf %974, %973 : vector<8x8xf32>
    %976 = arith.addf %970, %975 : vector<8x8xf32>
    %c26_579 = arith.constant 26 : index
    %977 = memref.load %arg3[%c26_579] : memref<144xf32, #tpu.memory_space<smem>>
    %c2_580 = arith.constant 2 : index
    %c2_581 = arith.constant 2 : index
    %c2_582 = arith.constant 2 : index
    %978 = vector.load %arg8[%c2_580, %c2_581, %c2_582] : memref<4x10x10xf32, #tpu.memory_space<vmem>>, vector<1x8x8xf32>
    %979 = vector.shape_cast %978 : vector<1x8x8xf32> to vector<8x8xf32>
    %980 = vector.broadcast %977 : f32 to vector<8x8xf32>
    %981 = arith.mulf %980, %979 : vector<8x8xf32>
    %982 = arith.addf %976, %981 : vector<8x8xf32>
    %c27_583 = arith.constant 27 : index
    %983 = memref.load %arg3[%c27_583] : memref<144xf32, #tpu.memory_space<smem>>
    %c3_584 = arith.constant 3 : index
    %c0_585 = arith.constant 0 : index
    %c0_586 = arith.constant 0 : index
    %984 = vector.load %arg8[%c3_584, %c0_585, %c0_586] : memref<4x10x10xf32, #tpu.memory_space<vmem>>, vector<1x8x8xf32>
    %985 = vector.shape_cast %984 : vector<1x8x8xf32> to vector<8x8xf32>
    %986 = vector.broadcast %983 : f32 to vector<8x8xf32>
    %987 = arith.mulf %986, %985 : vector<8x8xf32>
    %988 = arith.addf %982, %987 : vector<8x8xf32>
    %c28_587 = arith.constant 28 : index
    %989 = memref.load %arg3[%c28_587] : memref<144xf32, #tpu.memory_space<smem>>
    %c3_588 = arith.constant 3 : index
    %c0_589 = arith.constant 0 : index
    %c1_590 = arith.constant 1 : index
    %990 = vector.load %arg8[%c3_588, %c0_589, %c1_590] : memref<4x10x10xf32, #tpu.memory_space<vmem>>, vector<1x8x8xf32>
    %991 = vector.shape_cast %990 : vector<1x8x8xf32> to vector<8x8xf32>
    %992 = vector.broadcast %989 : f32 to vector<8x8xf32>
    %993 = arith.mulf %992, %991 : vector<8x8xf32>
    %994 = arith.addf %988, %993 : vector<8x8xf32>
    %c29_591 = arith.constant 29 : index
    %995 = memref.load %arg3[%c29_591] : memref<144xf32, #tpu.memory_space<smem>>
    %c3_592 = arith.constant 3 : index
    %c0_593 = arith.constant 0 : index
    %c2_594 = arith.constant 2 : index
    %996 = vector.load %arg8[%c3_592, %c0_593, %c2_594] : memref<4x10x10xf32, #tpu.memory_space<vmem>>, vector<1x8x8xf32>
    %997 = vector.shape_cast %996 : vector<1x8x8xf32> to vector<8x8xf32>
    %998 = vector.broadcast %995 : f32 to vector<8x8xf32>
    %999 = arith.mulf %998, %997 : vector<8x8xf32>
    %1000 = arith.addf %994, %999 : vector<8x8xf32>
    %c30_595 = arith.constant 30 : index
    %1001 = memref.load %arg3[%c30_595] : memref<144xf32, #tpu.memory_space<smem>>
    %c3_596 = arith.constant 3 : index
    %c1_597 = arith.constant 1 : index
    %c0_598 = arith.constant 0 : index
    %1002 = vector.load %arg8[%c3_596, %c1_597, %c0_598] : memref<4x10x10xf32, #tpu.memory_space<vmem>>, vector<1x8x8xf32>
    %1003 = vector.shape_cast %1002 : vector<1x8x8xf32> to vector<8x8xf32>
    %1004 = vector.broadcast %1001 : f32 to vector<8x8xf32>
    %1005 = arith.mulf %1004, %1003 : vector<8x8xf32>
    %1006 = arith.addf %1000, %1005 : vector<8x8xf32>
    %c31_599 = arith.constant 31 : index
    %1007 = memref.load %arg3[%c31_599] : memref<144xf32, #tpu.memory_space<smem>>
    %c3_600 = arith.constant 3 : index
    %c1_601 = arith.constant 1 : index
    %c1_602 = arith.constant 1 : index
    %1008 = vector.load %arg8[%c3_600, %c1_601, %c1_602] : memref<4x10x10xf32, #tpu.memory_space<vmem>>, vector<1x8x8xf32>
    %1009 = vector.shape_cast %1008 : vector<1x8x8xf32> to vector<8x8xf32>
    %1010 = vector.broadcast %1007 : f32 to vector<8x8xf32>
    %1011 = arith.mulf %1010, %1009 : vector<8x8xf32>
    %1012 = arith.addf %1006, %1011 : vector<8x8xf32>
    %c32_603 = arith.constant 32 : index
    %1013 = memref.load %arg3[%c32_603] : memref<144xf32, #tpu.memory_space<smem>>
    %c3_604 = arith.constant 3 : index
    %c1_605 = arith.constant 1 : index
    %c2_606 = arith.constant 2 : index
    %1014 = vector.load %arg8[%c3_604, %c1_605, %c2_606] : memref<4x10x10xf32, #tpu.memory_space<vmem>>, vector<1x8x8xf32>
    %1015 = vector.shape_cast %1014 : vector<1x8x8xf32> to vector<8x8xf32>
    %1016 = vector.broadcast %1013 : f32 to vector<8x8xf32>
    %1017 = arith.mulf %1016, %1015 : vector<8x8xf32>
    %1018 = arith.addf %1012, %1017 : vector<8x8xf32>
    %c33_607 = arith.constant 33 : index
    %1019 = memref.load %arg3[%c33_607] : memref<144xf32, #tpu.memory_space<smem>>
    %c3_608 = arith.constant 3 : index
    %c2_609 = arith.constant 2 : index
    %c0_610 = arith.constant 0 : index
    %1020 = vector.load %arg8[%c3_608, %c2_609, %c0_610] : memref<4x10x10xf32, #tpu.memory_space<vmem>>, vector<1x8x8xf32>
    %1021 = vector.shape_cast %1020 : vector<1x8x8xf32> to vector<8x8xf32>
    %1022 = vector.broadcast %1019 : f32 to vector<8x8xf32>
    %1023 = arith.mulf %1022, %1021 : vector<8x8xf32>
    %1024 = arith.addf %1018, %1023 : vector<8x8xf32>
    %c34_611 = arith.constant 34 : index
    %1025 = memref.load %arg3[%c34_611] : memref<144xf32, #tpu.memory_space<smem>>
    %c3_612 = arith.constant 3 : index
    %c2_613 = arith.constant 2 : index
    %c1_614 = arith.constant 1 : index
    %1026 = vector.load %arg8[%c3_612, %c2_613, %c1_614] : memref<4x10x10xf32, #tpu.memory_space<vmem>>, vector<1x8x8xf32>
    %1027 = vector.shape_cast %1026 : vector<1x8x8xf32> to vector<8x8xf32>
    %1028 = vector.broadcast %1025 : f32 to vector<8x8xf32>
    %1029 = arith.mulf %1028, %1027 : vector<8x8xf32>
    %1030 = arith.addf %1024, %1029 : vector<8x8xf32>
    %c35_615 = arith.constant 35 : index
    %1031 = memref.load %arg3[%c35_615] : memref<144xf32, #tpu.memory_space<smem>>
    %c3_616 = arith.constant 3 : index
    %c2_617 = arith.constant 2 : index
    %c2_618 = arith.constant 2 : index
    %1032 = vector.load %arg8[%c3_616, %c2_617, %c2_618] : memref<4x10x10xf32, #tpu.memory_space<vmem>>, vector<1x8x8xf32>
    %1033 = vector.shape_cast %1032 : vector<1x8x8xf32> to vector<8x8xf32>
    %1034 = vector.broadcast %1031 : f32 to vector<8x8xf32>
    %1035 = arith.mulf %1034, %1033 : vector<8x8xf32>
    %1036 = arith.addf %1030, %1035 : vector<8x8xf32>
    %cst_619 = arith.constant 0.000000e+00 : f32
    %1037 = vector.broadcast %cst_619 : f32 to vector<8x8xf32>
    %1038 = arith.maximumf %1036, %1037 : vector<8x8xf32>
    %c0_620 = arith.constant 0 : index
    %c0_621 = arith.constant 0 : index
    %c0_622 = arith.constant 0 : index
    %c0_623 = arith.constant 0 : index
    %1039 = vector.load %arg6[%c0_620, %c0_621, %c0_622, %c0_623] : memref<1x4x8x8xf32, #tpu.memory_space<vmem>>, vector<1x1x8x8xf32>
    %1040 = vector.shape_cast %1039 : vector<1x1x8x8xf32> to vector<8x8xf32>
    %1041 = vector.shape_cast %1038 : vector<8x8xf32> to vector<1x1x8x8xf32>
    tpu.vector_store %arg6[%c0_620, %c0_621, %c0_622, %c0_623], %1041 {strides = array<i32>} : memref<1x4x8x8xf32, #tpu.memory_space<vmem>>, vector<1x1x8x8xf32>,
    %cst_624 = arith.constant 0.000000e+00 : f32
    %1042 = vector.broadcast %cst_624 : f32 to vector<8x8xf32>
    %c1_625 = arith.constant 1 : index
    %1043 = memref.load %arg4[%c1_625] : memref<4xf32, #tpu.memory_space<smem>>
    %1044 = vector.broadcast %1043 : f32 to vector<8x8xf32>
    %1045 = arith.addf %1042, %1044 : vector<8x8xf32>
    %c36_626 = arith.constant 36 : index
    %1046 = memref.load %arg3[%c36_626] : memref<144xf32, #tpu.memory_space<smem>>
    %c0_627 = arith.constant 0 : index
    %c0_628 = arith.constant 0 : index
    %c0_629 = arith.constant 0 : index
    %1047 = vector.load %arg8[%c0_627, %c0_628, %c0_629] : memref<4x10x10xf32, #tpu.memory_space<vmem>>, vector<1x8x8xf32>
    %1048 = vector.shape_cast %1047 : vector<1x8x8xf32> to vector<8x8xf32>
    %1049 = vector.broadcast %1046 : f32 to vector<8x8xf32>
    %1050 = arith.mulf %1049, %1048 : vector<8x8xf32>
    %1051 = arith.addf %1045, %1050 : vector<8x8xf32>
    %c37_630 = arith.constant 37 : index
    %1052 = memref.load %arg3[%c37_630] : memref<144xf32, #tpu.memory_space<smem>>
    %c0_631 = arith.constant 0 : index
    %c0_632 = arith.constant 0 : index
    %c1_633 = arith.constant 1 : index
    %1053 = vector.load %arg8[%c0_631, %c0_632, %c1_633] : memref<4x10x10xf32, #tpu.memory_space<vmem>>, vector<1x8x8xf32>
    %1054 = vector.shape_cast %1053 : vector<1x8x8xf32> to vector<8x8xf32>
    %1055 = vector.broadcast %1052 : f32 to vector<8x8xf32>
    %1056 = arith.mulf %1055, %1054 : vector<8x8xf32>
    %1057 = arith.addf %1051, %1056 : vector<8x8xf32>
    %c38_634 = arith.constant 38 : index
    %1058 = memref.load %arg3[%c38_634] : memref<144xf32, #tpu.memory_space<smem>>
    %c0_635 = arith.constant 0 : index
    %c0_636 = arith.constant 0 : index
    %c2_637 = arith.constant 2 : index
    %1059 = vector.load %arg8[%c0_635, %c0_636, %c2_637] : memref<4x10x10xf32, #tpu.memory_space<vmem>>, vector<1x8x8xf32>
    %1060 = vector.shape_cast %1059 : vector<1x8x8xf32> to vector<8x8xf32>
    %1061 = vector.broadcast %1058 : f32 to vector<8x8xf32>
    %1062 = arith.mulf %1061, %1060 : vector<8x8xf32>
    %1063 = arith.addf %1057, %1062 : vector<8x8xf32>
    %c39_638 = arith.constant 39 : index
    %1064 = memref.load %arg3[%c39_638] : memref<144xf32, #tpu.memory_space<smem>>
    %c0_639 = arith.constant 0 : index
    %c1_640 = arith.constant 1 : index
    %c0_641 = arith.constant 0 : index
    %1065 = vector.load %arg8[%c0_639, %c1_640, %c0_641] : memref<4x10x10xf32, #tpu.memory_space<vmem>>, vector<1x8x8xf32>
    %1066 = vector.shape_cast %1065 : vector<1x8x8xf32> to vector<8x8xf32>
    %1067 = vector.broadcast %1064 : f32 to vector<8x8xf32>
    %1068 = arith.mulf %1067, %1066 : vector<8x8xf32>
    %1069 = arith.addf %1063, %1068 : vector<8x8xf32>
    %c40_642 = arith.constant 40 : index
    %1070 = memref.load %arg3[%c40_642] : memref<144xf32, #tpu.memory_space<smem>>
    %c0_643 = arith.constant 0 : index
    %c1_644 = arith.constant 1 : index
    %c1_645 = arith.constant 1 : index
    %1071 = vector.load %arg8[%c0_643, %c1_644, %c1_645] : memref<4x10x10xf32, #tpu.memory_space<vmem>>, vector<1x8x8xf32>
    %1072 = vector.shape_cast %1071 : vector<1x8x8xf32> to vector<8x8xf32>
    %1073 = vector.broadcast %1070 : f32 to vector<8x8xf32>
    %1074 = arith.mulf %1073, %1072 : vector<8x8xf32>
    %1075 = arith.addf %1069, %1074 : vector<8x8xf32>
    %c41_646 = arith.constant 41 : index
    %1076 = memref.load %arg3[%c41_646] : memref<144xf32, #tpu.memory_space<smem>>
    %c0_647 = arith.constant 0 : index
    %c1_648 = arith.constant 1 : index
    %c2_649 = arith.constant 2 : index
    %1077 = vector.load %arg8[%c0_647, %c1_648, %c2_649] : memref<4x10x10xf32, #tpu.memory_space<vmem>>, vector<1x8x8xf32>
    %1078 = vector.shape_cast %1077 : vector<1x8x8xf32> to vector<8x8xf32>
    %1079 = vector.broadcast %1076 : f32 to vector<8x8xf32>
    %1080 = arith.mulf %1079, %1078 : vector<8x8xf32>
    %1081 = arith.addf %1075, %1080 : vector<8x8xf32>
    %c42_650 = arith.constant 42 : index
    %1082 = memref.load %arg3[%c42_650] : memref<144xf32, #tpu.memory_space<smem>>
    %c0_651 = arith.constant 0 : index
    %c2_652 = arith.constant 2 : index
    %c0_653 = arith.constant 0 : index
    %1083 = vector.load %arg8[%c0_651, %c2_652, %c0_653] : memref<4x10x10xf32, #tpu.memory_space<vmem>>, vector<1x8x8xf32>
    %1084 = vector.shape_cast %1083 : vector<1x8x8xf32> to vector<8x8xf32>
    %1085 = vector.broadcast %1082 : f32 to vector<8x8xf32>
    %1086 = arith.mulf %1085, %1084 : vector<8x8xf32>
    %1087 = arith.addf %1081, %1086 : vector<8x8xf32>
    %c43_654 = arith.constant 43 : index
    %1088 = memref.load %arg3[%c43_654] : memref<144xf32, #tpu.memory_space<smem>>
    %c0_655 = arith.constant 0 : index
    %c2_656 = arith.constant 2 : index
    %c1_657 = arith.constant 1 : index
    %1089 = vector.load %arg8[%c0_655, %c2_656, %c1_657] : memref<4x10x10xf32, #tpu.memory_space<vmem>>, vector<1x8x8xf32>
    %1090 = vector.shape_cast %1089 : vector<1x8x8xf32> to vector<8x8xf32>
    %1091 = vector.broadcast %1088 : f32 to vector<8x8xf32>
    %1092 = arith.mulf %1091, %1090 : vector<8x8xf32>
    %1093 = arith.addf %1087, %1092 : vector<8x8xf32>
    %c44_658 = arith.constant 44 : index
    %1094 = memref.load %arg3[%c44_658] : memref<144xf32, #tpu.memory_space<smem>>
    %c0_659 = arith.constant 0 : index
    %c2_660 = arith.constant 2 : index
    %c2_661 = arith.constant 2 : index
    %1095 = vector.load %arg8[%c0_659, %c2_660, %c2_661] : memref<4x10x10xf32, #tpu.memory_space<vmem>>, vector<1x8x8xf32>
    %1096 = vector.shape_cast %1095 : vector<1x8x8xf32> to vector<8x8xf32>
    %1097 = vector.broadcast %1094 : f32 to vector<8x8xf32>
    %1098 = arith.mulf %1097, %1096 : vector<8x8xf32>
    %1099 = arith.addf %1093, %1098 : vector<8x8xf32>
    %c45_662 = arith.constant 45 : index
    %1100 = memref.load %arg3[%c45_662] : memref<144xf32, #tpu.memory_space<smem>>
    %c1_663 = arith.constant 1 : index
    %c0_664 = arith.constant 0 : index
    %c0_665 = arith.constant 0 : index
    %1101 = vector.load %arg8[%c1_663, %c0_664, %c0_665] : memref<4x10x10xf32, #tpu.memory_space<vmem>>, vector<1x8x8xf32>
    %1102 = vector.shape_cast %1101 : vector<1x8x8xf32> to vector<8x8xf32>
    %1103 = vector.broadcast %1100 : f32 to vector<8x8xf32>
    %1104 = arith.mulf %1103, %1102 : vector<8x8xf32>
    %1105 = arith.addf %1099, %1104 : vector<8x8xf32>
    %c46_666 = arith.constant 46 : index
    %1106 = memref.load %arg3[%c46_666] : memref<144xf32, #tpu.memory_space<smem>>
    %c1_667 = arith.constant 1 : index
    %c0_668 = arith.constant 0 : index
    %c1_669 = arith.constant 1 : index
    %1107 = vector.load %arg8[%c1_667, %c0_668, %c1_669] : memref<4x10x10xf32, #tpu.memory_space<vmem>>, vector<1x8x8xf32>
    %1108 = vector.shape_cast %1107 : vector<1x8x8xf32> to vector<8x8xf32>
    %1109 = vector.broadcast %1106 : f32 to vector<8x8xf32>
    %1110 = arith.mulf %1109, %1108 : vector<8x8xf32>
    %1111 = arith.addf %1105, %1110 : vector<8x8xf32>
    %c47_670 = arith.constant 47 : index
    %1112 = memref.load %arg3[%c47_670] : memref<144xf32, #tpu.memory_space<smem>>
    %c1_671 = arith.constant 1 : index
    %c0_672 = arith.constant 0 : index
    %c2_673 = arith.constant 2 : index
    %1113 = vector.load %arg8[%c1_671, %c0_672, %c2_673] : memref<4x10x10xf32, #tpu.memory_space<vmem>>, vector<1x8x8xf32>
    %1114 = vector.shape_cast %1113 : vector<1x8x8xf32> to vector<8x8xf32>
    %1115 = vector.broadcast %1112 : f32 to vector<8x8xf32>
    %1116 = arith.mulf %1115, %1114 : vector<8x8xf32>
    %1117 = arith.addf %1111, %1116 : vector<8x8xf32>
    %c48_674 = arith.constant 48 : index
    %1118 = memref.load %arg3[%c48_674] : memref<144xf32, #tpu.memory_space<smem>>
    %c1_675 = arith.constant 1 : index
    %c1_676 = arith.constant 1 : index
    %c0_677 = arith.constant 0 : index
    %1119 = vector.load %arg8[%c1_675, %c1_676, %c0_677] : memref<4x10x10xf32, #tpu.memory_space<vmem>>, vector<1x8x8xf32>
    %1120 = vector.shape_cast %1119 : vector<1x8x8xf32> to vector<8x8xf32>
    %1121 = vector.broadcast %1118 : f32 to vector<8x8xf32>
    %1122 = arith.mulf %1121, %1120 : vector<8x8xf32>
    %1123 = arith.addf %1117, %1122 : vector<8x8xf32>
    %c49_678 = arith.constant 49 : index
    %1124 = memref.load %arg3[%c49_678] : memref<144xf32, #tpu.memory_space<smem>>
    %c1_679 = arith.constant 1 : index
    %c1_680 = arith.constant 1 : index
    %c1_681 = arith.constant 1 : index
    %1125 = vector.load %arg8[%c1_679, %c1_680, %c1_681] : memref<4x10x10xf32, #tpu.memory_space<vmem>>, vector<1x8x8xf32>
    %1126 = vector.shape_cast %1125 : vector<1x8x8xf32> to vector<8x8xf32>
    %1127 = vector.broadcast %1124 : f32 to vector<8x8xf32>
    %1128 = arith.mulf %1127, %1126 : vector<8x8xf32>
    %1129 = arith.addf %1123, %1128 : vector<8x8xf32>
    %c50_682 = arith.constant 50 : index
    %1130 = memref.load %arg3[%c50_682] : memref<144xf32, #tpu.memory_space<smem>>
    %c1_683 = arith.constant 1 : index
    %c1_684 = arith.constant 1 : index
    %c2_685 = arith.constant 2 : index
    %1131 = vector.load %arg8[%c1_683, %c1_684, %c2_685] : memref<4x10x10xf32, #tpu.memory_space<vmem>>, vector<1x8x8xf32>
    %1132 = vector.shape_cast %1131 : vector<1x8x8xf32> to vector<8x8xf32>
    %1133 = vector.broadcast %1130 : f32 to vector<8x8xf32>
    %1134 = arith.mulf %1133, %1132 : vector<8x8xf32>
    %1135 = arith.addf %1129, %1134 : vector<8x8xf32>
    %c51_686 = arith.constant 51 : index
    %1136 = memref.load %arg3[%c51_686] : memref<144xf32, #tpu.memory_space<smem>>
    %c1_687 = arith.constant 1 : index
    %c2_688 = arith.constant 2 : index
    %c0_689 = arith.constant 0 : index
    %1137 = vector.load %arg8[%c1_687, %c2_688, %c0_689] : memref<4x10x10xf32, #tpu.memory_space<vmem>>, vector<1x8x8xf32>
    %1138 = vector.shape_cast %1137 : vector<1x8x8xf32> to vector<8x8xf32>
    %1139 = vector.broadcast %1136 : f32 to vector<8x8xf32>
    %1140 = arith.mulf %1139, %1138 : vector<8x8xf32>
    %1141 = arith.addf %1135, %1140 : vector<8x8xf32>
    %c52_690 = arith.constant 52 : index
    %1142 = memref.load %arg3[%c52_690] : memref<144xf32, #tpu.memory_space<smem>>
    %c1_691 = arith.constant 1 : index
    %c2_692 = arith.constant 2 : index
    %c1_693 = arith.constant 1 : index
    %1143 = vector.load %arg8[%c1_691, %c2_692, %c1_693] : memref<4x10x10xf32, #tpu.memory_space<vmem>>, vector<1x8x8xf32>
    %1144 = vector.shape_cast %1143 : vector<1x8x8xf32> to vector<8x8xf32>
    %1145 = vector.broadcast %1142 : f32 to vector<8x8xf32>
    %1146 = arith.mulf %1145, %1144 : vector<8x8xf32>
    %1147 = arith.addf %1141, %1146 : vector<8x8xf32>
    %c53_694 = arith.constant 53 : index
    %1148 = memref.load %arg3[%c53_694] : memref<144xf32, #tpu.memory_space<smem>>
    %c1_695 = arith.constant 1 : index
    %c2_696 = arith.constant 2 : index
    %c2_697 = arith.constant 2 : index
    %1149 = vector.load %arg8[%c1_695, %c2_696, %c2_697] : memref<4x10x10xf32, #tpu.memory_space<vmem>>, vector<1x8x8xf32>
    %1150 = vector.shape_cast %1149 : vector<1x8x8xf32> to vector<8x8xf32>
    %1151 = vector.broadcast %1148 : f32 to vector<8x8xf32>
    %1152 = arith.mulf %1151, %1150 : vector<8x8xf32>
    %1153 = arith.addf %1147, %1152 : vector<8x8xf32>
    %c54_698 = arith.constant 54 : index
    %1154 = memref.load %arg3[%c54_698] : memref<144xf32, #tpu.memory_space<smem>>
    %c2_699 = arith.constant 2 : index
    %c0_700 = arith.constant 0 : index
    %c0_701 = arith.constant 0 : index
    %1155 = vector.load %arg8[%c2_699, %c0_700, %c0_701] : memref<4x10x10xf32, #tpu.memory_space<vmem>>, vector<1x8x8xf32>
    %1156 = vector.shape_cast %1155 : vector<1x8x8xf32> to vector<8x8xf32>
    %1157 = vector.broadcast %1154 : f32 to vector<8x8xf32>
    %1158 = arith.mulf %1157, %1156 : vector<8x8xf32>
    %1159 = arith.addf %1153, %1158 : vector<8x8xf32>
    %c55_702 = arith.constant 55 : index
    %1160 = memref.load %arg3[%c55_702] : memref<144xf32, #tpu.memory_space<smem>>
    %c2_703 = arith.constant 2 : index
    %c0_704 = arith.constant 0 : index
    %c1_705 = arith.constant 1 : index
    %1161 = vector.load %arg8[%c2_703, %c0_704, %c1_705] : memref<4x10x10xf32, #tpu.memory_space<vmem>>, vector<1x8x8xf32>
    %1162 = vector.shape_cast %1161 : vector<1x8x8xf32> to vector<8x8xf32>
    %1163 = vector.broadcast %1160 : f32 to vector<8x8xf32>
    %1164 = arith.mulf %1163, %1162 : vector<8x8xf32>
    %1165 = arith.addf %1159, %1164 : vector<8x8xf32>
    %c56_706 = arith.constant 56 : index
    %1166 = memref.load %arg3[%c56_706] : memref<144xf32, #tpu.memory_space<smem>>
    %c2_707 = arith.constant 2 : index
    %c0_708 = arith.constant 0 : index
    %c2_709 = arith.constant 2 : index
    %1167 = vector.load %arg8[%c2_707, %c0_708, %c2_709] : memref<4x10x10xf32, #tpu.memory_space<vmem>>, vector<1x8x8xf32>
    %1168 = vector.shape_cast %1167 : vector<1x8x8xf32> to vector<8x8xf32>
    %1169 = vector.broadcast %1166 : f32 to vector<8x8xf32>
    %1170 = arith.mulf %1169, %1168 : vector<8x8xf32>
    %1171 = arith.addf %1165, %1170 : vector<8x8xf32>
    %c57_710 = arith.constant 57 : index
    %1172 = memref.load %arg3[%c57_710] : memref<144xf32, #tpu.memory_space<smem>>
    %c2_711 = arith.constant 2 : index
    %c1_712 = arith.constant 1 : index
    %c0_713 = arith.constant 0 : index
    %1173 = vector.load %arg8[%c2_711, %c1_712, %c0_713] : memref<4x10x10xf32, #tpu.memory_space<vmem>>, vector<1x8x8xf32>
    %1174 = vector.shape_cast %1173 : vector<1x8x8xf32> to vector<8x8xf32>
    %1175 = vector.broadcast %1172 : f32 to vector<8x8xf32>
    %1176 = arith.mulf %1175, %1174 : vector<8x8xf32>
    %1177 = arith.addf %1171, %1176 : vector<8x8xf32>
    %c58_714 = arith.constant 58 : index
    %1178 = memref.load %arg3[%c58_714] : memref<144xf32, #tpu.memory_space<smem>>
    %c2_715 = arith.constant 2 : index
    %c1_716 = arith.constant 1 : index
    %c1_717 = arith.constant 1 : index
    %1179 = vector.load %arg8[%c2_715, %c1_716, %c1_717] : memref<4x10x10xf32, #tpu.memory_space<vmem>>, vector<1x8x8xf32>
    %1180 = vector.shape_cast %1179 : vector<1x8x8xf32> to vector<8x8xf32>
    %1181 = vector.broadcast %1178 : f32 to vector<8x8xf32>
    %1182 = arith.mulf %1181, %1180 : vector<8x8xf32>
    %1183 = arith.addf %1177, %1182 : vector<8x8xf32>
    %c59_718 = arith.constant 59 : index
    %1184 = memref.load %arg3[%c59_718] : memref<144xf32, #tpu.memory_space<smem>>
    %c2_719 = arith.constant 2 : index
    %c1_720 = arith.constant 1 : index
    %c2_721 = arith.constant 2 : index
    %1185 = vector.load %arg8[%c2_719, %c1_720, %c2_721] : memref<4x10x10xf32, #tpu.memory_space<vmem>>, vector<1x8x8xf32>
    %1186 = vector.shape_cast %1185 : vector<1x8x8xf32> to vector<8x8xf32>
    %1187 = vector.broadcast %1184 : f32 to vector<8x8xf32>
    %1188 = arith.mulf %1187, %1186 : vector<8x8xf32>
    %1189 = arith.addf %1183, %1188 : vector<8x8xf32>
    %c60_722 = arith.constant 60 : index
    %1190 = memref.load %arg3[%c60_722] : memref<144xf32, #tpu.memory_space<smem>>
    %c2_723 = arith.constant 2 : index
    %c2_724 = arith.constant 2 : index
    %c0_725 = arith.constant 0 : index
    %1191 = vector.load %arg8[%c2_723, %c2_724, %c0_725] : memref<4x10x10xf32, #tpu.memory_space<vmem>>, vector<1x8x8xf32>
    %1192 = vector.shape_cast %1191 : vector<1x8x8xf32> to vector<8x8xf32>
    %1193 = vector.broadcast %1190 : f32 to vector<8x8xf32>
    %1194 = arith.mulf %1193, %1192 : vector<8x8xf32>
    %1195 = arith.addf %1189, %1194 : vector<8x8xf32>
    %c61_726 = arith.constant 61 : index
    %1196 = memref.load %arg3[%c61_726] : memref<144xf32, #tpu.memory_space<smem>>
    %c2_727 = arith.constant 2 : index
    %c2_728 = arith.constant 2 : index
    %c1_729 = arith.constant 1 : index
    %1197 = vector.load %arg8[%c2_727, %c2_728, %c1_729] : memref<4x10x10xf32, #tpu.memory_space<vmem>>, vector<1x8x8xf32>
    %1198 = vector.shape_cast %1197 : vector<1x8x8xf32> to vector<8x8xf32>
    %1199 = vector.broadcast %1196 : f32 to vector<8x8xf32>
    %1200 = arith.mulf %1199, %1198 : vector<8x8xf32>
    %1201 = arith.addf %1195, %1200 : vector<8x8xf32>
    %c62_730 = arith.constant 62 : index
    %1202 = memref.load %arg3[%c62_730] : memref<144xf32, #tpu.memory_space<smem>>
    %c2_731 = arith.constant 2 : index
    %c2_732 = arith.constant 2 : index
    %c2_733 = arith.constant 2 : index
    %1203 = vector.load %arg8[%c2_731, %c2_732, %c2_733] : memref<4x10x10xf32, #tpu.memory_space<vmem>>, vector<1x8x8xf32>
    %1204 = vector.shape_cast %1203 : vector<1x8x8xf32> to vector<8x8xf32>
    %1205 = vector.broadcast %1202 : f32 to vector<8x8xf32>
    %1206 = arith.mulf %1205, %1204 : vector<8x8xf32>
    %1207 = arith.addf %1201, %1206 : vector<8x8xf32>
    %c63_734 = arith.constant 63 : index
    %1208 = memref.load %arg3[%c63_734] : memref<144xf32, #tpu.memory_space<smem>>
    %c3_735 = arith.constant 3 : index
    %c0_736 = arith.constant 0 : index
    %c0_737 = arith.constant 0 : index
    %1209 = vector.load %arg8[%c3_735, %c0_736, %c0_737] : memref<4x10x10xf32, #tpu.memory_space<vmem>>, vector<1x8x8xf32>
    %1210 = vector.shape_cast %1209 : vector<1x8x8xf32> to vector<8x8xf32>
    %1211 = vector.broadcast %1208 : f32 to vector<8x8xf32>
    %1212 = arith.mulf %1211, %1210 : vector<8x8xf32>
    %1213 = arith.addf %1207, %1212 : vector<8x8xf32>
    %c64_738 = arith.constant 64 : index
    %1214 = memref.load %arg3[%c64_738] : memref<144xf32, #tpu.memory_space<smem>>
    %c3_739 = arith.constant 3 : index
    %c0_740 = arith.constant 0 : index
    %c1_741 = arith.constant 1 : index
    %1215 = vector.load %arg8[%c3_739, %c0_740, %c1_741] : memref<4x10x10xf32, #tpu.memory_space<vmem>>, vector<1x8x8xf32>
    %1216 = vector.shape_cast %1215 : vector<1x8x8xf32> to vector<8x8xf32>
    %1217 = vector.broadcast %1214 : f32 to vector<8x8xf32>
    %1218 = arith.mulf %1217, %1216 : vector<8x8xf32>
    %1219 = arith.addf %1213, %1218 : vector<8x8xf32>
    %c65_742 = arith.constant 65 : index
    %1220 = memref.load %arg3[%c65_742] : memref<144xf32, #tpu.memory_space<smem>>
    %c3_743 = arith.constant 3 : index
    %c0_744 = arith.constant 0 : index
    %c2_745 = arith.constant 2 : index
    %1221 = vector.load %arg8[%c3_743, %c0_744, %c2_745] : memref<4x10x10xf32, #tpu.memory_space<vmem>>, vector<1x8x8xf32>
    %1222 = vector.shape_cast %1221 : vector<1x8x8xf32> to vector<8x8xf32>
    %1223 = vector.broadcast %1220 : f32 to vector<8x8xf32>
    %1224 = arith.mulf %1223, %1222 : vector<8x8xf32>
    %1225 = arith.addf %1219, %1224 : vector<8x8xf32>
    %c66_746 = arith.constant 66 : index
    %1226 = memref.load %arg3[%c66_746] : memref<144xf32, #tpu.memory_space<smem>>
    %c3_747 = arith.constant 3 : index
    %c1_748 = arith.constant 1 : index
    %c0_749 = arith.constant 0 : index
    %1227 = vector.load %arg8[%c3_747, %c1_748, %c0_749] : memref<4x10x10xf32, #tpu.memory_space<vmem>>, vector<1x8x8xf32>
    %1228 = vector.shape_cast %1227 : vector<1x8x8xf32> to vector<8x8xf32>
    %1229 = vector.broadcast %1226 : f32 to vector<8x8xf32>
    %1230 = arith.mulf %1229, %1228 : vector<8x8xf32>
    %1231 = arith.addf %1225, %1230 : vector<8x8xf32>
    %c67_750 = arith.constant 67 : index
    %1232 = memref.load %arg3[%c67_750] : memref<144xf32, #tpu.memory_space<smem>>
    %c3_751 = arith.constant 3 : index
    %c1_752 = arith.constant 1 : index
    %c1_753 = arith.constant 1 : index
    %1233 = vector.load %arg8[%c3_751, %c1_752, %c1_753] : memref<4x10x10xf32, #tpu.memory_space<vmem>>, vector<1x8x8xf32>
    %1234 = vector.shape_cast %1233 : vector<1x8x8xf32> to vector<8x8xf32>
    %1235 = vector.broadcast %1232 : f32 to vector<8x8xf32>
    %1236 = arith.mulf %1235, %1234 : vector<8x8xf32>
    %1237 = arith.addf %1231, %1236 : vector<8x8xf32>
    %c68_754 = arith.constant 68 : index
    %1238 = memref.load %arg3[%c68_754] : memref<144xf32, #tpu.memory_space<smem>>
    %c3_755 = arith.constant 3 : index
    %c1_756 = arith.constant 1 : index
    %c2_757 = arith.constant 2 : index
    %1239 = vector.load %arg8[%c3_755, %c1_756, %c2_757] : memref<4x10x10xf32, #tpu.memory_space<vmem>>, vector<1x8x8xf32>
    %1240 = vector.shape_cast %1239 : vector<1x8x8xf32> to vector<8x8xf32>
    %1241 = vector.broadcast %1238 : f32 to vector<8x8xf32>
    %1242 = arith.mulf %1241, %1240 : vector<8x8xf32>
    %1243 = arith.addf %1237, %1242 : vector<8x8xf32>
    %c69_758 = arith.constant 69 : index
    %1244 = memref.load %arg3[%c69_758] : memref<144xf32, #tpu.memory_space<smem>>
    %c3_759 = arith.constant 3 : index
    %c2_760 = arith.constant 2 : index
    %c0_761 = arith.constant 0 : index
    %1245 = vector.load %arg8[%c3_759, %c2_760, %c0_761] : memref<4x10x10xf32, #tpu.memory_space<vmem>>, vector<1x8x8xf32>
    %1246 = vector.shape_cast %1245 : vector<1x8x8xf32> to vector<8x8xf32>
    %1247 = vector.broadcast %1244 : f32 to vector<8x8xf32>
    %1248 = arith.mulf %1247, %1246 : vector<8x8xf32>
    %1249 = arith.addf %1243, %1248 : vector<8x8xf32>
    %c70_762 = arith.constant 70 : index
    %1250 = memref.load %arg3[%c70_762] : memref<144xf32, #tpu.memory_space<smem>>
    %c3_763 = arith.constant 3 : index
    %c2_764 = arith.constant 2 : index
    %c1_765 = arith.constant 1 : index
    %1251 = vector.load %arg8[%c3_763, %c2_764, %c1_765] : memref<4x10x10xf32, #tpu.memory_space<vmem>>, vector<1x8x8xf32>
    %1252 = vector.shape_cast %1251 : vector<1x8x8xf32> to vector<8x8xf32>
    %1253 = vector.broadcast %1250 : f32 to vector<8x8xf32>
    %1254 = arith.mulf %1253, %1252 : vector<8x8xf32>
    %1255 = arith.addf %1249, %1254 : vector<8x8xf32>
    %c71_766 = arith.constant 71 : index
    %1256 = memref.load %arg3[%c71_766] : memref<144xf32, #tpu.memory_space<smem>>
    %c3_767 = arith.constant 3 : index
    %c2_768 = arith.constant 2 : index
    %c2_769 = arith.constant 2 : index
    %1257 = vector.load %arg8[%c3_767, %c2_768, %c2_769] : memref<4x10x10xf32, #tpu.memory_space<vmem>>, vector<1x8x8xf32>
    %1258 = vector.shape_cast %1257 : vector<1x8x8xf32> to vector<8x8xf32>
    %1259 = vector.broadcast %1256 : f32 to vector<8x8xf32>
    %1260 = arith.mulf %1259, %1258 : vector<8x8xf32>
    %1261 = arith.addf %1255, %1260 : vector<8x8xf32>
    %cst_770 = arith.constant 0.000000e+00 : f32
    %1262 = vector.broadcast %cst_770 : f32 to vector<8x8xf32>
    %1263 = arith.maximumf %1261, %1262 : vector<8x8xf32>
    %c0_771 = arith.constant 0 : index
    %c1_772 = arith.constant 1 : index
    %c0_773 = arith.constant 0 : index
    %c0_774 = arith.constant 0 : index
    %1264 = vector.load %arg6[%c0_771, %c1_772, %c0_773, %c0_774] : memref<1x4x8x8xf32, #tpu.memory_space<vmem>>, vector<1x1x8x8xf32>
    %1265 = vector.shape_cast %1264 : vector<1x1x8x8xf32> to vector<8x8xf32>
    %1266 = vector.shape_cast %1263 : vector<8x8xf32> to vector<1x1x8x8xf32>
    tpu.vector_store %arg6[%c0_771, %c1_772, %c0_773, %c0_774], %1266 {strides = array<i32>} : memref<1x4x8x8xf32, #tpu.memory_space<vmem>>, vector<1x1x8x8xf32>,
    %cst_775 = arith.constant 0.000000e+00 : f32
    %1267 = vector.broadcast %cst_775 : f32 to vector<8x8xf32>
    %c2_776 = arith.constant 2 : index
    %1268 = memref.load %arg4[%c2_776] : memref<4xf32, #tpu.memory_space<smem>>
    %1269 = vector.broadcast %1268 : f32 to vector<8x8xf32>
    %1270 = arith.addf %1267, %1269 : vector<8x8xf32>
    %c72_777 = arith.constant 72 : index
    %1271 = memref.load %arg3[%c72_777] : memref<144xf32, #tpu.memory_space<smem>>
    %c0_778 = arith.constant 0 : index
    %c0_779 = arith.constant 0 : index
    %c0_780 = arith.constant 0 : index
    %1272 = vector.load %arg8[%c0_778, %c0_779, %c0_780] : memref<4x10x10xf32, #tpu.memory_space<vmem>>, vector<1x8x8xf32>
    %1273 = vector.shape_cast %1272 : vector<1x8x8xf32> to vector<8x8xf32>
    %1274 = vector.broadcast %1271 : f32 to vector<8x8xf32>
    %1275 = arith.mulf %1274, %1273 : vector<8x8xf32>
    %1276 = arith.addf %1270, %1275 : vector<8x8xf32>
    %c73_781 = arith.constant 73 : index
    %1277 = memref.load %arg3[%c73_781] : memref<144xf32, #tpu.memory_space<smem>>
    %c0_782 = arith.constant 0 : index
    %c0_783 = arith.constant 0 : index
    %c1_784 = arith.constant 1 : index
    %1278 = vector.load %arg8[%c0_782, %c0_783, %c1_784] : memref<4x10x10xf32, #tpu.memory_space<vmem>>, vector<1x8x8xf32>
    %1279 = vector.shape_cast %1278 : vector<1x8x8xf32> to vector<8x8xf32>
    %1280 = vector.broadcast %1277 : f32 to vector<8x8xf32>
    %1281 = arith.mulf %1280, %1279 : vector<8x8xf32>
    %1282 = arith.addf %1276, %1281 : vector<8x8xf32>
    %c74_785 = arith.constant 74 : index
    %1283 = memref.load %arg3[%c74_785] : memref<144xf32, #tpu.memory_space<smem>>
    %c0_786 = arith.constant 0 : index
    %c0_787 = arith.constant 0 : index
    %c2_788 = arith.constant 2 : index
    %1284 = vector.load %arg8[%c0_786, %c0_787, %c2_788] : memref<4x10x10xf32, #tpu.memory_space<vmem>>, vector<1x8x8xf32>
    %1285 = vector.shape_cast %1284 : vector<1x8x8xf32> to vector<8x8xf32>
    %1286 = vector.broadcast %1283 : f32 to vector<8x8xf32>
    %1287 = arith.mulf %1286, %1285 : vector<8x8xf32>
    %1288 = arith.addf %1282, %1287 : vector<8x8xf32>
    %c75_789 = arith.constant 75 : index
    %1289 = memref.load %arg3[%c75_789] : memref<144xf32, #tpu.memory_space<smem>>
    %c0_790 = arith.constant 0 : index
    %c1_791 = arith.constant 1 : index
    %c0_792 = arith.constant 0 : index
    %1290 = vector.load %arg8[%c0_790, %c1_791, %c0_792] : memref<4x10x10xf32, #tpu.memory_space<vmem>>, vector<1x8x8xf32>
    %1291 = vector.shape_cast %1290 : vector<1x8x8xf32> to vector<8x8xf32>
    %1292 = vector.broadcast %1289 : f32 to vector<8x8xf32>
    %1293 = arith.mulf %1292, %1291 : vector<8x8xf32>
    %1294 = arith.addf %1288, %1293 : vector<8x8xf32>
    %c76_793 = arith.constant 76 : index
    %1295 = memref.load %arg3[%c76_793] : memref<144xf32, #tpu.memory_space<smem>>
    %c0_794 = arith.constant 0 : index
    %c1_795 = arith.constant 1 : index
    %c1_796 = arith.constant 1 : index
    %1296 = vector.load %arg8[%c0_794, %c1_795, %c1_796] : memref<4x10x10xf32, #tpu.memory_space<vmem>>, vector<1x8x8xf32>
    %1297 = vector.shape_cast %1296 : vector<1x8x8xf32> to vector<8x8xf32>
    %1298 = vector.broadcast %1295 : f32 to vector<8x8xf32>
    %1299 = arith.mulf %1298, %1297 : vector<8x8xf32>
    %1300 = arith.addf %1294, %1299 : vector<8x8xf32>
    %c77_797 = arith.constant 77 : index
    %1301 = memref.load %arg3[%c77_797] : memref<144xf32, #tpu.memory_space<smem>>
    %c0_798 = arith.constant 0 : index
    %c1_799 = arith.constant 1 : index
    %c2_800 = arith.constant 2 : index
    %1302 = vector.load %arg8[%c0_798, %c1_799, %c2_800] : memref<4x10x10xf32, #tpu.memory_space<vmem>>, vector<1x8x8xf32>
    %1303 = vector.shape_cast %1302 : vector<1x8x8xf32> to vector<8x8xf32>
    %1304 = vector.broadcast %1301 : f32 to vector<8x8xf32>
    %1305 = arith.mulf %1304, %1303 : vector<8x8xf32>
    %1306 = arith.addf %1300, %1305 : vector<8x8xf32>
    %c78_801 = arith.constant 78 : index
    %1307 = memref.load %arg3[%c78_801] : memref<144xf32, #tpu.memory_space<smem>>
    %c0_802 = arith.constant 0 : index
    %c2_803 = arith.constant 2 : index
    %c0_804 = arith.constant 0 : index
    %1308 = vector.load %arg8[%c0_802, %c2_803, %c0_804] : memref<4x10x10xf32, #tpu.memory_space<vmem>>, vector<1x8x8xf32>
    %1309 = vector.shape_cast %1308 : vector<1x8x8xf32> to vector<8x8xf32>
    %1310 = vector.broadcast %1307 : f32 to vector<8x8xf32>
    %1311 = arith.mulf %1310, %1309 : vector<8x8xf32>
    %1312 = arith.addf %1306, %1311 : vector<8x8xf32>
    %c79_805 = arith.constant 79 : index
    %1313 = memref.load %arg3[%c79_805] : memref<144xf32, #tpu.memory_space<smem>>
    %c0_806 = arith.constant 0 : index
    %c2_807 = arith.constant 2 : index
    %c1_808 = arith.constant 1 : index
    %1314 = vector.load %arg8[%c0_806, %c2_807, %c1_808] : memref<4x10x10xf32, #tpu.memory_space<vmem>>, vector<1x8x8xf32>
    %1315 = vector.shape_cast %1314 : vector<1x8x8xf32> to vector<8x8xf32>
    %1316 = vector.broadcast %1313 : f32 to vector<8x8xf32>
    %1317 = arith.mulf %1316, %1315 : vector<8x8xf32>
    %1318 = arith.addf %1312, %1317 : vector<8x8xf32>
    %c80_809 = arith.constant 80 : index
    %1319 = memref.load %arg3[%c80_809] : memref<144xf32, #tpu.memory_space<smem>>
    %c0_810 = arith.constant 0 : index
    %c2_811 = arith.constant 2 : index
    %c2_812 = arith.constant 2 : index
    %1320 = vector.load %arg8[%c0_810, %c2_811, %c2_812] : memref<4x10x10xf32, #tpu.memory_space<vmem>>, vector<1x8x8xf32>
    %1321 = vector.shape_cast %1320 : vector<1x8x8xf32> to vector<8x8xf32>
    %1322 = vector.broadcast %1319 : f32 to vector<8x8xf32>
    %1323 = arith.mulf %1322, %1321 : vector<8x8xf32>
    %1324 = arith.addf %1318, %1323 : vector<8x8xf32>
    %c81_813 = arith.constant 81 : index
    %1325 = memref.load %arg3[%c81_813] : memref<144xf32, #tpu.memory_space<smem>>
    %c1_814 = arith.constant 1 : index
    %c0_815 = arith.constant 0 : index
    %c0_816 = arith.constant 0 : index
    %1326 = vector.load %arg8[%c1_814, %c0_815, %c0_816] : memref<4x10x10xf32, #tpu.memory_space<vmem>>, vector<1x8x8xf32>
    %1327 = vector.shape_cast %1326 : vector<1x8x8xf32> to vector<8x8xf32>
    %1328 = vector.broadcast %1325 : f32 to vector<8x8xf32>
    %1329 = arith.mulf %1328, %1327 : vector<8x8xf32>
    %1330 = arith.addf %1324, %1329 : vector<8x8xf32>
    %c82_817 = arith.constant 82 : index
    %1331 = memref.load %arg3[%c82_817] : memref<144xf32, #tpu.memory_space<smem>>
    %c1_818 = arith.constant 1 : index
    %c0_819 = arith.constant 0 : index
    %c1_820 = arith.constant 1 : index
    %1332 = vector.load %arg8[%c1_818, %c0_819, %c1_820] : memref<4x10x10xf32, #tpu.memory_space<vmem>>, vector<1x8x8xf32>
    %1333 = vector.shape_cast %1332 : vector<1x8x8xf32> to vector<8x8xf32>
    %1334 = vector.broadcast %1331 : f32 to vector<8x8xf32>
    %1335 = arith.mulf %1334, %1333 : vector<8x8xf32>
    %1336 = arith.addf %1330, %1335 : vector<8x8xf32>
    %c83_821 = arith.constant 83 : index
    %1337 = memref.load %arg3[%c83_821] : memref<144xf32, #tpu.memory_space<smem>>
    %c1_822 = arith.constant 1 : index
    %c0_823 = arith.constant 0 : index
    %c2_824 = arith.constant 2 : index
    %1338 = vector.load %arg8[%c1_822, %c0_823, %c2_824] : memref<4x10x10xf32, #tpu.memory_space<vmem>>, vector<1x8x8xf32>
    %1339 = vector.shape_cast %1338 : vector<1x8x8xf32> to vector<8x8xf32>
    %1340 = vector.broadcast %1337 : f32 to vector<8x8xf32>
    %1341 = arith.mulf %1340, %1339 : vector<8x8xf32>
    %1342 = arith.addf %1336, %1341 : vector<8x8xf32>
    %c84_825 = arith.constant 84 : index
    %1343 = memref.load %arg3[%c84_825] : memref<144xf32, #tpu.memory_space<smem>>
    %c1_826 = arith.constant 1 : index
    %c1_827 = arith.constant 1 : index
    %c0_828 = arith.constant 0 : index
    %1344 = vector.load %arg8[%c1_826, %c1_827, %c0_828] : memref<4x10x10xf32, #tpu.memory_space<vmem>>, vector<1x8x8xf32>
    %1345 = vector.shape_cast %1344 : vector<1x8x8xf32> to vector<8x8xf32>
    %1346 = vector.broadcast %1343 : f32 to vector<8x8xf32>
    %1347 = arith.mulf %1346, %1345 : vector<8x8xf32>
    %1348 = arith.addf %1342, %1347 : vector<8x8xf32>
    %c85_829 = arith.constant 85 : index
    %1349 = memref.load %arg3[%c85_829] : memref<144xf32, #tpu.memory_space<smem>>
    %c1_830 = arith.constant 1 : index
    %c1_831 = arith.constant 1 : index
    %c1_832 = arith.constant 1 : index
    %1350 = vector.load %arg8[%c1_830, %c1_831, %c1_832] : memref<4x10x10xf32, #tpu.memory_space<vmem>>, vector<1x8x8xf32>
    %1351 = vector.shape_cast %1350 : vector<1x8x8xf32> to vector<8x8xf32>
    %1352 = vector.broadcast %1349 : f32 to vector<8x8xf32>
    %1353 = arith.mulf %1352, %1351 : vector<8x8xf32>
    %1354 = arith.addf %1348, %1353 : vector<8x8xf32>
    %c86_833 = arith.constant 86 : index
    %1355 = memref.load %arg3[%c86_833] : memref<144xf32, #tpu.memory_space<smem>>
    %c1_834 = arith.constant 1 : index
    %c1_835 = arith.constant 1 : index
    %c2_836 = arith.constant 2 : index
    %1356 = vector.load %arg8[%c1_834, %c1_835, %c2_836] : memref<4x10x10xf32, #tpu.memory_space<vmem>>, vector<1x8x8xf32>
    %1357 = vector.shape_cast %1356 : vector<1x8x8xf32> to vector<8x8xf32>
    %1358 = vector.broadcast %1355 : f32 to vector<8x8xf32>
    %1359 = arith.mulf %1358, %1357 : vector<8x8xf32>
    %1360 = arith.addf %1354, %1359 : vector<8x8xf32>
    %c87_837 = arith.constant 87 : index
    %1361 = memref.load %arg3[%c87_837] : memref<144xf32, #tpu.memory_space<smem>>
    %c1_838 = arith.constant 1 : index
    %c2_839 = arith.constant 2 : index
    %c0_840 = arith.constant 0 : index
    %1362 = vector.load %arg8[%c1_838, %c2_839, %c0_840] : memref<4x10x10xf32, #tpu.memory_space<vmem>>, vector<1x8x8xf32>
    %1363 = vector.shape_cast %1362 : vector<1x8x8xf32> to vector<8x8xf32>
    %1364 = vector.broadcast %1361 : f32 to vector<8x8xf32>
    %1365 = arith.mulf %1364, %1363 : vector<8x8xf32>
    %1366 = arith.addf %1360, %1365 : vector<8x8xf32>
    %c88_841 = arith.constant 88 : index
    %1367 = memref.load %arg3[%c88_841] : memref<144xf32, #tpu.memory_space<smem>>
    %c1_842 = arith.constant 1 : index
    %c2_843 = arith.constant 2 : index
    %c1_844 = arith.constant 1 : index
    %1368 = vector.load %arg8[%c1_842, %c2_843, %c1_844] : memref<4x10x10xf32, #tpu.memory_space<vmem>>, vector<1x8x8xf32>
    %1369 = vector.shape_cast %1368 : vector<1x8x8xf32> to vector<8x8xf32>
    %1370 = vector.broadcast %1367 : f32 to vector<8x8xf32>
    %1371 = arith.mulf %1370, %1369 : vector<8x8xf32>
    %1372 = arith.addf %1366, %1371 : vector<8x8xf32>
    %c89_845 = arith.constant 89 : index
    %1373 = memref.load %arg3[%c89_845] : memref<144xf32, #tpu.memory_space<smem>>
    %c1_846 = arith.constant 1 : index
    %c2_847 = arith.constant 2 : index
    %c2_848 = arith.constant 2 : index
    %1374 = vector.load %arg8[%c1_846, %c2_847, %c2_848] : memref<4x10x10xf32, #tpu.memory_space<vmem>>, vector<1x8x8xf32>
    %1375 = vector.shape_cast %1374 : vector<1x8x8xf32> to vector<8x8xf32>
    %1376 = vector.broadcast %1373 : f32 to vector<8x8xf32>
    %1377 = arith.mulf %1376, %1375 : vector<8x8xf32>
    %1378 = arith.addf %1372, %1377 : vector<8x8xf32>
    %c90_849 = arith.constant 90 : index
    %1379 = memref.load %arg3[%c90_849] : memref<144xf32, #tpu.memory_space<smem>>
    %c2_850 = arith.constant 2 : index
    %c0_851 = arith.constant 0 : index
    %c0_852 = arith.constant 0 : index
    %1380 = vector.load %arg8[%c2_850, %c0_851, %c0_852] : memref<4x10x10xf32, #tpu.memory_space<vmem>>, vector<1x8x8xf32>
    %1381 = vector.shape_cast %1380 : vector<1x8x8xf32> to vector<8x8xf32>
    %1382 = vector.broadcast %1379 : f32 to vector<8x8xf32>
    %1383 = arith.mulf %1382, %1381 : vector<8x8xf32>
    %1384 = arith.addf %1378, %1383 : vector<8x8xf32>
    %c91_853 = arith.constant 91 : index
    %1385 = memref.load %arg3[%c91_853] : memref<144xf32, #tpu.memory_space<smem>>
    %c2_854 = arith.constant 2 : index
    %c0_855 = arith.constant 0 : index
    %c1_856 = arith.constant 1 : index
    %1386 = vector.load %arg8[%c2_854, %c0_855, %c1_856] : memref<4x10x10xf32, #tpu.memory_space<vmem>>, vector<1x8x8xf32>
    %1387 = vector.shape_cast %1386 : vector<1x8x8xf32> to vector<8x8xf32>
    %1388 = vector.broadcast %1385 : f32 to vector<8x8xf32>
    %1389 = arith.mulf %1388, %1387 : vector<8x8xf32>
    %1390 = arith.addf %1384, %1389 : vector<8x8xf32>
    %c92_857 = arith.constant 92 : index
    %1391 = memref.load %arg3[%c92_857] : memref<144xf32, #tpu.memory_space<smem>>
    %c2_858 = arith.constant 2 : index
    %c0_859 = arith.constant 0 : index
    %c2_860 = arith.constant 2 : index
    %1392 = vector.load %arg8[%c2_858, %c0_859, %c2_860] : memref<4x10x10xf32, #tpu.memory_space<vmem>>, vector<1x8x8xf32>
    %1393 = vector.shape_cast %1392 : vector<1x8x8xf32> to vector<8x8xf32>
    %1394 = vector.broadcast %1391 : f32 to vector<8x8xf32>
    %1395 = arith.mulf %1394, %1393 : vector<8x8xf32>
    %1396 = arith.addf %1390, %1395 : vector<8x8xf32>
    %c93_861 = arith.constant 93 : index
    %1397 = memref.load %arg3[%c93_861] : memref<144xf32, #tpu.memory_space<smem>>
    %c2_862 = arith.constant 2 : index
    %c1_863 = arith.constant 1 : index
    %c0_864 = arith.constant 0 : index
    %1398 = vector.load %arg8[%c2_862, %c1_863, %c0_864] : memref<4x10x10xf32, #tpu.memory_space<vmem>>, vector<1x8x8xf32>
    %1399 = vector.shape_cast %1398 : vector<1x8x8xf32> to vector<8x8xf32>
    %1400 = vector.broadcast %1397 : f32 to vector<8x8xf32>
    %1401 = arith.mulf %1400, %1399 : vector<8x8xf32>
    %1402 = arith.addf %1396, %1401 : vector<8x8xf32>
    %c94_865 = arith.constant 94 : index
    %1403 = memref.load %arg3[%c94_865] : memref<144xf32, #tpu.memory_space<smem>>
    %c2_866 = arith.constant 2 : index
    %c1_867 = arith.constant 1 : index
    %c1_868 = arith.constant 1 : index
    %1404 = vector.load %arg8[%c2_866, %c1_867, %c1_868] : memref<4x10x10xf32, #tpu.memory_space<vmem>>, vector<1x8x8xf32>
    %1405 = vector.shape_cast %1404 : vector<1x8x8xf32> to vector<8x8xf32>
    %1406 = vector.broadcast %1403 : f32 to vector<8x8xf32>
    %1407 = arith.mulf %1406, %1405 : vector<8x8xf32>
    %1408 = arith.addf %1402, %1407 : vector<8x8xf32>
    %c95_869 = arith.constant 95 : index
    %1409 = memref.load %arg3[%c95_869] : memref<144xf32, #tpu.memory_space<smem>>
    %c2_870 = arith.constant 2 : index
    %c1_871 = arith.constant 1 : index
    %c2_872 = arith.constant 2 : index
    %1410 = vector.load %arg8[%c2_870, %c1_871, %c2_872] : memref<4x10x10xf32, #tpu.memory_space<vmem>>, vector<1x8x8xf32>
    %1411 = vector.shape_cast %1410 : vector<1x8x8xf32> to vector<8x8xf32>
    %1412 = vector.broadcast %1409 : f32 to vector<8x8xf32>
    %1413 = arith.mulf %1412, %1411 : vector<8x8xf32>
    %1414 = arith.addf %1408, %1413 : vector<8x8xf32>
    %c96_873 = arith.constant 96 : index
    %1415 = memref.load %arg3[%c96_873] : memref<144xf32, #tpu.memory_space<smem>>
    %c2_874 = arith.constant 2 : index
    %c2_875 = arith.constant 2 : index
    %c0_876 = arith.constant 0 : index
    %1416 = vector.load %arg8[%c2_874, %c2_875, %c0_876] : memref<4x10x10xf32, #tpu.memory_space<vmem>>, vector<1x8x8xf32>
    %1417 = vector.shape_cast %1416 : vector<1x8x8xf32> to vector<8x8xf32>
    %1418 = vector.broadcast %1415 : f32 to vector<8x8xf32>
    %1419 = arith.mulf %1418, %1417 : vector<8x8xf32>
    %1420 = arith.addf %1414, %1419 : vector<8x8xf32>
    %c97_877 = arith.constant 97 : index
    %1421 = memref.load %arg3[%c97_877] : memref<144xf32, #tpu.memory_space<smem>>
    %c2_878 = arith.constant 2 : index
    %c2_879 = arith.constant 2 : index
    %c1_880 = arith.constant 1 : index
    %1422 = vector.load %arg8[%c2_878, %c2_879, %c1_880] : memref<4x10x10xf32, #tpu.memory_space<vmem>>, vector<1x8x8xf32>
    %1423 = vector.shape_cast %1422 : vector<1x8x8xf32> to vector<8x8xf32>
    %1424 = vector.broadcast %1421 : f32 to vector<8x8xf32>
    %1425 = arith.mulf %1424, %1423 : vector<8x8xf32>
    %1426 = arith.addf %1420, %1425 : vector<8x8xf32>
    %c98_881 = arith.constant 98 : index
    %1427 = memref.load %arg3[%c98_881] : memref<144xf32, #tpu.memory_space<smem>>
    %c2_882 = arith.constant 2 : index
    %c2_883 = arith.constant 2 : index
    %c2_884 = arith.constant 2 : index
    %1428 = vector.load %arg8[%c2_882, %c2_883, %c2_884] : memref<4x10x10xf32, #tpu.memory_space<vmem>>, vector<1x8x8xf32>
    %1429 = vector.shape_cast %1428 : vector<1x8x8xf32> to vector<8x8xf32>
    %1430 = vector.broadcast %1427 : f32 to vector<8x8xf32>
    %1431 = arith.mulf %1430, %1429 : vector<8x8xf32>
    %1432 = arith.addf %1426, %1431 : vector<8x8xf32>
    %c99_885 = arith.constant 99 : index
    %1433 = memref.load %arg3[%c99_885] : memref<144xf32, #tpu.memory_space<smem>>
    %c3_886 = arith.constant 3 : index
    %c0_887 = arith.constant 0 : index
    %c0_888 = arith.constant 0 : index
    %1434 = vector.load %arg8[%c3_886, %c0_887, %c0_888] : memref<4x10x10xf32, #tpu.memory_space<vmem>>, vector<1x8x8xf32>
    %1435 = vector.shape_cast %1434 : vector<1x8x8xf32> to vector<8x8xf32>
    %1436 = vector.broadcast %1433 : f32 to vector<8x8xf32>
    %1437 = arith.mulf %1436, %1435 : vector<8x8xf32>
    %1438 = arith.addf %1432, %1437 : vector<8x8xf32>
    %c100_889 = arith.constant 100 : index
    %1439 = memref.load %arg3[%c100_889] : memref<144xf32, #tpu.memory_space<smem>>
    %c3_890 = arith.constant 3 : index
    %c0_891 = arith.constant 0 : index
    %c1_892 = arith.constant 1 : index
    %1440 = vector.load %arg8[%c3_890, %c0_891, %c1_892] : memref<4x10x10xf32, #tpu.memory_space<vmem>>, vector<1x8x8xf32>
    %1441 = vector.shape_cast %1440 : vector<1x8x8xf32> to vector<8x8xf32>
    %1442 = vector.broadcast %1439 : f32 to vector<8x8xf32>
    %1443 = arith.mulf %1442, %1441 : vector<8x8xf32>
    %1444 = arith.addf %1438, %1443 : vector<8x8xf32>
    %c101_893 = arith.constant 101 : index
    %1445 = memref.load %arg3[%c101_893] : memref<144xf32, #tpu.memory_space<smem>>
    %c3_894 = arith.constant 3 : index
    %c0_895 = arith.constant 0 : index
    %c2_896 = arith.constant 2 : index
    %1446 = vector.load %arg8[%c3_894, %c0_895, %c2_896] : memref<4x10x10xf32, #tpu.memory_space<vmem>>, vector<1x8x8xf32>
    %1447 = vector.shape_cast %1446 : vector<1x8x8xf32> to vector<8x8xf32>
    %1448 = vector.broadcast %1445 : f32 to vector<8x8xf32>
    %1449 = arith.mulf %1448, %1447 : vector<8x8xf32>
    %1450 = arith.addf %1444, %1449 : vector<8x8xf32>
    %c102_897 = arith.constant 102 : index
    %1451 = memref.load %arg3[%c102_897] : memref<144xf32, #tpu.memory_space<smem>>
    %c3_898 = arith.constant 3 : index
    %c1_899 = arith.constant 1 : index
    %c0_900 = arith.constant 0 : index
    %1452 = vector.load %arg8[%c3_898, %c1_899, %c0_900] : memref<4x10x10xf32, #tpu.memory_space<vmem>>, vector<1x8x8xf32>
    %1453 = vector.shape_cast %1452 : vector<1x8x8xf32> to vector<8x8xf32>
    %1454 = vector.broadcast %1451 : f32 to vector<8x8xf32>
    %1455 = arith.mulf %1454, %1453 : vector<8x8xf32>
    %1456 = arith.addf %1450, %1455 : vector<8x8xf32>
    %c103_901 = arith.constant 103 : index
    %1457 = memref.load %arg3[%c103_901] : memref<144xf32, #tpu.memory_space<smem>>
    %c3_902 = arith.constant 3 : index
    %c1_903 = arith.constant 1 : index
    %c1_904 = arith.constant 1 : index
    %1458 = vector.load %arg8[%c3_902, %c1_903, %c1_904] : memref<4x10x10xf32, #tpu.memory_space<vmem>>, vector<1x8x8xf32>
    %1459 = vector.shape_cast %1458 : vector<1x8x8xf32> to vector<8x8xf32>
    %1460 = vector.broadcast %1457 : f32 to vector<8x8xf32>
    %1461 = arith.mulf %1460, %1459 : vector<8x8xf32>
    %1462 = arith.addf %1456, %1461 : vector<8x8xf32>
    %c104_905 = arith.constant 104 : index
    %1463 = memref.load %arg3[%c104_905] : memref<144xf32, #tpu.memory_space<smem>>
    %c3_906 = arith.constant 3 : index
    %c1_907 = arith.constant 1 : index
    %c2_908 = arith.constant 2 : index
    %1464 = vector.load %arg8[%c3_906, %c1_907, %c2_908] : memref<4x10x10xf32, #tpu.memory_space<vmem>>, vector<1x8x8xf32>
    %1465 = vector.shape_cast %1464 : vector<1x8x8xf32> to vector<8x8xf32>
    %1466 = vector.broadcast %1463 : f32 to vector<8x8xf32>
    %1467 = arith.mulf %1466, %1465 : vector<8x8xf32>
    %1468 = arith.addf %1462, %1467 : vector<8x8xf32>
    %c105_909 = arith.constant 105 : index
    %1469 = memref.load %arg3[%c105_909] : memref<144xf32, #tpu.memory_space<smem>>
    %c3_910 = arith.constant 3 : index
    %c2_911 = arith.constant 2 : index
    %c0_912 = arith.constant 0 : index
    %1470 = vector.load %arg8[%c3_910, %c2_911, %c0_912] : memref<4x10x10xf32, #tpu.memory_space<vmem>>, vector<1x8x8xf32>
    %1471 = vector.shape_cast %1470 : vector<1x8x8xf32> to vector<8x8xf32>
    %1472 = vector.broadcast %1469 : f32 to vector<8x8xf32>
    %1473 = arith.mulf %1472, %1471 : vector<8x8xf32>
    %1474 = arith.addf %1468, %1473 : vector<8x8xf32>
    %c106_913 = arith.constant 106 : index
    %1475 = memref.load %arg3[%c106_913] : memref<144xf32, #tpu.memory_space<smem>>
    %c3_914 = arith.constant 3 : index
    %c2_915 = arith.constant 2 : index
    %c1_916 = arith.constant 1 : index
    %1476 = vector.load %arg8[%c3_914, %c2_915, %c1_916] : memref<4x10x10xf32, #tpu.memory_space<vmem>>, vector<1x8x8xf32>
    %1477 = vector.shape_cast %1476 : vector<1x8x8xf32> to vector<8x8xf32>
    %1478 = vector.broadcast %1475 : f32 to vector<8x8xf32>
    %1479 = arith.mulf %1478, %1477 : vector<8x8xf32>
    %1480 = arith.addf %1474, %1479 : vector<8x8xf32>
    %c107_917 = arith.constant 107 : index
    %1481 = memref.load %arg3[%c107_917] : memref<144xf32, #tpu.memory_space<smem>>
    %c3_918 = arith.constant 3 : index
    %c2_919 = arith.constant 2 : index
    %c2_920 = arith.constant 2 : index
    %1482 = vector.load %arg8[%c3_918, %c2_919, %c2_920] : memref<4x10x10xf32, #tpu.memory_space<vmem>>, vector<1x8x8xf32>
    %1483 = vector.shape_cast %1482 : vector<1x8x8xf32> to vector<8x8xf32>
    %1484 = vector.broadcast %1481 : f32 to vector<8x8xf32>
    %1485 = arith.mulf %1484, %1483 : vector<8x8xf32>
    %1486 = arith.addf %1480, %1485 : vector<8x8xf32>
    %cst_921 = arith.constant 0.000000e+00 : f32
    %1487 = vector.broadcast %cst_921 : f32 to vector<8x8xf32>
    %1488 = arith.maximumf %1486, %1487 : vector<8x8xf32>
    %c0_922 = arith.constant 0 : index
    %c2_923 = arith.constant 2 : index
    %c0_924 = arith.constant 0 : index
    %c0_925 = arith.constant 0 : index
    %1489 = vector.load %arg6[%c0_922, %c2_923, %c0_924, %c0_925] : memref<1x4x8x8xf32, #tpu.memory_space<vmem>>, vector<1x1x8x8xf32>
    %1490 = vector.shape_cast %1489 : vector<1x1x8x8xf32> to vector<8x8xf32>
    %1491 = vector.shape_cast %1488 : vector<8x8xf32> to vector<1x1x8x8xf32>
    tpu.vector_store %arg6[%c0_922, %c2_923, %c0_924, %c0_925], %1491 {strides = array<i32>} : memref<1x4x8x8xf32, #tpu.memory_space<vmem>>, vector<1x1x8x8xf32>,
    %cst_926 = arith.constant 0.000000e+00 : f32
    %1492 = vector.broadcast %cst_926 : f32 to vector<8x8xf32>
    %c3_927 = arith.constant 3 : index
    %1493 = memref.load %arg4[%c3_927] : memref<4xf32, #tpu.memory_space<smem>>
    %1494 = vector.broadcast %1493 : f32 to vector<8x8xf32>
    %1495 = arith.addf %1492, %1494 : vector<8x8xf32>
    %c108 = arith.constant 108 : index
    %1496 = memref.load %arg3[%c108] : memref<144xf32, #tpu.memory_space<smem>>
    %c0_928 = arith.constant 0 : index
    %c0_929 = arith.constant 0 : index
    %c0_930 = arith.constant 0 : index
    %1497 = vector.load %arg8[%c0_928, %c0_929, %c0_930] : memref<4x10x10xf32, #tpu.memory_space<vmem>>, vector<1x8x8xf32>
    %1498 = vector.shape_cast %1497 : vector<1x8x8xf32> to vector<8x8xf32>
    %1499 = vector.broadcast %1496 : f32 to vector<8x8xf32>
    %1500 = arith.mulf %1499, %1498 : vector<8x8xf32>
    %1501 = arith.addf %1495, %1500 : vector<8x8xf32>
    %c109 = arith.constant 109 : index
    %1502 = memref.load %arg3[%c109] : memref<144xf32, #tpu.memory_space<smem>>
    %c0_931 = arith.constant 0 : index
    %c0_932 = arith.constant 0 : index
    %c1_933 = arith.constant 1 : index
    %1503 = vector.load %arg8[%c0_931, %c0_932, %c1_933] : memref<4x10x10xf32, #tpu.memory_space<vmem>>, vector<1x8x8xf32>
    %1504 = vector.shape_cast %1503 : vector<1x8x8xf32> to vector<8x8xf32>
    %1505 = vector.broadcast %1502 : f32 to vector<8x8xf32>
    %1506 = arith.mulf %1505, %1504 : vector<8x8xf32>
    %1507 = arith.addf %1501, %1506 : vector<8x8xf32>
    %c110 = arith.constant 110 : index
    %1508 = memref.load %arg3[%c110] : memref<144xf32, #tpu.memory_space<smem>>
    %c0_934 = arith.constant 0 : index
    %c0_935 = arith.constant 0 : index
    %c2_936 = arith.constant 2 : index
    %1509 = vector.load %arg8[%c0_934, %c0_935, %c2_936] : memref<4x10x10xf32, #tpu.memory_space<vmem>>, vector<1x8x8xf32>
    %1510 = vector.shape_cast %1509 : vector<1x8x8xf32> to vector<8x8xf32>
    %1511 = vector.broadcast %1508 : f32 to vector<8x8xf32>
    %1512 = arith.mulf %1511, %1510 : vector<8x8xf32>
    %1513 = arith.addf %1507, %1512 : vector<8x8xf32>
    %c111 = arith.constant 111 : index
    %1514 = memref.load %arg3[%c111] : memref<144xf32, #tpu.memory_space<smem>>
    %c0_937 = arith.constant 0 : index
    %c1_938 = arith.constant 1 : index
    %c0_939 = arith.constant 0 : index
    %1515 = vector.load %arg8[%c0_937, %c1_938, %c0_939] : memref<4x10x10xf32, #tpu.memory_space<vmem>>, vector<1x8x8xf32>
    %1516 = vector.shape_cast %1515 : vector<1x8x8xf32> to vector<8x8xf32>
    %1517 = vector.broadcast %1514 : f32 to vector<8x8xf32>
    %1518 = arith.mulf %1517, %1516 : vector<8x8xf32>
    %1519 = arith.addf %1513, %1518 : vector<8x8xf32>
    %c112 = arith.constant 112 : index
    %1520 = memref.load %arg3[%c112] : memref<144xf32, #tpu.memory_space<smem>>
    %c0_940 = arith.constant 0 : index
    %c1_941 = arith.constant 1 : index
    %c1_942 = arith.constant 1 : index
    %1521 = vector.load %arg8[%c0_940, %c1_941, %c1_942] : memref<4x10x10xf32, #tpu.memory_space<vmem>>, vector<1x8x8xf32>
    %1522 = vector.shape_cast %1521 : vector<1x8x8xf32> to vector<8x8xf32>
    %1523 = vector.broadcast %1520 : f32 to vector<8x8xf32>
    %1524 = arith.mulf %1523, %1522 : vector<8x8xf32>
    %1525 = arith.addf %1519, %1524 : vector<8x8xf32>
    %c113 = arith.constant 113 : index
    %1526 = memref.load %arg3[%c113] : memref<144xf32, #tpu.memory_space<smem>>
    %c0_943 = arith.constant 0 : index
    %c1_944 = arith.constant 1 : index
    %c2_945 = arith.constant 2 : index
    %1527 = vector.load %arg8[%c0_943, %c1_944, %c2_945] : memref<4x10x10xf32, #tpu.memory_space<vmem>>, vector<1x8x8xf32>
    %1528 = vector.shape_cast %1527 : vector<1x8x8xf32> to vector<8x8xf32>
    %1529 = vector.broadcast %1526 : f32 to vector<8x8xf32>
    %1530 = arith.mulf %1529, %1528 : vector<8x8xf32>
    %1531 = arith.addf %1525, %1530 : vector<8x8xf32>
    %c114 = arith.constant 114 : index
    %1532 = memref.load %arg3[%c114] : memref<144xf32, #tpu.memory_space<smem>>
    %c0_946 = arith.constant 0 : index
    %c2_947 = arith.constant 2 : index
    %c0_948 = arith.constant 0 : index
    %1533 = vector.load %arg8[%c0_946, %c2_947, %c0_948] : memref<4x10x10xf32, #tpu.memory_space<vmem>>, vector<1x8x8xf32>
    %1534 = vector.shape_cast %1533 : vector<1x8x8xf32> to vector<8x8xf32>
    %1535 = vector.broadcast %1532 : f32 to vector<8x8xf32>
    %1536 = arith.mulf %1535, %1534 : vector<8x8xf32>
    %1537 = arith.addf %1531, %1536 : vector<8x8xf32>
    %c115 = arith.constant 115 : index
    %1538 = memref.load %arg3[%c115] : memref<144xf32, #tpu.memory_space<smem>>
    %c0_949 = arith.constant 0 : index
    %c2_950 = arith.constant 2 : index
    %c1_951 = arith.constant 1 : index
    %1539 = vector.load %arg8[%c0_949, %c2_950, %c1_951] : memref<4x10x10xf32, #tpu.memory_space<vmem>>, vector<1x8x8xf32>
    %1540 = vector.shape_cast %1539 : vector<1x8x8xf32> to vector<8x8xf32>
    %1541 = vector.broadcast %1538 : f32 to vector<8x8xf32>
    %1542 = arith.mulf %1541, %1540 : vector<8x8xf32>
    %1543 = arith.addf %1537, %1542 : vector<8x8xf32>
    %c116 = arith.constant 116 : index
    %1544 = memref.load %arg3[%c116] : memref<144xf32, #tpu.memory_space<smem>>
    %c0_952 = arith.constant 0 : index
    %c2_953 = arith.constant 2 : index
    %c2_954 = arith.constant 2 : index
    %1545 = vector.load %arg8[%c0_952, %c2_953, %c2_954] : memref<4x10x10xf32, #tpu.memory_space<vmem>>, vector<1x8x8xf32>
    %1546 = vector.shape_cast %1545 : vector<1x8x8xf32> to vector<8x8xf32>
    %1547 = vector.broadcast %1544 : f32 to vector<8x8xf32>
    %1548 = arith.mulf %1547, %1546 : vector<8x8xf32>
    %1549 = arith.addf %1543, %1548 : vector<8x8xf32>
    %c117 = arith.constant 117 : index
    %1550 = memref.load %arg3[%c117] : memref<144xf32, #tpu.memory_space<smem>>
    %c1_955 = arith.constant 1 : index
    %c0_956 = arith.constant 0 : index
    %c0_957 = arith.constant 0 : index
    %1551 = vector.load %arg8[%c1_955, %c0_956, %c0_957] : memref<4x10x10xf32, #tpu.memory_space<vmem>>, vector<1x8x8xf32>
    %1552 = vector.shape_cast %1551 : vector<1x8x8xf32> to vector<8x8xf32>
    %1553 = vector.broadcast %1550 : f32 to vector<8x8xf32>
    %1554 = arith.mulf %1553, %1552 : vector<8x8xf32>
    %1555 = arith.addf %1549, %1554 : vector<8x8xf32>
    %c118 = arith.constant 118 : index
    %1556 = memref.load %arg3[%c118] : memref<144xf32, #tpu.memory_space<smem>>
    %c1_958 = arith.constant 1 : index
    %c0_959 = arith.constant 0 : index
    %c1_960 = arith.constant 1 : index
    %1557 = vector.load %arg8[%c1_958, %c0_959, %c1_960] : memref<4x10x10xf32, #tpu.memory_space<vmem>>, vector<1x8x8xf32>
    %1558 = vector.shape_cast %1557 : vector<1x8x8xf32> to vector<8x8xf32>
    %1559 = vector.broadcast %1556 : f32 to vector<8x8xf32>
    %1560 = arith.mulf %1559, %1558 : vector<8x8xf32>
    %1561 = arith.addf %1555, %1560 : vector<8x8xf32>
    %c119 = arith.constant 119 : index
    %1562 = memref.load %arg3[%c119] : memref<144xf32, #tpu.memory_space<smem>>
    %c1_961 = arith.constant 1 : index
    %c0_962 = arith.constant 0 : index
    %c2_963 = arith.constant 2 : index
    %1563 = vector.load %arg8[%c1_961, %c0_962, %c2_963] : memref<4x10x10xf32, #tpu.memory_space<vmem>>, vector<1x8x8xf32>
    %1564 = vector.shape_cast %1563 : vector<1x8x8xf32> to vector<8x8xf32>
    %1565 = vector.broadcast %1562 : f32 to vector<8x8xf32>
    %1566 = arith.mulf %1565, %1564 : vector<8x8xf32>
    %1567 = arith.addf %1561, %1566 : vector<8x8xf32>
    %c120 = arith.constant 120 : index
    %1568 = memref.load %arg3[%c120] : memref<144xf32, #tpu.memory_space<smem>>
    %c1_964 = arith.constant 1 : index
    %c1_965 = arith.constant 1 : index
    %c0_966 = arith.constant 0 : index
    %1569 = vector.load %arg8[%c1_964, %c1_965, %c0_966] : memref<4x10x10xf32, #tpu.memory_space<vmem>>, vector<1x8x8xf32>
    %1570 = vector.shape_cast %1569 : vector<1x8x8xf32> to vector<8x8xf32>
    %1571 = vector.broadcast %1568 : f32 to vector<8x8xf32>
    %1572 = arith.mulf %1571, %1570 : vector<8x8xf32>
    %1573 = arith.addf %1567, %1572 : vector<8x8xf32>
    %c121 = arith.constant 121 : index
    %1574 = memref.load %arg3[%c121] : memref<144xf32, #tpu.memory_space<smem>>
    %c1_967 = arith.constant 1 : index
    %c1_968 = arith.constant 1 : index
    %c1_969 = arith.constant 1 : index
    %1575 = vector.load %arg8[%c1_967, %c1_968, %c1_969] : memref<4x10x10xf32, #tpu.memory_space<vmem>>, vector<1x8x8xf32>
    %1576 = vector.shape_cast %1575 : vector<1x8x8xf32> to vector<8x8xf32>
    %1577 = vector.broadcast %1574 : f32 to vector<8x8xf32>
    %1578 = arith.mulf %1577, %1576 : vector<8x8xf32>
    %1579 = arith.addf %1573, %1578 : vector<8x8xf32>
    %c122 = arith.constant 122 : index
    %1580 = memref.load %arg3[%c122] : memref<144xf32, #tpu.memory_space<smem>>
    %c1_970 = arith.constant 1 : index
    %c1_971 = arith.constant 1 : index
    %c2_972 = arith.constant 2 : index
    %1581 = vector.load %arg8[%c1_970, %c1_971, %c2_972] : memref<4x10x10xf32, #tpu.memory_space<vmem>>, vector<1x8x8xf32>
    %1582 = vector.shape_cast %1581 : vector<1x8x8xf32> to vector<8x8xf32>
    %1583 = vector.broadcast %1580 : f32 to vector<8x8xf32>
    %1584 = arith.mulf %1583, %1582 : vector<8x8xf32>
    %1585 = arith.addf %1579, %1584 : vector<8x8xf32>
    %c123 = arith.constant 123 : index
    %1586 = memref.load %arg3[%c123] : memref<144xf32, #tpu.memory_space<smem>>
    %c1_973 = arith.constant 1 : index
    %c2_974 = arith.constant 2 : index
    %c0_975 = arith.constant 0 : index
    %1587 = vector.load %arg8[%c1_973, %c2_974, %c0_975] : memref<4x10x10xf32, #tpu.memory_space<vmem>>, vector<1x8x8xf32>
    %1588 = vector.shape_cast %1587 : vector<1x8x8xf32> to vector<8x8xf32>
    %1589 = vector.broadcast %1586 : f32 to vector<8x8xf32>
    %1590 = arith.mulf %1589, %1588 : vector<8x8xf32>
    %1591 = arith.addf %1585, %1590 : vector<8x8xf32>
    %c124 = arith.constant 124 : index
    %1592 = memref.load %arg3[%c124] : memref<144xf32, #tpu.memory_space<smem>>
    %c1_976 = arith.constant 1 : index
    %c2_977 = arith.constant 2 : index
    %c1_978 = arith.constant 1 : index
    %1593 = vector.load %arg8[%c1_976, %c2_977, %c1_978] : memref<4x10x10xf32, #tpu.memory_space<vmem>>, vector<1x8x8xf32>
    %1594 = vector.shape_cast %1593 : vector<1x8x8xf32> to vector<8x8xf32>
    %1595 = vector.broadcast %1592 : f32 to vector<8x8xf32>
    %1596 = arith.mulf %1595, %1594 : vector<8x8xf32>
    %1597 = arith.addf %1591, %1596 : vector<8x8xf32>
    %c125 = arith.constant 125 : index
    %1598 = memref.load %arg3[%c125] : memref<144xf32, #tpu.memory_space<smem>>
    %c1_979 = arith.constant 1 : index
    %c2_980 = arith.constant 2 : index
    %c2_981 = arith.constant 2 : index
    %1599 = vector.load %arg8[%c1_979, %c2_980, %c2_981] : memref<4x10x10xf32, #tpu.memory_space<vmem>>, vector<1x8x8xf32>
    %1600 = vector.shape_cast %1599 : vector<1x8x8xf32> to vector<8x8xf32>
    %1601 = vector.broadcast %1598 : f32 to vector<8x8xf32>
    %1602 = arith.mulf %1601, %1600 : vector<8x8xf32>
    %1603 = arith.addf %1597, %1602 : vector<8x8xf32>
    %c126 = arith.constant 126 : index
    %1604 = memref.load %arg3[%c126] : memref<144xf32, #tpu.memory_space<smem>>
    %c2_982 = arith.constant 2 : index
    %c0_983 = arith.constant 0 : index
    %c0_984 = arith.constant 0 : index
    %1605 = vector.load %arg8[%c2_982, %c0_983, %c0_984] : memref<4x10x10xf32, #tpu.memory_space<vmem>>, vector<1x8x8xf32>
    %1606 = vector.shape_cast %1605 : vector<1x8x8xf32> to vector<8x8xf32>
    %1607 = vector.broadcast %1604 : f32 to vector<8x8xf32>
    %1608 = arith.mulf %1607, %1606 : vector<8x8xf32>
    %1609 = arith.addf %1603, %1608 : vector<8x8xf32>
    %c127 = arith.constant 127 : index
    %1610 = memref.load %arg3[%c127] : memref<144xf32, #tpu.memory_space<smem>>
    %c2_985 = arith.constant 2 : index
    %c0_986 = arith.constant 0 : index
    %c1_987 = arith.constant 1 : index
    %1611 = vector.load %arg8[%c2_985, %c0_986, %c1_987] : memref<4x10x10xf32, #tpu.memory_space<vmem>>, vector<1x8x8xf32>
    %1612 = vector.shape_cast %1611 : vector<1x8x8xf32> to vector<8x8xf32>
    %1613 = vector.broadcast %1610 : f32 to vector<8x8xf32>
    %1614 = arith.mulf %1613, %1612 : vector<8x8xf32>
    %1615 = arith.addf %1609, %1614 : vector<8x8xf32>
    %c128 = arith.constant 128 : index
    %1616 = memref.load %arg3[%c128] : memref<144xf32, #tpu.memory_space<smem>>
    %c2_988 = arith.constant 2 : index
    %c0_989 = arith.constant 0 : index
    %c2_990 = arith.constant 2 : index
    %1617 = vector.load %arg8[%c2_988, %c0_989, %c2_990] : memref<4x10x10xf32, #tpu.memory_space<vmem>>, vector<1x8x8xf32>
    %1618 = vector.shape_cast %1617 : vector<1x8x8xf32> to vector<8x8xf32>
    %1619 = vector.broadcast %1616 : f32 to vector<8x8xf32>
    %1620 = arith.mulf %1619, %1618 : vector<8x8xf32>
    %1621 = arith.addf %1615, %1620 : vector<8x8xf32>
    %c129 = arith.constant 129 : index
    %1622 = memref.load %arg3[%c129] : memref<144xf32, #tpu.memory_space<smem>>
    %c2_991 = arith.constant 2 : index
    %c1_992 = arith.constant 1 : index
    %c0_993 = arith.constant 0 : index
    %1623 = vector.load %arg8[%c2_991, %c1_992, %c0_993] : memref<4x10x10xf32, #tpu.memory_space<vmem>>, vector<1x8x8xf32>
    %1624 = vector.shape_cast %1623 : vector<1x8x8xf32> to vector<8x8xf32>
    %1625 = vector.broadcast %1622 : f32 to vector<8x8xf32>
    %1626 = arith.mulf %1625, %1624 : vector<8x8xf32>
    %1627 = arith.addf %1621, %1626 : vector<8x8xf32>
    %c130 = arith.constant 130 : index
    %1628 = memref.load %arg3[%c130] : memref<144xf32, #tpu.memory_space<smem>>
    %c2_994 = arith.constant 2 : index
    %c1_995 = arith.constant 1 : index
    %c1_996 = arith.constant 1 : index
    %1629 = vector.load %arg8[%c2_994, %c1_995, %c1_996] : memref<4x10x10xf32, #tpu.memory_space<vmem>>, vector<1x8x8xf32>
    %1630 = vector.shape_cast %1629 : vector<1x8x8xf32> to vector<8x8xf32>
    %1631 = vector.broadcast %1628 : f32 to vector<8x8xf32>
    %1632 = arith.mulf %1631, %1630 : vector<8x8xf32>
    %1633 = arith.addf %1627, %1632 : vector<8x8xf32>
    %c131 = arith.constant 131 : index
    %1634 = memref.load %arg3[%c131] : memref<144xf32, #tpu.memory_space<smem>>
    %c2_997 = arith.constant 2 : index
    %c1_998 = arith.constant 1 : index
    %c2_999 = arith.constant 2 : index
    %1635 = vector.load %arg8[%c2_997, %c1_998, %c2_999] : memref<4x10x10xf32, #tpu.memory_space<vmem>>, vector<1x8x8xf32>
    %1636 = vector.shape_cast %1635 : vector<1x8x8xf32> to vector<8x8xf32>
    %1637 = vector.broadcast %1634 : f32 to vector<8x8xf32>
    %1638 = arith.mulf %1637, %1636 : vector<8x8xf32>
    %1639 = arith.addf %1633, %1638 : vector<8x8xf32>
    %c132 = arith.constant 132 : index
    %1640 = memref.load %arg3[%c132] : memref<144xf32, #tpu.memory_space<smem>>
    %c2_1000 = arith.constant 2 : index
    %c2_1001 = arith.constant 2 : index
    %c0_1002 = arith.constant 0 : index
    %1641 = vector.load %arg8[%c2_1000, %c2_1001, %c0_1002] : memref<4x10x10xf32, #tpu.memory_space<vmem>>, vector<1x8x8xf32>
    %1642 = vector.shape_cast %1641 : vector<1x8x8xf32> to vector<8x8xf32>
    %1643 = vector.broadcast %1640 : f32 to vector<8x8xf32>
    %1644 = arith.mulf %1643, %1642 : vector<8x8xf32>
    %1645 = arith.addf %1639, %1644 : vector<8x8xf32>
    %c133 = arith.constant 133 : index
    %1646 = memref.load %arg3[%c133] : memref<144xf32, #tpu.memory_space<smem>>
    %c2_1003 = arith.constant 2 : index
    %c2_1004 = arith.constant 2 : index
    %c1_1005 = arith.constant 1 : index
    %1647 = vector.load %arg8[%c2_1003, %c2_1004, %c1_1005] : memref<4x10x10xf32, #tpu.memory_space<vmem>>, vector<1x8x8xf32>
    %1648 = vector.shape_cast %1647 : vector<1x8x8xf32> to vector<8x8xf32>
    %1649 = vector.broadcast %1646 : f32 to vector<8x8xf32>
    %1650 = arith.mulf %1649, %1648 : vector<8x8xf32>
    %1651 = arith.addf %1645, %1650 : vector<8x8xf32>
    %c134 = arith.constant 134 : index
    %1652 = memref.load %arg3[%c134] : memref<144xf32, #tpu.memory_space<smem>>
    %c2_1006 = arith.constant 2 : index
    %c2_1007 = arith.constant 2 : index
    %c2_1008 = arith.constant 2 : index
    %1653 = vector.load %arg8[%c2_1006, %c2_1007, %c2_1008] : memref<4x10x10xf32, #tpu.memory_space<vmem>>, vector<1x8x8xf32>
    %1654 = vector.shape_cast %1653 : vector<1x8x8xf32> to vector<8x8xf32>
    %1655 = vector.broadcast %1652 : f32 to vector<8x8xf32>
    %1656 = arith.mulf %1655, %1654 : vector<8x8xf32>
    %1657 = arith.addf %1651, %1656 : vector<8x8xf32>
    %c135 = arith.constant 135 : index
    %1658 = memref.load %arg3[%c135] : memref<144xf32, #tpu.memory_space<smem>>
    %c3_1009 = arith.constant 3 : index
    %c0_1010 = arith.constant 0 : index
    %c0_1011 = arith.constant 0 : index
    %1659 = vector.load %arg8[%c3_1009, %c0_1010, %c0_1011] : memref<4x10x10xf32, #tpu.memory_space<vmem>>, vector<1x8x8xf32>
    %1660 = vector.shape_cast %1659 : vector<1x8x8xf32> to vector<8x8xf32>
    %1661 = vector.broadcast %1658 : f32 to vector<8x8xf32>
    %1662 = arith.mulf %1661, %1660 : vector<8x8xf32>
    %1663 = arith.addf %1657, %1662 : vector<8x8xf32>
    %c136 = arith.constant 136 : index
    %1664 = memref.load %arg3[%c136] : memref<144xf32, #tpu.memory_space<smem>>
    %c3_1012 = arith.constant 3 : index
    %c0_1013 = arith.constant 0 : index
    %c1_1014 = arith.constant 1 : index
    %1665 = vector.load %arg8[%c3_1012, %c0_1013, %c1_1014] : memref<4x10x10xf32, #tpu.memory_space<vmem>>, vector<1x8x8xf32>
    %1666 = vector.shape_cast %1665 : vector<1x8x8xf32> to vector<8x8xf32>
    %1667 = vector.broadcast %1664 : f32 to vector<8x8xf32>
    %1668 = arith.mulf %1667, %1666 : vector<8x8xf32>
    %1669 = arith.addf %1663, %1668 : vector<8x8xf32>
    %c137 = arith.constant 137 : index
    %1670 = memref.load %arg3[%c137] : memref<144xf32, #tpu.memory_space<smem>>
    %c3_1015 = arith.constant 3 : index
    %c0_1016 = arith.constant 0 : index
    %c2_1017 = arith.constant 2 : index
    %1671 = vector.load %arg8[%c3_1015, %c0_1016, %c2_1017] : memref<4x10x10xf32, #tpu.memory_space<vmem>>, vector<1x8x8xf32>
    %1672 = vector.shape_cast %1671 : vector<1x8x8xf32> to vector<8x8xf32>
    %1673 = vector.broadcast %1670 : f32 to vector<8x8xf32>
    %1674 = arith.mulf %1673, %1672 : vector<8x8xf32>
    %1675 = arith.addf %1669, %1674 : vector<8x8xf32>
    %c138 = arith.constant 138 : index
    %1676 = memref.load %arg3[%c138] : memref<144xf32, #tpu.memory_space<smem>>
    %c3_1018 = arith.constant 3 : index
    %c1_1019 = arith.constant 1 : index
    %c0_1020 = arith.constant 0 : index
    %1677 = vector.load %arg8[%c3_1018, %c1_1019, %c0_1020] : memref<4x10x10xf32, #tpu.memory_space<vmem>>, vector<1x8x8xf32>
    %1678 = vector.shape_cast %1677 : vector<1x8x8xf32> to vector<8x8xf32>
    %1679 = vector.broadcast %1676 : f32 to vector<8x8xf32>
    %1680 = arith.mulf %1679, %1678 : vector<8x8xf32>
    %1681 = arith.addf %1675, %1680 : vector<8x8xf32>
    %c139 = arith.constant 139 : index
    %1682 = memref.load %arg3[%c139] : memref<144xf32, #tpu.memory_space<smem>>
    %c3_1021 = arith.constant 3 : index
    %c1_1022 = arith.constant 1 : index
    %c1_1023 = arith.constant 1 : index
    %1683 = vector.load %arg8[%c3_1021, %c1_1022, %c1_1023] : memref<4x10x10xf32, #tpu.memory_space<vmem>>, vector<1x8x8xf32>
    %1684 = vector.shape_cast %1683 : vector<1x8x8xf32> to vector<8x8xf32>
    %1685 = vector.broadcast %1682 : f32 to vector<8x8xf32>
    %1686 = arith.mulf %1685, %1684 : vector<8x8xf32>
    %1687 = arith.addf %1681, %1686 : vector<8x8xf32>
    %c140 = arith.constant 140 : index
    %1688 = memref.load %arg3[%c140] : memref<144xf32, #tpu.memory_space<smem>>
    %c3_1024 = arith.constant 3 : index
    %c1_1025 = arith.constant 1 : index
    %c2_1026 = arith.constant 2 : index
    %1689 = vector.load %arg8[%c3_1024, %c1_1025, %c2_1026] : memref<4x10x10xf32, #tpu.memory_space<vmem>>, vector<1x8x8xf32>
    %1690 = vector.shape_cast %1689 : vector<1x8x8xf32> to vector<8x8xf32>
    %1691 = vector.broadcast %1688 : f32 to vector<8x8xf32>
    %1692 = arith.mulf %1691, %1690 : vector<8x8xf32>
    %1693 = arith.addf %1687, %1692 : vector<8x8xf32>
    %c141 = arith.constant 141 : index
    %1694 = memref.load %arg3[%c141] : memref<144xf32, #tpu.memory_space<smem>>
    %c3_1027 = arith.constant 3 : index
    %c2_1028 = arith.constant 2 : index
    %c0_1029 = arith.constant 0 : index
    %1695 = vector.load %arg8[%c3_1027, %c2_1028, %c0_1029] : memref<4x10x10xf32, #tpu.memory_space<vmem>>, vector<1x8x8xf32>
    %1696 = vector.shape_cast %1695 : vector<1x8x8xf32> to vector<8x8xf32>
    %1697 = vector.broadcast %1694 : f32 to vector<8x8xf32>
    %1698 = arith.mulf %1697, %1696 : vector<8x8xf32>
    %1699 = arith.addf %1693, %1698 : vector<8x8xf32>
    %c142 = arith.constant 142 : index
    %1700 = memref.load %arg3[%c142] : memref<144xf32, #tpu.memory_space<smem>>
    %c3_1030 = arith.constant 3 : index
    %c2_1031 = arith.constant 2 : index
    %c1_1032 = arith.constant 1 : index
    %1701 = vector.load %arg8[%c3_1030, %c2_1031, %c1_1032] : memref<4x10x10xf32, #tpu.memory_space<vmem>>, vector<1x8x8xf32>
    %1702 = vector.shape_cast %1701 : vector<1x8x8xf32> to vector<8x8xf32>
    %1703 = vector.broadcast %1700 : f32 to vector<8x8xf32>
    %1704 = arith.mulf %1703, %1702 : vector<8x8xf32>
    %1705 = arith.addf %1699, %1704 : vector<8x8xf32>
    %c143 = arith.constant 143 : index
    %1706 = memref.load %arg3[%c143] : memref<144xf32, #tpu.memory_space<smem>>
    %c3_1033 = arith.constant 3 : index
    %c2_1034 = arith.constant 2 : index
    %c2_1035 = arith.constant 2 : index
    %1707 = vector.load %arg8[%c3_1033, %c2_1034, %c2_1035] : memref<4x10x10xf32, #tpu.memory_space<vmem>>, vector<1x8x8xf32>
    %1708 = vector.shape_cast %1707 : vector<1x8x8xf32> to vector<8x8xf32>
    %1709 = vector.broadcast %1706 : f32 to vector<8x8xf32>
    %1710 = arith.mulf %1709, %1708 : vector<8x8xf32>
    %1711 = arith.addf %1705, %1710 : vector<8x8xf32>
    %cst_1036 = arith.constant 0.000000e+00 : f32
    %1712 = vector.broadcast %cst_1036 : f32 to vector<8x8xf32>
    %1713 = arith.maximumf %1711, %1712 : vector<8x8xf32>
    %c0_1037 = arith.constant 0 : index
    %c3_1038 = arith.constant 3 : index
    %c0_1039 = arith.constant 0 : index
    %c0_1040 = arith.constant 0 : index
    %1714 = vector.load %arg6[%c0_1037, %c3_1038, %c0_1039, %c0_1040] : memref<1x4x8x8xf32, #tpu.memory_space<vmem>>, vector<1x1x8x8xf32>
    %1715 = vector.shape_cast %1714 : vector<1x1x8x8xf32> to vector<8x8xf32>
    %1716 = vector.shape_cast %1713 : vector<8x8xf32> to vector<1x1x8x8xf32>
    tpu.vector_store %arg6[%c0_1037, %c3_1038, %c0_1039, %c0_1040], %1716 {strides = array<i32>} : memref<1x4x8x8xf32, #tpu.memory_space<vmem>>, vector<1x1x8x8xf32>,
    return
  }
  func.func @transform_0(%arg0: i32, %arg1: memref<108xf32, #tpu.memory_space<smem>>, %arg2: memref<4xf32, #tpu.memory_space<smem>>, %arg3: memref<144xf32, #tpu.memory_space<smem>>, %arg4: memref<4xf32, #tpu.memory_space<smem>>) -> (i32, i32, i32, i32) {
    %c0_i32 = arith.constant 0 : i32
    %c0_i32_0 = arith.constant 0 : i32
    %c0_i32_1 = arith.constant 0 : i32
    %c0_i32_2 = arith.constant 0 : i32
    return %arg0, %c0_i32, %c0_i32_0, %c0_i32_1 : i32, i32, i32, i32
  }
  func.func @transform_1(%arg0: i32, %arg1: memref<108xf32, #tpu.memory_space<smem>>, %arg2: memref<4xf32, #tpu.memory_space<smem>>, %arg3: memref<144xf32, #tpu.memory_space<smem>>, %arg4: memref<4xf32, #tpu.memory_space<smem>>) -> (i32, i32, i32, i32) {
    %c0_i32 = arith.constant 0 : i32
    %c0_i32_0 = arith.constant 0 : i32
    %c0_i32_1 = arith.constant 0 : i32
    %c0_i32_2 = arith.constant 0 : i32
    return %arg0, %c0_i32, %c0_i32_0, %c0_i32_1 : i32, i32, i32, i32
  }
}

</mosaic_0001>

<bundles_post_ra>
// kernel: down_conv.1
= control target key start
LH: loop header
LB: loop body
LE: loop exit
PB: predicated region body
PF: predicated region fallthrough
CT: control target
= control target key end

     0   :  { %s7166_s0 = inlined_call_operand.vmem [shape: f32[108], index: 0, kind: input, shape index: {}]   ;;  %s7167_s4 = inlined_call_operand.vmem [shape: f32[2,3,8,32], index: 4, kind: input, shape index: {}]   ;;  %s7168_s5 = inlined_call_operand.hbm [shape: f32[2,4,8,8], index: 5, kind: output, shape index: {}]   ;;  %s7169_s1 = inlined_call_operand.vmem [shape: f32[4], index: 1, kind: input, shape index: {}]   ;;  %s7170_s2 = inlined_call_operand.vmem [shape: f32[144], index: 2, kind: input, shape index: {}]   ;;  %s7171_s3 = inlined_call_operand.vmem [shape: f32[4], index: 3, kind: input, shape index: {}]  }
   0x1   :  { %s10_s20 = sshll.u32 %s7166_s0, 4  ;;  %s14_s23 = sshll.u32 %s7169_s1, 4  ;;  %s11_s20 = int_to_ptr.vmem [resolvable:$true] %s10_s20  ;;  %s15_s23 = int_to_ptr.vmem [resolvable:$true] %s14_s23 }
   0x2   :  { %s5817_s24 = scalar_lea.vmem %s11_s20, 16  ;;  %p5822_p1 = scmp.lt.s32.totalorder %s11_s20, %s11_s20 }
   0x3   :  { %p5818_p0 = scmp.ne.s32.totalorder %s11_s20, %s5817_s24  ;;  %p5823_p2 = scmp.lt.s32.totalorder %s5817_s24, %s5817_s24 }
   0x5   :  { %p5824_p3 = por %p5823_p2, %p5822_p1 }
   0x7   :  { %p5825_p4 = pnand %p5824_p3, %p5818_p0 }
   0x9   :  { %5828 = shalt.err (!%p5825_p4)  }
   0xa   :  { %s5931_s25 = smov [#allocation5]   ;;  %s5829_s26 = scalar_lea.vmem %s15_s23, 16 }
   0xb   :  { %13 = dma.vmem_to_smem %s11_s20, 16, %s5931_s25, [#allocation4] }
   0xc   :  { %p5830_p5 = scmp.ne.s32.totalorder %s15_s23, %s5829_s26  ;;  %p5834_p6 = scmp.lt.s32.totalorder %s15_s23, %s15_s23 }
   0xd   :  { %p5835_p7 = scmp.lt.s32.totalorder %s5829_s26, %s5829_s26 }
   0xf   :  { %p5836_p8 = por %p5835_p7, %p5834_p6 }
  0x11   :  { %p5837_p9 = pnand %p5836_p8, %p5830_p5 }
  0x13   :  { %5840 = shalt.err (!%p5837_p9)  }
  0x14   :  { %s5932_s0 = smov [#allocation6]   ;;  %s18_s28 = sshll.u32 %s7170_s2, 4  ;;  %s19_s28 = int_to_ptr.vmem [resolvable:$true] %s18_s28 }
  0x15   :  { %17 = dma.vmem_to_smem %s15_s23, 16, %s5932_s0, [#allocation4] }
  0x16   :  { %s22_s6 = sshll.u32 %s7171_s3, 4  ;;  %s5841_s7 = scalar_lea.vmem %s19_s28, 32  ;;  %s23_s6 = int_to_ptr.vmem [resolvable:$true] %s22_s6 }
  0x17   :  { %p5842_p10 = scmp.ne.s32.totalorder %s19_s28, %s5841_s7  ;;  %p5846_p11 = scmp.lt.s32.totalorder %s19_s28, %s19_s28 }
  0x18   :  { %p5847_p12 = scmp.lt.s32.totalorder %s5841_s7, %s5841_s7 }
  0x1a   :  { %p5848_p13 = por %p5847_p12, %p5846_p11 }
  0x1c   :  { %p5849_p0 = pnand %p5848_p13, %p5842_p10 }
  0x1e   :  { %5852 = shalt.err (!%p5849_p0)  }
  0x1f   :  { %s5933_s8 = smov [#allocation7]   ;;  %s5853_s9 = scalar_lea.vmem %s23_s6, 16 }
  0x20   :  { %21 = dma.vmem_to_smem %s19_s28, 32, %s5933_s8, [#allocation4] }
  0x21   :  { %p5854_p1 = scmp.ne.s32.totalorder %s23_s6, %s5853_s9  ;;  %p5858_p2 = scmp.lt.s32.totalorder %s23_s6, %s23_s6 }
  0x22   :  { %p5859_p3 = scmp.lt.s32.totalorder %s5853_s9, %s5853_s9 }
  0x24   :  { %p5860_p4 = por %p5859_p3, %p5858_p2 }
  0x26   :  { %p5861_p5 = pnand %p5860_p4, %p5854_p1 }
  0x28   :  { %5864 = shalt.err (!%p5861_p5)  }
  0x29   :  { %s5934_s2 = smov [#allocation8]  }
  0x2a   :  { %25 = dma.vmem_to_smem %s23_s6, 16, %s5934_s2, [#allocation4] }
  0x2b   :  { %5909 = dma.done.wait [#allocation4], 80 }
  0x2c   :  { %5910 = vsyncadd [#allocation4], 4294967216 }
  0x2d   :  { %27 = sfence }
  0x2e   :  { %28 = vsyncpa [#allocation10], 0 }
  0x2f   :  { %30 = vsyncpa [#allocation10 + $0x1], 0  ;;  %s5988_s3 = smov 0   ;;  %s5990_s10 = smov 0  }
  0x30   :  { %s5992_s11 = smov 0   ;;  %s5994_s12 = smov 0  }
  0x31 LB: > { %s6009_s13 = sadd.s32 4294967295, %s5929_s12   ;;  %s4911_s14 = sadd.s32 4294967294, %s5929_s12   ;;  %s5929_s12 = sphi %s5994_s12, %s7181_s12   ;;  %s5925_s11 = sphi %s5992_s11, %s7180_s11   ;;  %s5921_s10 = sphi %s5990_s10, %s7179_s10   ;;  %s5917_s3 = sphi %s5988_s3, %s7178_s3  }
  0x32   : > { %s6013_s15 = sadd.s32 1, %s5929_s12   ;;  %s69_s16 = sadd.s32 1, %s5925_s11 }
  0x33   : > { %s66_s17 = ssub.s32 %s5929_s12, %s6013_s15  ;;  %p79_p6 = scmp.ne.s32.totalorder %s5925_s11, %s5921_s10 }
  0x34   : > { %p67_p7 = scmp.eq.s32.totalorder %s66_s17, 0  ;;  %p80_p8 = scmp.eq.s32.totalorder %s6009_s13, 1 }
  0x35   : > { %p85_p9 = scmp.ne.s32.totalorder %s5921_s10, %s5917_s3  ;;  %p86_p10 = scmp.eq.s32.totalorder %s4911_s14, 1 }
  0x36   : > { %s6024_s18 = scalar_select %p67_p7, %s5925_s11, %s69_s16  }
  0x37   : > { %p6026_p11 = por %p80_p8, %p79_p6  ;;  %p6030_p12 = por %p86_p10, %p85_p9 }
  0x38   : > { %p4914_p13 = scmp.ge.s32.totalorder %s5929_s12, 1  ;;  %p112_p0 = scmp.lt.s32.totalorder %s5929_s12, 3 }
  0x3a   : > { %p113_p1 = pnand %p4914_p13, %p112_p0 }
  0x3b   : > { %p132_p2 = scmp.lt.s32.totalorder (!%p113_p1), %s6009_s13, 1  ;;  %v137_v0 = vlaneseq (!%p113_p1)  ;;  %v5935_v1 = vmov (!%p113_p1), 0.0|0.0   ;;  %vm5936_vm0 = vmmov (!%p113_p1), 0   ;;  %v5937_v4 = vmov (!%p113_p1), 0.0   ;;  %s5938_s26 = smov (!%p113_p1), 112  }
  0x3c   : > { %116 = sbr.rel (%p113_p1) target bundleno = 1268 (0x4f4), region = 24  ;;  %5584 = vmatprep.subr.bf16.mxu0 (!%p113_p1), %v5935_v1  ;;  %5602 = vmatprep.subr.bf16.mxu1 (!%p113_p1), %v5935_v1  ;;  %v5939_v15 = vmov (!%p113_p1), 1.0|1.0   ;;  %vm214_vm7 = vcmask (!%p113_p1), 130048   ;;  %vm156_vm8 = vcmask (!%p113_p1), 73728   ;;  %vm159_vm9 = vcmask (!%p113_p1), 7168  }
  0x3d   : > { %v138_v2 = vshrl.u32 (!%p113_p1), %v137_v0, 7  ;;  %v141_v3 = vand.u32 (!%p113_p1), 127, %v137_v0  ;;  %5336 = vmatprep.mubr.msk.f32.mxu0 (!%p113_p1), %vm5936_vm0, %v5937_v4  ;;  %5378 = vmatprep.mubr.msk.f32.mxu1 (!%p113_p1), %vm5936_vm0, %v5937_v4  ;;  %vm161_vm10 = vcmask (!%p113_p1), 1024   ;;  %vm163_vm11 = vcmask (!%p113_p1), 80968   ;;  %157 = vst.msk [vmem:[#allocation2] sm:$0x1] (!%p113_p1), %vm156_vm8, %v5937_v4 }
  0x3e   : > { %158 = vst.msk [vmem:[#allocation2 + $0x9] sm:$0x1] (!%p113_p1), %vm156_vm8, %v5937_v4  ;;  %vm165_vm12 = vcmask (!%p113_p1), 74824   ;;  %168 = vst.msk [vmem:[#allocation2 + $0x10] sm:$0x1] (!%p113_p1), %vm156_vm8, %v5937_v4  ;;  %s5940_s0 = smov (!%p113_p1), 1  }
  0x3f   : > { %v139_v5 = vadd.s32 (!%p113_p1), 8, %v138_v2  ;;  %v142_v6 = vmul.u32 (!%p113_p1), 2, %v141_v3  ;;  %169 = vst.msk [vmem:[#allocation2 + $0x19] sm:$0x1] (!%p113_p1), %vm156_vm8, %v5937_v4  ;;  %175 = vst.msk [vmem:[#allocation2 + $0x20] sm:$0x1] (!%p113_p1), %vm156_vm8, %v5937_v4 }
  0x40   : > { %176 = vst.msk [vmem:[#allocation2 + $0x29] sm:$0x1] (!%p113_p1), %vm156_vm8, %v5937_v4  ;;  %181 = vst.msk [vmem:[#allocation3] sm:$0x1] (!%p113_p1), %vm156_vm8, %v5937_v4  ;;  %vm1141_vm13 = vcmask (!%p113_p1), 72712   ;;  %s4959_s1 = sld [smem:[#allocation5 + $0x1]] (!%p113_p1) }
  0x41   : > { %vm143_vm1 = vcmp.eq.s32.totalorder (!%p113_p1), %v138_v2, %v142_v6  ;;  %vm144_vm2 = vcmp.eq.s32.totalorder (!%p113_p1), %v139_v5, %v142_v6  ;;  %v149_v7 = vadd.s32 (!%p113_p1), 1, %v142_v6  ;;  %182 = vst.msk [vmem:[#allocation3 + $0x9] sm:$0x1] (!%p113_p1), %vm156_vm8, %v5937_v4  ;;  %188 = vst.msk [vmem:[#allocation3 + $0x10] sm:$0x1] (!%p113_p1), %vm156_vm8, %v5937_v4  ;;  %s4960_s27 = sld [smem:[#allocation5 + $0x2]] (!%p113_p1) }
  0x42   : > { %v4917_v10 = vsel (!%p113_p1), %vm143_vm1, 1.0, %v5937_v4  ;;  %v4918_v11 = vsel (!%p113_p1), %vm144_vm2, 1.0, %v5937_v4  ;;  %vm6052_vm3 = vmpackc.low (!%p113_p1), %vm144_vm2, %vm143_vm1  ;;  %189 = vst.msk [vmem:[#allocation3 + $0x19] sm:$0x1] (!%p113_p1), %vm156_vm8, %v5937_v4  ;;  %s4962_s28 = sld [smem:[#allocation5 + $0x4]] (!%p113_p1)  ;;  %s4963_s29 = sld [smem:[#allocation5 + $0x5]] (!%p113_p1) }
  0x43   : > { %s133_s21 = scalar_select %p132_p2, %s6009_s13, 1  ;;  %vm150_vm4 = vcmp.eq.s32.totalorder %v138_v2, %v149_v7  ;;  %vm151_vm5 = vcmp.eq.s32.totalorder %v139_v5, %v149_v7  ;;  %v297_v13 = vsub.f32 %v4917_v10, %v4917_v10  ;;  %5586 = vmatpush3.bf16.msk.msra.mxu0 %vm6052_vm3, %v5939_v15  ;;  %v304_v17 = vsub.f32 %v4918_v11, %v4918_v11 }
  0x44   : > { %vm6061_vm6 = vmpackc.low %vm151_vm5, %vm150_vm4  ;;  %v4919_v18 = vsel %vm150_vm4, 1.0, %v5937_v4  ;;  %v4920_v19 = vsel %vm151_vm5, 1.0, %v5937_v4  ;;  %5587 = vmatprep.subr.bf16.mxu0 %v5935_v1  ;;  %195 = vst.msk [vmem:[#allocation3 + $0x20] sm:$0x1] %vm156_vm8, %v5937_v4  ;;  %s4965_s30 = sld [smem:[#allocation5 + $0x7]]  ;;  %s4966_s6 = sld [smem:[#allocation5 + $0x8]] }
  0x45   : > { %s5752_s22 = smul.u32 24, %s133_s21  ;;  %5604 = vmatpush3.bf16.msk.msra.mxu1 %vm6061_vm6, %v5939_v15  ;;  %v298_v20 = vand.u32 4294901760, %v297_v13  ;;  %v756_v21 = vsub.f32 %v4919_v18, %v4919_v18  ;;  %v763_v22 = vsub.f32 %v4920_v19, %v4920_v19  ;;  %v305_v23 = vand.u32 4294901760, %v304_v17  ;;  %196 = vst.msk [vmem:[#allocation3 + $0x29] sm:$0x1] %vm156_vm8, %v5937_v4  ;;  %s4988_s7 = sld [smem:[#allocation5 + $0x1d]] }
  0x46   : > { %5605 = vmatprep.subr.bf16.mxu1 %v5935_v1  ;;  %v6073_v34 = vpack.c.bf16 %v304_v17, %v297_v13  ;;  %202 = vst.msk [vmem:[#allocation3 + $0x30] sm:$0x1] %vm156_vm8, %v5937_v4  ;;  %203 = vst.msk [vmem:[#allocation3 + $0x39] sm:$0x1] %vm156_vm8, %v5937_v4  ;;  %v3020_v16 = vstv %s4959_s1  ;;  %s4987_s8 = sld [smem:[#allocation5 + $0x1c]]  ;;  %s5941_s9 = smov 127  }
  0x47   : > { %s136_s25 = scalar_lea.vmem %s7167_s4, %s5752_s22  ;;  %v299_v24 = vsub.f32 %v297_v13, %v298_v20  ;;  %v757_v25 = vand.u32 4294901760, %v756_v21  ;;  %v764_v26 = vand.u32 4294901760, %v763_v22  ;;  %v306_v27 = vsub.f32 %v304_v17, %v305_v23  ;;  %160 = vst.msk [vmem:[#allocation2] sm:$0xff] %vm159_vm9, %v5937_v4  ;;  %170 = vst.msk [vmem:[#allocation2 + $0x10] sm:$0xff] %vm159_vm9, %v5937_v4  ;;  %s5942_s2 = smov 126  }
  0x48   : > { %v208_v8 = vld [vmem:[%s136_s25] sm:$0xff]  ;;  %v6047_v9 = vld [vmem:[%s136_s25 + $0x10] sm:$0xff]  ;;  %v6056_v14 = vld [vmem:[%s136_s25 + $0x8] sm:$0xff]  ;;  %v6077_v36 = vpack.c.bf16 %v763_v22, %v756_v21  ;;  %v6081_v38 = vpack.c.bf16 %v305_v23, %v298_v20  ;;  %162 = vst.msk [vmem:[#allocation2 + $0x8] sm:$0x3] %vm161_vm10, %v5937_v4  ;;  %v3028_v17 = vstv %s4960_s27  ;;  %s4991_s14 = sld [smem:[#allocation5 + $0x20]] }
  0x49   : > { %210 = vrot.lane.b32.xlu0 %v208_v8, %s5938_s26  ;;  %2080 = vrot.lane.b32.xlu1 %v6047_v9, %s5938_s26  ;;  %v300_v28 = vand.u32 4294901760, %v299_v24  ;;  %v758_v29 = vsub.f32 %v756_v21, %v757_v25  ;;  %v765_v30 = vsub.f32 %v763_v22, %v764_v26  ;;  %v307_v31 = vand.u32 4294901760, %v306_v27  ;;  %171 = vst.msk [vmem:[#allocation2 + $0x18] sm:$0x3] %vm161_vm10, %v5937_v4  ;;  %s4990_s16 = sld [smem:[#allocation5 + $0x1f]]  ;;  %s4994_s17 = sld [smem:[#allocation5 + $0x23]] }
  0x4a   : > { %v6083_v39 = vpack.c.bf16 %v764_v26, %v757_v25  ;;  %177 = vst.msk [vmem:[#allocation2 + $0x20] sm:$0xff] %vm159_vm9, %v5937_v4  ;;  %183 = vst.msk [vmem:[#allocation3] sm:$0xff] %vm159_vm9, %v5937_v4  ;;  %v3041_v22 = vstv %s4962_s28  ;;  %v3049_v23 = vstv %s4963_s29  ;;  %v3062_v27 = vstv %s4965_s30  ;;  %s4993_s21 = sld [smem:[#allocation5 + $0x22]]  ;;  %s5016_s22 = sld [smem:[#allocation5 + $0x38]] }
  0x4b   : > { %v759_v32 = vand.u32 4294901760, %v758_v29  ;;  %v766_v33 = vand.u32 4294901760, %v765_v30  ;;  %v6075_v35 = vpack.c.bf16 %v307_v31, %v300_v28  ;;  %178 = vst.msk [vmem:[#allocation2 + $0x28] sm:$0x3] %vm161_vm10, %v5937_v4  ;;  %184 = vst.msk [vmem:[#allocation3 + $0x8] sm:$0x3] %vm161_vm10, %v5937_v4  ;;  %v3070_v28 = vstv %s4966_s6 }
  0x4c   : > { %190 = vst.msk [vmem:[#allocation3 + $0x10] sm:$0xff] %vm159_vm9, %v5937_v4  ;;  %197 = vst.msk [vmem:[#allocation3 + $0x20] sm:$0xff] %vm159_vm9, %v5937_v4  ;;  %v3226_v31 = vstv %s4988_s7  ;;  %s5015_s23 = sld [smem:[#allocation5 + $0x37]]  ;;  %s5018_s24 = sld [smem:[#allocation5 + $0x3a]]  ;;  %vm4059_vm14 = vcmask 64512  }
  0x4d   : > { %1146 = vrot.lane.b32.xlu0 %v6056_v14, %s5938_s26  ;;  %v6079_v37 = vpack.c.bf16 %v766_v33, %v759_v32  ;;  %191 = vst.msk [vmem:[#allocation3 + $0x18] sm:$0x3] %vm161_vm10, %v5937_v4  ;;  %198 = vst.msk [vmem:[#allocation3 + $0x28] sm:$0x3] %vm161_vm10, %v5937_v4  ;;  %v3218_v32 = vstv %s4987_s8  ;;  %s5019_s25 = sld [smem:[#allocation5 + $0x3b]]  ;;  %s5022_s26 = sld [smem:[#allocation5 + $0x3e]] }
  0x4e   : > { %204 = vst.msk [vmem:[#allocation3 + $0x30] sm:$0xff] %vm159_vm9, %v5937_v4  ;;  %s5021_s1 = sld [smem:[#allocation5 + $0x3d]]  ;;  %s5043_s27 = sld [smem:[#allocation5 + $0x52]] }
  0x4f   : > { %205 = vst.msk [vmem:[#allocation3 + $0x38] sm:$0x3] %vm161_vm10, %v5937_v4  ;;  %s5044_s28 = sld [smem:[#allocation5 + $0x53]]  ;;  %s4968_s29 = sld [smem:[#allocation5 + $0xa]] }
  0x50   : > { %164 = vst.msk [vmem:[#allocation2] sm:$0xff] %vm163_vm11, %v5937_v4  ;;  %172 = vst.msk [vmem:[#allocation2 + $0x10] sm:$0xff] %vm163_vm11, %v5937_v4  ;;  %s5046_s30 = sld [smem:[#allocation5 + $0x55]]  ;;  %s5047_s7 = sld [smem:[#allocation5 + $0x56]] }
  0x51   : > { %166 = vst.msk [vmem:[#allocation2 + $0x8] sm:$0x3] %vm165_vm12, %v5937_v4  ;;  %173 = vst.msk [vmem:[#allocation2 + $0x18] sm:$0x3] %vm165_vm12, %v5937_v4  ;;  %s4971_s6 = sld [smem:[#allocation5 + $0xd]]  ;;  %s4974_s8 = sld [smem:[#allocation5 + $0x10]] }
  0x52   : > { %179 = vst.msk [vmem:[#allocation2 + $0x20] sm:$0xff] %vm163_vm11, %v5937_v4  ;;  %185 = vst.msk [vmem:[#allocation3] sm:$0xff] %vm163_vm11, %v5937_v4 }
  0x53   : > { %180 = vst.msk [vmem:[#allocation2 + $0x28] sm:$0x3] %vm165_vm12, %v5937_v4  ;;  %186 = vst.msk [vmem:[#allocation3 + $0x8] sm:$0x3] %vm165_vm12, %v5937_v4 }
  0x54   : > { %192 = vst.msk [vmem:[#allocation3 + $0x10] sm:$0xff] %vm163_vm11, %v5937_v4  ;;  %199 = vst.msk [vmem:[#allocation3 + $0x20] sm:$0xff] %vm163_vm11, %v5937_v4 }
  0x55   : > { %193 = vst.msk [vmem:[#allocation3 + $0x18] sm:$0x3] %vm165_vm12, %v5937_v4  ;;  %200 = vst.msk [vmem:[#allocation3 + $0x28] sm:$0x3] %vm165_vm12, %v5937_v4 }
  0x56   : > { %206 = vst.msk [vmem:[#allocation3 + $0x30] sm:$0xff] %vm163_vm11, %v5937_v4 }
  0x57   : > { %207 = vst.msk [vmem:[#allocation3 + $0x38] sm:$0x3] %vm165_vm12, %v5937_v4 }
  0xbb   : > { %v211_v40 = vpop.permute.xlu0 %210  ;;  %v2081_v56 = vpop.permute.xlu1 %2080 }
  0xbc   : > { %v213_v41 = vmax.f32 %v208_v8, %v211_v40  ;;  %v2083_v57 = vmax.f32 %v6047_v9, %v2081_v56  ;;  %v3260_v40 = vstv %s4993_s21  ;;  %s5000_s21 = sld [smem:[#allocation5 + $0x29]] }
  0xbe   : > { %v216_v42 = vsel %vm214_vm7, %v213_v41, 0  ;;  %v2085_v58 = vsel %vm214_vm7, %v2083_v57, 0 }
  0xbf   : > { %v285_v43 = vand.u32 4294901760, %v216_v42  ;;  %v1147_v48 = vpop.permute.xlu0 %1146  ;;  %v6183_v59 = vand.u32 4294901760, %v2085_v58 }
  0xc0   : > { %v1149_v49 = vmax.f32 %v6056_v14, %v1147_v48  ;;  %v3445_v48 = vstv %s5019_s25  ;;  %s5024_s25 = sld [smem:[#allocation5 + $0x40]] }
  0xc1   : > { %v286_v44 = vsub.f32 %v216_v42, %v285_v43  ;;  %v2155_v60 = vsub.f32 %v2085_v58, %v6183_v59  ;;  %v3622_v58 = vstv %s5044_s28  ;;  %s5027_s28 = sld [smem:[#allocation5 + $0x43]] }
  0xc2   : > { %v1151_v50 = vsel %vm214_vm7, %v1149_v49, 0 }
  0xc3   : > { %v287_v45 = vand.u32 4294901760, %v286_v44  ;;  %v6116_v51 = vand.u32 4294901760, %v1151_v50  ;;  %v2156_v61 = vand.u32 4294901760, %v2155_v60 }
  0xc5   : > { %v288_v46 = vsub.f32 %v286_v44, %v287_v45  ;;  %v1221_v52 = vsub.f32 %v1151_v50, %v6116_v51  ;;  %v2157_v62 = vsub.f32 %v2155_v60, %v2156_v61 }
  0xc7   : > { %v289_v47 = vand.u32 4294901760, %v288_v46  ;;  %v1222_v53 = vand.u32 4294901760, %v1221_v52  ;;  %v2158_v63 = vand.u32 4294901760, %v2157_v62 }
  0xc9   : > { %5337 = vmatmul.mubr.f32.vlgmr.msra.gmra.mrb[0].mxu0 %v289_v47  ;;  %5379 = vmatmul.mubr.f32.vlgmr.msra.gmra.mrb[0].mxu1 %v289_v47  ;;  %v1223_v54 = vsub.f32 %v1221_v52, %v1222_v53  ;;  %v3437_v47 = vstv %s5018_s24  ;;  %s4972_s24 = sld [smem:[#allocation5 + $0xe]] }
  0xca   : > { %5589 = vmatpush3.bf16.msra.mxu0 %v6075_v35  ;;  %5607 = vmatpush3.bf16.msra.mxu1 %v6079_v37 }
  0xcb   : > { %5343 = vmatprep.mubr.msk.f32.mxu0 %vm5936_vm0, %v5937_v4  ;;  %5590 = vmatprep.subr.bf16.mxu0 %v5935_v1  ;;  %v1224_v55 = vand.u32 4294901760, %v1223_v54 }
  0xcc   : > { %5385 = vmatprep.mubr.msk.f32.mxu1 %vm5936_vm0, %v5937_v4  ;;  %5608 = vmatprep.subr.bf16.mxu1 %v5935_v1 }
  0xd1   : > { %5344 = vmatmul.mubr.f32.vlgmr.msra.gmra.mrb[0].mxu0 %v285_v43  ;;  %5386 = vmatmul.mubr.f32.vlgmr.msra.gmra.mrb[0].mxu1 %v285_v43 }
  0xd2   : > { %5592 = vmatpush3.bf16.msra.mxu0 %v6073_v34  ;;  %5610 = vmatpush3.bf16.msra.mxu1 %v6077_v36 }
  0xd3   : > { %5350 = vmatprep.mubr.msk.f32.mxu0 %vm5936_vm0, %v5937_v4  ;;  %5593 = vmatprep.subr.bf16.mxu0 %v5935_v1 }
  0xd4   : > { %5392 = vmatprep.mubr.msk.f32.mxu1 %vm5936_vm0, %v5937_v4  ;;  %5611 = vmatprep.subr.bf16.mxu1 %v5935_v1 }
  0xd9   : > { %5351 = vmatmul.mubr.f32.vlgmr.msra.gmra.mrb[0].mxu0 %v286_v44  ;;  %5393 = vmatmul.mubr.f32.vlgmr.msra.gmra.mrb[0].mxu1 %v286_v44  ;;  %v3416_v44 = vstv %s5015_s23  ;;  %s5003_s23 = sld [smem:[#allocation5 + $0x2c]] }
  0xda   : > { %5595 = vmatpush3.bf16.msk.msra.mxu0 %vm6052_vm3, %v5939_v15  ;;  %5613 = vmatpush3.bf16.msk.msra.mxu1 %vm6061_vm6, %v5939_v15 }
  0xdb   : > { %5357 = vmatprep.mubr.msk.f32.mxu0 %vm5936_vm0, %v5937_v4  ;;  %5596 = vmatprep.subr.bf16.mxu0 %v5935_v1 }
  0xdc   : > { %5399 = vmatprep.mubr.msk.f32.mxu1 %vm5936_vm0, %v5937_v4  ;;  %5614 = vmatprep.subr.bf16.mxu1 %v5935_v1 }
  0xe1   : > { %5358 = vmatmul.mubr.f32.vlgmr.msra.gmra.mrb[0].mxu0 %v287_v45  ;;  %5400 = vmatmul.mubr.f32.vlgmr.msra.gmra.mrb[0].mxu1 %v287_v45 }
  0xe2   : > { %5598 = vmatpush3.bf16.msra.mxu0 %v6081_v38  ;;  %5616 = vmatpush3.bf16.msra.mxu1 %v6083_v39 }
  0xe3   : > { %5364 = vmatprep.mubr.msk.f32.mxu0 %vm5936_vm0, %v5937_v4  ;;  %5599 = vmatprep.subr.bf16.mxu0 %v5935_v1 }
  0xe4   : > { %5406 = vmatprep.mubr.msk.f32.mxu1 %vm5936_vm0, %v5937_v4  ;;  %5617 = vmatprep.subr.bf16.mxu1 %v5935_v1 }
  0xe9   : > { %5365 = vmatmul.mubr.f32.vlgmr.msra.gmra.mrb[0].mxu0 %v285_v43  ;;  %5407 = vmatmul.mubr.f32.vlgmr.msra.gmra.mrb[0].mxu1 %v285_v43 }
  0xea   : > { %5601 = vmatpush3.bf16.msk.msra.mxu0 %vm6052_vm3, %v5939_v15  ;;  %5619 = vmatpush3.bf16.msk.msra.mxu1 %vm6061_vm6, %v5939_v15 }
  0xeb   : > { %5371 = vmatprep.mubr.msk.f32.mxu0 %vm5936_vm0, %v5937_v4  ;;  %5413 = vmatprep.mubr.msk.f32.mxu1 %vm5936_vm0, %v5937_v4 }
  0xec   : > { %5620 = vmatprep.subr.bf16.mxu0 %v5935_v1  ;;  %5638 = vmatprep.subr.bf16.mxu1 %v5935_v1 }
  0xf1   : > { %5372 = vmatmul.mubr.f32.vlgmr.msra.gmra.mrb[0].mxu0 %v285_v43  ;;  %5414 = vmatmul.mubr.f32.vlgmr.msra.gmra.mrb[0].mxu1 %v285_v43  ;;  %v3424_v43 = vstv %s5016_s22  ;;  %s4969_s22 = sld [smem:[#allocation5 + $0xb]] }
  0xf2   : > { %5622 = vmatpush3.bf16.msk.msra.mxu0 %vm6052_vm3, %v5939_v15  ;;  %5640 = vmatpush3.bf16.msk.msra.mxu1 %vm6061_vm6, %v5939_v15 }
  0xf3   : > { %5420 = vmatprep.mubr.msk.f32.mxu0 %vm5936_vm0, %v5937_v4  ;;  %5462 = vmatprep.mubr.msk.f32.mxu1 %vm5936_vm0, %v5937_v4 }
  0xf4   : > { %5623 = vmatprep.subr.bf16.mxu0 %v5935_v1  ;;  %5641 = vmatprep.subr.bf16.mxu1 %v5935_v1 }
  0xf5   : > { %5421 = vmatmul.mubr.f32.vlgmr.msra.gmra.mrb[2].mxu0 %v1224_v55  ;;  %5463 = vmatmul.mubr.f32.vlgmr.msra.gmra.mrb[2].mxu1 %v1224_v55  ;;  %v3614_v55 = vstv %s5043_s27  ;;  %s4996_s27 = sld [smem:[#allocation5 + $0x25]] }
  0xf6   : > { %5625 = vmatpush3.bf16.msra.mxu0 %v6075_v35  ;;  %5643 = vmatpush3.bf16.msra.mxu1 %v6079_v37 }
  0xf7   : > { %5427 = vmatprep.mubr.msk.f32.mxu0 %vm5936_vm0, %v5937_v4  ;;  %5469 = vmatprep.mubr.msk.f32.mxu1 %vm5936_vm0, %v5937_v4 }
  0xf8   : > { %5626 = vmatprep.subr.bf16.mxu0 %v5935_v1  ;;  %5644 = vmatprep.subr.bf16.mxu1 %v5935_v1 }
  0xfd   : > { %5428 = vmatmul.mubr.f32.vlgmr.msra.gmra.mrb[2].mxu0 %v6116_v51  ;;  %5470 = vmatmul.mubr.f32.vlgmr.msra.gmra.mrb[2].mxu1 %v6116_v51 }
  0xfe   : > { %5628 = vmatpush3.bf16.msra.mxu0 %v6073_v34  ;;  %5646 = vmatpush3.bf16.msra.mxu1 %v6077_v36 }
  0xff   : > { %5434 = vmatprep.mubr.msk.f32.mxu0 %vm5936_vm0, %v5937_v4  ;;  %5476 = vmatprep.mubr.msk.f32.mxu1 %vm5936_vm0, %v5937_v4 }
 0x100   : > { %5629 = vmatprep.subr.bf16.mxu0 %v5935_v1  ;;  %5647 = vmatprep.subr.bf16.mxu1 %v5935_v1 }
 0x105   : > { %5435 = vmatmul.mubr.f32.vlgmr.msra.gmra.mrb[2].mxu0 %v1221_v52  ;;  %5477 = vmatmul.mubr.f32.vlgmr.msra.gmra.mrb[2].mxu1 %v1221_v52  ;;  %v3458_v52 = vstv %s5021_s1  ;;  %s5025_s1 = sld [smem:[#allocation5 + $0x41]] }
 0x106   : > { %5631 = vmatpush3.bf16.msk.msra.mxu0 %vm6052_vm3, %v5939_v15  ;;  %5649 = vmatpush3.bf16.msk.msra.mxu1 %vm6061_vm6, %v5939_v15 }
 0x107   : > { %5441 = vmatprep.mubr.msk.f32.mxu0 %vm5936_vm0, %v5937_v4  ;;  %5483 = vmatprep.mubr.msk.f32.mxu1 %vm5936_vm0, %v5937_v4 }
 0x108   : > { %5632 = vmatprep.subr.bf16.mxu0 %v5935_v1  ;;  %5650 = vmatprep.subr.bf16.mxu1 %v5935_v1 }
 0x10d   : > { %5442 = vmatmul.mubr.f32.vlgmr.msra.gmra.mrb[2].mxu0 %v1222_v53  ;;  %5484 = vmatmul.mubr.f32.vlgmr.msra.gmra.mrb[2].mxu1 %v1222_v53 }
 0x10e   : > { %5634 = vmatpush3.bf16.msra.mxu0 %v6081_v38  ;;  %5652 = vmatpush3.bf16.msra.mxu1 %v6083_v39 }
 0x10f   : > { %5448 = vmatprep.mubr.msk.f32.mxu0 %vm5936_vm0, %v5937_v4  ;;  %5490 = vmatprep.mubr.msk.f32.mxu1 %vm5936_vm0, %v5937_v4 }
 0x110   : > { %5635 = vmatprep.subr.bf16.mxu0 %v5935_v1  ;;  %5653 = vmatprep.subr.bf16.mxu1 %v5935_v1 }
 0x115   : > { %5449 = vmatmul.mubr.f32.vlgmr.msra.gmra.mrb[2].mxu0 %v6116_v51  ;;  %5491 = vmatmul.mubr.f32.vlgmr.msra.gmra.mrb[2].mxu1 %v6116_v51 }
 0x116   : > { %5637 = vmatpush3.bf16.msk.msra.mxu0 %vm6052_vm3, %v5939_v15  ;;  %5655 = vmatpush3.bf16.msk.msra.mxu1 %vm6061_vm6, %v5939_v15 }
 0x117   : > { %5455 = vmatprep.mubr.msk.f32.mxu0 %vm5936_vm0, %v5937_v4  ;;  %5497 = vmatprep.mubr.msk.f32.mxu1 %vm5936_vm0, %v5937_v4 }
 0x118   : > { %5656 = vmatprep.subr.bf16.mxu0 %v5935_v1  ;;  %5674 = vmatprep.subr.bf16.mxu1 %v5935_v1 }
 0x11d   : > { %5456 = vmatmul.mubr.f32.vlgmr.msra.gmra.mrb[2].mxu0 %v6116_v51  ;;  %5498 = vmatmul.mubr.f32.vlgmr.msra.gmra.mrb[2].mxu1 %v6116_v51  ;;  %v3466_v51 = vstv %s5022_s26  ;;  %s4975_s26 = sld [smem:[#allocation5 + $0x11]] }
 0x11e   : > { %5658 = vmatpush3.bf16.msk.msra.mxu0 %vm6052_vm3, %v5939_v15  ;;  %5676 = vmatpush3.bf16.msk.msra.mxu1 %vm6061_vm6, %v5939_v15 }
 0x11f   : > { %5504 = vmatprep.mubr.msk.f32.mxu0 %vm5936_vm0, %v5937_v4  ;;  %5546 = vmatprep.mubr.msk.f32.mxu1 %vm5936_vm0, %v5937_v4 }
 0x120   : > { %5659 = vmatprep.subr.bf16.mxu0 %v5935_v1  ;;  %5677 = vmatprep.subr.bf16.mxu1 %v5935_v1 }
 0x121   : > { %5505 = vmatmul.mubr.f32.vlgmr.msra.gmra.mrb[4].mxu0 %v2158_v63  ;;  %5547 = vmatmul.mubr.f32.vlgmr.msra.gmra.mrb[4].mxu1 %v2158_v63 }
 0x122   : > { %5661 = vmatpush3.bf16.msra.mxu0 %v6075_v35  ;;  %5679 = vmatpush3.bf16.msra.mxu1 %v6079_v37  ;;  %v3247_v35 = vstv %s4991_s14  ;;  %s5049_s14 = sld [smem:[#allocation5 + $0x58]] }
 0x123   : > { %5511 = vmatprep.mubr.msk.f32.mxu0 %vm5936_vm0, %v5937_v4  ;;  %5553 = vmatprep.mubr.msk.f32.mxu1 %vm5936_vm0, %v5937_v4 }
 0x124   : > { %5662 = vmatprep.subr.bf16.mxu0 %v5935_v1  ;;  %5680 = vmatprep.subr.bf16.mxu1 %v5935_v1 }
 0x129   : > { %5512 = vmatmul.mubr.f32.vlgmr.msra.gmra.mrb[4].mxu0 %v6183_v59  ;;  %5554 = vmatmul.mubr.f32.vlgmr.msra.gmra.mrb[4].mxu1 %v6183_v59 }
 0x12a   : > { %5664 = vmatpush3.bf16.msra.mxu0 %v6073_v34  ;;  %5682 = vmatpush3.bf16.msra.mxu1 %v6077_v36  ;;  %v3239_v36 = vstv %s4990_s16  ;;  %s4997_s16 = sld [smem:[#allocation5 + $0x26]] }
 0x12b   : > { %5518 = vmatprep.mubr.msk.f32.mxu0 %vm5936_vm0, %v5937_v4  ;;  %5560 = vmatprep.mubr.msk.f32.mxu1 %vm5936_vm0, %v5937_v4 }
 0x12c   : > { %5665 = vmatprep.subr.bf16.mxu0 %v5935_v1  ;;  %5683 = vmatprep.subr.bf16.mxu1 %v5935_v1 }
 0x131   : > { %5519 = vmatmul.mubr.f32.vlgmr.msra.gmra.mrb[4].mxu0 %v2155_v60  ;;  %5561 = vmatmul.mubr.f32.vlgmr.msra.gmra.mrb[4].mxu1 %v2155_v60  ;;  %v3083_v60 = vstv %s4968_s29  ;;  %s4999_s29 = sld [smem:[#allocation5 + $0x28]] }
 0x132   : > { %5667 = vmatpush3.bf16.msk.msra.mxu0 %vm6052_vm3, %v5939_v15  ;;  %5685 = vmatpush3.bf16.msk.msra.mxu1 %vm6061_vm6, %v5939_v15 }
 0x133   : > { %5525 = vmatprep.mubr.msk.f32.mxu0 %vm5936_vm0, %v5937_v4  ;;  %5567 = vmatprep.mubr.msk.f32.mxu1 %vm5936_vm0, %v5937_v4 }
 0x134   : > { %5668 = vmatprep.subr.bf16.mxu0 %v5935_v1  ;;  %5686 = vmatprep.subr.bf16.mxu1 %v5935_v1 }
 0x139   : > { %5526 = vmatmul.mubr.f32.vlgmr.msra.gmra.mrb[4].mxu0 %v2156_v61  ;;  %5568 = vmatmul.mubr.f32.vlgmr.msra.gmra.mrb[4].mxu1 %v2156_v61  ;;  %v3635_v61 = vstv %s5046_s30  ;;  %s5028_s30 = sld [smem:[#allocation5 + $0x44]] }
 0x13a   : > { %5670 = vmatpush3.bf16.msra.mxu0 %v6081_v38  ;;  %5688 = vmatpush3.bf16.msra.mxu1 %v6083_v39  ;;  %v3268_v39 = vstv %s4994_s17  ;;  %s5050_s17 = sld [smem:[#allocation5 + $0x59]] }
 0x13b   : > { %5532 = vmatprep.mubr.msk.f32.mxu0 %vm5936_vm0, %v5937_v4  ;;  %5574 = vmatprep.mubr.msk.f32.mxu1 %vm5936_vm0, %v5937_v4 }
 0x13c   : > { %5671 = vmatprep.subr.bf16.mxu0 %v5935_v1  ;;  %5689 = vmatprep.subr.bf16.mxu1 %v5935_v1 }
 0x141   : > { %5533 = vmatmul.mubr.f32.vlgmr.msra.gmra.mrb[4].mxu0 %v6183_v59  ;;  %5575 = vmatmul.mubr.f32.vlgmr.msra.gmra.mrb[4].mxu1 %v6183_v59 }
 0x142   : > { %5673 = vmatpush3.bf16.msk.msra.mxu0 %vm6052_vm3, %v5939_v15  ;;  %5691 = vmatpush3.bf16.msk.msra.mxu1 %vm6061_vm6, %v5939_v15 }
 0x143   : > { %5539 = vmatprep.mubr.msk.f32.mxu0 %vm5936_vm0, %v5937_v4  ;;  %5581 = vmatprep.mubr.msk.f32.mxu1 %vm5936_vm0, %v5937_v4 }
 0x149   : > { %5540 = vmatmul.mubr.f32.vlgmr.msra.gmra.mrb[4].mxu0 %v6183_v59  ;;  %5582 = vmatmul.mubr.f32.vlgmr.msra.gmra.mrb[4].mxu1 %v6183_v59 }
 0x1c4   : > { %v673_v0 = vpop.f32.mrb[0].mxu0  ;;  %v1132_v1 = vpop.f32.mrb[0].mxu1 }
 0x1c5   : > { %v1136_v2 = vmax.f32 %v673_v0, %v1132_v1  ;;  %v5373_v3 = vpop.f32.mrb[1].mxu0  ;;  %v5415_v5 = vpop.f32.mrb[1].mxu1 }
 0x1c6   : > { %v3643_v3 = vstv %s5047_s7  ;;  %s5030_s7 = sld [smem:[#allocation5 + $0x46]] }
 0x1c7   : > { %1138 = vrot.lane.b32.xlu1 %v1136_v2, %s5940_s0  ;;  %v3104_v2 = vstv %s4971_s6  ;;  %s5002_s6 = sld [smem:[#allocation5 + $0x2b]] }
 0x1f0   : > { %v1608_v6 = vpop.f32.mrb[2].mxu0  ;;  %v2067_v7 = vpop.f32.mrb[2].mxu1 }
 0x1f1   : > { %v2071_v8 = vmax.f32 %v1608_v6, %v2067_v7  ;;  %v5457_v9 = vpop.f32.mrb[3].mxu0  ;;  %v5499_v10 = vpop.f32.mrb[3].mxu1 }
 0x1f2   : > { %v3656_v9 = vstv %s5049_s14  ;;  %s5031_s14 = sld [smem:[#allocation5 + $0x47]] }
 0x1f3   : > { %2073 = vrot.lane.b32.xlu0 %v2071_v8, %s5940_s0  ;;  %v3125_v8 = vstv %s4974_s8  ;;  %s5052_s8 = sld [smem:[#allocation5 + $0x5b]] }
 0x21c   : > { %v2542_v11 = vpop.f32.mrb[4].mxu0  ;;  %v3001_v12 = vpop.f32.mrb[4].mxu1 }
 0x21d   : > { %v3005_v13 = vmax.f32 %v2542_v11, %v3001_v12  ;;  %v5541_v14 = vpop.f32.mrb[5].mxu0  ;;  %v5583_v4 = vpop.f32.mrb[5].mxu1  ;;  %v3289_v12 = vstv %s4997_s16  ;;  %s5053_s16 = sld [smem:[#allocation5 + $0x5c]] }
 0x21f   : > { %3007 = vrot.lane.b32.xlu1 %v3005_v13, %s5940_s0  ;;  %v3664_v13 = vstv %s5050_s17  ;;  %s5055_s17 = sld [smem:[#allocation5 + $0x5e]] }
 0x239   : > { %v1139_v15 = vpop.permute.xlu1 %1138 }
 0x23a   : > { %1142 = vst.msk [vmem:[#allocation2 + $0x1] sm:$0xff] %vm1141_vm13, %v1139_v15  ;;  %v3310_v15 = vstv %s5000_s21  ;;  %s4977_s21 = sld [smem:[#allocation5 + $0x13]] }
 0x241   : > { %v6362_v18 = vld [vmem:[#allocation2] sm:$0xff] }
 0x242   : > { %v3021_v19 = vmul.f32 %v3020_v16, %v6362_v18  ;;  %v3029_v20 = vmul.f32 %v3028_v17, %v6362_v18  ;;  %v6366_v21 = vld [vmem:[#allocation2 + $0x1] sm:$0xff]  ;;  %v3227_v33 = vmul.f32 %v3226_v31, %v6362_v18  ;;  %v3219_v34 = vmul.f32 %v3218_v32, %v6362_v18 }
 0x243   : > { %v3042_v24 = vmul.f32 %v3041_v22, %v6366_v21  ;;  %v3050_v25 = vmul.f32 %v3049_v23, %v6366_v21  ;;  %v6372_v26 = vld [vmem:[#allocation2 + $0x2] sm:$0xff]  ;;  %v3248_v37 = vmul.f32 %v3247_v35, %v6366_v21  ;;  %v3240_v38 = vmul.f32 %v3239_v36, %v6366_v21 }
 0x244   : > { %3023 = vrot.lane.b32.xlu0 %v3021_v19, %s5941_s9  ;;  %3031 = vrot.lane.b32.xlu1 %v3029_v20, %s5942_s2  ;;  %v3063_v29 = vmul.f32 %v3062_v27, %v6372_v26  ;;  %v3071_v30 = vmul.f32 %v3070_v28, %v6372_v26  ;;  %v3269_v41 = vmul.f32 %v3268_v39, %v6372_v26  ;;  %v3091_v16 = vstv %s4969_s22  ;;  %s5056_s22 = sld [smem:[#allocation5 + $0x5f]] }
 0x245   : > { %v3261_v42 = vmul.f32 %v3260_v40, %v6372_v26  ;;  %v3425_v45 = vmul.f32 %v3424_v43, %v6362_v18  ;;  %v3417_v46 = vmul.f32 %v3416_v44, %v6362_v18  ;;  %v3438_v49 = vmul.f32 %v3437_v47, %v6366_v21 }
 0x246   : > { %v3446_v50 = vmul.f32 %v3445_v48, %v6366_v21  ;;  %v3467_v53 = vmul.f32 %v3466_v51, %v6372_v26  ;;  %v3459_v54 = vmul.f32 %v3458_v52, %v6372_v26  ;;  %v3615_v57 = vmul.f32 %v3614_v55, %v6362_v18 }
 0x247   : > { %v3623_v59 = vmul.f32 %v3622_v58, %v6362_v18  ;;  %v3636_v0 = vmul.f32 %v3635_v61, %v6366_v21  ;;  %v3644_v6 = vmul.f32 %v3643_v3, %v6366_v21  ;;  %v3657_v11 = vmul.f32 %v3656_v9, %v6372_v26 }
 0x248   : > { %3044 = vrot.lane.b32.xlu0 %v3042_v24, %s5941_s9  ;;  %3052 = vrot.lane.b32.xlu1 %v3050_v25, %s5942_s2  ;;  %v3665_v4 = vmul.f32 %v3664_v13, %v6372_v26  ;;  %v3331_v20 = vstv %s5003_s23  ;;  %v3112_v22 = vstv %s4972_s24  ;;  %s4980_s23 = sld [smem:[#allocation5 + $0x16]]  ;;  %s5058_s24 = sld [smem:[#allocation5 + $0x61]] }
 0x249   : > { %v3479_v25 = vstv %s5024_s25  ;;  %v3133_v27 = vstv %s4975_s26  ;;  %v3281_v31 = vstv %s4996_s27  ;;  %v3302_v35 = vstv %s4999_s29  ;;  %s4983_s25 = sld [smem:[#allocation5 + $0x19]]  ;;  %s5059_s26 = sld [smem:[#allocation5 + $0x62]] }
 0x24a   : > { %v3323_v39 = vstv %s5002_s6  ;;  %v3521_v43 = vstv %s5030_s7  ;;  %v3677_v44 = vstv %s5052_s8  ;;  %v3529_v47 = vstv %s5031_s14  ;;  %s4978_s27 = sld [smem:[#allocation5 + $0x14]]  ;;  %s3014_s29 = sld [smem:[#allocation5]] }
 0x24b   : > { %v3685_v48 = vstv %s5053_s16  ;;  %v3698_v51 = vstv %s5055_s17  ;;  %s5012_s6 = sld [smem:[#allocation5 + $0x35]]  ;;  %s3011_s7 = sld [smem:[#allocation6]] }
 0x24c   : > { %3065 = vrot.lane.b32.xlu0 %v3063_v29, %s5941_s9  ;;  %3073 = vrot.lane.b32.xlu1 %v3071_v30, %s5942_s2  ;;  %v3487_v30 = vstv %s5025_s1  ;;  %s5006_s1 = sld [smem:[#allocation5 + $0x2f]]  ;;  %s4984_s8 = sld [smem:[#allocation5 + $0x1a]] }
 0x24d   : > { %s5033_s14 = sld [smem:[#allocation5 + $0x49]]  ;;  %s6488_s16 = sld [smem:[#allocation5 + $0x3]] }
 0x24e   : > { %v3167_v58 = vstv %s4980_s23  ;;  %v3719_v61 = vstv %s5058_s24  ;;  %s6490_s17 = sld [smem:[#allocation5 + $0x2e]]  ;;  %s6501_s23 = sld [smem:[#allocation5 + $0x31]] }
 0x24f   : > { %s6503_s24 = sld [smem:[#allocation5 + $0x4c]] }
 0x250   : > { %3229 = vrot.lane.b32.xlu0 %v3227_v33, %s5942_s2  ;;  %3221 = vrot.lane.b32.xlu1 %v3219_v34, %s5941_s9  ;;  %v3500_v34 = vstv %s5027_s28  ;;  %s5009_s28 = sld [smem:[#allocation5 + $0x32]] }
 0x254   : > { %3250 = vrot.lane.b32.xlu0 %v3248_v37, %s5942_s2  ;;  %3242 = vrot.lane.b32.xlu1 %v3240_v38, %s5941_s9  ;;  %v3508_v38 = vstv %s5028_s30  ;;  %s4981_s30 = sld [smem:[#allocation5 + $0x17]] }
 0x258   : > { %3271 = vrot.lane.b32.xlu0 %v3269_v41, %s5942_s2  ;;  %3263 = vrot.lane.b32.xlu1 %v3261_v42, %s5941_s9 }
 0x25c   : > { %3427 = vrot.lane.b32.xlu0 %v3425_v45, %s5942_s2  ;;  %3419 = vrot.lane.b32.xlu1 %v3417_v46, %s5941_s9 }
 0x260   : > { %3440 = vrot.lane.b32.xlu0 %v3438_v49, %s5941_s9  ;;  %3448 = vrot.lane.b32.xlu1 %v3446_v50, %s5942_s2 }
 0x264   : > { %3469 = vrot.lane.b32.xlu0 %v3467_v53, %s5942_s2  ;;  %3461 = vrot.lane.b32.xlu1 %v3459_v54, %s5941_s9  ;;  %v3146_v53 = vstv %s4977_s21  ;;  %s6492_s21 = sld [smem:[#allocation5 + $0x4a]] }
 0x265   : > { %v2074_v56 = vpop.permute.xlu0 %2073 }
 0x266   : > { %2076 = vst.msk [vmem:[#allocation2 + $0x11] sm:$0xff] %vm1141_vm13, %v2074_v56  ;;  %v3706_v56 = vstv %s5056_s22  ;;  %s6499_s22 = sld [smem:[#allocation5 + $0x1b]] }
 0x268   : > { %3617 = vrot.lane.b32.xlu1 %v3615_v57, %s5941_s9 }
 0x26c   : > { %3625 = vrot.lane.b32.xlu1 %v3623_v59, %s5942_s2 }
 0x26d   : > { %v6409_v62 = vld [vmem:[#allocation2 + $0x10] sm:$0xff] }
 0x26e   : > { %v3084_v63 = vmul.f32 %v3083_v60, %v6409_v62  ;;  %v6413_v1 = vld [vmem:[#allocation2 + $0x11] sm:$0xff]  ;;  %v3290_v14 = vmul.f32 %v3289_v12, %v6409_v62  ;;  %v3092_v19 = vmul.f32 %v3091_v16, %v6409_v62  ;;  %v3480_v28 = vmul.f32 %v3479_v25, %v6409_v62 }
 0x26f   : > { %v3105_v5 = vmul.f32 %v3104_v2, %v6413_v1  ;;  %v6419_v7 = vld [vmem:[#allocation2 + $0x12] sm:$0xff]  ;;  %v3311_v17 = vmul.f32 %v3310_v15, %v6413_v1  ;;  %v3113_v24 = vmul.f32 %v3112_v22, %v6413_v1  ;;  %v3488_v32 = vmul.f32 %v3487_v30, %v6409_v62 }
 0x270   : > { %3086 = vrot.lane.b32.xlu0 %v3084_v63, %s5941_s9  ;;  %3638 = vrot.lane.b32.xlu1 %v3636_v0, %s5941_s9  ;;  %v3126_v10 = vmul.f32 %v3125_v8, %v6419_v7  ;;  %v3332_v23 = vmul.f32 %v3331_v20, %v6419_v7  ;;  %v3134_v29 = vmul.f32 %v3133_v27, %v6419_v7  ;;  %v3188_v0 = vstv %s4983_s25  ;;  %s6507_s25 = sld [smem:[#allocation5 + $0x6]] }
 0x271   : > { %v3282_v33 = vmul.f32 %v3281_v31, %v6409_v62  ;;  %v3501_v36 = vmul.f32 %v3500_v34, %v6413_v1  ;;  %v3303_v37 = vmul.f32 %v3302_v35, %v6413_v1  ;;  %v3509_v41 = vmul.f32 %v3508_v38, %v6413_v1 }
 0x272   : > { %v3324_v42 = vmul.f32 %v3323_v39, %v6419_v7  ;;  %v3522_v45 = vmul.f32 %v3521_v43, %v6419_v7  ;;  %v3678_v46 = vmul.f32 %v3677_v44, %v6409_v62  ;;  %v3530_v49 = vmul.f32 %v3529_v47, %v6419_v7 }
 0x273   : > { %v3686_v50 = vmul.f32 %v3685_v48, %v6409_v62  ;;  %v3699_v54 = vmul.f32 %v3698_v51, %v6413_v1  ;;  %v3707_v59 = vmul.f32 %v3706_v56, %v6413_v1  ;;  %v3720_v2 = vmul.f32 %v3719_v61, %v6419_v7 }
 0x274   : > { %3107 = vrot.lane.b32.xlu0 %v3105_v5, %s5941_s9  ;;  %3646 = vrot.lane.b32.xlu1 %v3644_v6, %s5942_s2  ;;  %v3727_v5 = vstv %s5059_s26  ;;  %v3352_v6 = vstv %s5006_s1  ;;  %s6512_s26 = sld [smem:[#allocation6 + $0x1]]  ;;  %s6516_s1 = sld [smem:[#allocation5 + $0x34]] }
 0x275   : > { %v3728_v8 = vmul.f32 %v3727_v5, %v6419_v7  ;;  %v3394_v15 = vstv %s5012_s6  ;;  %v3012_v20 = vstv %s3011_s7  ;;  %v3196_v22 = vstv %s4984_s8  ;;  %s6534_s6 = sld [smem:[#allocation5 + $0x4f]]  ;;  %s6543_s7 = sld [smem:[#allocation5 + $0x36]] }
 0x276   : > { %v3037_v30 = vstv %s6488_s16  ;;  %v3563_v43 = vstv %s6503_s24  ;;  %v3058_v44 = vstv %s6507_s25  ;;  %s6548_s8 = sld [smem:[#allocation5 + $0x68]]  ;;  %s6554_s16 = sld [smem:[#allocation5 + $0x21]] }
 0x277   : > { %v3038_v35 = vmul.f32 %v3037_v30, %v6366_v21  ;;  %s6577_s24 = sld [smem:[#allocation5 + $0x24]]  ;;  %s6581_s25 = sld [smem:[#allocation5 + $0x67]] }
 0x278   : > { %3128 = vrot.lane.b32.xlu0 %v3126_v10, %s5941_s9  ;;  %3659 = vrot.lane.b32.xlu1 %v3657_v11, %s5941_s9  ;;  %v3154_v10 = vstv %s4978_s27  ;;  %v3373_v11 = vstv %s5009_s28  ;;  %s6518_s27 = sld [smem:[#allocation5 + $0x4d]]  ;;  %s6526_s28 = sld [smem:[#allocation5 + $0x1e]] }
 0x27a   : > { %v3210_v51 = vstv %s6512_s26  ;;  %s6595_s26 = sld [smem:[#allocation5 + $0x6a]] }
 0x27c   : > { %3292 = vrot.lane.b32.xlu0 %v3290_v14, %s5942_s2  ;;  %3667 = vrot.lane.b32.xlu1 %v3665_v4, %s5942_s2  ;;  %v3016_v14 = vstv %s3014_s29  ;;  %v3175_v4 = vstv %s4981_s30  ;;  %s6528_s29 = sld [smem:[#allocation5 + $0x9]]  ;;  %s6532_s30 = sld [smem:[#allocation5 + $0x65]] }
 0x27d   : > { %v3017_v16 = vmul.f32 %v3016_v14, %v6362_v18 }
 0x27e   : > { %v3571_v56 = vstv %s6518_s27  ;;  %s6601_s27 = sld [smem:[#allocation5 + $0x51]] }
 0x280   : > { %3313 = vrot.lane.b32.xlu0 %v3311_v17, %s5942_s2  ;;  %3094 = vrot.lane.b32.xlu1 %v3092_v19, %s5942_s2 }
 0x282   : > { %v3079_v5 = vstv %s6528_s29  ;;  %s5023_s29 = sld [smem:[#allocation5 + $0x3f]] }
 0x283   : > { %v3080_v14 = vmul.f32 %v3079_v5, %v6409_v62 }
 0x284   : > { %3334 = vrot.lane.b32.xlu0 %v3332_v23, %s5942_s2  ;;  %3115 = vrot.lane.b32.xlu1 %v3113_v24, %s5942_s2  ;;  %v3542_v23 = vstv %s5033_s14  ;;  %v3018_v24 = vadd.f32 %v3017_v16, %v3012_v20  ;;  %s6550_s14 = sld [smem:[#allocation5 + $0x50]] }
 0x288   : > { %3482 = vrot.lane.b32.xlu0 %v3480_v28, %s5941_s9  ;;  %3136 = vrot.lane.b32.xlu1 %v3134_v29, %s5942_s2 }
 0x28c   : > { %3490 = vrot.lane.b32.xlu0 %v3488_v32, %s5942_s2  ;;  %3284 = vrot.lane.b32.xlu1 %v3282_v33, %s5941_s9  ;;  %v3344_v32 = vstv %s6490_s17  ;;  %v3550_v33 = vstv %s6492_s21  ;;  %s6559_s17 = sld [smem:[#allocation6 + $0x2]]  ;;  %s6564_s21 = sld [smem:[#allocation5 + $0x6b]] }
 0x290   : > { %3503 = vrot.lane.b32.xlu0 %v3501_v36, %s5941_s9  ;;  %3305 = vrot.lane.b32.xlu1 %v3303_v37, %s5941_s9 }
 0x291   : > { %v3008_v40 = vpop.permute.xlu1 %3007 }
 0x292   : > { %3010 = vst.msk [vmem:[#allocation2 + $0x21] sm:$0xff] %vm1141_vm13, %v3008_v40  ;;  %v3214_v40 = vstv %s6499_s22  ;;  %s6566_s22 = sld [smem:[#allocation5 + $0x64]] }
 0x294   : > { %3511 = vrot.lane.b32.xlu0 %v3509_v41, %s5942_s2  ;;  %3326 = vrot.lane.b32.xlu1 %v3324_v42, %s5941_s9  ;;  %v3365_v42 = vstv %s6501_s23  ;;  %s6575_s23 = sld [smem:[#allocation5 + $0x39]] }
 0x298   : > { %3524 = vrot.lane.b32.xlu0 %v3522_v45, %s5941_s9  ;;  %3680 = vrot.lane.b32.xlu1 %v3678_v46, %s5941_s9  ;;  %v3215_v46 = vmul.f32 %v3214_v40, %v6362_v18 }
 0x299   : > { %v6462_v52 = vld [vmem:[#allocation2 + $0x20] sm:$0xff] }
 0x29a   : > { %v3147_v55 = vmul.f32 %v3146_v53, %v6462_v52  ;;  %v6468_v57 = vld [vmem:[#allocation2 + $0x21] sm:$0xff]  ;;  %v3353_v9 = vmul.f32 %v3352_v6, %v6462_v52  ;;  %v3155_v12 = vmul.f32 %v3154_v10, %v6462_v52  ;;  %v3543_v29 = vmul.f32 %v3542_v23, %v6462_v52 }
 0x29b   : > { %v3168_v60 = vmul.f32 %v3167_v58, %v6468_v57  ;;  %v6474_v63 = vld [vmem:[#allocation2 + $0x22] sm:$0xff]  ;;  %v3374_v13 = vmul.f32 %v3373_v11, %v6468_v57  ;;  %v3176_v17 = vmul.f32 %v3175_v4, %v6468_v57  ;;  %v3345_v38 = vmul.f32 %v3344_v32, %v6462_v52 }
 0x29c   : > { %3532 = vrot.lane.b32.xlu0 %v3530_v49, %s5942_s2  ;;  %3688 = vrot.lane.b32.xlu1 %v3686_v50, %s5942_s2  ;;  %v3189_v3 = vmul.f32 %v3188_v0, %v6474_v63  ;;  %v3395_v19 = vmul.f32 %v3394_v15, %v6474_v63  ;;  %v3197_v28 = vmul.f32 %v3196_v22, %v6474_v63  ;;  %v3584_v10 = vstv %s6534_s6  ;;  %s5048_s6 = sld [smem:[#allocation5 + $0x57]] }
 0x29d   : > { %v3551_v39 = vmul.f32 %v3550_v33, %v6462_v52  ;;  %v3366_v49 = vmul.f32 %v3365_v42, %v6468_v57  ;;  %v3564_v50 = vmul.f32 %v3563_v43, %v6468_v57  ;;  %v3769_v22 = vstv %s6548_s8  ;;  %s4970_s8 = sld [smem:[#allocation5 + $0xc]] }
 0x29e   : > { %v3592_v23 = vstv %s6550_s14  ;;  %v3408_v33 = vstv %s6559_s17  ;;  %s4973_s14 = sld [smem:[#allocation5 + $0xf]]  ;;  %s4976_s17 = sld [smem:[#allocation5 + $0x12]] }
 0x29f   : > { %v3593_v32 = vmul.f32 %v3592_v23, %v6474_v63 }
 0x2a0   : > { %3701 = vrot.lane.b32.xlu1 %v3699_v54, %s5941_s9  ;;  %3149 = vrot.lane.b32.xlu0 %v3147_v55, %s5941_s9  ;;  %v3059_v54 = vmul.f32 %v3058_v44, %v6372_v26  ;;  %v3386_v55 = vstv %s6516_s1  ;;  %s6599_s1 = sld [smem:[#allocation5 + $0x3c]]  ;;  %v3433_v44 = vstv %s6575_s23  ;;  %s6634_s23 = sld [smem:[#allocation5 + $0x45]] }
 0x2a1   : > { %v3387_v0 = vmul.f32 %v3386_v55, %v6474_v63 }
 0x2a4   : > { %3709 = vrot.lane.b32.xlu1 %v3707_v59, %s5942_s2  ;;  %3170 = vrot.lane.b32.xlu0 %v3168_v60, %s5941_s9  ;;  %v3216_v59 = vadd.f32 %v3215_v46, %v3210_v51  ;;  %v3434_v51 = vmul.f32 %v3433_v44, %v6366_v21  ;;  %v3100_v44 = vstv %s4970_s8  ;;  %s5038_s8 = sld [smem:[#allocation5 + $0x4e]] }
 0x2a8   : > { %3722 = vrot.lane.b32.xlu1 %v3720_v2, %s5941_s9  ;;  %3191 = vrot.lane.b32.xlu0 %v3189_v3, %s5941_s9  ;;  %v3572_v2 = vmul.f32 %v3571_v56, %v6468_v57  ;;  %v3235_v3 = vstv %s6526_s28  ;;  %s5041_s28 = sld [smem:[#allocation6 + $0x3]] }
 0x2ac   : > { %3730 = vrot.lane.b32.xlu1 %v3728_v8, %s5942_s2  ;;  %3355 = vrot.lane.b32.xlu0 %v3353_v9, %s5942_s2  ;;  %v3748_v9 = vstv %s6532_s30  ;;  %s5045_s30 = sld [smem:[#allocation5 + $0x54]] }
 0x2ad   : > { %v3749_v16 = vmul.f32 %v3748_v9, %v6462_v52 }
 0x2b0   : > { %3157 = vrot.lane.b32.xlu1 %v3155_v12, %s5942_s2  ;;  %3376 = vrot.lane.b32.xlu0 %v3374_v13, %s5942_s2  ;;  %v3236_v13 = vmul.f32 %v3235_v3, %v6366_v21 }
 0x2b4   : > { %3178 = vrot.lane.b32.xlu1 %v3176_v17, %s5942_s2  ;;  %3397 = vrot.lane.b32.xlu0 %v3395_v19, %s5942_s2  ;;  %v3585_v17 = vmul.f32 %v3584_v10, %v6474_v63  ;;  %v3412_v19 = vstv %s6543_s7  ;;  %v3606_v10 = vstv %s5041_s28  ;;  %s5051_s7 = sld [smem:[#allocation5 + $0x5a]]  ;;  %s4979_s28 = sld [smem:[#allocation5 + $0x15]] }
 0x2b6   : > { %v3024_v25 = vpop.permute.xlu0 %3023  ;;  %v3032_v27 = vpop.permute.xlu1 %3031 }
 0x2b7   : > { %v3026_v31 = vadd.f32 %v3024_v25, %v3018_v24  ;;  %v3256_v25 = vstv %s6554_s16  ;;  %s5026_s16 = sld [smem:[#allocation5 + $0x42]] }
 0x2b8   : > { %3199 = vrot.lane.b32.xlu1 %v3197_v28, %s5942_s2  ;;  %3545 = vrot.lane.b32.xlu0 %v3543_v29, %s5941_s9  ;;  %v3413_v28 = vmul.f32 %v3412_v19, %v6362_v18 }
 0x2b9   : > { %v3034_v34 = vadd.f32 %v3032_v27, %v3026_v31  ;;  %v3770_v31 = vmul.f32 %v3769_v22, %v6468_v57 }
 0x2ba   : > { %v3045_v36 = vpop.permute.xlu0 %3044  ;;  %v3053_v37 = vpop.permute.xlu1 %3052 }
 0x2bb   : > { %v3039_v41 = vadd.f32 %v3038_v35, %v3034_v34  ;;  %v3257_v35 = vmul.f32 %v3256_v25, %v6372_v26 }
 0x2bc   : > { %3347 = vrot.lane.b32.xlu1 %v3345_v38, %s5941_s9  ;;  %3553 = vrot.lane.b32.xlu0 %v3551_v39, %s5942_s2  ;;  %v3414_v39 = vadd.f32 %v3413_v28, %v3408_v33 }
 0x2bd   : > { %v3047_v45 = vadd.f32 %v3045_v36, %v3039_v41  ;;  %v3790_v36 = vstv %s6564_s21  ;;  %s4998_s21 = sld [smem:[#allocation5 + $0x27]] }
 0x2be   : > { %v3066_v47 = vpop.permute.xlu0 %3065  ;;  %v3074_v48 = vpop.permute.xlu1 %3073  ;;  %v3791_v42 = vmul.f32 %v3790_v36, %v6474_v63 }
 0x2bf   : > { %v3055_v53 = vadd.f32 %v3053_v37, %v3047_v45  ;;  %v3740_v37 = vstv %s6566_s22  ;;  %v3277_v45 = vstv %s6577_s24  ;;  %s6632_s22 = sld [smem:[#allocation5 + $0x2a]]  ;;  %s5004_s24 = sld [smem:[#allocation5 + $0x2d]] }
 0x2c0   : > { %3368 = vrot.lane.b32.xlu1 %v3366_v49, %s5941_s9  ;;  %3566 = vrot.lane.b32.xlu0 %v3564_v50, %s5941_s9  ;;  %v3741_v43 = vmul.f32 %v3740_v37, %v6462_v52 }
 0x2c1   : > { %v3060_v58 = vadd.f32 %v3059_v54, %v3055_v53  ;;  %v3278_v53 = vmul.f32 %v3277_v45, %v6409_v62 }
 0x2c2   : > { %v3230_v60 = vpop.permute.xlu0 %3229  ;;  %v3222_v61 = vpop.permute.xlu1 %3221 }
 0x2c3   : > { %v3068_v6 = vadd.f32 %v3066_v47, %v3060_v58  ;;  %v3224_v8 = vadd.f32 %v3222_v61, %v3216_v59  ;;  %v3782_v58 = vstv %s6595_s26  ;;  %v3454_v61 = vstv %s6599_s1  ;;  %s5032_s26 = sld [smem:[#allocation5 + $0x48]] }
 0x2c4   : > { %3389 = vrot.lane.b32.xlu1 %v3387_v0, %s5941_s9  ;;  %3574 = vrot.lane.b32.xlu0 %v3572_v2, %s5942_s2  ;;  %v3610_v0 = vstv %s6601_s27  ;;  %v3783_v5 = vmul.f32 %v3782_v58, %v6474_v63  ;;  %s5057_s1 = sld [smem:[#allocation5 + $0x60]]  ;;  %s5060_s27 = sld [smem:[#allocation5 + $0x63]] }
 0x2c5   : > { %v3076_v11 = vadd.f32 %v3074_v48, %v3068_v6  ;;  %v3232_v12 = vadd.f32 %v3230_v60, %v3224_v8  ;;  %v3761_v48 = vstv %s6581_s25  ;;  %v3455_v8 = vmul.f32 %v3454_v61, %v6372_v26  ;;  %s5054_s25 = sld [smem:[#allocation5 + $0x5d]] }
 0x2c6   : > { %v3251_v4 = vpop.permute.xlu0 %3250  ;;  %v3243_v15 = vpop.permute.xlu1 %3242  ;;  %v3762_v55 = vmul.f32 %v3761_v48, %v6468_v57  ;;  %v3611_v9 = vmul.f32 %v3610_v0, %v6362_v18  ;;  %v3496_v61 = vstv %s5026_s16  ;;  %v3142_v0 = vstv %s4976_s17  ;;  %s5066_s16 = sld [smem:[#allocation5 + $0x69]] }
 0x2c7   : > { %v3237_v20 = vadd.f32 %v3236_v13, %v3232_v12  ;;  %v6583_v24 = vadd.f32 %v3080_v14, %v3076_v11  ;;  %v3475_v13 = vstv %s5023_s29  ;;  %s4982_s29 = sld [smem:[#allocation5 + $0x18]]  ;;  %s5069_s17 = sld [smem:[#allocation7 + $0x1]] }
 0x2c8   : > { %3751 = vrot.lane.b32.xlu1 %v3749_v16, %s5942_s2  ;;  %3587 = vrot.lane.b32.xlu0 %v3585_v17, %s5941_s9  ;;  %v3631_v16 = vstv %s5045_s30  ;;  %s5035_s30 = sld [smem:[#allocation5 + $0x4b]] }
 0x2c9   : > { %v3245_v27 = vadd.f32 %v3243_v15, %v3237_v20  ;;  %v3476_v20 = vmul.f32 %v3475_v13, %v6409_v62  ;;  %v3632_v25 = vmul.f32 %v3631_v16, %v6366_v21  ;;  %v3143_v13 = vmul.f32 %v3142_v0, %v6462_v52 }
 0x2ca   : > { %v3272_v29 = vpop.permute.xlu0 %3271  ;;  %v3264_v30 = vpop.permute.xlu1 %3263  ;;  %v3736_v0 = vstv %s5060_s27  ;;  %s5081_s27 = sld [smem:[#allocation7 + $0xd]] }
 0x2cb   : > { %v3253_v34 = vadd.f32 %v3251_v4, %v3245_v27  ;;  %v3612_v4 = vadd.f32 %v3611_v9, %v3606_v10  ;;  %v3298_v9 = vstv %s4998_s21  ;;  %s5070_s21 = sld [smem:[#allocation7 + $0x2]] }
 0x2cc   : > { %3772 = vrot.lane.b32.xlu1 %v3770_v31, %s5942_s2  ;;  %3595 = vrot.lane.b32.xlu0 %v3593_v32, %s5942_s2 }
 0x2cd   : > { %v3258_v38 = vadd.f32 %v3257_v35, %v3253_v34 }
 0x2ce   : > { %v3428_v40 = vpop.permute.xlu0 %3427  ;;  %v3420_v41 = vpop.permute.xlu1 %3419 }
 0x2cf   : > { %v3266_v46 = vadd.f32 %v3264_v30, %v3258_v38  ;;  %v3422_v47 = vadd.f32 %v3420_v41, %v3414_v39  ;;  %v3652_v30 = vstv %s5048_s6  ;;  %v3673_v39 = vstv %s5051_s7  ;;  %s5007_s6 = sld [smem:[#allocation5 + $0x30]]  ;;  %s5010_s7 = sld [smem:[#allocation5 + $0x33]] }
 0x2d0   : > { %3793 = vrot.lane.b32.xlu1 %v3791_v42, %s5942_s2  ;;  %3743 = vrot.lane.b32.xlu0 %v3741_v43, %s5941_s9  ;;  %v3653_v35 = vmul.f32 %v3652_v30, %v6372_v26  ;;  %v3674_v43 = vmul.f32 %v3673_v39, %v6409_v62  ;;  %v3101_v26 = vmul.f32 %v3100_v44, %v6413_v1  ;;  %v3538_v39 = vstv %s5032_s26  ;;  %s5078_s26 = sld [smem:[#allocation7 + $0xa]] }
 0x2d1   : > { %v3274_v49 = vadd.f32 %v3272_v29, %v3266_v46  ;;  %v3430_v50 = vadd.f32 %v3428_v40, %v3422_v47 }
 0x2d2   : > { %v3449_v54 = vpop.permute.xlu1 %3448  ;;  %v3441_v60 = vpop.permute.xlu0 %3440 }
 0x2d3   : > { %v3435_v56 = vadd.f32 %v3434_v51, %v3430_v50  ;;  %v6614_v59 = vadd.f32 %v3278_v53, %v3274_v49  ;;  %v3121_v53 = vstv %s4973_s14  ;;  %s5063_s14 = sld [smem:[#allocation5 + $0x66]] }
 0x2d4   : > { %3764 = vrot.lane.b32.xlu0 %v3762_v55, %s5941_s9  ;;  %v3122_v62 = vmul.f32 %v3121_v53, %v6419_v7 }
 0x2d5   : > { %v3443_v2 = vadd.f32 %v3441_v60, %v3435_v56 }
 0x2d6   : > { %v3462_v3 = vpop.permute.xlu1 %3461  ;;  %v3470_v15 = vpop.permute.xlu0 %3469 }
 0x2d7   : > { %v3451_v6 = vadd.f32 %v3449_v54, %v3443_v2 }
 0x2d8   : > { %3785 = vrot.lane.b32.xlu0 %v3783_v5, %s5941_s9 }
 0x2d9   : > { %v3456_v11 = vadd.f32 %v3455_v8, %v3451_v6  ;;  %v3497_v8 = vmul.f32 %v3496_v61, %v6413_v1 }
 0x2da   : > { %v3618_v12 = vpop.permute.xlu1 %3617 }
 0x2db   : > { %v3464_v14 = vadd.f32 %v3462_v3, %v3456_v11  ;;  %v3620_v19 = vadd.f32 %v3618_v12, %v3612_v4 }
 0x2dd   : > { %v3472_v17 = vadd.f32 %v3470_v15, %v3464_v14  ;;  %v3299_v15 = vmul.f32 %v3298_v9, %v6413_v1  ;;  %v3163_v9 = vstv %s4979_s28  ;;  %s5085_s28 = sld [smem:[#allocation7 + $0x11]] }
 0x2de   : > { %v3626_v22 = vpop.permute.xlu1 %3625 }
 0x2df   : > { %v3628_v23 = vadd.f32 %v3626_v22, %v3620_v19  ;;  %v3477_v18 = vadd.f32 %v3476_v20, %v3472_v17  ;;  %v3319_v22 = vstv %s6632_s22  ;;  %s5072_s22 = sld [smem:[#allocation7 + $0x4]] }
 0x2e0   : > { %v3320_v30 = vmul.f32 %v3319_v22, %v6419_v7 }
 0x2e1   : > { %v3633_v27 = vadd.f32 %v3632_v25, %v3628_v23  ;;  %v3517_v23 = vstv %s6634_s23  ;;  %s5073_s23 = sld [smem:[#allocation7 + $0x5]] }
 0x2e2   : > { %v3087_v28 = vpop.permute.xlu0 %3086  ;;  %v3639_v29 = vpop.permute.xlu1 %3638 }
 0x2e3   : > { %v3641_v31 = vadd.f32 %v3639_v29, %v3633_v27  ;;  %v3089_v45 = vadd.f32 %v3087_v28, %v6583_v24 }
 0x2e6   : > { %v3108_v32 = vpop.permute.xlu0 %3107  ;;  %v3647_v33 = vpop.permute.xlu1 %3646 }
 0x2e7   : > { %v3649_v34 = vadd.f32 %v3647_v33, %v3641_v31  ;;  %v3518_v31 = vmul.f32 %v3517_v23, %v6419_v7 }
 0x2e9   : > { %v3654_v36 = vadd.f32 %v3653_v35, %v3649_v34 }
 0x2ea   : > { %v3129_v37 = vpop.permute.xlu0 %3128  ;;  %v3660_v38 = vpop.permute.xlu1 %3659 }
 0x2eb   : > { %v3662_v40 = vadd.f32 %v3660_v38, %v3654_v36  ;;  %v3340_v36 = vstv %s5004_s24  ;;  %v3694_v38 = vstv %s5054_s25  ;;  %s5075_s24 = sld [smem:[#allocation7 + $0x7]]  ;;  %s5076_s25 = sld [smem:[#allocation7 + $0x8]] }
 0x2ee   : > { %v3293_v41 = vpop.permute.xlu0 %3292  ;;  %v3668_v21 = vpop.permute.xlu1 %3667 }
 0x2ef   : > { %v3670_v42 = vadd.f32 %v3668_v21, %v3662_v40 }
 0x2f1   : > { %v6628_v46 = vadd.f32 %v3674_v43, %v3670_v42  ;;  %v3341_v42 = vmul.f32 %v3340_v36, %v6462_v52 }
 0x2f2   : > { %v3314_v47 = vpop.permute.xlu0 %3313  ;;  %v3095_v48 = vpop.permute.xlu1 %3094 }
 0x2f3   : > { %v3097_v49 = vadd.f32 %v3095_v48, %v3089_v45  ;;  %v3695_v45 = vmul.f32 %v3694_v38, %v6413_v1 }
 0x2f5   : > { %v3102_v50 = vadd.f32 %v3101_v26, %v3097_v49  ;;  %v3539_v26 = vmul.f32 %v3538_v39, %v6462_v52 }
 0x2f6   : > { %v3335_v51 = vpop.permute.xlu0 %3334  ;;  %v3116_v54 = vpop.permute.xlu1 %3115 }
 0x2f7   : > { %v3110_v55 = vadd.f32 %v3108_v32, %v3102_v50 }
 0x2f9   : > { %v3118_v56 = vadd.f32 %v3116_v54, %v3110_v55 }
 0x2fa   : > { %v3483_v58 = vpop.permute.xlu0 %3482  ;;  %v3137_v24 = vpop.permute.xlu1 %3136 }
 0x2fb   : > { %v3123_v60 = vadd.f32 %v3122_v62, %v3118_v56  ;;  %v3485_v2 = vadd.f32 %v3483_v58, %v3477_v18  ;;  %v3715_v62 = vstv %s5057_s1  ;;  %s5082_s1 = sld [smem:[#allocation7 + $0xe]] }
 0x2fd   : > { %v3131_v3 = vadd.f32 %v3129_v37, %v3123_v60 }
 0x2fe   : > { %v3491_v5 = vpop.permute.xlu0 %3490  ;;  %v3285_v6 = vpop.permute.xlu1 %3284 }
 0x2ff   : > { %v3139_v10 = vadd.f32 %v3137_v24, %v3131_v3  ;;  %v3493_v11 = vadd.f32 %v3491_v5, %v3485_v2  ;;  %v3287_v12 = vadd.f32 %v3285_v6, %v6614_v59  ;;  %v3716_v24 = vmul.f32 %v3715_v62, %v6419_v7 }
 0x301   : > { %v3295_v14 = vadd.f32 %v3293_v41, %v3287_v12  ;;  %v3498_v4 = vadd.f32 %v3497_v8, %v3493_v11  ;;  %v3144_v16 = vadd.f32 %v3143_v13, %v3139_v10  ;;  %v3737_v8 = vmul.f32 %v3736_v0, %v6462_v52 }
 0x302   : > { %v3504_v17 = vpop.permute.xlu0 %3503  ;;  %v3306_v19 = vpop.permute.xlu1 %3305 }
 0x303   : > { %v3300_v20 = vadd.f32 %v3299_v15, %v3295_v14  ;;  %v3506_v25 = vadd.f32 %v3504_v17, %v3498_v4  ;;  %v3164_v14 = vmul.f32 %v3163_v9, %v6468_v57  ;;  %v3184_v17 = vstv %s4982_s29  ;;  %s5084_s29 = sld [smem:[#allocation7 + $0x10]] }
 0x304   : > { %v3185_v22 = vmul.f32 %v3184_v17, %v6474_v63  ;;  %v3778_v9 = vstv %s5066_s16  ;;  %s5093_s16 = sld [smem:[#allocation7 + $0x19]] }
 0x305   : > { %v3308_v18 = vadd.f32 %v3306_v19, %v3300_v20 }
 0x306   : > { %v3512_v27 = vpop.permute.xlu0 %3511  ;;  %v3327_v28 = vpop.permute.xlu1 %3326 }
 0x307   : > { %v3316_v59 = vadd.f32 %v3314_v47, %v3308_v18  ;;  %v3514_v29 = vadd.f32 %v3512_v27, %v3506_v25 }
 0x309   : > { %v3321_v32 = vadd.f32 %v3320_v30, %v3316_v59  ;;  %v3519_v33 = vadd.f32 %v3518_v31, %v3514_v29  ;;  %v3361_v30 = vstv %s5007_s6  ;;  %s5087_s6 = sld [smem:[#allocation7 + $0x13]] }
 0x30a   : > { %v3525_v34 = vpop.permute.xlu0 %3524  ;;  %v3681_v35 = vpop.permute.xlu1 %3680  ;;  %v3362_v38 = vmul.f32 %v3361_v30, %v6468_v57  ;;  %v3854_v30 = vstv %s5075_s24  ;;  %s5103_s24 = sld [smem:[#allocation7 + $0x23]] }
 0x30b   : > { %v3329_v37 = vadd.f32 %v3327_v28, %v3321_v32  ;;  %v3527_v41 = vadd.f32 %v3525_v34, %v3519_v33  ;;  %v3683_v21 = vadd.f32 %v3681_v35, %v6628_v46 }
 0x30d   : > { %v3337_v40 = vadd.f32 %v3335_v51, %v3329_v37 }
 0x30e   : > { %v3533_v43 = vpop.permute.xlu0 %3532  ;;  %v3689_v44 = vpop.permute.xlu1 %3688 }
 0x30f   : > { %v3535_v47 = vadd.f32 %v3533_v43, %v3527_v41  ;;  %v3691_v48 = vadd.f32 %v3689_v44, %v3683_v21  ;;  %v3342_v49 = vadd.f32 %v3341_v42, %v3337_v40  ;;  %v3382_v21 = vstv %s5010_s7  ;;  %s5091_s7 = sld [smem:[#allocation7 + $0x17]] }
 0x310   : > { %v3580_v42 = vstv %s5038_s8  ;;  %s5090_s8 = sld [smem:[#allocation7 + $0x16]] }
 0x311   : > { %v3696_v50 = vadd.f32 %v3695_v45, %v3691_v48  ;;  %v3540_v53 = vadd.f32 %v3539_v26, %v3535_v47  ;;  %v3383_v26 = vmul.f32 %v3382_v21, %v6474_v63  ;;  %v3896_v21 = vstv %s5081_s27  ;;  %s5109_s27 = sld [smem:[#allocation7 + $0x28]] }
 0x312   : > { %v3150_v54 = vpop.permute.xlu0 %3149  ;;  %v3702_v55 = vpop.permute.xlu1 %3701 }
 0x313   : > { %v3704_v51 = vadd.f32 %v3702_v55, %v3696_v50  ;;  %v3152_v10 = vadd.f32 %v3150_v54, %v3144_v16  ;;  %v3559_v16 = vstv %s5035_s30  ;;  %s5088_s30 = sld [smem:[#allocation7 + $0x14]] }
 0x314   : > { %v3560_v34 = vmul.f32 %v3559_v16, %v6468_v57  ;;  %v3841_v16 = vstv %s5073_s23  ;;  %s5099_s23 = sld [smem:[#allocation7 + $0x1f]] }
 0x316   : > { %v3171_v56 = vpop.permute.xlu0 %3170  ;;  %v3710_v46 = vpop.permute.xlu1 %3709 }
 0x317   : > { %v3712_v58 = vadd.f32 %v3710_v46, %v3704_v51 }
 0x319   : > { %v3717_v60 = vadd.f32 %v3716_v24, %v3712_v58 }
 0x31a   : > { %v3192_v1 = vpop.permute.xlu0 %3191  ;;  %v3723_v61 = vpop.permute.xlu1 %3722 }
 0x31b   : > { %v3725_v2 = vadd.f32 %v3723_v61, %v3717_v60  ;;  %v3757_v61 = vstv %s5063_s14  ;;  %s5094_s14 = sld [smem:[#allocation7 + $0x1a]] }
 0x31e   : > { %v3356_v3 = vpop.permute.xlu0 %3355  ;;  %v3731_v5 = vpop.permute.xlu1 %3730 }
 0x31f   : > { %v3733_v6 = vadd.f32 %v3731_v5, %v3725_v2  ;;  %v3758_v5 = vmul.f32 %v3757_v61, %v6468_v57  ;;  %v3812_v57 = vstv %s5069_s17  ;;  %s5097_s17 = sld [smem:[#allocation7 + $0x1d]]  ;;  %v3980_v61 = vstv %s5093_s16  ;;  %s5183_s16 = sld [smem:[#allocation7 + $0x6e]] }
 0x321   : > { %v3738_v11 = vadd.f32 %v3737_v8, %v3733_v6 }
 0x322   : > { %v3377_v12 = vpop.permute.xlu0 %3376  ;;  %v3158_v13 = vpop.permute.xlu1 %3157 }
 0x323   : > { %v3160_v7 = vadd.f32 %v3158_v13, %v3152_v10 }
 0x325   : > { %v3165_v4 = vadd.f32 %v3164_v14, %v3160_v7  ;;  %v3779_v14 = vmul.f32 %v3778_v9, %v6474_v63 }
 0x326   : > { %v3398_v15 = vpop.permute.xlu0 %3397  ;;  %v3179_v19 = vpop.permute.xlu1 %3178 }
 0x327   : > { %v3173_v20 = vadd.f32 %v3171_v56, %v3165_v4 }
 0x329   : > { %v3181_v23 = vadd.f32 %v3179_v19, %v3173_v20 }
 0x32a   : > { %v3546_v25 = vpop.permute.xlu0 %3545  ;;  %v3200_v52 = vpop.permute.xlu1 %3199 }
 0x32b   : > { %v3186_v18 = vadd.f32 %v3185_v22, %v3181_v23  ;;  %v3548_v27 = vadd.f32 %v3546_v25, %v3540_v53  ;;  %v3820_v22 = vstv %s5070_s21  ;;  %s5096_s21 = sld [smem:[#allocation7 + $0x1c]] }
 0x32d   : > { %v3194_v28 = vadd.f32 %v3192_v1, %v3186_v18  ;;  %v3833_v18 = vstv %s5072_s22  ;;  %s5100_s22 = sld [smem:[#allocation7 + $0x20]] }
 0x32e   : > { %v3554_v59 = vpop.permute.xlu0 %3553  ;;  %v3348_v29 = vpop.permute.xlu1 %3347 }
 0x32f   : > { %v3202_v31 = vadd.f32 %v3200_v52, %v3194_v28  ;;  %v3556_v32 = vadd.f32 %v3554_v59, %v3548_v27  ;;  %v3350_v33 = vadd.f32 %v3348_v29, %v3342_v49  ;;  %v3581_v49 = vmul.f32 %v3580_v42, %v6474_v63 }
 0x331   : > { %v3203_v35 = vmax.f32 %v3202_v31, 0.0  ;;  %v3358_v36 = vadd.f32 %v3356_v3, %v3350_v33  ;;  %v3561_v37 = vadd.f32 %v3560_v34, %v3556_v32  ;;  %v3862_v31 = vstv %s5076_s25  ;;  %s5102_s25 = sld [smem:[#allocation7 + $0x22]] }
 0x332   : > { %v3567_v39 = vpop.permute.xlu0 %3566  ;;  %v3369_v41 = vpop.permute.xlu1 %3368 }
 0x333   : > { %v3363_v40 = vadd.f32 %v3362_v38, %v3358_v36  ;;  %3205 = vrot.lane.b32.xlu0 %v3203_v35, %s5940_s0  ;;  %v3569_v43 = vadd.f32 %v3567_v39, %v3561_v37  ;;  %v3875_v36 = vstv %s5078_s26  ;;  %s5106_s26 = sld [smem:[#allocation7 + $0x25]] }
 0x335   : > { %v3371_v44 = vadd.f32 %v3369_v41, %v3363_v40  ;;  %v3904_v41 = vstv %s5082_s1  ;;  %s5110_s1 = sld [smem:[#allocation7 + $0x29]] }
 0x336   : > { %v3575_v45 = vpop.permute.xlu0 %3574  ;;  %v3390_v54 = vpop.permute.xlu1 %3389 }
 0x337   : > { %v3379_v47 = vadd.f32 %v3377_v12, %v3371_v44  ;;  %v3577_v48 = vadd.f32 %v3575_v45, %v3569_v43  ;;  %v3925_v45 = vstv %s5085_s28  ;;  %s5113_s28 = sld [smem:[#allocation7 + $0x2c]] }
 0x339   : > { %v3384_v50 = vadd.f32 %v3383_v26, %v3379_v47  ;;  %v3582_v53 = vadd.f32 %v3581_v49, %v3577_v48  ;;  %v3917_v47 = vstv %s5084_s29  ;;  %s5112_s29 = sld [smem:[#allocation7 + $0x2b]] }
 0x33a   : > { %v3588_v55 = vpop.permute.xlu0 %3587  ;;  %v3752_v2 = vpop.permute.xlu1 %3751 }
 0x33b   : > { %v3392_v62 = vadd.f32 %v3390_v54, %v3384_v50  ;;  %v3590_v56 = vadd.f32 %v3588_v55, %v3582_v53  ;;  %v3946_v50 = vstv %s5088_s30  ;;  %v3938_v53 = vstv %s5087_s6  ;;  %s5144_s30 = sld [smem:[#allocation7 + $0x49]]  ;;  %s5115_s6 = sld [smem:[#allocation7 + $0x2e]] }
 0x33d   : > { %v3400_v51 = vadd.f32 %v3398_v15, %v3392_v62 }
 0x33e   : > { %v3596_v46 = vpop.permute.xlu0 %3595  ;;  %v3773_v12 = vpop.permute.xlu1 %3772 }
 0x33f   : > { %v3598_v58 = vadd.f32 %v3596_v46, %v3590_v56  ;;  %v3401_v24 = vmax.f32 %v3400_v51, 0.0  ;;  %v3967_v56 = vstv %s5091_s7  ;;  %v3959_v46 = vstv %s5090_s8  ;;  %s5145_s7 = sld [smem:[#allocation7 + $0x4a]]  ;;  %s5182_s8 = sld [smem:[#allocation7 + $0x6d]] }
 0x341   : > { %v3599_v60 = vmax.f32 %v3598_v58, 0.0  ;;  %3403 = vrot.lane.b32.xlu1 %v3401_v24, %s5940_s0 }
 0x342   : > { %v3744_v1 = vpop.permute.xlu0 %3743  ;;  %v3794_v17 = vpop.permute.xlu1 %3793 }
 0x343   : > { %v3746_v0 = vadd.f32 %v3744_v1, %v3738_v11  ;;  %3601 = vrot.lane.b32.xlu0 %v3599_v60, %s5940_s0  ;;  %v3988_v1 = vstv %s5094_s14  ;;  %s5147_s14 = sld [smem:[#allocation7 + $0x4c]] }
 0x345   : > { %v3754_v3 = vadd.f32 %v3752_v2, %v3746_v0 }
 0x346   : > { %v3765_v8 = vpop.permute.xlu0 %3764 }
 0x347   : > { %v3759_v6 = vadd.f32 %v3758_v5, %v3754_v3  ;;  %v4009_v5 = vstv %s5097_s17  ;;  %s5148_s17 = sld [smem:[#allocation7 + $0x4d]] }
 0x349   : > { %v3767_v10 = vadd.f32 %v3765_v8, %v3759_v6  ;;  %v4001_v6 = vstv %s5096_s21  ;;  %s5185_s21 = sld [smem:[#allocation7 + $0x70]] }
 0x34a   : > { %v3786_v4 = vpop.permute.xlu0 %3785 }
 0x34b   : > { %v3775_v13 = vadd.f32 %v3773_v12, %v3767_v10  ;;  %v4030_v12 = vstv %s5100_s22  ;;  %s5150_s22 = sld [smem:[#allocation7 + $0x4f]] }
 0x34d   : > { %v3780_v7 = vadd.f32 %v3779_v14, %v3775_v13  ;;  %v4022_v13 = vstv %s5099_s23  ;;  %s5186_s23 = sld [smem:[#allocation7 + $0x71]] }
 0x34f   : > { %v3788_v15 = vadd.f32 %v3786_v4, %v3780_v7 }
 0x351   : > { %v3796_v19 = vadd.f32 %v3794_v17, %v3788_v15  ;;  %v4051_v15 = vstv %s5103_s24  ;;  %v4043_v17 = vstv %s5102_s25  ;;  %s5151_s24 = sld [smem:[#allocation7 + $0x50]]  ;;  %s5188_s25 = sld [smem:[#allocation7 + $0x73]] }
 0x353   : > { %v3797_v11 = vmax.f32 %v3796_v19, 0.0 }
 0x355   : > { %3799 = vrot.lane.b32.xlu1 %v3797_v11, %s5940_s0  ;;  %s5079_s0 = sld [smem:[#allocation7 + $0xb]] }
 0x35b   : > { %v3883_v35 = vstv %s5079_s0  ;;  %s5107_s0 = sld [smem:[#allocation7 + $0x26]] }
 0x3a5   : > { %v3206_v20 = vpop.permute.xlu0 %3205 }
 0x3a6   : > { %3208 = vst.msk [vmem:[#allocation3 + $0x1] sm:$0xff] %vm1141_vm13, %v3206_v20  ;;  %v4078_v20 = vstv %s5107_s0  ;;  %s5153_s0 = sld [smem:[#allocation7 + $0x52]] }
 0x3ad   : > { %v6663_v63 = vld [vmem:[#allocation3] sm:$0xff] }
 0x3ae   : > { %v3813_v23 = vmul.f32 %v3812_v57, %v6663_v63  ;;  %v3821_v25 = vmul.f32 %v3820_v22, %v6663_v63  ;;  %v6667_v52 = vld [vmem:[#allocation3 + $0x1] sm:$0xff]  ;;  %v4070_v57 = vstv %s5106_s26  ;;  %v4079_v22 = vmul.f32 %v4078_v20, %v6663_v63  ;;  %s5189_s26 = sld [smem:[#allocation7 + $0x74]] }
 0x3af   : > { %v3834_v27 = vmul.f32 %v3833_v18, %v6667_v52  ;;  %v3842_v28 = vmul.f32 %v3841_v16, %v6667_v52  ;;  %v6673_v29 = vld [vmem:[#allocation3 + $0x2] sm:$0xff]  ;;  %v4091_v18 = vstv %s5109_s27  ;;  %s5191_s27 = sld [smem:[#allocation7 + $0x76]] }
 0x3b0   : > { %3815 = vrot.lane.b32.xlu0 %v3813_v23, %s5941_s9  ;;  %3823 = vrot.lane.b32.xlu1 %v3821_v25, %s5942_s2  ;;  %v3855_v33 = vmul.f32 %v3854_v30, %v6673_v29  ;;  %v3863_v34 = vmul.f32 %v3862_v31, %v6673_v29  ;;  %v4071_v23 = vmul.f32 %v4070_v57, %v6663_v63  ;;  %v4099_v25 = vstv %s5110_s1  ;;  %s5116_s1 = sld [smem:[#allocation7 + $0x2f]] }
 0x3b1   : > { %v4100_v16 = vmul.f32 %v4099_v25, %v6667_v52 }
 0x3b3   : > { %v3404_v59 = vpop.permute.xlu1 %3403 }
 0x3b4   : > { %3406 = vst.msk [vmem:[#allocation3 + $0x11] sm:$0xff] %vm1141_vm13, %v3404_v59  ;;  %3836 = vrot.lane.b32.xlu0 %v3834_v27, %s5941_s9  ;;  %3844 = vrot.lane.b32.xlu1 %v3842_v28, %s5942_s2  ;;  %v4092_v27 = vmul.f32 %v4091_v18, %v6667_v52  ;;  %v4120_v28 = vstv %s5113_s28  ;;  %v4112_v59 = vstv %s5112_s29  ;;  %s5192_s28 = sld [smem:[#allocation7 + $0x77]]  ;;  %s5154_s29 = sld [smem:[#allocation7 + $0x53]] }
 0x3b5   : > { %v3602_v32 = vpop.permute.xlu0 %3601  ;;  %v4121_v30 = vmul.f32 %v4120_v28, %v6673_v29  ;;  %v4113_v31 = vmul.f32 %v4112_v59, %v6673_v29 }
 0x3b6   : > { %3604 = vst.msk [vmem:[#allocation3 + $0x21] sm:$0xff] %vm1141_vm13, %v3602_v32  ;;  %v4328_v32 = vstv %s5144_s30  ;;  %s5156_s30 = sld [smem:[#allocation7 + $0x55]] }
 0x3b8   : > { %3857 = vrot.lane.b32.xlu0 %v3855_v33, %s5941_s9  ;;  %3865 = vrot.lane.b32.xlu1 %v3863_v34, %s5942_s2  ;;  %v4133_v33 = vstv %s5115_s6  ;;  %v4329_v34 = vmul.f32 %v4328_v32, %v6663_v63  ;;  %s5118_s6 = sld [smem:[#allocation7 + $0x31]] }
 0x3bb   : > { %v6683_v37 = vld [vmem:[#allocation3 + $0x10] sm:$0xff] }
 0x3bc   : > { %v3884_v38 = vmul.f32 %v3883_v35, %v6683_v37  ;;  %v3876_v39 = vmul.f32 %v3875_v36, %v6683_v37  ;;  %v6687_v40 = vld [vmem:[#allocation3 + $0x11] sm:$0xff]  ;;  %v4134_v35 = vmul.f32 %v4133_v33, %v6683_v37  ;;  %v4336_v36 = vstv %s5145_s7  ;;  %s5119_s7 = sld [smem:[#allocation7 + $0x32]] }
 0x3bd   : > { %v3905_v42 = vmul.f32 %v3904_v41, %v6687_v40  ;;  %v3897_v43 = vmul.f32 %v3896_v21, %v6687_v40  ;;  %v6693_v44 = vld [vmem:[#allocation3 + $0x12] sm:$0xff]  ;;  %v6699_v49 = vld [vmem:[#allocation3 + $0x20] sm:$0xff]  ;;  %v4349_v21 = vstv %s5147_s14  ;;  %s5195_s14 = sld [smem:[#allocation7 + $0x7a]] }
 0x3be   : > { %3886 = vrot.lane.b32.xlu1 %v3884_v38, %s5942_s2  ;;  %3878 = vrot.lane.b32.xlu0 %v3876_v39, %s5941_s9  ;;  %v3926_v48 = vmul.f32 %v3925_v45, %v6693_v44  ;;  %v3918_v26 = vmul.f32 %v3917_v47, %v6693_v44  ;;  %v3947_v55 = vmul.f32 %v3946_v50, %v6699_v49  ;;  %v6706_v51 = vld [vmem:[#allocation3 + $0x21] sm:$0xff]  ;;  %v4586_v38 = vstv %s5182_s8  ;;  %s5194_s8 = sld [smem:[#allocation7 + $0x79]] }
 0x3bf   : > { %v3939_v62 = vmul.f32 %v3938_v53, %v6699_v49  ;;  %v3968_v58 = vmul.f32 %v3967_v56, %v6706_v51  ;;  %v3960_v24 = vmul.f32 %v3959_v46, %v6706_v51  ;;  %v6712_v60 = vld [vmem:[#allocation3 + $0x22] sm:$0xff]  ;;  %v4337_v39 = vmul.f32 %v4336_v36, %v6663_v63 }
 0x3c0   : > { %v3989_v0 = vmul.f32 %v3988_v1, %v6712_v60  ;;  %v3981_v2 = vmul.f32 %v3980_v61, %v6712_v60  ;;  %v4587_v41 = vmul.f32 %v4586_v38, %v6663_v63  ;;  %v4357_v47 = vstv %s5148_s17  ;;  %s5159_s17 = sld [smem:[#allocation7 + $0x58]] }
 0x3c1   : > { %v4370_v53 = vstv %s5150_s22  ;;  %v4378_v56 = vstv %s5151_s24  ;;  %v4628_v46 = vstv %s5188_s25  ;;  %v4391_v1 = vstv %s5153_s0  ;;  %s3806_s22 = sld [smem:[#allocation7]]  ;;  %s5197_s24 = sld [smem:[#allocation7 + $0x7c]] }
 0x3c2   : > { %3907 = vrot.lane.b32.xlu1 %v3905_v42, %s5942_s2  ;;  %3899 = vrot.lane.b32.xlu0 %v3897_v43, %s5941_s9  ;;  %v4594_v42 = vstv %s5183_s16  ;;  %v4350_v43 = vmul.f32 %v4349_v21, %v6667_v52  ;;  %v4636_v61 = vstv %s5189_s26  ;;  %s5157_s16 = sld [smem:[#allocation7 + $0x56]]  ;;  %s3803_s25 = sld [smem:[#allocation8]] }
 0x3c3   : > { %v4595_v45 = vmul.f32 %v4594_v42, %v6663_v63  ;;  %v4162_v20 = vstv %s5119_s7  ;;  %v4678_v25 = vstv %s5195_s14  ;;  %s5198_s0 = sld [smem:[#allocation7 + $0x7d]]  ;;  %s5160_s26 = sld [smem:[#allocation7 + $0x59]] }
 0x3c4   : > { %v4670_v57 = vstv %s5194_s8  ;;  %s6822_s7 = sld [smem:[#allocation7 + $0x80]]  ;;  %s6824_s8 = sld [smem:[#allocation7 + $0x5c]] }
 0x3c5   : > { %s6828_s14 = sld [smem:[#allocation7 + $0x9]] }
 0x3c6   : > { %3928 = vrot.lane.b32.xlu1 %v3926_v48, %s5942_s2  ;;  %3920 = vrot.lane.b32.xlu0 %v3918_v26, %s5941_s9  ;;  %v4607_v48 = vstv %s5185_s21  ;;  %v4358_v26 = vmul.f32 %v4357_v47, %v6667_v52  ;;  %s5121_s21 = sld [smem:[#allocation7 + $0x34]]  ;;  %v4433_v28 = vstv %s5159_s17  ;;  %s6837_s17 = sld [smem:[#allocation7 + $0x3a]] }
 0x3c7   : > { %v3800_v54 = vpop.permute.xlu1 %3799  ;;  %v4608_v50 = vmul.f32 %v4607_v48, %v6667_v52 }
 0x3c8   : > { %3802 = vst.msk [vmem:[#allocation3 + $0x31] sm:$0xff] %vm1141_vm13, %v3800_v54  ;;  %v4615_v54 = vstv %s5186_s23  ;;  %v4420_v18 = vstv %s5157_s16  ;;  %s5122_s23 = sld [smem:[#allocation7 + $0x35]]  ;;  %v3804_v36 = vstv %s3803_s25  ;;  %s6835_s16 = sld [smem:[#allocation7 + $0x5e]] }
 0x3c9   : > { %v4699_v21 = vstv %s5198_s0  ;;  %v4441_v42 = vstv %s5160_s26  ;;  %s6862_s25 = sld [smem:[#allocation7 + $0x5f]]  ;;  %s6873_s26 = sld [smem:[#allocation7 + $0x61]] }
 0x3ca   : > { %3949 = vrot.lane.b32.xlu1 %v3947_v55, %s5942_s2  ;;  %3941 = vrot.lane.b32.xlu0 %v3939_v62, %s5941_s9  ;;  %v4371_v55 = vmul.f32 %v4370_v53, %v6673_v29  ;;  %v4616_v62 = vmul.f32 %v4615_v54, %v6667_v52  ;;  %s6866_s0 = sld [smem:[#allocation7 + $0xf]] }
 0x3cc   : > { %v4175_v59 = vstv %s5121_s21  ;;  %s6844_s21 = sld [smem:[#allocation7 + $0xc]] }
 0x3cd   : > { %v4176_v32 = vmul.f32 %v4175_v59, %v6693_v44 }
 0x3ce   : > { %3970 = vrot.lane.b32.xlu1 %v3968_v58, %s5942_s2  ;;  %3962 = vrot.lane.b32.xlu0 %v3960_v24, %s5941_s9  ;;  %v4379_v58 = vmul.f32 %v4378_v56, %v6673_v29  ;;  %v4629_v24 = vmul.f32 %v4628_v46, %v6673_v29 }
 0x3cf   : > { %v6718_v3 = vld [vmem:[#allocation3 + $0x30] sm:$0xff] }
 0x3d0   : > { %v4010_v8 = vmul.f32 %v4009_v5, %v6718_v3  ;;  %v4002_v9 = vmul.f32 %v4001_v6, %v6718_v3  ;;  %v6724_v10 = vld [vmem:[#allocation3 + $0x31] sm:$0xff]  ;;  %v4141_v5 = vstv %s5116_s1  ;;  %v4649_v6 = vstv %s5191_s27  ;;  %s5071_s1 = sld [smem:[#allocation7 + $0x3]] }
 0x3d1   : > { %v4031_v14 = vmul.f32 %v4030_v12, %v6724_v10  ;;  %v4023_v7 = vmul.f32 %v4022_v13, %v6724_v10  ;;  %v6730_v4 = vld [vmem:[#allocation3 + $0x32] sm:$0xff]  ;;  %v4657_v12 = vstv %s5192_s28  ;;  %v4399_v13 = vstv %s5154_s29  ;;  %s6801_s27 = sld [smem:[#allocation7 + $0x5b]]  ;;  %s6803_s28 = sld [smem:[#allocation7 + $0x37]] }
 0x3d2   : > { %3991 = vrot.lane.b32.xlu1 %v3989_v0, %s5942_s2  ;;  %3983 = vrot.lane.b32.xlu0 %v3981_v2, %s5941_s9  ;;  %v4052_v19 = vmul.f32 %v4051_v15, %v6730_v4  ;;  %v4044_v11 = vmul.f32 %v4043_v17, %v6730_v4  ;;  %v4392_v0 = vmul.f32 %v4391_v1, %v6683_v37  ;;  %v4412_v15 = vstv %s5156_s30  ;;  %s6809_s29 = sld [smem:[#allocation7 + $0x6]]  ;;  %s6811_s30 = sld [smem:[#allocation7 + $0x38]] }
 0x3d3   : > { %v4637_v2 = vmul.f32 %v4636_v61, %v6673_v29  ;;  %v4154_v17 = vstv %s5118_s6  ;;  %s6813_s6 = sld [smem:[#allocation7 + $0x7f]]  ;;  %v3892_v59 = vstv %s6844_s21  ;;  %s6930_s21 = sld [smem:[#allocation7 + $0x41]] }
 0x3d6   : > { %4012 = vrot.lane.b32.xlu1 %v4010_v8, %s5942_s2  ;;  %4004 = vrot.lane.b32.xlu0 %v4002_v9, %s5941_s9  ;;  %v4142_v8 = vmul.f32 %v4141_v5, %v6683_v37  ;;  %v4650_v9 = vmul.f32 %v4649_v6, %v6683_v37  ;;  %v3829_v47 = vstv %s5071_s1  ;;  %s6875_s1 = sld [smem:[#allocation7 + $0x3d]] }
 0x3d7   : > { %v3830_v54 = vmul.f32 %v3829_v47, %v6667_v52 }
 0x3d9   : > { %v4712_v5 = vstv %s6813_s6  ;;  %s6900_s6 = sld [smem:[#allocation7 + $0x62]] }
 0x3da   : > { %4033 = vrot.lane.b32.xlu1 %v4031_v14, %s5942_s2  ;;  %4025 = vrot.lane.b32.xlu0 %v4023_v7, %s5941_s9  ;;  %v4658_v14 = vmul.f32 %v4657_v12, %v6683_v37  ;;  %v4400_v7 = vmul.f32 %v4399_v13, %v6683_v37 }
 0x3de   : > { %4054 = vrot.lane.b32.xlu1 %v4052_v19, %s5942_s2  ;;  %4046 = vrot.lane.b32.xlu0 %v4044_v11, %s5941_s9  ;;  %v4413_v19 = vmul.f32 %v4412_v15, %v6687_v40  ;;  %v4155_v11 = vmul.f32 %v4154_v17, %v6687_v40  ;;  %v4720_v15 = vstv %s6822_s7  ;;  %v4462_v17 = vstv %s6824_s8  ;;  %s6904_s7 = sld [smem:[#allocation7 + $0x15]]  ;;  %s6911_s8 = sld [smem:[#allocation7 + $0x64]] }
 0x3e2   : > { %4081 = vrot.lane.b32.xlu1 %v4079_v22, %s5942_s2  ;;  %4073 = vrot.lane.b32.xlu0 %v4071_v23, %s5941_s9  ;;  %v4163_v22 = vmul.f32 %v4162_v20, %v6687_v40  ;;  %v4671_v23 = vmul.f32 %v4670_v57, %v6687_v40 }
 0x3e6   : > { %4102 = vrot.lane.b32.xlu1 %v4100_v16, %s5942_s2  ;;  %4094 = vrot.lane.b32.xlu0 %v4092_v27, %s5941_s9  ;;  %v4679_v16 = vmul.f32 %v4678_v25, %v6687_v40  ;;  %v4421_v27 = vmul.f32 %v4420_v18, %v6687_v40 }
 0x3ea   : > { %4123 = vrot.lane.b32.xlu1 %v4121_v30, %s5942_s2  ;;  %4115 = vrot.lane.b32.xlu0 %v4113_v31, %s5941_s9  ;;  %v3808_v30 = vstv %s3806_s22  ;;  %v4434_v31 = vmul.f32 %v4433_v28, %v6693_v44  ;;  %s6848_s22 = sld [smem:[#allocation7 + $0x3b]] }
 0x3eb   : > { %v3809_v33 = vmul.f32 %v3808_v30, %v6663_v63 }
 0x3ee   : > { %4331 = vrot.lane.b32.xlu1 %v4329_v34, %s5941_s9  ;;  %4136 = vrot.lane.b32.xlu0 %v4134_v35, %s5941_s9  ;;  %v4183_v34 = vstv %s5122_s23  ;;  %v4691_v35 = vstv %s5197_s24  ;;  %s6850_s23 = sld [smem:[#allocation7 + $0x82]]  ;;  %s6860_s24 = sld [smem:[#allocation7 + $0x83]] }
 0x3ef   : > { %v4184_v38 = vmul.f32 %v4183_v34, %v6693_v44 }
 0x3f2   : > { %4339 = vrot.lane.b32.xlu1 %v4337_v39, %s5942_s2  ;;  %4589 = vrot.lane.b32.xlu0 %v4587_v41, %s5941_s9  ;;  %v4692_v39 = vmul.f32 %v4691_v35, %v6693_v44  ;;  %v3810_v41 = vadd.f32 %v3809_v33, %v3804_v36  ;;  %v4225_v35 = vstv %s6848_s22  ;;  %s6932_s22 = sld [smem:[#allocation7 + $0x88]] }
 0x3f4   : > { %v4733_v36 = vstv %s6850_s23  ;;  %v4741_v47 = vstv %s6860_s24  ;;  %s6943_s23 = sld [smem:[#allocation8 + $0x1]] }
 0x3f5   : > { %s6948_s24 = sld [smem:[#allocation7 + $0x89]] }
 0x3f6   : > { %4352 = vrot.lane.b32.xlu1 %v4350_v43, %s5941_s9  ;;  %4597 = vrot.lane.b32.xlu0 %v4595_v45, %s5942_s2 }
 0x3fa   : > { %4360 = vrot.lane.b32.xlu1 %v4358_v26, %s5942_s2  ;;  %4610 = vrot.lane.b32.xlu0 %v4608_v50, %s5941_s9  ;;  %v4700_v26 = vmul.f32 %v4699_v21, %v6693_v44  ;;  %v4442_v50 = vmul.f32 %v4441_v42, %v6693_v44  ;;  %v4226_v42 = vmul.f32 %v4225_v35, %v6706_v51 }
 0x3fe   : > { %4373 = vrot.lane.b32.xlu1 %v4371_v55, %s5941_s9  ;;  %4618 = vrot.lane.b32.xlu0 %v4616_v62, %s5942_s2  ;;  %v4454_v55 = vstv %s6801_s27  ;;  %v4196_v62 = vstv %s6803_s28  ;;  %s6882_s27 = sld [smem:[#allocation7 + $0x12]]  ;;  %s6886_s28 = sld [smem:[#allocation7 + $0x3e]] }
 0x3ff   : > { %v4455_v1 = vmul.f32 %v4454_v55, %v6699_v49  ;;  %v4197_v61 = vmul.f32 %v4196_v62, %v6699_v49 }
 0x402   : > { %4381 = vrot.lane.b32.xlu1 %v4379_v58, %s5942_s2  ;;  %4631 = vrot.lane.b32.xlu0 %v4629_v24, %s5941_s9  ;;  %v3850_v24 = vstv %s6809_s29  ;;  %s6888_s29 = sld [smem:[#allocation7 + $0x85]] }
 0x406   : > { %4394 = vrot.lane.b32.xlu1 %v4392_v0, %s5941_s9  ;;  %4639 = vrot.lane.b32.xlu0 %v4637_v2, %s5942_s2  ;;  %v4204_v2 = vstv %s6811_s30  ;;  %s6898_s30 = sld [smem:[#allocation7 + $0x86]] }
 0x407   : > { %v4205_v13 = vmul.f32 %v4204_v2, %v6699_v49 }
 0x40a   : > { %4144 = vrot.lane.b32.xlu1 %v4142_v8, %s5942_s2  ;;  %4652 = vrot.lane.b32.xlu0 %v4650_v9, %s5941_s9  ;;  %v3851_v8 = vmul.f32 %v3850_v24, %v6673_v29 }
 0x40e   : > { %4660 = vrot.lane.b32.xlu1 %v4658_v14, %s5942_s2  ;;  %4402 = vrot.lane.b32.xlu0 %v4400_v7, %s5942_s2  ;;  %v4713_v14 = vmul.f32 %v4712_v5, %v6699_v49 }
 0x412   : > { %4415 = vrot.lane.b32.xlu1 %v4413_v19, %s5941_s9  ;;  %4157 = vrot.lane.b32.xlu0 %v4155_v11, %s5941_s9  ;;  %v3871_v19 = vstv %s6828_s14  ;;  %s6913_s14 = sld [smem:[#allocation7 + $0x40]] }
 0x413   : > { %v3872_v18 = vmul.f32 %v3871_v19, %v6683_v37  ;;  %v4762_v19 = vstv %s6898_s30  ;;  %s6989_s30 = sld [smem:[#allocation7 + $0x44]] }
 0x416   : > { %4165 = vrot.lane.b32.xlu1 %v4163_v22, %s5942_s2  ;;  %4673 = vrot.lane.b32.xlu0 %v4671_v23, %s5941_s9  ;;  %v4721_v22 = vmul.f32 %v4720_v15, %v6699_v49  ;;  %v4463_v23 = vmul.f32 %v4462_v17, %v6699_v49 }
 0x41a   : > { %4681 = vrot.lane.b32.xlu1 %v4679_v16, %s5942_s2  ;;  %4423 = vrot.lane.b32.xlu0 %v4421_v27, %s5942_s2  ;;  %v4475_v16 = vstv %s6835_s16  ;;  %v4217_v27 = vstv %s6837_s17  ;;  %s6918_s16 = sld [smem:[#allocation7 + $0x18]]  ;;  %s6926_s17 = sld [smem:[#allocation7 + $0x24]] }
 0x41b   : > { %v4218_v33 = vmul.f32 %v4217_v27, %v6706_v51  ;;  %v4517_v27 = vstv %s6911_s8  ;;  %s6998_s8 = sld [smem:[#allocation7 + $0x48]] }
 0x41e   : > { %4436 = vrot.lane.b32.xlu1 %v4434_v31, %s5941_s9  ;;  %4178 = vrot.lane.b32.xlu0 %v4176_v32, %s5941_s9  ;;  %v4476_v32 = vmul.f32 %v4475_v16, %v6706_v51 }
 0x422   : > { %v3816_v43 = vpop.permute.xlu0 %3815  ;;  %4186 = vrot.lane.b32.xlu1 %v4184_v38, %s5942_s2  ;;  %4694 = vrot.lane.b32.xlu0 %v4692_v39, %s5941_s9  ;;  %v3824_v45 = vpop.permute.xlu1 %3823  ;;  %v3893_v39 = vmul.f32 %v3892_v59, %v6687_v40 }
 0x423   : > { %v3818_v48 = vadd.f32 %v3816_v43, %v3810_v41  ;;  %v4734_v43 = vmul.f32 %v4733_v36, %v6706_v51  ;;  %v4267_v36 = vstv %s6930_s21  ;;  %s7016_s21 = sld [smem:[#allocation7 + $0x2d]] }
 0x425   : > { %v3826_v53 = vadd.f32 %v3824_v45, %v3818_v48  ;;  %v4483_v48 = vstv %s6862_s25  ;;  %s6950_s25 = sld [smem:[#allocation7 + $0x65]] }
 0x426   : > { %v3837_v56 = vpop.permute.xlu0 %3836  ;;  %4702 = vrot.lane.b32.xlu1 %v4700_v26, %s5942_s2  ;;  %4444 = vrot.lane.b32.xlu0 %v4442_v50, %s5942_s2  ;;  %v3845_v46 = vpop.permute.xlu1 %3844  ;;  %v3913_v26 = vstv %s6866_s0  ;;  %v4484_v55 = vmul.f32 %v4483_v48, %v6706_v51  ;;  %s6952_s0 = sld [smem:[#allocation7 + $0x1b]]  ;;  %v4062_v48 = vstv %s6943_s23  ;;  %s7021_s23 = sld [smem:[#allocation7 + $0x6a]] }
 0x427   : > { %v3831_v58 = vadd.f32 %v3830_v54, %v3826_v53  ;;  %v4742_v54 = vmul.f32 %v4741_v47, %v6706_v51 }
 0x429   : > { %v3839_v0 = vadd.f32 %v3837_v56, %v3831_v58  ;;  %v3914_v56 = vmul.f32 %v3913_v26, %v6693_v44  ;;  %v4238_v58 = vstv %s6875_s1  ;;  %s6966_s1 = sld [smem:[#allocation7 + $0x67]] }
 0x42a   : > { %4457 = vrot.lane.b32.xlu1 %v4455_v1, %s5941_s9  ;;  %4199 = vrot.lane.b32.xlu0 %v4197_v61, %s5941_s9  ;;  %v3858_v9 = vpop.permute.xlu0 %3857  ;;  %v3866_v12 = vpop.permute.xlu1 %3865  ;;  %v3934_v1 = vstv %s6882_s27  ;;  %v4239_v44 = vmul.f32 %v4238_v58, %v6712_v60  ;;  %s6970_s27 = sld [smem:[#allocation7 + $0x43]] }
 0x42b   : > { %v3847_v6 = vadd.f32 %v3845_v46, %v3839_v0  ;;  %v4496_v46 = vstv %s6873_s26  ;;  %s6964_s26 = sld [smem:[#allocation7 + $0x27]] }
 0x42c   : > { %v4497_v2 = vmul.f32 %v4496_v46, %v6712_v60 }
 0x42d   : > { %v3852_v7 = vadd.f32 %v3851_v8, %v3847_v6  ;;  %v4246_v6 = vstv %s6886_s28  ;;  %v4754_v8 = vstv %s6888_s29  ;;  %s6976_s28 = sld [smem:[#allocation7 + $0x1e]]  ;;  %s6978_s29 = sld [smem:[#allocation7 + $0x21]] }
 0x42e   : > { %4207 = vrot.lane.b32.xlu1 %v4205_v13, %s5942_s2  ;;  %4715 = vrot.lane.b32.xlu0 %v4713_v14, %s5941_s9  ;;  %v4755_v15 = vmul.f32 %v4754_v8, %v6712_v60 }
 0x42f   : > { %v3860_v11 = vadd.f32 %v3858_v9, %v3852_v7  ;;  %v4247_v7 = vmul.f32 %v4246_v6, %v6712_v60 }
 0x430   : > { %v3879_v20 = vpop.permute.xlu0 %3878  ;;  %v3887_v57 = vpop.permute.xlu1 %3886 }
 0x431   : > { %v3868_v25 = vadd.f32 %v3866_v12, %v3860_v11  ;;  %v3935_v12 = vmul.f32 %v3934_v1, %v6699_v49  ;;  %v4504_v11 = vstv %s6900_s6  ;;  %v3955_v49 = vstv %s6904_s7  ;;  %s6991_s6 = sld [smem:[#allocation7 + $0x8b]]  ;;  %s6996_s7 = sld [smem:[#allocation7 + $0x2a]] }
 0x432   : > { %4723 = vrot.lane.b32.xlu1 %v4721_v22, %s5942_s2  ;;  %4465 = vrot.lane.b32.xlu0 %v4463_v23, %s5942_s2  ;;  %v4763_v23 = vmul.f32 %v4762_v19, %v6712_v60  ;;  %v3956_v16 = vmul.f32 %v3955_v49, %v6706_v51  ;;  %v4518_v51 = vmul.f32 %v4517_v27, %v6718_v3  ;;  %v4087_v58 = vstv %s6964_s26  ;;  %s7040_s26 = sld [smem:[#allocation7 + $0x47]] }
 0x433   : > { %v3873_v28 = vadd.f32 %v3872_v18, %v3868_v25  ;;  %v4505_v25 = vmul.f32 %v4504_v11, %v6712_v60  ;;  %v4088_v6 = vmul.f32 %v4087_v58, %v6667_v52  ;;  %v4039_v8 = vstv %s6978_s29  ;;  %s7070_s29 = sld [smem:[#allocation7 + $0x6b]] }
 0x434   : > { %v3900_v30 = vpop.permute.xlu0 %3899  ;;  %v3908_v31 = vpop.permute.xlu1 %3907  ;;  %v4324_v11 = vstv %s6998_s8  ;;  %s7089_s8 = sld [smem:[#allocation7 + $0x72]] }
 0x435   : > { %v3881_v34 = vadd.f32 %v3879_v20, %v3873_v28  ;;  %v4259_v28 = vstv %s6913_s14  ;;  %s7001_s14 = sld [smem:[#allocation7 + $0x8c]] }
 0x436   : > { %4478 = vrot.lane.b32.xlu1 %v4476_v32, %s5941_s9  ;;  %4220 = vrot.lane.b32.xlu0 %v4218_v33, %s5941_s9  ;;  %v4260_v33 = vmul.f32 %v4259_v28, %v6718_v3 }
 0x437   : > { %v3889_v38 = vadd.f32 %v3887_v57, %v3881_v34  ;;  %v4066_v34 = vstv %s6926_s17  ;;  %s7009_s17 = sld [smem:[#allocation7 + $0x6c]]  ;;  %v4108_v19 = vstv %s6996_s7 }
 0x438   : > { %v3921_v41 = vpop.permute.xlu0 %3920  ;;  %v3929_v21 = vpop.permute.xlu1 %3928 }
 0x439   : > { %v3894_v45 = vadd.f32 %v3893_v39, %v3889_v38  ;;  %v4775_v38 = vstv %s6932_s22  ;;  %s7018_s22 = sld [smem:[#allocation8 + $0x2]] }
 0x43a   : > { %4228 = vrot.lane.b32.xlu1 %v4226_v42, %s5942_s2  ;;  %4736 = vrot.lane.b32.xlu0 %v4734_v43, %s5941_s9  ;;  %v4776_v47 = vmul.f32 %v4775_v38, %v6718_v3 }
 0x43b   : > { %v3902_v40 = vadd.f32 %v3900_v30, %v3894_v45  ;;  %v3976_v30 = vstv %s6918_s16  ;;  %v4268_v45 = vmul.f32 %v4267_v36, %v6718_v3  ;;  %s7007_s16 = sld [smem:[#allocation7 + $0x68]] }
 0x43c   : > { %v3942_v50 = vpop.permute.xlu0 %3941  ;;  %v3950_v53 = vpop.permute.xlu1 %3949 }
 0x43d   : > { %v3910_v62 = vadd.f32 %v3908_v31, %v3902_v40  ;;  %v4783_v40 = vstv %s6948_s24  ;;  %s7023_s24 = sld [smem:[#allocation7 + $0x46]] }
 0x43e   : > { %4744 = vrot.lane.b32.xlu1 %v4742_v54, %s5942_s2  ;;  %4486 = vrot.lane.b32.xlu0 %v4484_v55, %s5942_s2 }
 0x43f   : > { %v3915_v24 = vadd.f32 %v3914_v56, %v3910_v62  ;;  %v4784_v56 = vmul.f32 %v4783_v40, %v6718_v3 }
 0x440   : > { %v3963_v61 = vpop.permute.xlu0 %3962  ;;  %v3971_v0 = vpop.permute.xlu1 %3970 }
 0x441   : > { %v3923_v5 = vadd.f32 %v3921_v41, %v3915_v24  ;;  %v3977_v41 = vmul.f32 %v3976_v30, %v6712_v60  ;;  %v3997_v60 = vstv %s6952_s0  ;;  %v4538_v24 = vstv %s6966_s1  ;;  %s7038_s0 = sld [smem:[#allocation8 + $0x3]]  ;;  %s7049_s1 = sld [smem:[#allocation7 + $0x8e]] }
 0x442   : > { %4499 = vrot.lane.b32.xlu1 %v4497_v2, %s5941_s9  ;;  %4241 = vrot.lane.b32.xlu0 %v4239_v44, %s5941_s9  ;;  %v4280_v2 = vstv %s6970_s27  ;;  %v4546_v28 = vstv %s7007_s16  ;;  %s7057_s27 = sld [smem:[#allocation7 + $0x6f]] }
 0x443   : > { %v3931_v9 = vadd.f32 %v3929_v21, %v3923_v5  ;;  %v4067_v21 = vmul.f32 %v4066_v34, %v6663_v63  ;;  %v4129_v34 = vstv %s7016_s21  ;;  %s5155_s21 = sld [smem:[#allocation7 + $0x54]] }
 0x444   : > { %v6920_v13 = vpop.permute.xlu0 %3983  ;;  %v6922_v14 = vpop.permute.xlu1 %3991 }
 0x445   : > { %v3936_v17 = vadd.f32 %v3935_v12, %v3931_v9  ;;  %v4068_v54 = vadd.f32 %v4067_v21, %v4062_v48 }
 0x446   : > { %4249 = vrot.lane.b32.xlu1 %v4247_v7, %s5942_s2  ;;  %4757 = vrot.lane.b32.xlu0 %v4755_v15, %s5941_s9  ;;  %v4288_v15 = vstv %s6989_s30  ;;  %s129_s30 = sand.u32 1, %s5921_s10  }
 0x447   : > { %v3944_v20 = vadd.f32 %v3942_v50, %v3936_v17  ;;  %v4525_v50 = vstv %s6950_s25  ;;  %s7029_s25 = sld [smem:[#allocation7 + $0x4b]]  ;;  %v4796_v17 = vstv %s6991_s6  ;;  %s7077_s6 = sld [smem:[#allocation7 + $0x4e]] }
 0x448   : > { %v6937_v57 = vpop.permute.xlu0 %4004  ;;  %v6939_v22 = vpop.permute.xlu1 %4012  ;;  %v4526_v46 = vmul.f32 %v4525_v50, %v6718_v3  ;;  %v4797_v27 = vmul.f32 %v4796_v17, %v6724_v10  ;;  %s4915_s7 = sshll.u32 %s129_s30, 5 }
 0x449   : > { %v3952_v18 = vadd.f32 %v3950_v53, %v3944_v20  ;;  %s7099_s16 = scalar_lea.vmem [#allocation9], %s4915_s7  ;;  %s5205_s7 = sld [smem:[#allocation7 + $0x84]] }
 0x44a   : > { %4765 = vrot.lane.b32.xlu1 %v4763_v23, %s5942_s2  ;;  %4507 = vrot.lane.b32.xlu0 %v4505_v25, %s5942_s2  ;;  %v4804_v23 = vstv %s7001_s14  ;;  %s5152_s14 = sld [smem:[#allocation7 + $0x51]] }
 0x44b   : > { %v3957_v59 = vadd.f32 %v3956_v16, %v3952_v18  ;;  %v4289_v16 = vmul.f32 %v4288_v15, %v6724_v10 }
 0x44c   : > { %v6957_v31 = vpop.permute.xlu0 %4025  ;;  %v6959_v32 = vpop.permute.xlu1 %4033 }
 0x44d   : > { %v3965_v35 = vadd.f32 %v3963_v61, %v3957_v59  ;;  %v3998_v61 = vmul.f32 %v3997_v60, %v6718_v3  ;;  %v4018_v3 = vstv %s6976_s28  ;;  %v4582_v59 = vstv %s7009_s17  ;;  %s7066_s28 = sld [smem:[#allocation7 + $0x8f]]  ;;  %s5117_s17 = sld [smem:[#allocation7 + $0x30]] }
 0x44e   : > { %4520 = vrot.lane.b32.xlu1 %v4518_v51, %s5941_s9  ;;  %4262 = vrot.lane.b32.xlu0 %v4260_v33, %s5941_s9  ;;  %v4019_v20 = vmul.f32 %v4018_v3, %v6724_v10  ;;  %v4109_v51 = vmul.f32 %v4108_v19, %v6673_v29  ;;  %v4325_v33 = vmul.f32 %v4324_v11, %v6663_v63  ;;  %v4567_v19 = vstv %s7070_s29  ;;  %s5129_s29 = sld [smem:[#allocation7 + $0x3c]] }
 0x44f   : > { %v3973_v39 = vadd.f32 %v3971_v0, %v3965_v35  ;;  %v4320_v35 = vstv %s7018_s22  ;;  %v4583_v48 = vmul.f32 %v4582_v59, %v6663_v63  ;;  %v4309_v63 = vstv %s7040_s26  ;;  %s5120_s22 = sld [smem:[#allocation7 + $0x33]]  ;;  %s5199_s26 = sld [smem:[#allocation7 + $0x7e]] }
 0x450   : > { %v6980_v42 = vpop.permute.xlu0 %4046  ;;  %v6982_v43 = vpop.permute.xlu1 %4054  ;;  %v4326_v60 = vadd.f32 %v4325_v33, %v4320_v35  ;;  %v4387_v35 = vstv %s5152_s14  ;;  %s5170_s14 = sld [smem:[#allocation7 + $0x63]] }
 0x451   : > { %v3978_v26 = vadd.f32 %v3977_v41, %v3973_v39  ;;  %v4559_v39 = vstv %s7021_s23  ;;  %v4301_v41 = vstv %s7023_s24  ;;  %s5158_s23 = sld [smem:[#allocation7 + $0x57]]  ;;  %s5196_s24 = sld [smem:[#allocation7 + $0x7b]] }
 0x452   : > { %4270 = vrot.lane.b32.xlu1 %v4268_v45, %s5942_s2  ;;  %4778 = vrot.lane.b32.xlu0 %v4776_v47, %s5941_s9  ;;  %v4805_v45 = vmul.f32 %v4804_v23, %v6724_v10  ;;  %v4547_v47 = vmul.f32 %v4546_v28, %v6724_v10  ;;  %v4302_v58 = vmul.f32 %v4301_v41, %v6730_v4  ;;  %v4624_v28 = vstv %s7089_s8  ;;  %s5132_s8 = sld [smem:[#allocation7 + $0x3f]] }
 0x453   : > { %v3986_v53 = vadd.f32 %v6920_v13, %v3978_v26  ;;  %v4539_v13 = vmul.f32 %v4538_v24, %v6724_v10  ;;  %v4345_v26 = vstv %s7029_s25  ;;  %v5806_v24 = vld [vmem:[#allocation3 + $0x1] sm:$0xff]  ;;  %s5123_s25 = sld [smem:[#allocation7 + $0x36]] }
 0x454   : > { %v4074_v55 = vpop.permute.xlu0 %4073  ;;  %v4082_v62 = vpop.permute.xlu1 %4081 }
 0x455   : > { %v3994_v1 = vadd.f32 %v6922_v14, %v3986_v53  ;;  %v4076_v0 = vadd.f32 %v4074_v55, %v4068_v54  ;;  %v4281_v14 = vmul.f32 %v4280_v2, %v6724_v10  ;;  %v4578_v10 = vstv %s7038_s0  ;;  %s5161_s0 = sld [smem:[#allocation7 + $0x5a]] }
 0x456   : > { %4786 = vrot.lane.b32.xlu1 %v4784_v56, %s5942_s2  ;;  %4528 = vrot.lane.b32.xlu0 %v4526_v46, %s5942_s2  ;;  %v4560_v46 = vmul.f32 %v4559_v39, %v6730_v4 }
 0x457   : > { %v3999_v44 = vadd.f32 %v3998_v61, %v3994_v1  ;;  %v4084_v5 = vadd.f32 %v4082_v62, %v4076_v0  ;;  %v4346_v1 = vmul.f32 %v5806_v24, %v4345_v26  ;;  %v4817_v61 = vstv %s7049_s1  ;;  %s5126_s1 = sld [smem:[#allocation7 + $0x39]] }
 0x458   : > { %v4095_v9 = vpop.permute.xlu0 %4094  ;;  %v4103_v12 = vpop.permute.xlu1 %4102 }
 0x459   : > { %v4007_v7 = vadd.f32 %v6937_v57, %v3999_v44  ;;  %v4089_v52 = vadd.f32 %v4088_v6, %v4084_v5  ;;  %v4584_v44 = vadd.f32 %v4583_v48, %v4578_v10 }
 0x45a   : > { %4541 = vrot.lane.b32.xlu1 %v4539_v13, %s5941_s9  ;;  %4283 = vrot.lane.b32.xlu0 %v4281_v14, %s5941_s9  ;;  %v4310_v13 = vmul.f32 %v4309_v63, %v6730_v4  ;;  %v4818_v14 = vmul.f32 %v4817_v61, %v6730_v4 }
 0x45b   : > { %v4015_v49 = vadd.f32 %v6939_v22, %v4007_v7  ;;  %v4097_v57 = vadd.f32 %v4095_v9, %v4089_v52  ;;  %v4825_v7 = vstv %s7066_s28  ;;  %s5202_s28 = sld [smem:[#allocation7 + $0x81]] }
 0x45c   : > { %v4116_v25 = vpop.permute.xlu0 %4115  ;;  %v4124_v18 = vpop.permute.xlu1 %4123  ;;  %v4826_v23 = vmul.f32 %v4825_v7, %v6730_v4  ;;  %v5810_v7 = vld [vmem:[#allocation3 + $0x12] sm:$0xff] }
 0x45d   : > { %v4020_v30 = vadd.f32 %v4019_v20, %v4015_v49  ;;  %v4105_v22 = vadd.f32 %v4103_v12, %v4097_v57 }
 0x45e   : > { %4291 = vrot.lane.b32.xlu1 %v4289_v16, %s5942_s2  ;;  %4799 = vrot.lane.b32.xlu0 %v4797_v27, %s5941_s9  ;;  %v5807_v16 = vld [vmem:[#allocation3 + $0x2] sm:$0xff] }
 0x45f   : > { %v4028_v36 = vadd.f32 %v6957_v31, %v4020_v30  ;;  %v4110_v38 = vadd.f32 %v4109_v51, %v4105_v22  ;;  %v4040_v31 = vmul.f32 %v4039_v8, %v6730_v4 }
 0x460   : > { %v4137_v21 = vpop.permute.xlu0 %4136  ;;  %v4332_v29 = vpop.permute.xlu1 %4331 }
 0x461   : > { %v4036_v40 = vadd.f32 %v6959_v32, %v4028_v36  ;;  %v4118_v50 = vadd.f32 %v4116_v25, %v4110_v38  ;;  %v4130_v32 = vmul.f32 %v4129_v34, %v6683_v37  ;;  %v4334_v55 = vadd.f32 %v4332_v29, %v4326_v60 }
 0x462   : > { %4807 = vrot.lane.b32.xlu1 %v4805_v45, %s5942_s2  ;;  %4549 = vrot.lane.b32.xlu0 %v4547_v47, %s5942_s2  ;;  %v4603_v37 = vstv %s7057_s27  ;;  %v4568_v25 = vmul.f32 %v4567_v19, %v6730_v4  ;;  %v4625_v34 = vmul.f32 %v5807_v16, %v4624_v28  ;;  %v4150_v60 = vstv %s5117_s17  ;;  %s5164_s27 = sld [smem:[#allocation7 + $0x5d]]  ;;  %s5135_s17 = sld [smem:[#allocation7 + $0x42]] }
 0x463   : > { %v4041_v53 = vadd.f32 %v4040_v31, %v4036_v40  ;;  %v4126_v54 = vadd.f32 %v4124_v18, %v4118_v50  ;;  %v4604_v17 = vmul.f32 %v5806_v24, %v4603_v37 }
 0x464   : > { %v4590_v62 = vpop.permute.xlu0 %4589  ;;  %v4340_v56 = vpop.permute.xlu1 %4339 }
 0x465   : > { %v4049_v0 = vadd.f32 %v6980_v42, %v4041_v53  ;;  %v4131_v2 = vadd.f32 %v4130_v32, %v4126_v54  ;;  %v4342_v5 = vadd.f32 %v4340_v56, %v4334_v55  ;;  %v4592_v8 = vadd.f32 %v4590_v62, %v4584_v44  ;;  %v5809_v32 = vld [vmem:[#allocation3 + $0x11] sm:$0xff] }
 0x466   : > { %4562 = vrot.lane.b32.xlu1 %v4560_v46, %s5941_s9  ;;  %4304 = vrot.lane.b32.xlu0 %v4302_v58, %s5941_s9  ;;  %v4151_v55 = vmul.f32 %v5809_v32, %v4150_v60  ;;  %v4408_v62 = vstv %s5155_s21  ;;  %s5173_s21 = sld [smem:[#allocation7 + $0x66]] }
 0x467   : > { %v4057_v6 = vadd.f32 %v6982_v43, %v4049_v0  ;;  %v4139_v3 = vadd.f32 %v4137_v21, %v4131_v2  ;;  %v4347_v42 = vadd.f32 %v4346_v1, %v4342_v5  ;;  %v4366_v43 = vstv %s7077_s6  ;;  %v5808_v21 = vld [vmem:[#allocation3 + $0x10] sm:$0xff]  ;;  %s5167_s6 = sld [smem:[#allocation7 + $0x60]] }
 0x468   : > { %v4598_v9 = vpop.permute.xlu0 %4597  ;;  %v4353_v12 = vpop.permute.xlu1 %4352  ;;  %v4367_v27 = vmul.f32 %v5807_v16, %v4366_v43  ;;  %v4388_v29 = vmul.f32 %v5808_v21, %v4387_v35  ;;  %v4409_v44 = vmul.f32 %v5809_v32, %v4408_v62  ;;  %v5811_v35 = vld [vmem:[#allocation3 + $0x20] sm:$0xff] }
 0x469   : > { %v4058_v52 = vmax.f32 %v4057_v6, 0.0  ;;  %v4600_v15 = vadd.f32 %v4598_v9, %v4592_v8  ;;  %v4355_v11 = vadd.f32 %v4353_v12, %v4347_v42  ;;  %v4171_v42 = vstv %s5120_s22  ;;  %v5812_v62 = vld [vmem:[#allocation3 + $0x21] sm:$0xff]  ;;  %s5138_s22 = sld [smem:[#allocation7 + $0x45]] }
 0x46a   : > { %4312 = vrot.lane.b32.xlu1 %v4310_v13, %s5942_s2  ;;  %4820 = vrot.lane.b32.xlu0 %v4818_v14, %s5941_s9  ;;  %s5190_s9 = sld [smem:[#allocation7 + $0x75]] }
 0x46b   : > { %4060 = vst.msk [vmem:[%s7099_s16] sm:$0xff] %vm4059_vm14, %v4058_v52  ;;  %v4605_v49 = vadd.f32 %v4604_v17, %v4600_v15  ;;  %v4172_v52 = vmul.f32 %v5810_v7, %v4171_v42  ;;  %v4429_v15 = vstv %s5158_s23  ;;  %v4687_v17 = vstv %s5196_s24  ;;  %s5176_s23 = sld [smem:[#allocation7 + $0x69]]  ;;  %s5214_s24 = sld [smem:[#allocation7 + $0x8d]] }
 0x46c   : > { %v4611_v20 = vpop.permute.xlu0 %4610  ;;  %v4361_v57 = vpop.permute.xlu1 %4360 }
 0x46d   : > { %v4363_v18 = vadd.f32 %v4361_v57, %v4355_v11  ;;  %v4613_v59 = vadd.f32 %v4611_v20, %v4605_v49 }
 0x46e   : > { %4828 = vrot.lane.b32.xlu1 %v4826_v23, %s5942_s2  ;;  %4570 = vrot.lane.b32.xlu0 %v4568_v25, %s5942_s2  ;;  %s5193_s2 = sld [smem:[#allocation7 + $0x78]]  ;;  %v4430_v25 = vmul.f32 %v5810_v7, %v4429_v15  ;;  %v5813_v15 = vld [vmem:[#allocation3 + $0x22] sm:$0xff] }
 0x46f   : > { %v4368_v30 = vadd.f32 %v4367_v27, %v4363_v18  ;;  %v4688_v18 = vmul.f32 %v5810_v7, %v4687_v17 }
 0x470   : > { %v4619_v22 = vpop.permute.xlu0 %4618  ;;  %v4374_v51 = vpop.permute.xlu1 %4373  ;;  %v4645_v45 = vstv %s5190_s9  ;;  %s5208_s9 = sld [smem:[#allocation7 + $0x87]] }
 0x471   : > { %v4621_v33 = vadd.f32 %v4619_v22, %v4613_v59  ;;  %v4376_v36 = vadd.f32 %v4374_v51, %v4368_v30  ;;  %v4646_v50 = vmul.f32 %v5808_v21, %v4645_v45  ;;  %v4192_v30 = vstv %s5123_s25  ;;  %s4849_s25 = sshll.u32 %s7099_s16, 4  ;;  %s7112_s25 = int_to_ptr.vmem [resolvable:$true] %s4849_s25 }
 0x473   : > { %v4626_v38 = vadd.f32 %v4625_v34, %v4621_v33 }
 0x474   : > { %v4632_v4 = vpop.permute.xlu0 %4631  ;;  %v4382_v39 = vpop.permute.xlu1 %4381  ;;  %v4666_v56 = vstv %s5193_s2  ;;  %s5211_s2 = sld [smem:[#allocation7 + $0x8a]] }
 0x475   : > { %v4384_v41 = vadd.f32 %v4382_v39, %v4376_v36  ;;  %v4634_v47 = vadd.f32 %v4632_v4, %v4626_v38  ;;  %v4667_v5 = vmul.f32 %v5809_v32, %v4666_v56  ;;  %v4193_v36 = vmul.f32 %v5811_v35, %v4192_v30 }
 0x476   : > { %v4450_v38 = vstv %s5161_s0  ;;  %v4708_v4 = vstv %s5199_s26  ;;  %s5223_s0 = sshll.u32 %s6009_s13, 9  ;;  %s7125_s13 = scalar_lea.sflag [#allocation10], %s129_s30 }
 0x477   : > { %v4389_v48 = vadd.f32 %v4388_v29, %v4384_v41 }
 0x478   : > { %v4640_v26 = vpop.permute.xlu0 %4639  ;;  %v4395_v40 = vpop.permute.xlu1 %4394 }
 0x479   : > { %v4642_v31 = vadd.f32 %v4640_v26, %v4634_v47  ;;  %v4397_v46 = vadd.f32 %v4395_v40, %v4389_v48  ;;  %v4451_v26 = vmul.f32 %v5811_v35, %v4450_v38  ;;  %v4709_v40 = vmul.f32 %v5811_v35, %v4708_v4  ;;  %v5814_v38 = vld [vmem:[#allocation3 + $0x30] sm:$0xff] }
 0x47b   : > { %v4647_v10 = vadd.f32 %v4646_v50, %v4642_v31 }
 0x47c   : > { %v4653_v63 = vpop.permute.xlu0 %4652  ;;  %v4145_v53 = vpop.permute.xlu1 %4144 }
 0x47d   : > { %v4147_v54 = vadd.f32 %v4145_v53, %v4139_v3  ;;  %v4655_v58 = vadd.f32 %v4653_v63, %v4647_v10  ;;  %v4213_v63 = vstv %s5126_s1 }
 0x47e   : > { %v4214_v56 = vmul.f32 %v5812_v62, %v4213_v63 }
 0x47f   : > { %v4152_v24 = vadd.f32 %v4151_v55, %v4147_v54 }
 0x480   : > { %v4403_v1 = vpop.permute.xlu0 %4402  ;;  %v4661_v61 = vpop.permute.xlu1 %4660 }
 0x481   : > { %v4405_v0 = vadd.f32 %v4403_v1, %v4397_v46  ;;  %v4663_v2 = vadd.f32 %v4661_v61, %v4655_v58  ;;  %v4471_v46 = vstv %s5164_s27  ;;  %v4729_v58 = vstv %s5202_s28  ;;  %s7117_s27 = scalar_lea.hbm %s7168_s5, %s5223_s0  ;;  %s5865_s28 = scalar_lea.vmem %s7112_s25, 512 }
 0x482   : > { %p5866_p3 = scmp.ne.s32.totalorder %s7112_s25, %s5865_s28 }
 0x483   : > { %v4410_v37 = vadd.f32 %v4409_v44, %v4405_v0  ;;  %v4668_v6 = vadd.f32 %v4667_v5, %v4663_v2 }
 0x484   : > { %v4158_v8 = vpop.permute.xlu0 %4157  ;;  %v4416_v3 = vpop.permute.xlu1 %4415  ;;  %p5867_p4 = pnand %p5866_p3, %p6026_p11 }
 0x485   : > { %v4160_v9 = vadd.f32 %v4158_v8, %v4152_v24  ;;  %v4418_v19 = vadd.f32 %v4416_v3, %v4410_v37  ;;  %v4472_v37 = vmul.f32 %v5812_v62, %v4471_v46  ;;  %v5815_v46 = vld [vmem:[#allocation3 + $0x31] sm:$0xff] }
 0x486   : > { %p5868_p5 = pneg %p5867_p4 }
 0x488   : > { %v4674_v12 = vpop.permute.xlu0 %4673  ;;  %v4166_v13 = vpop.permute.xlu1 %4165 }
 0x489   : > { %v4168_v14 = vadd.f32 %v4166_v13, %v4160_v9  ;;  %v4676_v43 = vadd.f32 %v4674_v12, %v4668_v6  ;;  %v4730_v6 = vmul.f32 %v5812_v62, %v4729_v58  ;;  %v4234_v12 = vstv %s5129_s29  ;;  %s5943_s29 = smov [#allocation9]  }
 0x48a   : > { %v4235_v17 = vmul.f32 %v5813_v15, %v4234_v12 }
 0x48b   : > { %v4173_v11 = vadd.f32 %v4172_v52, %v4168_v14 }
 0x48c   : > { %v4424_v49 = vpop.permute.xlu0 %4423  ;;  %v4682_v20 = vpop.permute.xlu1 %4681 }
 0x48d   : > { %v4426_v57 = vadd.f32 %v4424_v49, %v4418_v19  ;;  %v4684_v23 = vadd.f32 %v4682_v20, %v4676_v43  ;;  %v4492_v19 = vstv %s5167_s6  ;;  %v4750_v43 = vstv %s5205_s7  ;;  %s5869_s6 = sshll.u32 %s5943_s29, 4  ;;  %s5870_s6 = int_to_ptr.vmem [resolvable:$false] %s5869_s6 }
 0x48e   : > { %s5871_s7 = scalar_lea.vmem %s5870_s6, 1024  ;;  %p5872_p6 = scmp.lt.s32.totalorder %s7112_s25, %s5870_s6 }
 0x48f   : > { %v4431_v16 = vadd.f32 %v4430_v25, %v4426_v57  ;;  %v4689_v27 = vadd.f32 %v4688_v18, %v4684_v23  ;;  %p5873_p7 = scmp.lt.s32.totalorder %s5871_s7, %s5865_s28 }
 0x490   : > { %v4179_v28 = vpop.permute.xlu0 %4178  ;;  %v4437_v59 = vpop.permute.xlu1 %4436 }
 0x491   : > { %v4181_v22 = vadd.f32 %v4179_v28, %v4173_v11  ;;  %v4439_v39 = vadd.f32 %v4437_v59, %v4431_v16  ;;  %v4493_v16 = vmul.f32 %v5813_v15, %v4492_v19  ;;  %v5816_v19 = vld [vmem:[#allocation3 + $0x32] sm:$0xff]  ;;  %p5874_p8 = por %p5873_p7, %p5872_p6 }
 0x493   : > { %p5875_p9 = pnand %p5874_p8, %p5868_p5 }
 0x494   : > { %v4695_v51 = vpop.permute.xlu0 %4694  ;;  %v4187_v33 = vpop.permute.xlu1 %4186 }
 0x495   : > { %v4189_v34 = vadd.f32 %v4187_v33, %v4181_v22  ;;  %v4697_v41 = vadd.f32 %v4695_v51, %v4689_v27  ;;  %v4751_v27 = vmul.f32 %v5813_v15, %v4750_v43  ;;  %v4255_v51 = vstv %s5132_s8 }
 0x496   : > { %v4256_v4 = vmul.f32 %v5814_v38, %v4255_v51 }
 0x497   : > { %v4194_v21 = vadd.f32 %v4193_v36, %v4189_v34 }
 0x498   : > { %v4445_v29 = vpop.permute.xlu0 %4444  ;;  %v4703_v45 = vpop.permute.xlu1 %4702 }
 0x499   : > { %v4447_v47 = vadd.f32 %v4445_v29, %v4439_v39  ;;  %v4705_v48 = vadd.f32 %v4703_v45, %v4697_v41  ;;  %v4513_v39 = vstv %s5170_s14  ;;  %v4771_v41 = vstv %s5208_s9 }
 0x49b   : > { %v4452_v31 = vadd.f32 %v4451_v26, %v4447_v47  ;;  %v4710_v50 = vadd.f32 %v4709_v40, %v4705_v48 }
 0x49c   : > { %v4200_v60 = vpop.permute.xlu0 %4199  ;;  %v4458_v10 = vpop.permute.xlu1 %4457 }
 0x49d   : > { %v4202_v53 = vadd.f32 %v4200_v60, %v4194_v21  ;;  %v4460_v24 = vadd.f32 %v4458_v10, %v4452_v31  ;;  %v4514_v31 = vmul.f32 %v5814_v38, %v4513_v39 }
 0x4a0   : > { %v4716_v54 = vpop.permute.xlu0 %4715  ;;  %v4208_v32 = vpop.permute.xlu1 %4207 }
 0x4a1   : > { %v4210_v55 = vadd.f32 %v4208_v32, %v4202_v53  ;;  %v4718_v1 = vadd.f32 %v4716_v54, %v4710_v50  ;;  %v4772_v50 = vmul.f32 %v5814_v38, %v4771_v41  ;;  %v4276_v54 = vstv %s5135_s17 }
 0x4a2   : > { %v4277_v58 = vmul.f32 %v5815_v46, %v4276_v54 }
 0x4a3   : > { %v4215_v61 = vadd.f32 %v4214_v56, %v4210_v55 }
 0x4a4   : > { %v4466_v0 = vpop.permute.xlu0 %4465  ;;  %v4724_v2 = vpop.permute.xlu1 %4723 }
 0x4a5   : > { %v4468_v44 = vadd.f32 %v4466_v0, %v4460_v24  ;;  %v4726_v5 = vadd.f32 %v4724_v2, %v4718_v1  ;;  %v4534_v24 = vstv %s5173_s21  ;;  %v4792_v1 = vstv %s5211_s2 }
 0x4a7   : > { %v4473_v8 = vadd.f32 %v4472_v37, %v4468_v44  ;;  %v4731_v3 = vadd.f32 %v4730_v6, %v4726_v5 }
 0x4a8   : > { %v4221_v42 = vpop.permute.xlu0 %4220  ;;  %v4479_v9 = vpop.permute.xlu1 %4478 }
 0x4a9   : > { %v4223_v13 = vadd.f32 %v4221_v42, %v4215_v61  ;;  %v4481_v11 = vadd.f32 %v4479_v9, %v4473_v8  ;;  %v4535_v8 = vmul.f32 %v5815_v46, %v4534_v24 }
 0x4ac   : > { %v4737_v14 = vpop.permute.xlu0 %4736  ;;  %v4229_v7 = vpop.permute.xlu1 %4228 }
 0x4ad   : > { %v4231_v52 = vadd.f32 %v4229_v7, %v4223_v13  ;;  %v4739_v49 = vadd.f32 %v4737_v14, %v4731_v3  ;;  %v4793_v3 = vmul.f32 %v5815_v46, %v4792_v1  ;;  %v4297_v14 = vstv %s5138_s22 }
 0x4ae   : > { %v4298_v43 = vmul.f32 %v5816_v19, %v4297_v14 }
 0x4af   : > { %v4236_v20 = vadd.f32 %v4235_v17, %v4231_v52 }
 0x4b0   : > { %v4487_v57 = vpop.permute.xlu0 %4486  ;;  %v4745_v23 = vpop.permute.xlu1 %4744 }
 0x4b1   : > { %v4489_v25 = vadd.f32 %v4487_v57, %v4481_v11  ;;  %v4747_v18 = vadd.f32 %v4745_v23, %v4739_v49  ;;  %v4555_v11 = vstv %s5176_s23  ;;  %v4813_v49 = vstv %s5214_s24 }
 0x4b3   : > { %v4494_v28 = vadd.f32 %v4493_v16, %v4489_v25  ;;  %v4752_v59 = vadd.f32 %v4751_v27, %v4747_v18 }
 0x4b4   : > { %v4242_v30 = vpop.permute.xlu0 %4241  ;;  %v4500_v22 = vpop.permute.xlu1 %4499 }
 0x4b5   : > { %v4244_v33 = vadd.f32 %v4242_v30, %v4236_v20  ;;  %v4502_v21 = vadd.f32 %v4500_v22, %v4494_v28  ;;  %v4556_v28 = vmul.f32 %v5816_v19, %v4555_v11 }
 0x4b8   : > { %v4758_v34 = vpop.permute.xlu0 %4757  ;;  %v4250_v35 = vpop.permute.xlu1 %4249 }
 0x4b9   : > { %v4252_v36 = vadd.f32 %v4250_v35, %v4244_v33  ;;  %v4760_v29 = vadd.f32 %v4758_v34, %v4752_v59  ;;  %v4814_v59 = vmul.f32 %v5816_v19, %v4813_v49 }
 0x4bb   : > { %v4257_v45 = vadd.f32 %v4256_v4, %v4252_v36 }
 0x4bc   : > { %v4508_v47 = vpop.permute.xlu0 %4507  ;;  %v4766_v48 = vpop.permute.xlu1 %4765 }
 0x4bd   : > { %v4510_v26 = vadd.f32 %v4508_v47, %v4502_v21  ;;  %v4768_v40 = vadd.f32 %v4766_v48, %v4760_v29 }
 0x4bf   : > { %v4515_v60 = vadd.f32 %v4514_v31, %v4510_v26  ;;  %v4773_v10 = vadd.f32 %v4772_v50, %v4768_v40 }
 0x4c0   : > { %v4263_v63 = vpop.permute.xlu0 %4262  ;;  %v4521_v53 = vpop.permute.xlu1 %4520 }
 0x4c1   : > { %v4265_v32 = vadd.f32 %v4263_v63, %v4257_v45  ;;  %v4523_v61 = vadd.f32 %v4521_v53, %v4515_v60 }
 0x4c4   : > { %v4779_v55 = vpop.permute.xlu0 %4778  ;;  %v4271_v62 = vpop.permute.xlu1 %4270 }
 0x4c5   : > { %v4273_v56 = vadd.f32 %v4271_v62, %v4265_v32  ;;  %v4781_v0 = vadd.f32 %v4779_v55, %v4773_v10 }
 0x4c7   : > { %v4278_v2 = vadd.f32 %v4277_v58, %v4273_v56 }
 0x4c8   : > { %v4529_v44 = vpop.permute.xlu0 %4528  ;;  %v4787_v5 = vpop.permute.xlu1 %4786 }
 0x4c9   : > { %v4531_v37 = vadd.f32 %v4529_v44, %v4523_v61  ;;  %v4789_v6 = vadd.f32 %v4787_v5, %v4781_v0 }
 0x4cb   : > { %v4536_v42 = vadd.f32 %v4535_v8, %v4531_v37  ;;  %v4794_v9 = vadd.f32 %v4793_v3, %v4789_v6 }
 0x4cc   : > { %v4284_v12 = vpop.permute.xlu0 %4283  ;;  %v4542_v13 = vpop.permute.xlu1 %4541 }
 0x4cd   : > { %v4286_v7 = vadd.f32 %v4284_v12, %v4278_v2  ;;  %v4544_v20 = vadd.f32 %v4542_v13, %v4536_v42 }
 0x4d0   : > { %v4800_v52 = vpop.permute.xlu0 %4799  ;;  %v4292_v15 = vpop.permute.xlu1 %4291 }
 0x4d1   : > { %v4294_v17 = vadd.f32 %v4292_v15, %v4286_v7  ;;  %v4802_v57 = vadd.f32 %v4800_v52, %v4794_v9 }
 0x4d3   : > { %v4299_v23 = vadd.f32 %v4298_v43, %v4294_v17 }
 0x4d4   : > { %v4550_v25 = vpop.permute.xlu0 %4549  ;;  %v4808_v18 = vpop.permute.xlu1 %4807 }
 0x4d5   : > { %v4552_v16 = vadd.f32 %v4550_v25, %v4544_v20  ;;  %v4810_v27 = vadd.f32 %v4808_v18, %v4802_v57 }
 0x4d7   : > { %v4557_v30 = vadd.f32 %v4556_v28, %v4552_v16  ;;  %v4815_v22 = vadd.f32 %v4814_v59, %v4810_v27 }
 0x4d8   : > { %v4305_v51 = vpop.permute.xlu0 %4304  ;;  %v4563_v33 = vpop.permute.xlu1 %4562 }
 0x4d9   : > { %v4307_v34 = vadd.f32 %v4305_v51, %v4299_v23  ;;  %v4565_v4 = vadd.f32 %v4563_v33, %v4557_v30 }
 0x4dc   : > { %v4821_v35 = vpop.permute.xlu0 %4820  ;;  %v4313_v36 = vpop.permute.xlu1 %4312 }
 0x4dd   : > { %v4315_v38 = vadd.f32 %v4313_v36, %v4307_v34  ;;  %v4823_v39 = vadd.f32 %v4821_v35, %v4815_v22 }
 0x4df   : > { %v4316_v41 = vmax.f32 %v4315_v38, 0.0 }
 0x4e0   : > { %v4571_v21 = vpop.permute.xlu0 %4570  ;;  %v4829_v29 = vpop.permute.xlu1 %4828 }
 0x4e1   : > { %5141 = vst.msk [vmem:[%s7099_s16 + $0x8] sm:$0xff] %vm4059_vm14, %v4316_v41  ;;  %v4573_v45 = vadd.f32 %v4571_v21, %v4565_v4  ;;  %v4831_v47 = vadd.f32 %v4829_v29, %v4823_v39 }
 0x4e3   : > { %v4574_v48 = vmax.f32 %v4573_v45, 0.0  ;;  %v4832_v26 = vmax.f32 %v4831_v47, 0.0 }
 0x4e5   : > { %5179 = vst.msk [vmem:[%s7099_s16 + $0x10] sm:$0xff] %vm4059_vm14, %v4574_v48  ;;  %5217 = vst.msk [vmem:[%s7099_s16 + $0x18] sm:$0xff] %vm4059_vm14, %v4832_v26 }
 0x4e6   : > { %5878 = shalt.err (!%p5875_p9)
}
 0x4e7   : > { %s5879_s30 = scalar_lea.hbm %s7117_s27, 512  ;;  %s5883_s14 = scalar_lea.hbm %s7168_s5, 1024 }
 0x4e8   : > { %p5880_p10 = scmp.ne.s32.totalorder %s7117_s27, %s5879_s30  ;;  %p5884_p1 = scmp.lt.u32.totalorder %s7117_s27, %s7168_s5 }
 0x4e9   : > { %p5885_p2 = scmp.lt.u32.totalorder %s5883_s14, %s5879_s30  ;;  %p5887_p4 = scmp.lt.u32.totalorder %s5879_s30, %s7117_s27 }
 0x4ea   : > { %p5881_p13 = pnand %p5880_p10, %p6026_p11 }
 0x4eb   : > { %p5886_p3 = por %p5885_p2, %p5884_p1 }
 0x4ec   : > { %p5882_p0 = pneg %p5881_p13 }
 0x4ed   : > { %p5888_p5 = por %p5887_p4, %p5886_p3 }
 0x4ef   : > { %p5889_p6 = pnand %p5888_p5, %p5882_p0 }
 0x4f1   : > { %5892 = shalt.err (!%p5889_p6)
}
 0x4f2   : > { %s5944_s21 = smov 128   ;;  %s5945_s2 = smov 8  }
 0x4f3   : > { %5753 = dma.vmem_to_hbm [thread:$0]  (%p6026_p11), %s7112_s25, 512, %s7117_s27, %s7125_s13, %s5944_s21, %s5944_s21, %s5945_s2  }
 0x4f4 PF: > { %p5759_p7 = scmp.ge.s32.totalorder %s5929_s12, 2  ;;  %s4864_s22 = sand.u32 1, %s5917_s3  }
 0x4f5   : > { %s4865_s23 = scalar_lea.sflag [#allocation10], %s4864_s22 }
 0x4f6   : > { %p5756_p8 = pnand %p5759_p7, %p6030_p12 }
 0x4f8   : > { %5912 = dma.done.wait (!%p5756_p8), %s4865_s23, 512  }
 0x4f9   : > { %5914 = vsyncadd (!%p5756_p8), %s4865_s23, 4294966784  ;;  %p33_p9 = scmp.ge.s32.totalorder %s6013_s15, 4   ;;  %s7178_s3 = smov %s5921_s10 }
 0x4fa   : > { %s7179_s10 = smov %s5925_s11  ;;  %s7180_s11 = smov %s6024_s18 }
 0x4fb   : > { %s7181_s12 = smov %s6013_s15  ;;  %35 = sbr.rel (!%p33_p9) target bundleno = 49 (0x31), region = 69 }
 0x502   :  { %4870 = vsyncpa [#allocation10], 1 }
 0x503   :  { %4872 = vsyncpa [#allocation10 + $0x1], 1 }

</bundles_post_ra>
